<compile_context>
chip_gen: v6e
topology: v6e:2x2x1
jax: 0.10.0
libtpu: 0.0.40
codegen_flags: <defaults>
</compile_context>

<pallas_src>
import jax
import jax.numpy as jnp
from jax import lax
from jax.experimental import pallas as pl
from jax.experimental.pallas import tpu as pltpu


def _round_up(v, m):
    return ((v + m - 1) // m) * m


def _fold_bn(gamma, beta, mean, var, eps=1e-5):
    """Eval-mode BatchNorm2d folded into per-channel scale/shift."""
    scale = gamma / jnp.sqrt(var + eps)
    shift = beta - mean * scale
    return scale, shift


# --------------------------- fused Pallas kernel -----------------------------

def decode_block_kernel(x_ref, y_ref, w1_ref, t1_ref, s1y_ref, t1y_ref,
                        w2a_ref, w2b_ref, t2_ref, o_ref,
                        xup_ref, z1p_ref, z2p_ref):
    """Whole DecodeBlock forward for one batch element.

    x_ref  : (1, Hx, Wx, Cx)   bf16  low-res decoder feature (NHWC)
    y_ref  : (1, Hy, Wy, Cy)   bf16  skip connection (NHWC)
    w1_ref : (3, 3, Cxp, Cfp)  bf16  conv1 weights, BN1 scale folded in
    t1_ref : (1, Cfp)          f32   conv1 bias*scale + BN1 shift
    s1y_ref: (1, Cy)           f32   BN1 scale for the skip channels
    t1y_ref: (1, Cy)           f32   BN1 shift for the skip channels
    w2a_ref: (3, 3, Cfp, Cop)  bf16  conv2 weights (z1 channels), BN2 folded
    w2b_ref: (3, 3, Cyp, Cop)  bf16  conv2 weights (skip channels), BN2 folded
    t2_ref : (1, Cop)          f32   conv2 bias*scale + BN2 shift
    o_ref  : (1, Hy*Wy, Cop)   f32   output, lane-dense (Cop = 128-padded)
    """
    _, Hx, Wx, Cx = x_ref.shape
    _, Hy, Wy, Cy = y_ref.shape
    _, _, Cxp, Cfp = w1_ref.shape
    Cyp = w2b_ref.shape[2]
    Cop = w2a_ref.shape[3]
    Hup, Wup = 2 * Hx, 2 * Wx
    M = Hy * Wy
    # real (non-zero-pad) extent of the upsampled window feeding the cropped conv
    Hreal = min(Hy + 1, Hup)
    Wreal = min(Wy + 1, Wup)

    f32, bf16 = jnp.float32, jnp.bfloat16

    # ---- 1) zero-padded, 2x nearest-upsampled x tile built in VMEM ----------
    xup_ref[...] = jnp.zeros_like(xup_ref)
    x = x_ref[0].astype(f32)                                # (Hx, Wx, Cx)
    nrows = (Hreal + 1) // 2
    xr = x[:nrows]
    # nearest row duplication: leading-dim concat + merge (layout no-op)
    xr = jnp.concatenate([xr[:, None], xr[:, None]], axis=1)
    xr = xr.reshape(2 * nrows, Wx, Cx)[:Hreal]              # (Hreal, Wx, Cx)
    # nearest column duplication: replicate each source column into a width-2
    # slab of the padded VMEM tile (static slices -> plain vector stores).
    for j in range((Wreal + 1) // 2):
        w0 = 2 * j
        ww = min(2, Wreal - w0)
        col = xr[:, j:j + 1, :]                             # (Hreal, 1, Cx)
        xup_ref[1:1 + Hreal, 1 + w0:1 + w0 + ww, :Cx] = jnp.broadcast_to(
            col, (Hreal, ww, Cx))

    # ---- 2) conv1 (3x3, pad=1) on the upsampled tile, cropped to (Hy, Wy),
    #         BN1[:Cf] folded into w1/t1, ReLU ---------------------------------
    w1 = w1_ref[...]
    acc1 = jnp.zeros((M, Cfp), f32)
    for kh in range(3):
        for kw in range(3):
            slab = xup_ref[kh:kh + Hy, kw:kw + Wy, :]       # (Hy, Wy, Cxp)
            slab = slab.reshape(M, Cxp).astype(bf16)
            acc1 = acc1 + jnp.dot(slab, w1[kh, kw],
                                  preferred_element_type=f32)
    z1 = jnp.maximum(acc1 + t1_ref[...], 0.0)               # (M, Cfp) f32

    # ---- 3) scatter z1 and the BN1/ReLU'd skip branch into padded VMEM tiles
    z1p_ref[...] = jnp.zeros_like(z1p_ref)
    z1p_ref[1:1 + Hy, 1:1 + Wy, :] = z1.reshape(Hy, Wy, Cfp)
    z2p_ref[...] = jnp.zeros_like(z2p_ref)
    yb = y_ref[0].astype(f32)                               # (Hy, Wy, Cy)
    z2p_ref[1:1 + Hy, 1:1 + Wy, :Cy] = jnp.maximum(
        yb * s1y_ref[...] + t1y_ref[...], 0.0)

    # ---- 4) conv2 (3x3, pad=1) over the channel concat [z1, skip] + BN2 + ReLU
    w2a = w2a_ref[...]
    w2b = w2b_ref[...]
    acc2 = jnp.zeros((M, Cop), f32)
    for kh in range(3):
        for kw in range(3):
            s1 = z1p_ref[kh:kh + Hy, kw:kw + Wy, :].reshape(M, Cfp).astype(bf16)
            s2 = z2p_ref[kh:kh + Hy, kw:kw + Wy, :].reshape(M, Cyp).astype(bf16)
            acc2 = acc2 + jnp.dot(s1, w2a[kh, kw], preferred_element_type=f32)
            acc2 = acc2 + jnp.dot(s2, w2b[kh, kw], preferred_element_type=f32)
    o_ref[0] = jnp.maximum(acc2 + t2_ref[...], 0.0)


# --------------------------- wrapper ------------------------------------------

def decode_block(x_nchw, y_nchw, p):
    """DecodeBlock forward. Inputs NCHW (PyTorch convention); output NCHW."""
    N, Cx, Hx, Wx = x_nchw.shape
    Ny, Cy, Hy, Wy = y_nchw.shape
    assert N == Ny and Hy <= 2 * Hx and Wy <= 2 * Wx

    Cf = p["w1"].shape[0]                   # conv1 out channels (= num_filters)
    Co = p["w2"].shape[0]                   # conv2 out channels
    Cc = p["w2"].shape[1]                   # conv2 in channels (= Cf + Cy)
    assert Cc == Cf + Cy

    Cxp = _round_up(Cx, 8)
    Cfp = _round_up(Cf, 8)
    Cyp = _round_up(Cy, 8)
    Cop = _round_up(Co, 128)                # lane-dense output store

    # ---- fold eval-mode BN + conv bias into weights / a single shift --------
    s1, t1 = _fold_bn(p["g1"], p["be1"], p["m1"], p["v1"])   # (Cf + Cy,)
    s2, t2 = _fold_bn(p["g2"], p["be2"], p["m2"], p["v2"])   # (Co,)

    # conv1: (Cf,Cx,3,3) -> (3,3,Cx,Cf), BN1[:Cf] scale folded, zero-padded, bf16
    w1 = jnp.transpose(p["w1"], (2, 3, 1, 0)) * s1[:Cf]
    w1 = jnp.pad(w1, ((0, 0), (0, 0), (0, Cxp - Cx), (0, Cfp - Cf)))
    t1a = jnp.pad(p["b1"] * s1[:Cf] + t1[:Cf], (0, Cfp - Cf)).reshape(1, Cfp)
    s1y = s1[Cf:].reshape(1, Cy)
    t1y = t1[Cf:].reshape(1, Cy)

    # conv2: (Co,Cf+Cy,3,3) -> (3,3,Cf+Cy,Co), split into z1 / skip channel
    # halves of the concat, BN2 scale folded, zero-padded, bf16
    w2 = jnp.transpose(p["w2"], (2, 3, 1, 0)) * s2
    w2a = jnp.pad(w2[:, :, :Cf, :],
                  ((0, 0), (0, 0), (0, Cfp - Cf), (0, Cop - Co)))
    w2b = jnp.pad(w2[:, :, Cf:, :],
                  ((0, 0), (0, 0), (0, Cyp - Cy), (0, Cop - Co)))
    t2a = jnp.pad(p["b2"] * s2 + t2, (0, Cop - Co)).reshape(1, Cop)

    w1 = w1.astype(jnp.bfloat16)
    w2a = w2a.astype(jnp.bfloat16)
    w2b = w2b.astype(jnp.bfloat16)

    # activations: NCHW -> NHWC, bf16 (halves HBM read traffic; f32 math inside)
    x = jnp.transpose(x_nchw, (0, 2, 3, 1)).astype(jnp.bfloat16)
    y = jnp.transpose(y_nchw, (0, 2, 3, 1)).astype(jnp.bfloat16)

    out = pl.pallas_call(
        decode_block_kernel,
        out_shape=jax.ShapeDtypeStruct((N, Hy * Wy, Cop), jnp.float32),
        grid=(N,),
        in_specs=[
            pl.BlockSpec((1, Hx, Wx, Cx), lambda n: (n, 0, 0, 0)),
            pl.BlockSpec((1, Hy, Wy, Cy), lambda n: (n, 0, 0, 0)),
            pl.BlockSpec((3, 3, Cxp, Cfp), lambda n: (0, 0, 0, 0)),
            pl.BlockSpec((1, Cfp), lambda n: (0, 0)),
            pl.BlockSpec((1, Cy), lambda n: (0, 0)),
            pl.BlockSpec((1, Cy), lambda n: (0, 0)),
            pl.BlockSpec((3, 3, Cfp, Cop), lambda n: (0, 0, 0, 0)),
            pl.BlockSpec((3, 3, Cyp, Cop), lambda n: (0, 0, 0, 0)),
            pl.BlockSpec((1, Cop), lambda n: (0, 0)),
        ],
        out_specs=pl.BlockSpec((1, Hy * Wy, Cop), lambda n: (n, 0, 0)),
        scratch_shapes=[
            pltpu.VMEM((Hy + 2, Wy + 2, Cxp), jnp.float32),   # upsampled x pad
            pltpu.VMEM((Hy + 2, Wy + 2, Cfp), jnp.float32),   # z1 pad
            pltpu.VMEM((Hy + 2, Wy + 2, Cyp), jnp.float32),   # skip branch pad
        ],
        compiler_params=pltpu.CompilerParams(
            dimension_semantics=("parallel",)),
    )(x, y, w1, t1a, s1y, t1y, w2a, w2b, t2a)

    # slice off the lane padding and return NCHW
    out = out[:, :, :Co].reshape(N, Hy, Wy, Co)
    # TODO(synk): Dropout2d layers are Identity here (args.dropout = 0).
    return jnp.transpose(out, (0, 3, 1, 2))


# --------------------------- pure-JAX reference & params ---------------------

def decode_block_reference(x, y, p):
    """f32 reference of the same forward pass (NCHW in/out)."""
    xu = jnp.repeat(jnp.repeat(x, 2, axis=2), 2, axis=3)
    c1 = lax.conv_general_dilated(
        xu, p["w1"], window_strides=(1, 1), padding=((1, 1), (1, 1)),
        dimension_numbers=("NCHW", "OIHW", "NCHW"))
    c1 = c1 + p["b1"][None, :, None, None]
    hy, wy = y.shape[2], y.shape[3]
    cat = jnp.concatenate([c1[:, :, :hy, :wy], y], axis=1)
    s1, t1 = _fold_bn(p["g1"], p["be1"], p["m1"], p["v1"])
    a1 = jnp.maximum(cat * s1[None, :, None, None] + t1[None, :, None, None], 0.0)
    c2 = lax.conv_general_dilated(
        a1, p["w2"], window_strides=(1, 1), padding=((1, 1), (1, 1)),
        dimension_numbers=("NCHW", "OIHW", "NCHW"))
    c2 = c2 + p["b2"][None, :, None, None]
    s2, t2 = _fold_bn(p["g2"], p["be2"], p["m2"], p["v2"])
    return jnp.maximum(c2 * s2[None, :, None, None] + t2[None, :, None, None], 0.0)


def init_params(key, c_x, c_y, nf):
    ks = jax.random.split(key, 12)

    def nrm(k, shape, std=0.1):
        return std * jax.random.normal(k, shape, jnp.float32)

    cc = nf + c_y  # channels after concat
    return dict(
        # DecodeSubBlock conv (c_x -> nf) and post-concat BN (cc channels)
        w1=nrm(ks[0], (nf, c_x, 3, 3)), b1=nrm(ks[1], (nf,)),
        g1=1.0 + nrm(ks[2], (cc,)), be1=nrm(ks[3], (cc,)),
        m1=nrm(ks[4], (cc,)), v1=1.0 + jnp.abs(nrm(ks[5], (cc,))),
        # CreateConvBnLayer conv (cc -> nf) and BN (nf channels)
        w2=nrm(ks[6], (nf, cc, 3, 3)), b2=nrm(ks[7], (nf,)),
        g2=1.0 + nrm(ks[8], (nf,)), be2=nrm(ks[9], (nf,)),
        m2=nrm(ks[10], (nf,)), v2=1.0 + jnp.abs(nrm(ks[11], (nf,))),
    )


if __name__ == "__main__":
    key = jax.random.PRNGKey(0)
    kx, ky, kp = jax.random.split(key, 3)

    # x: low-res decoder feature; y: skip connection at 2x resolution.
    N, Cx, Hx, Wx = 2, 8, 8, 8
    Cy, Hy, Wy = 4, 16, 16
    num_filters = 8

    x = jax.random.normal(kx, (N, Cx, Hx, Wx), jnp.float32)   # NCHW
    y = jax.random.normal(ky, (N, Cy, Hy, Wy), jnp.float32)   # NCHW
    params = init_params(kp, Cx, Cy, num_filters)

    out = jax.block_until_ready(jax.jit(decode_block)(x, y, params))
    assert out.shape == (N, num_filters, Hy, Wy), out.shape
    assert bool(jnp.all(jnp.isfinite(out)))

    # numerical check vs f32 reference (bf16 matmul inputs -> loose tolerance)
    ref = decode_block_reference(x, y, params)
    assert bool(jnp.allclose(out, ref, rtol=5e-2, atol=5e-2)), float(
        jnp.max(jnp.abs(out - ref)))

    print("KERNEL_OK")
</pallas_src>

<mosaic_0001>
module attributes {stable_mosaic.version = 11 : i64} {
  func.func @decode_block_kernel(%arg0: i32, %arg1: memref<1x8x8x8xbf16, #tpu.memory_space<vmem>>, %arg2: memref<1x16x16x4xbf16, #tpu.memory_space<vmem>>, %arg3: memref<3x3x8x8xbf16, #tpu.memory_space<vmem>>, %arg4: memref<1x8xf32, #tpu.memory_space<vmem>>, %arg5: memref<1x4xf32, #tpu.memory_space<vmem>>, %arg6: memref<1x4xf32, #tpu.memory_space<vmem>>, %arg7: memref<3x3x8x128xbf16, #tpu.memory_space<vmem>>, %arg8: memref<3x3x8x128xbf16, #tpu.memory_space<vmem>>, %arg9: memref<1x128xf32, #tpu.memory_space<vmem>>, %arg10: memref<1x256x128xf32, #tpu.memory_space<vmem>>, %arg11: memref<18x18x8xf32, #tpu.memory_space<vmem>>, %arg12: memref<18x18x8xf32, #tpu.memory_space<vmem>>, %arg13: memref<18x18x8xf32, #tpu.memory_space<vmem>>) attributes {dimension_semantics = [#tpu.dimension_semantics<parallel>], iteration_bounds = array<i64: 2>, scalar_prefetch = 0 : i64, scratch_operands = 3 : i64, tpu.core_type = #tpu.core_type<tc>, window_params = [{transform_indices = @transform_0, window_bounds = array<i64: 1, 8, 8, 8>}, {transform_indices = @transform_1, window_bounds = array<i64: 1, 16, 16, 4>}, {pipeline_mode = #tpu.pipeline_mode<synchronous>, transform_indices = @transform_2, window_bounds = array<i64: 3, 3, 8, 8>}, {pipeline_mode = #tpu.pipeline_mode<synchronous>, transform_indices = @transform_3, window_bounds = array<i64: 1, 8>}, {pipeline_mode = #tpu.pipeline_mode<synchronous>, transform_indices = @transform_4, window_bounds = array<i64: 1, 4>}, {pipeline_mode = #tpu.pipeline_mode<synchronous>, transform_indices = @transform_5, window_bounds = array<i64: 1, 4>}, {pipeline_mode = #tpu.pipeline_mode<synchronous>, transform_indices = @transform_6, window_bounds = array<i64: 3, 3, 8, 128>}, {pipeline_mode = #tpu.pipeline_mode<synchronous>, transform_indices = @transform_7, window_bounds = array<i64: 3, 3, 8, 128>}, {pipeline_mode = #tpu.pipeline_mode<synchronous>, transform_indices = @transform_8, window_bounds = array<i64: 1, 128>}, {transform_indices = @transform_9, window_bounds = array<i64: 1, 256, 128>}]} {
    %cst = arith.constant 0.000000e+00 : f32
    %0 = vector.broadcast %cst : f32 to vector<18x18x8xf32>
    %c0 = arith.constant 0 : index
    %c0_0 = arith.constant 0 : index
    %c0_1 = arith.constant 0 : index
    %1 = vector.load %arg11[%c0, %c0_0, %c0_1] : memref<18x18x8xf32, #tpu.memory_space<vmem>>, vector<18x18x8xf32>
    tpu.vector_store %arg11[%c0, %c0_0, %c0_1], %0 {strides = array<i32>} : memref<18x18x8xf32, #tpu.memory_space<vmem>>, vector<18x18x8xf32>,
    %c0_2 = arith.constant 0 : index
    %c0_3 = arith.constant 0 : index
    %c0_4 = arith.constant 0 : index
    %c0_5 = arith.constant 0 : index
    %2 = vector.load %arg1[%c0_2, %c0_3, %c0_4, %c0_5] : memref<1x8x8x8xbf16, #tpu.memory_space<vmem>>, vector<1x8x8x8xbf16>
    %3 = vector.shape_cast %2 : vector<1x8x8x8xbf16> to vector<8x8x8xbf16>
    %4 = arith.extf %3 : vector<8x8x8xbf16> to vector<8x8x8xf32>
    %5 = vector.shape_cast %4 : vector<8x8x8xf32> to vector<8x1x8x8xf32>
    %6 = vector.shape_cast %4 : vector<8x8x8xf32> to vector<8x1x8x8xf32>
    %7 = tpu.concatenate %5, %6 in 1 : vector<8x1x8x8xf32>, vector<8x1x8x8xf32> -> vector<8x2x8x8xf32>
    %8 = vector.shape_cast %7 : vector<8x2x8x8xf32> to vector<16x8x8xf32>
    %9 = vector.extract_strided_slice %8 {offsets = [0, 0, 0], sizes = [16, 1, 8], strides = [1, 1, 1]} : vector<16x8x8xf32> to vector<16x1x8xf32>
    %10 = vector.shape_cast %9 : vector<16x1x8xf32> to vector<16x1x8xf32>
    %11 = vector.broadcast %10 : vector<16x1x8xf32> to vector<16x2x8xf32>
    %c1 = arith.constant 1 : index
    %c1_6 = arith.constant 1 : index
    %c0_7 = arith.constant 0 : index
    %12 = vector.load %arg11[%c1, %c1_6, %c0_7] : memref<18x18x8xf32, #tpu.memory_space<vmem>>, vector<16x2x8xf32>
    tpu.vector_store %arg11[%c1, %c1_6, %c0_7], %11 {strides = array<i32>} : memref<18x18x8xf32, #tpu.memory_space<vmem>>, vector<16x2x8xf32>,
    %13 = vector.extract_strided_slice %8 {offsets = [0, 1, 0], sizes = [16, 1, 8], strides = [1, 1, 1]} : vector<16x8x8xf32> to vector<16x1x8xf32>
    %14 = vector.shape_cast %13 : vector<16x1x8xf32> to vector<16x1x8xf32>
    %15 = vector.broadcast %14 : vector<16x1x8xf32> to vector<16x2x8xf32>
    %c1_8 = arith.constant 1 : index
    %c3 = arith.constant 3 : index
    %c0_9 = arith.constant 0 : index
    %16 = vector.load %arg11[%c1_8, %c3, %c0_9] : memref<18x18x8xf32, #tpu.memory_space<vmem>>, vector<16x2x8xf32>
    tpu.vector_store %arg11[%c1_8, %c3, %c0_9], %15 {strides = array<i32>} : memref<18x18x8xf32, #tpu.memory_space<vmem>>, vector<16x2x8xf32>,
    %17 = vector.extract_strided_slice %8 {offsets = [0, 2, 0], sizes = [16, 1, 8], strides = [1, 1, 1]} : vector<16x8x8xf32> to vector<16x1x8xf32>
    %18 = vector.shape_cast %17 : vector<16x1x8xf32> to vector<16x1x8xf32>
    %19 = vector.broadcast %18 : vector<16x1x8xf32> to vector<16x2x8xf32>
    %c1_10 = arith.constant 1 : index
    %c5 = arith.constant 5 : index
    %c0_11 = arith.constant 0 : index
    %20 = vector.load %arg11[%c1_10, %c5, %c0_11] : memref<18x18x8xf32, #tpu.memory_space<vmem>>, vector<16x2x8xf32>
    tpu.vector_store %arg11[%c1_10, %c5, %c0_11], %19 {strides = array<i32>} : memref<18x18x8xf32, #tpu.memory_space<vmem>>, vector<16x2x8xf32>,
    %21 = vector.extract_strided_slice %8 {offsets = [0, 3, 0], sizes = [16, 1, 8], strides = [1, 1, 1]} : vector<16x8x8xf32> to vector<16x1x8xf32>
    %22 = vector.shape_cast %21 : vector<16x1x8xf32> to vector<16x1x8xf32>
    %23 = vector.broadcast %22 : vector<16x1x8xf32> to vector<16x2x8xf32>
    %c1_12 = arith.constant 1 : index
    %c7 = arith.constant 7 : index
    %c0_13 = arith.constant 0 : index
    %24 = vector.load %arg11[%c1_12, %c7, %c0_13] : memref<18x18x8xf32, #tpu.memory_space<vmem>>, vector<16x2x8xf32>
    tpu.vector_store %arg11[%c1_12, %c7, %c0_13], %23 {strides = array<i32>} : memref<18x18x8xf32, #tpu.memory_space<vmem>>, vector<16x2x8xf32>,
    %25 = vector.extract_strided_slice %8 {offsets = [0, 4, 0], sizes = [16, 1, 8], strides = [1, 1, 1]} : vector<16x8x8xf32> to vector<16x1x8xf32>
    %26 = vector.shape_cast %25 : vector<16x1x8xf32> to vector<16x1x8xf32>
    %27 = vector.broadcast %26 : vector<16x1x8xf32> to vector<16x2x8xf32>
    %c1_14 = arith.constant 1 : index
    %c9 = arith.constant 9 : index
    %c0_15 = arith.constant 0 : index
    %28 = vector.load %arg11[%c1_14, %c9, %c0_15] : memref<18x18x8xf32, #tpu.memory_space<vmem>>, vector<16x2x8xf32>
    tpu.vector_store %arg11[%c1_14, %c9, %c0_15], %27 {strides = array<i32>} : memref<18x18x8xf32, #tpu.memory_space<vmem>>, vector<16x2x8xf32>,
    %29 = vector.extract_strided_slice %8 {offsets = [0, 5, 0], sizes = [16, 1, 8], strides = [1, 1, 1]} : vector<16x8x8xf32> to vector<16x1x8xf32>
    %30 = vector.shape_cast %29 : vector<16x1x8xf32> to vector<16x1x8xf32>
    %31 = vector.broadcast %30 : vector<16x1x8xf32> to vector<16x2x8xf32>
    %c1_16 = arith.constant 1 : index
    %c11 = arith.constant 11 : index
    %c0_17 = arith.constant 0 : index
    %32 = vector.load %arg11[%c1_16, %c11, %c0_17] : memref<18x18x8xf32, #tpu.memory_space<vmem>>, vector<16x2x8xf32>
    tpu.vector_store %arg11[%c1_16, %c11, %c0_17], %31 {strides = array<i32>} : memref<18x18x8xf32, #tpu.memory_space<vmem>>, vector<16x2x8xf32>,
    %33 = vector.extract_strided_slice %8 {offsets = [0, 6, 0], sizes = [16, 1, 8], strides = [1, 1, 1]} : vector<16x8x8xf32> to vector<16x1x8xf32>
    %34 = vector.shape_cast %33 : vector<16x1x8xf32> to vector<16x1x8xf32>
    %35 = vector.broadcast %34 : vector<16x1x8xf32> to vector<16x2x8xf32>
    %c1_18 = arith.constant 1 : index
    %c13 = arith.constant 13 : index
    %c0_19 = arith.constant 0 : index
    %36 = vector.load %arg11[%c1_18, %c13, %c0_19] : memref<18x18x8xf32, #tpu.memory_space<vmem>>, vector<16x2x8xf32>
    tpu.vector_store %arg11[%c1_18, %c13, %c0_19], %35 {strides = array<i32>} : memref<18x18x8xf32, #tpu.memory_space<vmem>>, vector<16x2x8xf32>,
    %37 = vector.extract_strided_slice %8 {offsets = [0, 7, 0], sizes = [16, 1, 8], strides = [1, 1, 1]} : vector<16x8x8xf32> to vector<16x1x8xf32>
    %38 = vector.shape_cast %37 : vector<16x1x8xf32> to vector<16x1x8xf32>
    %39 = vector.broadcast %38 : vector<16x1x8xf32> to vector<16x2x8xf32>
    %c1_20 = arith.constant 1 : index
    %c15 = arith.constant 15 : index
    %c0_21 = arith.constant 0 : index
    %40 = vector.load %arg11[%c1_20, %c15, %c0_21] : memref<18x18x8xf32, #tpu.memory_space<vmem>>, vector<16x2x8xf32>
    tpu.vector_store %arg11[%c1_20, %c15, %c0_21], %39 {strides = array<i32>} : memref<18x18x8xf32, #tpu.memory_space<vmem>>, vector<16x2x8xf32>,
    %c0_22 = arith.constant 0 : index
    %c0_23 = arith.constant 0 : index
    %c0_24 = arith.constant 0 : index
    %c0_25 = arith.constant 0 : index
    %41 = vector.load %arg3[%c0_22, %c0_23, %c0_24, %c0_25] : memref<3x3x8x8xbf16, #tpu.memory_space<vmem>>, vector<3x3x8x8xbf16>
    %cst_26 = arith.constant 0.000000e+00 : f32
    %42 = vector.broadcast %cst_26 : f32 to vector<256x8xf32>
    %c0_27 = arith.constant 0 : index
    %c0_28 = arith.constant 0 : index
    %c0_29 = arith.constant 0 : index
    %43 = vector.load %arg11[%c0_27, %c0_28, %c0_29] : memref<18x18x8xf32, #tpu.memory_space<vmem>>, vector<16x16x8xf32>
    %44 = vector.shape_cast %43 : vector<16x16x8xf32> to vector<256x8xf32>
    %45 = arith.truncf %44 : vector<256x8xf32> to vector<256x8xbf16>
    %46 = vector.extract_strided_slice %41 {offsets = [0, 0, 0, 0], sizes = [1, 1, 8, 8], strides = [1, 1, 1, 1]} : vector<3x3x8x8xbf16> to vector<1x1x8x8xbf16>
    %47 = vector.shape_cast %46 : vector<1x1x8x8xbf16> to vector<8x8xbf16>
    %cst_30 = arith.constant dense<0.000000e+00> : vector<256x8xf32>
    %48 = tpu.matmul %45, %47, %cst_30 {dimension_numbers = #tpu.dot_dimension_numbers<[1], [0], [0], [1], [0, 0, 1, 1], [], []>} : vector<256x8xbf16>, vector<8x8xbf16>, vector<256x8xf32> -> vector<256x8xf32>
    %49 = arith.addf %42, %48 : vector<256x8xf32>
    %c0_31 = arith.constant 0 : index
    %c1_32 = arith.constant 1 : index
    %c0_33 = arith.constant 0 : index
    %50 = vector.load %arg11[%c0_31, %c1_32, %c0_33] : memref<18x18x8xf32, #tpu.memory_space<vmem>>, vector<16x16x8xf32>
    %51 = vector.shape_cast %50 : vector<16x16x8xf32> to vector<256x8xf32>
    %52 = arith.truncf %51 : vector<256x8xf32> to vector<256x8xbf16>
    %53 = vector.extract_strided_slice %41 {offsets = [0, 1, 0, 0], sizes = [1, 1, 8, 8], strides = [1, 1, 1, 1]} : vector<3x3x8x8xbf16> to vector<1x1x8x8xbf16>
    %54 = vector.shape_cast %53 : vector<1x1x8x8xbf16> to vector<8x8xbf16>
    %cst_34 = arith.constant dense<0.000000e+00> : vector<256x8xf32>
    %55 = tpu.matmul %52, %54, %cst_34 {dimension_numbers = #tpu.dot_dimension_numbers<[1], [0], [0], [1], [0, 0, 1, 1], [], []>} : vector<256x8xbf16>, vector<8x8xbf16>, vector<256x8xf32> -> vector<256x8xf32>
    %56 = arith.addf %49, %55 : vector<256x8xf32>
    %c0_35 = arith.constant 0 : index
    %c2 = arith.constant 2 : index
    %c0_36 = arith.constant 0 : index
    %57 = vector.load %arg11[%c0_35, %c2, %c0_36] : memref<18x18x8xf32, #tpu.memory_space<vmem>>, vector<16x16x8xf32>
    %58 = vector.shape_cast %57 : vector<16x16x8xf32> to vector<256x8xf32>
    %59 = arith.truncf %58 : vector<256x8xf32> to vector<256x8xbf16>
    %60 = vector.extract_strided_slice %41 {offsets = [0, 2, 0, 0], sizes = [1, 1, 8, 8], strides = [1, 1, 1, 1]} : vector<3x3x8x8xbf16> to vector<1x1x8x8xbf16>
    %61 = vector.shape_cast %60 : vector<1x1x8x8xbf16> to vector<8x8xbf16>
    %cst_37 = arith.constant dense<0.000000e+00> : vector<256x8xf32>
    %62 = tpu.matmul %59, %61, %cst_37 {dimension_numbers = #tpu.dot_dimension_numbers<[1], [0], [0], [1], [0, 0, 1, 1], [], []>} : vector<256x8xbf16>, vector<8x8xbf16>, vector<256x8xf32> -> vector<256x8xf32>
    %63 = arith.addf %56, %62 : vector<256x8xf32>
    %c1_38 = arith.constant 1 : index
    %c0_39 = arith.constant 0 : index
    %c0_40 = arith.constant 0 : index
    %64 = vector.load %arg11[%c1_38, %c0_39, %c0_40] : memref<18x18x8xf32, #tpu.memory_space<vmem>>, vector<16x16x8xf32>
    %65 = vector.shape_cast %64 : vector<16x16x8xf32> to vector<256x8xf32>
    %66 = arith.truncf %65 : vector<256x8xf32> to vector<256x8xbf16>
    %67 = vector.extract_strided_slice %41 {offsets = [1, 0, 0, 0], sizes = [1, 1, 8, 8], strides = [1, 1, 1, 1]} : vector<3x3x8x8xbf16> to vector<1x1x8x8xbf16>
    %68 = vector.shape_cast %67 : vector<1x1x8x8xbf16> to vector<8x8xbf16>
    %cst_41 = arith.constant dense<0.000000e+00> : vector<256x8xf32>
    %69 = tpu.matmul %66, %68, %cst_41 {dimension_numbers = #tpu.dot_dimension_numbers<[1], [0], [0], [1], [0, 0, 1, 1], [], []>} : vector<256x8xbf16>, vector<8x8xbf16>, vector<256x8xf32> -> vector<256x8xf32>
    %70 = arith.addf %63, %69 : vector<256x8xf32>
    %c1_42 = arith.constant 1 : index
    %c1_43 = arith.constant 1 : index
    %c0_44 = arith.constant 0 : index
    %71 = vector.load %arg11[%c1_42, %c1_43, %c0_44] : memref<18x18x8xf32, #tpu.memory_space<vmem>>, vector<16x16x8xf32>
    %72 = vector.shape_cast %71 : vector<16x16x8xf32> to vector<256x8xf32>
    %73 = arith.truncf %72 : vector<256x8xf32> to vector<256x8xbf16>
    %74 = vector.extract_strided_slice %41 {offsets = [1, 1, 0, 0], sizes = [1, 1, 8, 8], strides = [1, 1, 1, 1]} : vector<3x3x8x8xbf16> to vector<1x1x8x8xbf16>
    %75 = vector.shape_cast %74 : vector<1x1x8x8xbf16> to vector<8x8xbf16>
    %cst_45 = arith.constant dense<0.000000e+00> : vector<256x8xf32>
    %76 = tpu.matmul %73, %75, %cst_45 {dimension_numbers = #tpu.dot_dimension_numbers<[1], [0], [0], [1], [0, 0, 1, 1], [], []>} : vector<256x8xbf16>, vector<8x8xbf16>, vector<256x8xf32> -> vector<256x8xf32>
    %77 = arith.addf %70, %76 : vector<256x8xf32>
    %c1_46 = arith.constant 1 : index
    %c2_47 = arith.constant 2 : index
    %c0_48 = arith.constant 0 : index
    %78 = vector.load %arg11[%c1_46, %c2_47, %c0_48] : memref<18x18x8xf32, #tpu.memory_space<vmem>>, vector<16x16x8xf32>
    %79 = vector.shape_cast %78 : vector<16x16x8xf32> to vector<256x8xf32>
    %80 = arith.truncf %79 : vector<256x8xf32> to vector<256x8xbf16>
    %81 = vector.extract_strided_slice %41 {offsets = [1, 2, 0, 0], sizes = [1, 1, 8, 8], strides = [1, 1, 1, 1]} : vector<3x3x8x8xbf16> to vector<1x1x8x8xbf16>
    %82 = vector.shape_cast %81 : vector<1x1x8x8xbf16> to vector<8x8xbf16>
    %cst_49 = arith.constant dense<0.000000e+00> : vector<256x8xf32>
    %83 = tpu.matmul %80, %82, %cst_49 {dimension_numbers = #tpu.dot_dimension_numbers<[1], [0], [0], [1], [0, 0, 1, 1], [], []>} : vector<256x8xbf16>, vector<8x8xbf16>, vector<256x8xf32> -> vector<256x8xf32>
    %84 = arith.addf %77, %83 : vector<256x8xf32>
    %c2_50 = arith.constant 2 : index
    %c0_51 = arith.constant 0 : index
    %c0_52 = arith.constant 0 : index
    %85 = vector.load %arg11[%c2_50, %c0_51, %c0_52] : memref<18x18x8xf32, #tpu.memory_space<vmem>>, vector<16x16x8xf32>
    %86 = vector.shape_cast %85 : vector<16x16x8xf32> to vector<256x8xf32>
    %87 = arith.truncf %86 : vector<256x8xf32> to vector<256x8xbf16>
    %88 = vector.extract_strided_slice %41 {offsets = [2, 0, 0, 0], sizes = [1, 1, 8, 8], strides = [1, 1, 1, 1]} : vector<3x3x8x8xbf16> to vector<1x1x8x8xbf16>
    %89 = vector.shape_cast %88 : vector<1x1x8x8xbf16> to vector<8x8xbf16>
    %cst_53 = arith.constant dense<0.000000e+00> : vector<256x8xf32>
    %90 = tpu.matmul %87, %89, %cst_53 {dimension_numbers = #tpu.dot_dimension_numbers<[1], [0], [0], [1], [0, 0, 1, 1], [], []>} : vector<256x8xbf16>, vector<8x8xbf16>, vector<256x8xf32> -> vector<256x8xf32>
    %91 = arith.addf %84, %90 : vector<256x8xf32>
    %c2_54 = arith.constant 2 : index
    %c1_55 = arith.constant 1 : index
    %c0_56 = arith.constant 0 : index
    %92 = vector.load %arg11[%c2_54, %c1_55, %c0_56] : memref<18x18x8xf32, #tpu.memory_space<vmem>>, vector<16x16x8xf32>
    %93 = vector.shape_cast %92 : vector<16x16x8xf32> to vector<256x8xf32>
    %94 = arith.truncf %93 : vector<256x8xf32> to vector<256x8xbf16>
    %95 = vector.extract_strided_slice %41 {offsets = [2, 1, 0, 0], sizes = [1, 1, 8, 8], strides = [1, 1, 1, 1]} : vector<3x3x8x8xbf16> to vector<1x1x8x8xbf16>
    %96 = vector.shape_cast %95 : vector<1x1x8x8xbf16> to vector<8x8xbf16>
    %cst_57 = arith.constant dense<0.000000e+00> : vector<256x8xf32>
    %97 = tpu.matmul %94, %96, %cst_57 {dimension_numbers = #tpu.dot_dimension_numbers<[1], [0], [0], [1], [0, 0, 1, 1], [], []>} : vector<256x8xbf16>, vector<8x8xbf16>, vector<256x8xf32> -> vector<256x8xf32>
    %98 = arith.addf %91, %97 : vector<256x8xf32>
    %c2_58 = arith.constant 2 : index
    %c2_59 = arith.constant 2 : index
    %c0_60 = arith.constant 0 : index
    %99 = vector.load %arg11[%c2_58, %c2_59, %c0_60] : memref<18x18x8xf32, #tpu.memory_space<vmem>>, vector<16x16x8xf32>
    %100 = vector.shape_cast %99 : vector<16x16x8xf32> to vector<256x8xf32>
    %101 = arith.truncf %100 : vector<256x8xf32> to vector<256x8xbf16>
    %102 = vector.extract_strided_slice %41 {offsets = [2, 2, 0, 0], sizes = [1, 1, 8, 8], strides = [1, 1, 1, 1]} : vector<3x3x8x8xbf16> to vector<1x1x8x8xbf16>
    %103 = vector.shape_cast %102 : vector<1x1x8x8xbf16> to vector<8x8xbf16>
    %cst_61 = arith.constant dense<0.000000e+00> : vector<256x8xf32>
    %104 = tpu.matmul %101, %103, %cst_61 {dimension_numbers = #tpu.dot_dimension_numbers<[1], [0], [0], [1], [0, 0, 1, 1], [], []>} : vector<256x8xbf16>, vector<8x8xbf16>, vector<256x8xf32> -> vector<256x8xf32>
    %105 = arith.addf %98, %104 : vector<256x8xf32>
    %c0_62 = arith.constant 0 : index
    %c0_63 = arith.constant 0 : index
    %106 = vector.load %arg4[%c0_62, %c0_63] : memref<1x8xf32, #tpu.memory_space<vmem>>, vector<1x8xf32>
    %107 = vector.broadcast %106 : vector<1x8xf32> to vector<256x8xf32>
    %108 = arith.addf %105, %107 : vector<256x8xf32>
    %cst_64 = arith.constant 0.000000e+00 : f32
    %109 = vector.broadcast %cst_64 : f32 to vector<256x8xf32>
    %110 = arith.maximumf %108, %109 : vector<256x8xf32>
    %cst_65 = arith.constant 0.000000e+00 : f32
    %111 = vector.broadcast %cst_65 : f32 to vector<18x18x8xf32>
    %c0_66 = arith.constant 0 : index
    %c0_67 = arith.constant 0 : index
    %c0_68 = arith.constant 0 : index
    %112 = vector.load %arg12[%c0_66, %c0_67, %c0_68] : memref<18x18x8xf32, #tpu.memory_space<vmem>>, vector<18x18x8xf32>
    tpu.vector_store %arg12[%c0_66, %c0_67, %c0_68], %111 {strides = array<i32>} : memref<18x18x8xf32, #tpu.memory_space<vmem>>, vector<18x18x8xf32>,
    %113 = vector.shape_cast %110 : vector<256x8xf32> to vector<16x16x8xf32>
    %c1_69 = arith.constant 1 : index
    %c1_70 = arith.constant 1 : index
    %c0_71 = arith.constant 0 : index
    %114 = vector.load %arg12[%c1_69, %c1_70, %c0_71] : memref<18x18x8xf32, #tpu.memory_space<vmem>>, vector<16x16x8xf32>
    tpu.vector_store %arg12[%c1_69, %c1_70, %c0_71], %113 {strides = array<i32>} : memref<18x18x8xf32, #tpu.memory_space<vmem>>, vector<16x16x8xf32>,
    %cst_72 = arith.constant 0.000000e+00 : f32
    %115 = vector.broadcast %cst_72 : f32 to vector<18x18x8xf32>
    %c0_73 = arith.constant 0 : index
    %c0_74 = arith.constant 0 : index
    %c0_75 = arith.constant 0 : index
    %116 = vector.load %arg13[%c0_73, %c0_74, %c0_75] : memref<18x18x8xf32, #tpu.memory_space<vmem>>, vector<18x18x8xf32>
    tpu.vector_store %arg13[%c0_73, %c0_74, %c0_75], %115 {strides = array<i32>} : memref<18x18x8xf32, #tpu.memory_space<vmem>>, vector<18x18x8xf32>,
    %c0_76 = arith.constant 0 : index
    %c0_77 = arith.constant 0 : index
    %c0_78 = arith.constant 0 : index
    %c0_79 = arith.constant 0 : index
    %117 = vector.load %arg2[%c0_76, %c0_77, %c0_78, %c0_79] : memref<1x16x16x4xbf16, #tpu.memory_space<vmem>>, vector<1x16x16x4xbf16>
    %118 = vector.shape_cast %117 : vector<1x16x16x4xbf16> to vector<16x16x4xbf16>
    %119 = arith.extf %118 : vector<16x16x4xbf16> to vector<16x16x4xf32>
    %c0_80 = arith.constant 0 : index
    %c0_81 = arith.constant 0 : index
    %120 = vector.load %arg5[%c0_80, %c0_81] : memref<1x4xf32, #tpu.memory_space<vmem>>, vector<1x4xf32>
    %121 = vector.shape_cast %120 : vector<1x4xf32> to vector<1x1x4xf32>
    %122 = vector.broadcast %121 : vector<1x1x4xf32> to vector<16x16x4xf32>
    %123 = arith.mulf %119, %122 : vector<16x16x4xf32>
    %c0_82 = arith.constant 0 : index
    %c0_83 = arith.constant 0 : index
    %124 = vector.load %arg6[%c0_82, %c0_83] : memref<1x4xf32, #tpu.memory_space<vmem>>, vector<1x4xf32>
    %125 = vector.shape_cast %124 : vector<1x4xf32> to vector<1x1x4xf32>
    %126 = vector.broadcast %125 : vector<1x1x4xf32> to vector<16x16x4xf32>
    %127 = arith.addf %123, %126 : vector<16x16x4xf32>
    %cst_84 = arith.constant 0.000000e+00 : f32
    %128 = vector.broadcast %cst_84 : f32 to vector<16x16x4xf32>
    %129 = arith.maximumf %127, %128 : vector<16x16x4xf32>
    %c1_85 = arith.constant 1 : index
    %c1_86 = arith.constant 1 : index
    %c0_87 = arith.constant 0 : index
    %130 = vector.load %arg13[%c1_85, %c1_86, %c0_87] : memref<18x18x8xf32, #tpu.memory_space<vmem>>, vector<16x16x4xf32>
    tpu.vector_store %arg13[%c1_85, %c1_86, %c0_87], %129 {strides = array<i32>} : memref<18x18x8xf32, #tpu.memory_space<vmem>>, vector<16x16x4xf32>,
    %c0_88 = arith.constant 0 : index
    %c0_89 = arith.constant 0 : index
    %c0_90 = arith.constant 0 : index
    %c0_91 = arith.constant 0 : index
    %131 = vector.load %arg7[%c0_88, %c0_89, %c0_90, %c0_91] : memref<3x3x8x128xbf16, #tpu.memory_space<vmem>>, vector<3x3x8x128xbf16>
    %c0_92 = arith.constant 0 : index
    %c0_93 = arith.constant 0 : index
    %c0_94 = arith.constant 0 : index
    %c0_95 = arith.constant 0 : index
    %132 = vector.load %arg8[%c0_92, %c0_93, %c0_94, %c0_95] : memref<3x3x8x128xbf16, #tpu.memory_space<vmem>>, vector<3x3x8x128xbf16>
    %cst_96 = arith.constant 0.000000e+00 : f32
    %133 = vector.broadcast %cst_96 : f32 to vector<256x128xf32>
    %c0_97 = arith.constant 0 : index
    %c0_98 = arith.constant 0 : index
    %c0_99 = arith.constant 0 : index
    %134 = vector.load %arg12[%c0_97, %c0_98, %c0_99] : memref<18x18x8xf32, #tpu.memory_space<vmem>>, vector<16x16x8xf32>
    %135 = vector.shape_cast %134 : vector<16x16x8xf32> to vector<256x8xf32>
    %136 = arith.truncf %135 : vector<256x8xf32> to vector<256x8xbf16>
    %c0_100 = arith.constant 0 : index
    %c0_101 = arith.constant 0 : index
    %c0_102 = arith.constant 0 : index
    %137 = vector.load %arg13[%c0_100, %c0_101, %c0_102] : memref<18x18x8xf32, #tpu.memory_space<vmem>>, vector<16x16x8xf32>
    %138 = vector.shape_cast %137 : vector<16x16x8xf32> to vector<256x8xf32>
    %139 = arith.truncf %138 : vector<256x8xf32> to vector<256x8xbf16>
    %140 = vector.extract_strided_slice %131 {offsets = [0, 0, 0, 0], sizes = [1, 1, 8, 128], strides = [1, 1, 1, 1]} : vector<3x3x8x128xbf16> to vector<1x1x8x128xbf16>
    %141 = vector.shape_cast %140 : vector<1x1x8x128xbf16> to vector<8x128xbf16>
    %cst_103 = arith.constant dense<0.000000e+00> : vector<256x128xf32>
    %142 = tpu.matmul %136, %141, %cst_103 {dimension_numbers = #tpu.dot_dimension_numbers<[1], [0], [0], [1], [0, 0, 1, 1], [], []>} : vector<256x8xbf16>, vector<8x128xbf16>, vector<256x128xf32> -> vector<256x128xf32>
    %143 = arith.addf %133, %142 : vector<256x128xf32>
    %144 = vector.extract_strided_slice %132 {offsets = [0, 0, 0, 0], sizes = [1, 1, 8, 128], strides = [1, 1, 1, 1]} : vector<3x3x8x128xbf16> to vector<1x1x8x128xbf16>
    %145 = vector.shape_cast %144 : vector<1x1x8x128xbf16> to vector<8x128xbf16>
    %cst_104 = arith.constant dense<0.000000e+00> : vector<256x128xf32>
    %146 = tpu.matmul %139, %145, %cst_104 {dimension_numbers = #tpu.dot_dimension_numbers<[1], [0], [0], [1], [0, 0, 1, 1], [], []>} : vector<256x8xbf16>, vector<8x128xbf16>, vector<256x128xf32> -> vector<256x128xf32>
    %147 = arith.addf %143, %146 : vector<256x128xf32>
    %c0_105 = arith.constant 0 : index
    %c1_106 = arith.constant 1 : index
    %c0_107 = arith.constant 0 : index
    %148 = vector.load %arg12[%c0_105, %c1_106, %c0_107] : memref<18x18x8xf32, #tpu.memory_space<vmem>>, vector<16x16x8xf32>
    %149 = vector.shape_cast %148 : vector<16x16x8xf32> to vector<256x8xf32>
    %150 = arith.truncf %149 : vector<256x8xf32> to vector<256x8xbf16>
    %c0_108 = arith.constant 0 : index
    %c1_109 = arith.constant 1 : index
    %c0_110 = arith.constant 0 : index
    %151 = vector.load %arg13[%c0_108, %c1_109, %c0_110] : memref<18x18x8xf32, #tpu.memory_space<vmem>>, vector<16x16x8xf32>
    %152 = vector.shape_cast %151 : vector<16x16x8xf32> to vector<256x8xf32>
    %153 = arith.truncf %152 : vector<256x8xf32> to vector<256x8xbf16>
    %154 = vector.extract_strided_slice %131 {offsets = [0, 1, 0, 0], sizes = [1, 1, 8, 128], strides = [1, 1, 1, 1]} : vector<3x3x8x128xbf16> to vector<1x1x8x128xbf16>
    %155 = vector.shape_cast %154 : vector<1x1x8x128xbf16> to vector<8x128xbf16>
    %cst_111 = arith.constant dense<0.000000e+00> : vector<256x128xf32>
    %156 = tpu.matmul %150, %155, %cst_111 {dimension_numbers = #tpu.dot_dimension_numbers<[1], [0], [0], [1], [0, 0, 1, 1], [], []>} : vector<256x8xbf16>, vector<8x128xbf16>, vector<256x128xf32> -> vector<256x128xf32>
    %157 = arith.addf %147, %156 : vector<256x128xf32>
    %158 = vector.extract_strided_slice %132 {offsets = [0, 1, 0, 0], sizes = [1, 1, 8, 128], strides = [1, 1, 1, 1]} : vector<3x3x8x128xbf16> to vector<1x1x8x128xbf16>
    %159 = vector.shape_cast %158 : vector<1x1x8x128xbf16> to vector<8x128xbf16>
    %cst_112 = arith.constant dense<0.000000e+00> : vector<256x128xf32>
    %160 = tpu.matmul %153, %159, %cst_112 {dimension_numbers = #tpu.dot_dimension_numbers<[1], [0], [0], [1], [0, 0, 1, 1], [], []>} : vector<256x8xbf16>, vector<8x128xbf16>, vector<256x128xf32> -> vector<256x128xf32>
    %161 = arith.addf %157, %160 : vector<256x128xf32>
    %c0_113 = arith.constant 0 : index
    %c2_114 = arith.constant 2 : index
    %c0_115 = arith.constant 0 : index
    %162 = vector.load %arg12[%c0_113, %c2_114, %c0_115] : memref<18x18x8xf32, #tpu.memory_space<vmem>>, vector<16x16x8xf32>
    %163 = vector.shape_cast %162 : vector<16x16x8xf32> to vector<256x8xf32>
    %164 = arith.truncf %163 : vector<256x8xf32> to vector<256x8xbf16>
    %c0_116 = arith.constant 0 : index
    %c2_117 = arith.constant 2 : index
    %c0_118 = arith.constant 0 : index
    %165 = vector.load %arg13[%c0_116, %c2_117, %c0_118] : memref<18x18x8xf32, #tpu.memory_space<vmem>>, vector<16x16x8xf32>
    %166 = vector.shape_cast %165 : vector<16x16x8xf32> to vector<256x8xf32>
    %167 = arith.truncf %166 : vector<256x8xf32> to vector<256x8xbf16>
    %168 = vector.extract_strided_slice %131 {offsets = [0, 2, 0, 0], sizes = [1, 1, 8, 128], strides = [1, 1, 1, 1]} : vector<3x3x8x128xbf16> to vector<1x1x8x128xbf16>
    %169 = vector.shape_cast %168 : vector<1x1x8x128xbf16> to vector<8x128xbf16>
    %cst_119 = arith.constant dense<0.000000e+00> : vector<256x128xf32>
    %170 = tpu.matmul %164, %169, %cst_119 {dimension_numbers = #tpu.dot_dimension_numbers<[1], [0], [0], [1], [0, 0, 1, 1], [], []>} : vector<256x8xbf16>, vector<8x128xbf16>, vector<256x128xf32> -> vector<256x128xf32>
    %171 = arith.addf %161, %170 : vector<256x128xf32>
    %172 = vector.extract_strided_slice %132 {offsets = [0, 2, 0, 0], sizes = [1, 1, 8, 128], strides = [1, 1, 1, 1]} : vector<3x3x8x128xbf16> to vector<1x1x8x128xbf16>
    %173 = vector.shape_cast %172 : vector<1x1x8x128xbf16> to vector<8x128xbf16>
    %cst_120 = arith.constant dense<0.000000e+00> : vector<256x128xf32>
    %174 = tpu.matmul %167, %173, %cst_120 {dimension_numbers = #tpu.dot_dimension_numbers<[1], [0], [0], [1], [0, 0, 1, 1], [], []>} : vector<256x8xbf16>, vector<8x128xbf16>, vector<256x128xf32> -> vector<256x128xf32>
    %175 = arith.addf %171, %174 : vector<256x128xf32>
    %c1_121 = arith.constant 1 : index
    %c0_122 = arith.constant 0 : index
    %c0_123 = arith.constant 0 : index
    %176 = vector.load %arg12[%c1_121, %c0_122, %c0_123] : memref<18x18x8xf32, #tpu.memory_space<vmem>>, vector<16x16x8xf32>
    %177 = vector.shape_cast %176 : vector<16x16x8xf32> to vector<256x8xf32>
    %178 = arith.truncf %177 : vector<256x8xf32> to vector<256x8xbf16>
    %c1_124 = arith.constant 1 : index
    %c0_125 = arith.constant 0 : index
    %c0_126 = arith.constant 0 : index
    %179 = vector.load %arg13[%c1_124, %c0_125, %c0_126] : memref<18x18x8xf32, #tpu.memory_space<vmem>>, vector<16x16x8xf32>
    %180 = vector.shape_cast %179 : vector<16x16x8xf32> to vector<256x8xf32>
    %181 = arith.truncf %180 : vector<256x8xf32> to vector<256x8xbf16>
    %182 = vector.extract_strided_slice %131 {offsets = [1, 0, 0, 0], sizes = [1, 1, 8, 128], strides = [1, 1, 1, 1]} : vector<3x3x8x128xbf16> to vector<1x1x8x128xbf16>
    %183 = vector.shape_cast %182 : vector<1x1x8x128xbf16> to vector<8x128xbf16>
    %cst_127 = arith.constant dense<0.000000e+00> : vector<256x128xf32>
    %184 = tpu.matmul %178, %183, %cst_127 {dimension_numbers = #tpu.dot_dimension_numbers<[1], [0], [0], [1], [0, 0, 1, 1], [], []>} : vector<256x8xbf16>, vector<8x128xbf16>, vector<256x128xf32> -> vector<256x128xf32>
    %185 = arith.addf %175, %184 : vector<256x128xf32>
    %186 = vector.extract_strided_slice %132 {offsets = [1, 0, 0, 0], sizes = [1, 1, 8, 128], strides = [1, 1, 1, 1]} : vector<3x3x8x128xbf16> to vector<1x1x8x128xbf16>
    %187 = vector.shape_cast %186 : vector<1x1x8x128xbf16> to vector<8x128xbf16>
    %cst_128 = arith.constant dense<0.000000e+00> : vector<256x128xf32>
    %188 = tpu.matmul %181, %187, %cst_128 {dimension_numbers = #tpu.dot_dimension_numbers<[1], [0], [0], [1], [0, 0, 1, 1], [], []>} : vector<256x8xbf16>, vector<8x128xbf16>, vector<256x128xf32> -> vector<256x128xf32>
    %189 = arith.addf %185, %188 : vector<256x128xf32>
    %c1_129 = arith.constant 1 : index
    %c1_130 = arith.constant 1 : index
    %c0_131 = arith.constant 0 : index
    %190 = vector.load %arg12[%c1_129, %c1_130, %c0_131] : memref<18x18x8xf32, #tpu.memory_space<vmem>>, vector<16x16x8xf32>
    %191 = vector.shape_cast %190 : vector<16x16x8xf32> to vector<256x8xf32>
    %192 = arith.truncf %191 : vector<256x8xf32> to vector<256x8xbf16>
    %c1_132 = arith.constant 1 : index
    %c1_133 = arith.constant 1 : index
    %c0_134 = arith.constant 0 : index
    %193 = vector.load %arg13[%c1_132, %c1_133, %c0_134] : memref<18x18x8xf32, #tpu.memory_space<vmem>>, vector<16x16x8xf32>
    %194 = vector.shape_cast %193 : vector<16x16x8xf32> to vector<256x8xf32>
    %195 = arith.truncf %194 : vector<256x8xf32> to vector<256x8xbf16>
    %196 = vector.extract_strided_slice %131 {offsets = [1, 1, 0, 0], sizes = [1, 1, 8, 128], strides = [1, 1, 1, 1]} : vector<3x3x8x128xbf16> to vector<1x1x8x128xbf16>
    %197 = vector.shape_cast %196 : vector<1x1x8x128xbf16> to vector<8x128xbf16>
    %cst_135 = arith.constant dense<0.000000e+00> : vector<256x128xf32>
    %198 = tpu.matmul %192, %197, %cst_135 {dimension_numbers = #tpu.dot_dimension_numbers<[1], [0], [0], [1], [0, 0, 1, 1], [], []>} : vector<256x8xbf16>, vector<8x128xbf16>, vector<256x128xf32> -> vector<256x128xf32>
    %199 = arith.addf %189, %198 : vector<256x128xf32>
    %200 = vector.extract_strided_slice %132 {offsets = [1, 1, 0, 0], sizes = [1, 1, 8, 128], strides = [1, 1, 1, 1]} : vector<3x3x8x128xbf16> to vector<1x1x8x128xbf16>
    %201 = vector.shape_cast %200 : vector<1x1x8x128xbf16> to vector<8x128xbf16>
    %cst_136 = arith.constant dense<0.000000e+00> : vector<256x128xf32>
    %202 = tpu.matmul %195, %201, %cst_136 {dimension_numbers = #tpu.dot_dimension_numbers<[1], [0], [0], [1], [0, 0, 1, 1], [], []>} : vector<256x8xbf16>, vector<8x128xbf16>, vector<256x128xf32> -> vector<256x128xf32>
    %203 = arith.addf %199, %202 : vector<256x128xf32>
    %c1_137 = arith.constant 1 : index
    %c2_138 = arith.constant 2 : index
    %c0_139 = arith.constant 0 : index
    %204 = vector.load %arg12[%c1_137, %c2_138, %c0_139] : memref<18x18x8xf32, #tpu.memory_space<vmem>>, vector<16x16x8xf32>
    %205 = vector.shape_cast %204 : vector<16x16x8xf32> to vector<256x8xf32>
    %206 = arith.truncf %205 : vector<256x8xf32> to vector<256x8xbf16>
    %c1_140 = arith.constant 1 : index
    %c2_141 = arith.constant 2 : index
    %c0_142 = arith.constant 0 : index
    %207 = vector.load %arg13[%c1_140, %c2_141, %c0_142] : memref<18x18x8xf32, #tpu.memory_space<vmem>>, vector<16x16x8xf32>
    %208 = vector.shape_cast %207 : vector<16x16x8xf32> to vector<256x8xf32>
    %209 = arith.truncf %208 : vector<256x8xf32> to vector<256x8xbf16>
    %210 = vector.extract_strided_slice %131 {offsets = [1, 2, 0, 0], sizes = [1, 1, 8, 128], strides = [1, 1, 1, 1]} : vector<3x3x8x128xbf16> to vector<1x1x8x128xbf16>
    %211 = vector.shape_cast %210 : vector<1x1x8x128xbf16> to vector<8x128xbf16>
    %cst_143 = arith.constant dense<0.000000e+00> : vector<256x128xf32>
    %212 = tpu.matmul %206, %211, %cst_143 {dimension_numbers = #tpu.dot_dimension_numbers<[1], [0], [0], [1], [0, 0, 1, 1], [], []>} : vector<256x8xbf16>, vector<8x128xbf16>, vector<256x128xf32> -> vector<256x128xf32>
    %213 = arith.addf %203, %212 : vector<256x128xf32>
    %214 = vector.extract_strided_slice %132 {offsets = [1, 2, 0, 0], sizes = [1, 1, 8, 128], strides = [1, 1, 1, 1]} : vector<3x3x8x128xbf16> to vector<1x1x8x128xbf16>
    %215 = vector.shape_cast %214 : vector<1x1x8x128xbf16> to vector<8x128xbf16>
    %cst_144 = arith.constant dense<0.000000e+00> : vector<256x128xf32>
    %216 = tpu.matmul %209, %215, %cst_144 {dimension_numbers = #tpu.dot_dimension_numbers<[1], [0], [0], [1], [0, 0, 1, 1], [], []>} : vector<256x8xbf16>, vector<8x128xbf16>, vector<256x128xf32> -> vector<256x128xf32>
    %217 = arith.addf %213, %216 : vector<256x128xf32>
    %c2_145 = arith.constant 2 : index
    %c0_146 = arith.constant 0 : index
    %c0_147 = arith.constant 0 : index
    %218 = vector.load %arg12[%c2_145, %c0_146, %c0_147] : memref<18x18x8xf32, #tpu.memory_space<vmem>>, vector<16x16x8xf32>
    %219 = vector.shape_cast %218 : vector<16x16x8xf32> to vector<256x8xf32>
    %220 = arith.truncf %219 : vector<256x8xf32> to vector<256x8xbf16>
    %c2_148 = arith.constant 2 : index
    %c0_149 = arith.constant 0 : index
    %c0_150 = arith.constant 0 : index
    %221 = vector.load %arg13[%c2_148, %c0_149, %c0_150] : memref<18x18x8xf32, #tpu.memory_space<vmem>>, vector<16x16x8xf32>
    %222 = vector.shape_cast %221 : vector<16x16x8xf32> to vector<256x8xf32>
    %223 = arith.truncf %222 : vector<256x8xf32> to vector<256x8xbf16>
    %224 = vector.extract_strided_slice %131 {offsets = [2, 0, 0, 0], sizes = [1, 1, 8, 128], strides = [1, 1, 1, 1]} : vector<3x3x8x128xbf16> to vector<1x1x8x128xbf16>
    %225 = vector.shape_cast %224 : vector<1x1x8x128xbf16> to vector<8x128xbf16>
    %cst_151 = arith.constant dense<0.000000e+00> : vector<256x128xf32>
    %226 = tpu.matmul %220, %225, %cst_151 {dimension_numbers = #tpu.dot_dimension_numbers<[1], [0], [0], [1], [0, 0, 1, 1], [], []>} : vector<256x8xbf16>, vector<8x128xbf16>, vector<256x128xf32> -> vector<256x128xf32>
    %227 = arith.addf %217, %226 : vector<256x128xf32>
    %228 = vector.extract_strided_slice %132 {offsets = [2, 0, 0, 0], sizes = [1, 1, 8, 128], strides = [1, 1, 1, 1]} : vector<3x3x8x128xbf16> to vector<1x1x8x128xbf16>
    %229 = vector.shape_cast %228 : vector<1x1x8x128xbf16> to vector<8x128xbf16>
    %cst_152 = arith.constant dense<0.000000e+00> : vector<256x128xf32>
    %230 = tpu.matmul %223, %229, %cst_152 {dimension_numbers = #tpu.dot_dimension_numbers<[1], [0], [0], [1], [0, 0, 1, 1], [], []>} : vector<256x8xbf16>, vector<8x128xbf16>, vector<256x128xf32> -> vector<256x128xf32>
    %231 = arith.addf %227, %230 : vector<256x128xf32>
    %c2_153 = arith.constant 2 : index
    %c1_154 = arith.constant 1 : index
    %c0_155 = arith.constant 0 : index
    %232 = vector.load %arg12[%c2_153, %c1_154, %c0_155] : memref<18x18x8xf32, #tpu.memory_space<vmem>>, vector<16x16x8xf32>
    %233 = vector.shape_cast %232 : vector<16x16x8xf32> to vector<256x8xf32>
    %234 = arith.truncf %233 : vector<256x8xf32> to vector<256x8xbf16>
    %c2_156 = arith.constant 2 : index
    %c1_157 = arith.constant 1 : index
    %c0_158 = arith.constant 0 : index
    %235 = vector.load %arg13[%c2_156, %c1_157, %c0_158] : memref<18x18x8xf32, #tpu.memory_space<vmem>>, vector<16x16x8xf32>
    %236 = vector.shape_cast %235 : vector<16x16x8xf32> to vector<256x8xf32>
    %237 = arith.truncf %236 : vector<256x8xf32> to vector<256x8xbf16>
    %238 = vector.extract_strided_slice %131 {offsets = [2, 1, 0, 0], sizes = [1, 1, 8, 128], strides = [1, 1, 1, 1]} : vector<3x3x8x128xbf16> to vector<1x1x8x128xbf16>
    %239 = vector.shape_cast %238 : vector<1x1x8x128xbf16> to vector<8x128xbf16>
    %cst_159 = arith.constant dense<0.000000e+00> : vector<256x128xf32>
    %240 = tpu.matmul %234, %239, %cst_159 {dimension_numbers = #tpu.dot_dimension_numbers<[1], [0], [0], [1], [0, 0, 1, 1], [], []>} : vector<256x8xbf16>, vector<8x128xbf16>, vector<256x128xf32> -> vector<256x128xf32>
    %241 = arith.addf %231, %240 : vector<256x128xf32>
    %242 = vector.extract_strided_slice %132 {offsets = [2, 1, 0, 0], sizes = [1, 1, 8, 128], strides = [1, 1, 1, 1]} : vector<3x3x8x128xbf16> to vector<1x1x8x128xbf16>
    %243 = vector.shape_cast %242 : vector<1x1x8x128xbf16> to vector<8x128xbf16>
    %cst_160 = arith.constant dense<0.000000e+00> : vector<256x128xf32>
    %244 = tpu.matmul %237, %243, %cst_160 {dimension_numbers = #tpu.dot_dimension_numbers<[1], [0], [0], [1], [0, 0, 1, 1], [], []>} : vector<256x8xbf16>, vector<8x128xbf16>, vector<256x128xf32> -> vector<256x128xf32>
    %245 = arith.addf %241, %244 : vector<256x128xf32>
    %c2_161 = arith.constant 2 : index
    %c2_162 = arith.constant 2 : index
    %c0_163 = arith.constant 0 : index
    %246 = vector.load %arg12[%c2_161, %c2_162, %c0_163] : memref<18x18x8xf32, #tpu.memory_space<vmem>>, vector<16x16x8xf32>
    %247 = vector.shape_cast %246 : vector<16x16x8xf32> to vector<256x8xf32>
    %248 = arith.truncf %247 : vector<256x8xf32> to vector<256x8xbf16>
    %c2_164 = arith.constant 2 : index
    %c2_165 = arith.constant 2 : index
    %c0_166 = arith.constant 0 : index
    %249 = vector.load %arg13[%c2_164, %c2_165, %c0_166] : memref<18x18x8xf32, #tpu.memory_space<vmem>>, vector<16x16x8xf32>
    %250 = vector.shape_cast %249 : vector<16x16x8xf32> to vector<256x8xf32>
    %251 = arith.truncf %250 : vector<256x8xf32> to vector<256x8xbf16>
    %252 = vector.extract_strided_slice %131 {offsets = [2, 2, 0, 0], sizes = [1, 1, 8, 128], strides = [1, 1, 1, 1]} : vector<3x3x8x128xbf16> to vector<1x1x8x128xbf16>
    %253 = vector.shape_cast %252 : vector<1x1x8x128xbf16> to vector<8x128xbf16>
    %cst_167 = arith.constant dense<0.000000e+00> : vector<256x128xf32>
    %254 = tpu.matmul %248, %253, %cst_167 {dimension_numbers = #tpu.dot_dimension_numbers<[1], [0], [0], [1], [0, 0, 1, 1], [], []>} : vector<256x8xbf16>, vector<8x128xbf16>, vector<256x128xf32> -> vector<256x128xf32>
    %255 = arith.addf %245, %254 : vector<256x128xf32>
    %256 = vector.extract_strided_slice %132 {offsets = [2, 2, 0, 0], sizes = [1, 1, 8, 128], strides = [1, 1, 1, 1]} : vector<3x3x8x128xbf16> to vector<1x1x8x128xbf16>
    %257 = vector.shape_cast %256 : vector<1x1x8x128xbf16> to vector<8x128xbf16>
    %cst_168 = arith.constant dense<0.000000e+00> : vector<256x128xf32>
    %258 = tpu.matmul %251, %257, %cst_168 {dimension_numbers = #tpu.dot_dimension_numbers<[1], [0], [0], [1], [0, 0, 1, 1], [], []>} : vector<256x8xbf16>, vector<8x128xbf16>, vector<256x128xf32> -> vector<256x128xf32>
    %259 = arith.addf %255, %258 : vector<256x128xf32>
    %c0_169 = arith.constant 0 : index
    %c0_170 = arith.constant 0 : index
    %260 = vector.load %arg9[%c0_169, %c0_170] : memref<1x128xf32, #tpu.memory_space<vmem>>, vector<1x128xf32>
    %261 = vector.broadcast %260 : vector<1x128xf32> to vector<256x128xf32>
    %262 = arith.addf %259, %261 : vector<256x128xf32>
    %cst_171 = arith.constant 0.000000e+00 : f32
    %263 = vector.broadcast %cst_171 : f32 to vector<256x128xf32>
    %264 = arith.maximumf %262, %263 : vector<256x128xf32>
    %c0_172 = arith.constant 0 : index
    %c0_173 = arith.constant 0 : index
    %c0_174 = arith.constant 0 : index
    %265 = vector.load %arg10[%c0_172, %c0_173, %c0_174] : memref<1x256x128xf32, #tpu.memory_space<vmem>>, vector<1x256x128xf32>
    %266 = vector.shape_cast %265 : vector<1x256x128xf32> to vector<256x128xf32>
    %267 = vector.shape_cast %264 : vector<256x128xf32> to vector<1x256x128xf32>
    tpu.vector_store %arg10[%c0_172, %c0_173, %c0_174], %267 {strides = array<i32>} : memref<1x256x128xf32, #tpu.memory_space<vmem>>, vector<1x256x128xf32>,
    return
  }
  func.func @transform_0(%arg0: i32) -> (i32, i32, i32, i32) {
    %c0_i32 = arith.constant 0 : i32
    %c0_i32_0 = arith.constant 0 : i32
    %c0_i32_1 = arith.constant 0 : i32
    %c0_i32_2 = arith.constant 0 : i32
    return %arg0, %c0_i32, %c0_i32_0, %c0_i32_1 : i32, i32, i32, i32
  }
  func.func @transform_1(%arg0: i32) -> (i32, i32, i32, i32) {
    %c0_i32 = arith.constant 0 : i32
    %c0_i32_0 = arith.constant 0 : i32
    %c0_i32_1 = arith.constant 0 : i32
    %c0_i32_2 = arith.constant 0 : i32
    return %arg0, %c0_i32, %c0_i32_0, %c0_i32_1 : i32, i32, i32, i32
  }
  func.func @transform_2(%arg0: i32) -> (i32, i32, i32, i32) {
    %c0_i32 = arith.constant 0 : i32
    %c0_i32_0 = arith.constant 0 : i32
    %c0_i32_1 = arith.constant 0 : i32
    %c0_i32_2 = arith.constant 0 : i32
    %c0_i32_3 = arith.constant 0 : i32
    return %c0_i32, %c0_i32_0, %c0_i32_1, %c0_i32_2 : i32, i32, i32, i32
  }
  func.func @transform_3(%arg0: i32) -> (i32, i32) {
    %c0_i32 = arith.constant 0 : i32
    %c0_i32_0 = arith.constant 0 : i32
    %c0_i32_1 = arith.constant 0 : i32
    return %c0_i32, %c0_i32_0 : i32, i32
  }
  func.func @transform_4(%arg0: i32) -> (i32, i32) {
    %c0_i32 = arith.constant 0 : i32
    %c0_i32_0 = arith.constant 0 : i32
    %c0_i32_1 = arith.constant 0 : i32
    return %c0_i32, %c0_i32_0 : i32, i32
  }
  func.func @transform_5(%arg0: i32) -> (i32, i32) {
    %c0_i32 = arith.constant 0 : i32
    %c0_i32_0 = arith.constant 0 : i32
    %c0_i32_1 = arith.constant 0 : i32
    return %c0_i32, %c0_i32_0 : i32, i32
  }
  func.func @transform_6(%arg0: i32) -> (i32, i32, i32, i32) {
    %c0_i32 = arith.constant 0 : i32
    %c0_i32_0 = arith.constant 0 : i32
    %c0_i32_1 = arith.constant 0 : i32
    %c0_i32_2 = arith.constant 0 : i32
    %c0_i32_3 = arith.constant 0 : i32
    return %c0_i32, %c0_i32_0, %c0_i32_1, %c0_i32_2 : i32, i32, i32, i32
  }
  func.func @transform_7(%arg0: i32) -> (i32, i32, i32, i32) {
    %c0_i32 = arith.constant 0 : i32
    %c0_i32_0 = arith.constant 0 : i32
    %c0_i32_1 = arith.constant 0 : i32
    %c0_i32_2 = arith.constant 0 : i32
    %c0_i32_3 = arith.constant 0 : i32
    return %c0_i32, %c0_i32_0, %c0_i32_1, %c0_i32_2 : i32, i32, i32, i32
  }
  func.func @transform_8(%arg0: i32) -> (i32, i32) {
    %c0_i32 = arith.constant 0 : i32
    %c0_i32_0 = arith.constant 0 : i32
    %c0_i32_1 = arith.constant 0 : i32
    return %c0_i32, %c0_i32_0 : i32, i32
  }
  func.func @transform_9(%arg0: i32) -> (i32, i32, i32) {
    %c0_i32 = arith.constant 0 : i32
    %c0_i32_0 = arith.constant 0 : i32
    %c0_i32_1 = arith.constant 0 : i32
    return %arg0, %c0_i32, %c0_i32_0 : i32, i32, i32
  }
}

</mosaic_0001>

<bundles_post_ra>
// kernel: decode_block.1
= control target key start
LH: loop header
LB: loop body
LE: loop exit
PB: predicated region body
PF: predicated region fallthrough
CT: control target
= control target key end

     0   :  { %s11215_s30 = smov 0   ;;  %s14556_s0 = inlined_call_operand.vmem [shape: bf16[2,8,8,8], index: 0, kind: input, shape index: {}]   ;;  %s14557_s1 = inlined_call_operand.vmem [shape: bf16[2,16,16,4], index: 1, kind: input, shape index: {}]   ;;  %s14558_s2 = inlined_call_operand.vmem [shape: bf16[3,3,8,8], index: 2, kind: input, shape index: {}]   ;;  %s14559_s3 = inlined_call_operand.vmem [shape: f32[1,8], index: 3, kind: input, shape index: {}]   ;;  %s14560_s4 = inlined_call_operand.vmem [shape: f32[1,4], index: 4, kind: input, shape index: {}]   ;;  %s14561_s5 = inlined_call_operand.vmem [shape: f32[1,4], index: 5, kind: input, shape index: {}]   ;;  %s14562_s6 = inlined_call_operand.vmem [shape: bf16[3,3,8,128], index: 6, kind: input, shape index: {}]   ;;  %s14563_s7 = inlined_call_operand.vmem [shape: bf16[3,3,8,128], index: 7, kind: input, shape index: {}]   ;;  %s14564_s8 = inlined_call_operand.vmem [shape: f32[1,128], index: 8, kind: input, shape index: {}]   ;;  %s14565_s9 = inlined_call_operand.vmem [shape: f32[2,256,128], index: 9, kind: output, shape index: {}]  }
   0x1 LB: > { %s9188_s10 = sadd.s32 4294967295, %s11162_s30   ;;  %p9192_p0 = scmp.ge.s32.totalorder %s11162_s30, 1  ;;  %s11162_s30 = sphi %s11215_s30, %s19_s30  }
   0x2   : > { %p297_p1 = scmp.lt.s32.totalorder %s11162_s30, 3 }
   0x4   : > { %p298_p2 = pnand %p9192_p0, %p297_p1 }
   0x6   : > { %301 = sbr.rel (%p298_p2) target bundleno = 1357 (0x54d), region = 56 }
   0xb   : > { %v812_v0 = vld [vmem:[%s14558_s2 + $0x4] sm:$0xf]  ;;  %vm964_vm0 = vcmask 1043456   ;;  %vm354_vm1 = vcmask 64512   ;;  %vm357_vm2 = vcmask 58368   ;;  %v11164_v2 = vmov 0.0  }
   0xc   : > { %11117 = vmatprep.subr.msk.bf16.mxu0 %vm964_vm0, %v812_v0  ;;  %11118 = vmatprep.subr.msk.bf16.mxu1 %vm964_vm0, %v812_v0  ;;  %v11229_v1 = vsel %vm964_vm0, %v812_v0, 0  ;;  %355 = vst.msk [vmem:[#allocation2] sm:$0xff] %vm354_vm1, %v11164_v2  ;;  %356 = vst.msk [vmem:[#allocation2 + $0x8] sm:$0xff] %vm354_vm1, %v11164_v2  ;;  %p338_p3 = scmp.lt.s32.totalorder %s9188_s10, 1  ;;  %v426_v3 = vlaneseq  ;;  %v11560_v4 = vld [vmem:[%s14558_s2] sm:$0xf] }
   0xd   : > { %358 = vst.msk [vmem:[#allocation2 + $0x10] sm:$0x3] %vm357_vm2, %v11164_v2  ;;  %361 = vst.msk [vmem:[#allocation2 + $0x28] sm:$0x3] %vm357_vm2, %v11164_v2  ;;  %v813_v5 = vld [vmem:[%s14558_s2 + $0x8] sm:$0xf]  ;;  %10198 = vmatpush3.bf16.msra.mxu0 %v11229_v1  ;;  %11116 = vmatpush3.bf16.msra.mxu1 %v11229_v1 }
   0xe   : > { %359 = vst.msk [vmem:[#allocation2 + $0x18] sm:$0xff] %vm354_vm1, %v11164_v2  ;;  %360 = vst.msk [vmem:[#allocation2 + $0x20] sm:$0xff] %vm354_vm1, %v11164_v2  ;;  %s14807_s10 = smov (!%p338_p3, %s9188_s10), 1  ;;  %v427_v6 = vshrl.u32 %v426_v3, 7  ;;  %11119 = vmatprep.subr.msk.bf16.mxu1 %vm964_vm0, %v11560_v4  ;;  %11120 = vmatprep.subr.msk.bf16.mxu0 %vm964_vm0, %v813_v5  ;;  %v11578_v8 = vsel %vm964_vm0, %v813_v5, 0  ;;  %vm3773_vm3 = vcmask 31744  }
   0xf   : > { %362 = vst.msk [vmem:[#allocation2 + $0x30] sm:$0xff] %vm354_vm1, %v11164_v2  ;;  %363 = vst.msk [vmem:[#allocation2 + $0x38] sm:$0xff] %vm354_vm1, %v11164_v2  ;;  %s9637_s17 = sshll.u32 %s14807_s10, 5  ;;  %s9638_s14 = sshll.u32 %s14807_s10, 7 }
  0x10   : > { %364 = vst.msk [vmem:[#allocation2 + $0x40] sm:$0x3] %vm357_vm2, %v11164_v2  ;;  %367 = vst.msk [vmem:[#allocation2 + $0x58] sm:$0x3] %vm357_vm2, %v11164_v2  ;;  %v11575_v7 = vsub.s32 0, %v427_v6  ;;  %s342_s20 = scalar_lea.vmem %s14556_s0, %s9637_s17  ;;  %v11583_v9 = vsub.s32 1, %v427_v6  ;;  %s12272_s17 = scalar_lea.vmem %s14557_s1, %s9638_s14 }
  0x11   : > { %365 = vst.msk [vmem:[#allocation2 + $0x48] sm:$0xff] %vm354_vm1, %v11164_v2  ;;  %366 = vst.msk [vmem:[#allocation2 + $0x50] sm:$0xff] %vm354_vm1, %v11164_v2  ;;  %v11585_v10 = vsub.s32 2, %v427_v6  ;;  %v11587_v11 = vsub.s32 3, %v427_v6  ;;  %v11589_v12 = vsub.s32 4, %v427_v6  ;;  %v9641_v13 = vld [vmem:[%s342_s20] sm:$0xff]  }
  0x12   : > { %368 = vst.msk [vmem:[#allocation2 + $0x60] sm:$0xff] %vm354_vm1, %v11164_v2  ;;  %369 = vst.msk [vmem:[#allocation2 + $0x68] sm:$0xff] %vm354_vm1, %v11164_v2  ;;  %v11591_v14 = vsub.s32 5, %v427_v6  ;;  %v11593_v15 = vsub.s32 6, %v427_v6  ;;  %v11595_v16 = vsub.s32 7, %v427_v6  ;;  %v9720_v17 = vld [vmem:[%s342_s20 + $0x8] sm:$0xff]   ;;  %v9642_v21 = vunpack.c.l.bf16 %v9641_v13 }
  0x13   : > { %370 = vst.msk [vmem:[#allocation2 + $0x70] sm:$0x3] %vm357_vm2, %v11164_v2  ;;  %373 = vst.msk [vmem:[#allocation2 + $0x88] sm:$0x3] %vm357_vm2, %v11164_v2  ;;  %v9721_v18 = vld [vmem:[%s342_s20 + $0x10] sm:$0xff]   ;;  %v868_v19 = vld [vmem:[#allocation2 + $0x1] sm:$0xff]  ;;  %v11597_v22 = vunpack.c.l.bf16 %v9720_v17  ;;  %v9647_v23 = vunpack.c.h.bf16 %v9720_v17  ;;  %v11601_v27 = vunpack.c.h.bf16 %v9641_v13 }
  0x14   : > { %371 = vst.msk [vmem:[#allocation2 + $0x78] sm:$0xff] %vm354_vm1, %v11164_v2  ;;  %372 = vst.msk [vmem:[#allocation2 + $0x80] sm:$0xff] %vm354_vm1, %v11164_v2  ;;  %v869_v20 = vld [vmem:[#allocation2 + $0x9] sm:$0xff]  ;;  %v9650_v24 = vunpack.c.l.bf16 %v9721_v18  ;;  %v11599_v25 = vld [vmem:[%s342_s20 + $0x18] sm:$0xff]   ;;  %v11603_v28 = vunpack.c.h.bf16 %v9721_v18  ;;  %v429_v30 = vrot.slane %v9642_v21, %v11575_v7  ;;  %v478_v31 = vrot.slane %v9642_v21, %v11583_v9  ;;  %s9639_s28 = sshll.u32 %s14807_s10, 8 }
  0x15   : > { %374 = vst.msk [vmem:[#allocation2 + $0x90] sm:$0xff] %vm354_vm1, %v11164_v2  ;;  %375 = vst.msk [vmem:[#allocation2 + $0x98] sm:$0xff] %vm354_vm1, %v11164_v2  ;;  %v900_v26 = vpack.c.bf16 %v869_v20, %v868_v19  ;;  %v11606_v29 = vunpack.c.l.bf16 %v11599_v25  ;;  %v526_v32 = vrot.slane %v9642_v21, %v11585_v10  ;;  %v574_v33 = vrot.slane %v9642_v21, %v11587_v11  ;;  %s14374_s12 = scalar_lea.vmem %s14565_s9, %s9639_s28 }
  0x16   : > { %376 = vst.msk [vmem:[#allocation2 + $0xa0] sm:$0x3] %vm357_vm2, %v11164_v2  ;;  %379 = vst.msk [vmem:[#allocation2 + $0xb8] sm:$0x3] %vm357_vm2, %v11164_v2  ;;  %v622_v34 = vrot.slane %v9642_v21, %v11589_v12  ;;  %v670_v35 = vrot.slane %v9642_v21, %v11591_v14  ;;  %v718_v36 = vrot.slane %v9642_v21, %v11593_v15 }
  0x17   : > { %377 = vst.msk [vmem:[#allocation2 + $0xa8] sm:$0xff] %vm354_vm1, %v11164_v2  ;;  %378 = vst.msk [vmem:[#allocation2 + $0xb0] sm:$0xff] %vm354_vm1, %v11164_v2  ;;  %10199 = vmatprep.mubr.msk.bf16.mxu0 %vm354_vm1, %v900_v26  ;;  %v766_v37 = vrot.slane %v9642_v21, %v11595_v16  ;;  %v441_v38 = vrot.slane %v9647_v23, %v11575_v7  ;;  %v490_v39 = vrot.slane %v9647_v23, %v11583_v9 }
  0x18   : > { %380 = vst.msk [vmem:[#allocation2 + $0xc0] sm:$0xff] %vm354_vm1, %v11164_v2  ;;  %381 = vst.msk [vmem:[#allocation2 + $0xc8] sm:$0xff] %vm354_vm1, %v11164_v2  ;;  %v538_v40 = vrot.slane %v9647_v23, %v11585_v10  ;;  %v586_v41 = vrot.slane %v9647_v23, %v11587_v11  ;;  %v634_v42 = vrot.slane %v9647_v23, %v11589_v12 }
  0x19   : > { %382 = vst.msk [vmem:[#allocation2 + $0xd0] sm:$0x3] %vm357_vm2, %v11164_v2  ;;  %385 = vst.msk [vmem:[#allocation2 + $0xe8] sm:$0x3] %vm357_vm2, %v11164_v2  ;;  %v682_v43 = vrot.slane %v9647_v23, %v11591_v14  ;;  %v730_v44 = vrot.slane %v9647_v23, %v11593_v15  ;;  %v778_v45 = vrot.slane %v9647_v23, %v11595_v16 }
  0x1a   : > { %383 = vst.msk [vmem:[#allocation2 + $0xd8] sm:$0xff] %vm354_vm1, %v11164_v2  ;;  %384 = vst.msk [vmem:[#allocation2 + $0xe0] sm:$0xff] %vm354_vm1, %v11164_v2  ;;  %v445_v46 = vrot.slane %v9650_v24, %v11575_v7  ;;  %v494_v47 = vrot.slane %v9650_v24, %v11583_v9  ;;  %v542_v48 = vrot.slane %v9650_v24, %v11585_v10 }
  0x1b   : > { %386 = vst.msk [vmem:[#allocation2 + $0xf0] sm:$0xff] %vm354_vm1, %v11164_v2  ;;  %387 = vst.msk [vmem:[#allocation2 + $0xf8] sm:$0xff] %vm354_vm1, %v11164_v2  ;;  %v590_v49 = vrot.slane %v9650_v24, %v11587_v11  ;;  %v638_v50 = vrot.slane %v9650_v24, %v11589_v12  ;;  %v686_v51 = vrot.slane %v9650_v24, %v11591_v14 }
  0x1c   : > { %388 = vst.msk [vmem:[#allocation2 + $0x100] sm:$0x3] %vm357_vm2, %v11164_v2  ;;  %391 = vst.msk [vmem:[#allocation2 + $0x118] sm:$0x3] %vm357_vm2, %v11164_v2  ;;  %v734_v52 = vrot.slane %v9650_v24, %v11593_v15  ;;  %v782_v53 = vrot.slane %v9650_v24, %v11595_v16  ;;  %v433_v54 = vrot.slane %v11601_v27, %v11575_v7 }
  0x1d   : > { %389 = vst.msk [vmem:[#allocation2 + $0x108] sm:$0xff] %vm354_vm1, %v11164_v2  ;;  %390 = vst.msk [vmem:[#allocation2 + $0x110] sm:$0xff] %vm354_vm1, %v11164_v2  ;;  %v482_v55 = vrot.slane %v11601_v27, %v11583_v9  ;;  %v530_v56 = vrot.slane %v11601_v27, %v11585_v10  ;;  %v578_v57 = vrot.slane %v11601_v27, %v11587_v11 }
  0x1e   : > { %392 = vst.msk [vmem:[#allocation2 + $0x120] sm:$0xff] %vm354_vm1, %v11164_v2  ;;  %393 = vst.msk [vmem:[#allocation2 + $0x128] sm:$0xff] %vm354_vm1, %v11164_v2  ;;  %v626_v58 = vrot.slane %v11601_v27, %v11589_v12  ;;  %v674_v59 = vrot.slane %v11601_v27, %v11591_v14  ;;  %v722_v60 = vrot.slane %v11601_v27, %v11593_v15 }
  0x1f   : > { %394 = vst.msk [vmem:[#allocation2 + $0x130] sm:$0x3] %vm357_vm2, %v11164_v2  ;;  %397 = vst.msk [vmem:[#allocation2 + $0x148] sm:$0x3] %vm357_vm2, %v11164_v2  ;;  %v770_v61 = vrot.slane %v11601_v27, %v11595_v16  ;;  %v449_v62 = vrot.slane %v11603_v28, %v11575_v7  ;;  %v498_v63 = vrot.slane %v11603_v28, %v11583_v9 }
  0x20   : > { %395 = vst.msk [vmem:[#allocation2 + $0x138] sm:$0xff] %vm354_vm1, %v11164_v2  ;;  %396 = vst.msk [vmem:[#allocation2 + $0x140] sm:$0xff] %vm354_vm1, %v11164_v2  ;;  %v546_v0 = vrot.slane %v11603_v28, %v11585_v10  ;;  %v594_v1 = vrot.slane %v11603_v28, %v11587_v11  ;;  %v642_v5 = vrot.slane %v11603_v28, %v11589_v12 }
  0x21   : > { %398 = vst.msk [vmem:[#allocation2 + $0x150] sm:$0xff] %vm354_vm1, %v11164_v2  ;;  %399 = vst.msk [vmem:[#allocation2 + $0x158] sm:$0xff] %vm354_vm1, %v11164_v2  ;;  %v690_v6 = vrot.slane %v11603_v28, %v11591_v14  ;;  %v738_v13 = vrot.slane %v11603_v28, %v11593_v15  ;;  %v786_v17 = vrot.slane %v11603_v28, %v11595_v16 }
  0x22   : > { %400 = vst.msk [vmem:[#allocation2 + $0x160] sm:$0x3] %vm357_vm2, %v11164_v2  ;;  %403 = vst.msk [vmem:[#allocation2 + $0x178] sm:$0x3] %vm357_vm2, %v11164_v2  ;;  %v437_v20 = vrot.slane %v11597_v22, %v11575_v7  ;;  %v486_v21 = vrot.slane %v11597_v22, %v11583_v9  ;;  %v534_v23 = vrot.slane %v11597_v22, %v11585_v10 }
  0x23   : > { %401 = vst.msk [vmem:[#allocation2 + $0x168] sm:$0xff] %vm354_vm1, %v11164_v2  ;;  %402 = vst.msk [vmem:[#allocation2 + $0x170] sm:$0xff] %vm354_vm1, %v11164_v2  ;;  %v582_v24 = vrot.slane %v11597_v22, %v11587_v11 }
  0x24   : > { %404 = vst.msk [vmem:[#allocation2 + $0x180] sm:$0xff] %vm354_vm1, %v11164_v2  ;;  %405 = vst.msk [vmem:[#allocation2 + $0x188] sm:$0xff] %vm354_vm1, %v11164_v2 }
  0x25   : > { %406 = vst.msk [vmem:[#allocation2 + $0x190] sm:$0x3] %vm357_vm2, %v11164_v2  ;;  %409 = vst.msk [vmem:[#allocation2 + $0x1a8] sm:$0x3] %vm357_vm2, %v11164_v2 }
  0x26   : > { %407 = vst.msk [vmem:[#allocation2 + $0x198] sm:$0xff] %vm354_vm1, %v11164_v2  ;;  %408 = vst.msk [vmem:[#allocation2 + $0x1a0] sm:$0xff] %vm354_vm1, %v11164_v2 }
  0x27   : > { %3457 = vst.msk [vmem:[#allocation3] sm:$0xff] %vm354_vm1, %v11164_v2  ;;  %3458 = vst.msk [vmem:[#allocation3 + $0x8] sm:$0xff] %vm354_vm1, %v11164_v2 }
  0x28   : > { %3459 = vst.msk [vmem:[#allocation3 + $0x10] sm:$0x3] %vm357_vm2, %v11164_v2  ;;  %3462 = vst.msk [vmem:[#allocation3 + $0x28] sm:$0x3] %vm357_vm2, %v11164_v2 }
  0x29   : > { %3460 = vst.msk [vmem:[#allocation3 + $0x18] sm:$0xff] %vm354_vm1, %v11164_v2  ;;  %3461 = vst.msk [vmem:[#allocation3 + $0x20] sm:$0xff] %vm354_vm1, %v11164_v2 }
  0x2a   : > { %3463 = vst.msk [vmem:[#allocation3 + $0x30] sm:$0xff] %vm354_vm1, %v11164_v2  ;;  %3464 = vst.msk [vmem:[#allocation3 + $0x38] sm:$0xff] %vm354_vm1, %v11164_v2 }
  0x2b   : > { %3465 = vst.msk [vmem:[#allocation3 + $0x40] sm:$0x3] %vm357_vm2, %v11164_v2  ;;  %3468 = vst.msk [vmem:[#allocation3 + $0x58] sm:$0x3] %vm357_vm2, %v11164_v2 }
  0x2c   : > { %3466 = vst.msk [vmem:[#allocation3 + $0x48] sm:$0xff] %vm354_vm1, %v11164_v2  ;;  %3467 = vst.msk [vmem:[#allocation3 + $0x50] sm:$0xff] %vm354_vm1, %v11164_v2 }
  0x2d   : > { %3469 = vst.msk [vmem:[#allocation3 + $0x60] sm:$0xff] %vm354_vm1, %v11164_v2  ;;  %3470 = vst.msk [vmem:[#allocation3 + $0x68] sm:$0xff] %vm354_vm1, %v11164_v2 }
  0x2e   : > { %3471 = vst.msk [vmem:[#allocation3 + $0x70] sm:$0x3] %vm357_vm2, %v11164_v2  ;;  %3474 = vst.msk [vmem:[#allocation3 + $0x88] sm:$0x3] %vm357_vm2, %v11164_v2 }
  0x2f   : > { %3472 = vst.msk [vmem:[#allocation3 + $0x78] sm:$0xff] %vm354_vm1, %v11164_v2  ;;  %3473 = vst.msk [vmem:[#allocation3 + $0x80] sm:$0xff] %vm354_vm1, %v11164_v2 }
  0x30   : > { %3475 = vst.msk [vmem:[#allocation3 + $0x90] sm:$0xff] %vm354_vm1, %v11164_v2  ;;  %3476 = vst.msk [vmem:[#allocation3 + $0x98] sm:$0xff] %vm354_vm1, %v11164_v2 }
  0x31   : > { %3477 = vst.msk [vmem:[#allocation3 + $0xa0] sm:$0x3] %vm357_vm2, %v11164_v2  ;;  %3480 = vst.msk [vmem:[#allocation3 + $0xb8] sm:$0x3] %vm357_vm2, %v11164_v2 }
  0x32   : > { %3478 = vst.msk [vmem:[#allocation3 + $0xa8] sm:$0xff] %vm354_vm1, %v11164_v2  ;;  %3479 = vst.msk [vmem:[#allocation3 + $0xb0] sm:$0xff] %vm354_vm1, %v11164_v2 }
  0x33   : > { %3481 = vst.msk [vmem:[#allocation3 + $0xc0] sm:$0xff] %vm354_vm1, %v11164_v2  ;;  %3482 = vst.msk [vmem:[#allocation3 + $0xc8] sm:$0xff] %vm354_vm1, %v11164_v2 }
  0x34   : > { %3483 = vst.msk [vmem:[#allocation3 + $0xd0] sm:$0x3] %vm357_vm2, %v11164_v2  ;;  %3486 = vst.msk [vmem:[#allocation3 + $0xe8] sm:$0x3] %vm357_vm2, %v11164_v2 }
  0x35   : > { %3484 = vst.msk [vmem:[#allocation3 + $0xd8] sm:$0xff] %vm354_vm1, %v11164_v2  ;;  %3485 = vst.msk [vmem:[#allocation3 + $0xe0] sm:$0xff] %vm354_vm1, %v11164_v2 }
  0x36   : > { %3487 = vst.msk [vmem:[#allocation3 + $0xf0] sm:$0xff] %vm354_vm1, %v11164_v2  ;;  %3488 = vst.msk [vmem:[#allocation3 + $0xf8] sm:$0xff] %vm354_vm1, %v11164_v2 }
  0x37   : > { %3489 = vst.msk [vmem:[#allocation3 + $0x100] sm:$0x3] %vm357_vm2, %v11164_v2  ;;  %3492 = vst.msk [vmem:[#allocation3 + $0x118] sm:$0x3] %vm357_vm2, %v11164_v2 }
  0x38   : > { %3490 = vst.msk [vmem:[#allocation3 + $0x108] sm:$0xff] %vm354_vm1, %v11164_v2  ;;  %3491 = vst.msk [vmem:[#allocation3 + $0x110] sm:$0xff] %vm354_vm1, %v11164_v2 }
  0x39   : > { %3493 = vst.msk [vmem:[#allocation3 + $0x120] sm:$0xff] %vm354_vm1, %v11164_v2  ;;  %3494 = vst.msk [vmem:[#allocation3 + $0x128] sm:$0xff] %vm354_vm1, %v11164_v2 }
  0x3a   : > { %3495 = vst.msk [vmem:[#allocation3 + $0x130] sm:$0x3] %vm357_vm2, %v11164_v2  ;;  %3498 = vst.msk [vmem:[#allocation3 + $0x148] sm:$0x3] %vm357_vm2, %v11164_v2 }
  0x3b   : > { %3496 = vst.msk [vmem:[#allocation3 + $0x138] sm:$0xff] %vm354_vm1, %v11164_v2  ;;  %3497 = vst.msk [vmem:[#allocation3 + $0x140] sm:$0xff] %vm354_vm1, %v11164_v2 }
  0x3c   : > { %3499 = vst.msk [vmem:[#allocation3 + $0x150] sm:$0xff] %vm354_vm1, %v11164_v2  ;;  %3500 = vst.msk [vmem:[#allocation3 + $0x158] sm:$0xff] %vm354_vm1, %v11164_v2 }
  0x3d   : > { %3501 = vst.msk [vmem:[#allocation3 + $0x160] sm:$0x3] %vm357_vm2, %v11164_v2  ;;  %3504 = vst.msk [vmem:[#allocation3 + $0x178] sm:$0x3] %vm357_vm2, %v11164_v2 }
  0x3e   : > { %3502 = vst.msk [vmem:[#allocation3 + $0x168] sm:$0xff] %vm354_vm1, %v11164_v2  ;;  %3503 = vst.msk [vmem:[#allocation3 + $0x170] sm:$0xff] %vm354_vm1, %v11164_v2 }
  0x3f   : > { %3505 = vst.msk [vmem:[#allocation3 + $0x180] sm:$0xff] %vm354_vm1, %v11164_v2  ;;  %3506 = vst.msk [vmem:[#allocation3 + $0x188] sm:$0xff] %vm354_vm1, %v11164_v2 }
  0x40   : > { %3507 = vst.msk [vmem:[#allocation3 + $0x190] sm:$0x3] %vm357_vm2, %v11164_v2  ;;  %3510 = vst.msk [vmem:[#allocation3 + $0x1a8] sm:$0x3] %vm357_vm2, %v11164_v2 }
  0x41   : > { %3508 = vst.msk [vmem:[#allocation3 + $0x198] sm:$0xff] %vm354_vm1, %v11164_v2  ;;  %3509 = vst.msk [vmem:[#allocation3 + $0x1a0] sm:$0xff] %vm354_vm1, %v11164_v2 }
  0x42   : > { %3544 = vst.msk [vmem:[#allocation4] sm:$0xff] %vm354_vm1, %v11164_v2  ;;  %3545 = vst.msk [vmem:[#allocation4 + $0x8] sm:$0xff] %vm354_vm1, %v11164_v2 }
  0x43   : > { %3546 = vst.msk [vmem:[#allocation4 + $0x10] sm:$0x3] %vm357_vm2, %v11164_v2  ;;  %3549 = vst.msk [vmem:[#allocation4 + $0x28] sm:$0x3] %vm357_vm2, %v11164_v2 }
  0x44   : > { %3547 = vst.msk [vmem:[#allocation4 + $0x18] sm:$0xff] %vm354_vm1, %v11164_v2  ;;  %3548 = vst.msk [vmem:[#allocation4 + $0x20] sm:$0xff] %vm354_vm1, %v11164_v2 }
  0x45   : > { %3550 = vst.msk [vmem:[#allocation4 + $0x30] sm:$0xff] %vm354_vm1, %v11164_v2  ;;  %3551 = vst.msk [vmem:[#allocation4 + $0x38] sm:$0xff] %vm354_vm1, %v11164_v2 }
  0x46   : > { %3552 = vst.msk [vmem:[#allocation4 + $0x40] sm:$0x3] %vm357_vm2, %v11164_v2  ;;  %3555 = vst.msk [vmem:[#allocation4 + $0x58] sm:$0x3] %vm357_vm2, %v11164_v2 }
  0x47   : > { %3553 = vst.msk [vmem:[#allocation4 + $0x48] sm:$0xff] %vm354_vm1, %v11164_v2  ;;  %3554 = vst.msk [vmem:[#allocation4 + $0x50] sm:$0xff] %vm354_vm1, %v11164_v2 }
  0x48   : > { %3556 = vst.msk [vmem:[#allocation4 + $0x60] sm:$0xff] %vm354_vm1, %v11164_v2  ;;  %3557 = vst.msk [vmem:[#allocation4 + $0x68] sm:$0xff] %vm354_vm1, %v11164_v2 }
  0x49   : > { %3558 = vst.msk [vmem:[#allocation4 + $0x70] sm:$0x3] %vm357_vm2, %v11164_v2  ;;  %3561 = vst.msk [vmem:[#allocation4 + $0x88] sm:$0x3] %vm357_vm2, %v11164_v2 }
  0x4a   : > { %3559 = vst.msk [vmem:[#allocation4 + $0x78] sm:$0xff] %vm354_vm1, %v11164_v2  ;;  %3560 = vst.msk [vmem:[#allocation4 + $0x80] sm:$0xff] %vm354_vm1, %v11164_v2 }
  0x4b   : > { %3562 = vst.msk [vmem:[#allocation4 + $0x90] sm:$0xff] %vm354_vm1, %v11164_v2  ;;  %3563 = vst.msk [vmem:[#allocation4 + $0x98] sm:$0xff] %vm354_vm1, %v11164_v2 }
  0x4c   : > { %3564 = vst.msk [vmem:[#allocation4 + $0xa0] sm:$0x3] %vm357_vm2, %v11164_v2  ;;  %3567 = vst.msk [vmem:[#allocation4 + $0xb8] sm:$0x3] %vm357_vm2, %v11164_v2 }
  0x4d   : > { %3565 = vst.msk [vmem:[#allocation4 + $0xa8] sm:$0xff] %vm354_vm1, %v11164_v2  ;;  %3566 = vst.msk [vmem:[#allocation4 + $0xb0] sm:$0xff] %vm354_vm1, %v11164_v2 }
  0x4e   : > { %3568 = vst.msk [vmem:[#allocation4 + $0xc0] sm:$0xff] %vm354_vm1, %v11164_v2  ;;  %3569 = vst.msk [vmem:[#allocation4 + $0xc8] sm:$0xff] %vm354_vm1, %v11164_v2 }
  0x4f   : > { %3570 = vst.msk [vmem:[#allocation4 + $0xd0] sm:$0x3] %vm357_vm2, %v11164_v2  ;;  %3573 = vst.msk [vmem:[#allocation4 + $0xe8] sm:$0x3] %vm357_vm2, %v11164_v2 }
  0x50   : > { %3571 = vst.msk [vmem:[#allocation4 + $0xd8] sm:$0xff] %vm354_vm1, %v11164_v2  ;;  %3572 = vst.msk [vmem:[#allocation4 + $0xe0] sm:$0xff] %vm354_vm1, %v11164_v2 }
  0x51   : > { %3574 = vst.msk [vmem:[#allocation4 + $0xf0] sm:$0xff] %vm354_vm1, %v11164_v2  ;;  %3575 = vst.msk [vmem:[#allocation4 + $0xf8] sm:$0xff] %vm354_vm1, %v11164_v2 }
  0x52   : > { %3576 = vst.msk [vmem:[#allocation4 + $0x100] sm:$0x3] %vm357_vm2, %v11164_v2  ;;  %3579 = vst.msk [vmem:[#allocation4 + $0x118] sm:$0x3] %vm357_vm2, %v11164_v2 }
  0x53   : > { %3577 = vst.msk [vmem:[#allocation4 + $0x108] sm:$0xff] %vm354_vm1, %v11164_v2  ;;  %3578 = vst.msk [vmem:[#allocation4 + $0x110] sm:$0xff] %vm354_vm1, %v11164_v2 }
  0x54   : > { %3580 = vst.msk [vmem:[#allocation4 + $0x120] sm:$0xff] %vm354_vm1, %v11164_v2  ;;  %3581 = vst.msk [vmem:[#allocation4 + $0x128] sm:$0xff] %vm354_vm1, %v11164_v2 }
  0x55   : > { %3582 = vst.msk [vmem:[#allocation4 + $0x130] sm:$0x3] %vm357_vm2, %v11164_v2  ;;  %3585 = vst.msk [vmem:[#allocation4 + $0x148] sm:$0x3] %vm357_vm2, %v11164_v2 }
  0x56   : > { %3583 = vst.msk [vmem:[#allocation4 + $0x138] sm:$0xff] %vm354_vm1, %v11164_v2  ;;  %3584 = vst.msk [vmem:[#allocation4 + $0x140] sm:$0xff] %vm354_vm1, %v11164_v2 }
  0x57   : > { %3586 = vst.msk [vmem:[#allocation4 + $0x150] sm:$0xff] %vm354_vm1, %v11164_v2  ;;  %3587 = vst.msk [vmem:[#allocation4 + $0x158] sm:$0xff] %vm354_vm1, %v11164_v2 }
  0x58   : > { %3588 = vst.msk [vmem:[#allocation4 + $0x160] sm:$0x3] %vm357_vm2, %v11164_v2  ;;  %3591 = vst.msk [vmem:[#allocation4 + $0x178] sm:$0x3] %vm357_vm2, %v11164_v2 }
  0x59   : > { %3589 = vst.msk [vmem:[#allocation4 + $0x168] sm:$0xff] %vm354_vm1, %v11164_v2  ;;  %3590 = vst.msk [vmem:[#allocation4 + $0x170] sm:$0xff] %vm354_vm1, %v11164_v2 }
  0x5a   : > { %3592 = vst.msk [vmem:[#allocation4 + $0x180] sm:$0xff] %vm354_vm1, %v11164_v2  ;;  %3593 = vst.msk [vmem:[#allocation4 + $0x188] sm:$0xff] %vm354_vm1, %v11164_v2 }
  0x5b   : > { %3594 = vst.msk [vmem:[#allocation4 + $0x190] sm:$0x3] %vm357_vm2, %v11164_v2  ;;  %3597 = vst.msk [vmem:[#allocation4 + $0x1a8] sm:$0x3] %vm357_vm2, %v11164_v2 }
  0x5c   : > { %3595 = vst.msk [vmem:[#allocation4 + $0x198] sm:$0xff] %vm354_vm1, %v11164_v2  ;;  %3596 = vst.msk [vmem:[#allocation4 + $0x1a0] sm:$0xff] %vm354_vm1, %v11164_v2 }
  0x5d   : > { %459 = vst.msk [vmem:[#allocation2 + $0x19] sm:$0x3] %vm357_vm2, %v429_v30  ;;  %507 = vst.msk [vmem:[#allocation2 + $0x1b] sm:$0x3] %vm357_vm2, %v478_v31 }
  0x5e   : > { %555 = vst.msk [vmem:[#allocation2 + $0x1d] sm:$0x3] %vm357_vm2, %v526_v32  ;;  %603 = vst.msk [vmem:[#allocation2 + $0x1f] sm:$0x3] %vm357_vm2, %v574_v33 }
  0x5f   : > { %460 = vst.msk [vmem:[#allocation2 + $0x31] sm:$0x3] %vm357_vm2, %v429_v30  ;;  %508 = vst.msk [vmem:[#allocation2 + $0x33] sm:$0x3] %vm357_vm2, %v478_v31  ;;  %v630_v30 = vrot.slane %v11597_v22, %v11589_v12  ;;  %v678_v31 = vrot.slane %v11597_v22, %v11591_v14 }
  0x60   : > { %556 = vst.msk [vmem:[#allocation2 + $0x35] sm:$0x3] %vm357_vm2, %v526_v32  ;;  %604 = vst.msk [vmem:[#allocation2 + $0x37] sm:$0x3] %vm357_vm2, %v574_v33  ;;  %v726_v33 = vrot.slane %v11597_v22, %v11593_v15 }
  0x61   : > { %651 = vst.msk [vmem:[#allocation2 + $0x21] sm:$0x3] %vm357_vm2, %v622_v34  ;;  %699 = vst.msk [vmem:[#allocation2 + $0x23] sm:$0x3] %vm357_vm2, %v670_v35 }
  0x62   : > { %747 = vst.msk [vmem:[#allocation2 + $0x25] sm:$0x3] %vm357_vm2, %v718_v36  ;;  %795 = vst.msk [vmem:[#allocation2 + $0x27] sm:$0x3] %vm357_vm2, %v766_v37 }
  0x63   : > { %652 = vst.msk [vmem:[#allocation2 + $0x39] sm:$0x3] %vm357_vm2, %v622_v34  ;;  %700 = vst.msk [vmem:[#allocation2 + $0x3b] sm:$0x3] %vm357_vm2, %v670_v35  ;;  %v774_v34 = vrot.slane %v11597_v22, %v11595_v16  ;;  %v453_v35 = vrot.slane %v11606_v29, %v11575_v7 }
  0x64   : > { %748 = vst.msk [vmem:[#allocation2 + $0x3d] sm:$0x3] %vm357_vm2, %v718_v36  ;;  %796 = vst.msk [vmem:[#allocation2 + $0x3f] sm:$0x3] %vm357_vm2, %v766_v37  ;;  %v502_v36 = vrot.slane %v11606_v29, %v11583_v9 }
  0x65   : > { %466 = vst.msk [vmem:[#allocation2 + $0xc1] sm:$0x3] %vm357_vm2, %v441_v38  ;;  %514 = vst.msk [vmem:[#allocation2 + $0xc3] sm:$0x3] %vm357_vm2, %v490_v39  ;;  %v870_v2 = vld [vmem:[#allocation2 + $0x19] sm:$0xff] }
  0x66   : > { %562 = vst.msk [vmem:[#allocation2 + $0xc5] sm:$0x3] %vm357_vm2, %v538_v40  ;;  %610 = vst.msk [vmem:[#allocation2 + $0xc7] sm:$0x3] %vm357_vm2, %v586_v41 }
  0x67   : > { %465 = vst.msk [vmem:[#allocation2 + $0xa9] sm:$0x3] %vm357_vm2, %v441_v38  ;;  %513 = vst.msk [vmem:[#allocation2 + $0xab] sm:$0x3] %vm357_vm2, %v490_v39  ;;  %v872_v3 = vld [vmem:[#allocation2 + $0x31] sm:$0xff]  ;;  %v550_v39 = vrot.slane %v11606_v29, %v11585_v10 }
  0x68   : > { %561 = vst.msk [vmem:[#allocation2 + $0xad] sm:$0x3] %vm357_vm2, %v538_v40  ;;  %609 = vst.msk [vmem:[#allocation2 + $0xaf] sm:$0x3] %vm357_vm2, %v586_v41  ;;  %v598_v40 = vrot.slane %v11606_v29, %v11587_v11  ;;  %v646_v41 = vrot.slane %v11606_v29, %v11589_v12 }
  0x69   : > { %658 = vst.msk [vmem:[#allocation2 + $0xc9] sm:$0x3] %vm357_vm2, %v634_v42  ;;  %706 = vst.msk [vmem:[#allocation2 + $0xcb] sm:$0x3] %vm357_vm2, %v682_v43  ;;  %v871_v18 = vld [vmem:[#allocation2 + $0x21] sm:$0xff] }
  0x6a   : > { %754 = vst.msk [vmem:[#allocation2 + $0xcd] sm:$0x3] %vm357_vm2, %v730_v44  ;;  %802 = vst.msk [vmem:[#allocation2 + $0xcf] sm:$0x3] %vm357_vm2, %v778_v45  ;;  %v11745_v26 = vpack.c.bf16 %v871_v18, %v870_v2 }
  0x6b   : > { %657 = vst.msk [vmem:[#allocation2 + $0xb1] sm:$0x3] %vm357_vm2, %v634_v42  ;;  %705 = vst.msk [vmem:[#allocation2 + $0xb3] sm:$0x3] %vm357_vm2, %v682_v43  ;;  %v873_v19 = vld [vmem:[#allocation2 + $0x39] sm:$0xff] }
  0x6c   : > { %753 = vst.msk [vmem:[#allocation2 + $0xb5] sm:$0x3] %vm357_vm2, %v730_v44  ;;  %801 = vst.msk [vmem:[#allocation2 + $0xb7] sm:$0x3] %vm357_vm2, %v778_v45  ;;  %v11747_v28 = vpack.c.bf16 %v873_v19, %v872_v3  ;;  %10200 = vmatmul.mubr.msk.bf16.vlgmr.msra.gmra.mxu0 %vm354_vm1, %v11745_v26  ;;  %v11794_v42 = vld [vmem:[%s14558_s2 + $0x10] sm:$0xf]  ;;  %v694_v45 = vrot.slane %v11606_v29, %v11591_v14 }
  0x6d   : > { %467 = vst.msk [vmem:[#allocation2 + $0xd9] sm:$0x3] %vm357_vm2, %v445_v46  ;;  %515 = vst.msk [vmem:[#allocation2 + $0xdb] sm:$0x3] %vm357_vm2, %v494_v47  ;;  %v884_v27 = vld [vmem:[#allocation2 + $0xc1] sm:$0xff]  ;;  %10266 = vmatpush3.bf16.msra.mxu0 %v11578_v8  ;;  %v742_v8 = vrot.slane %v11606_v29, %v11593_v15 }
  0x6e   : > { %563 = vst.msk [vmem:[#allocation2 + $0xdd] sm:$0x3] %vm357_vm2, %v542_v48  ;;  %611 = vst.msk [vmem:[#allocation2 + $0xdf] sm:$0x3] %vm357_vm2, %v590_v49  ;;  %10203 = vmatprep.mubr.msk.bf16.mxu0 %vm354_vm1, %v11747_v28  ;;  %11122 = vmatprep.subr.msk.bf16.mxu0 %vm964_vm0, %v11794_v42 }
  0x6f   : > { %468 = vst.msk [vmem:[#allocation2 + $0xf1] sm:$0x3] %vm357_vm2, %v445_v46  ;;  %516 = vst.msk [vmem:[#allocation2 + $0xf3] sm:$0x3] %vm357_vm2, %v494_v47  ;;  %v790_v46 = vrot.slane %v11606_v29, %v11595_v16  ;;  %v9655_v47 = vunpack.c.h.bf16 %v11599_v25  ;;  %v882_v18 = vld [vmem:[#allocation2 + $0xa9] sm:$0xff] }
  0x70   : > { %564 = vst.msk [vmem:[#allocation2 + $0xf5] sm:$0x3] %vm357_vm2, %v542_v48  ;;  %612 = vst.msk [vmem:[#allocation2 + $0xf7] sm:$0x3] %vm357_vm2, %v590_v49  ;;  %v1178_v49 = vsel %vm964_vm0, %v11560_v4, 0 }
  0x71   : > { %659 = vst.msk [vmem:[#allocation2 + $0xe1] sm:$0x3] %vm357_vm2, %v638_v50  ;;  %707 = vst.msk [vmem:[#allocation2 + $0xe3] sm:$0x3] %vm357_vm2, %v686_v51  ;;  %v885_v32 = vld [vmem:[#allocation2 + $0xc9] sm:$0xff]  ;;  %v457_v4 = vrot.slane %v9655_v47, %v11575_v7  ;;  %v650_v7 = vrot.slane %v9655_v47, %v11589_v12  ;;  %v746_v12 = vrot.slane %v9655_v47, %v11593_v15 }
  0x72   : > { %755 = vst.msk [vmem:[#allocation2 + $0xe5] sm:$0x3] %vm357_vm2, %v734_v52  ;;  %803 = vst.msk [vmem:[#allocation2 + $0xe7] sm:$0x3] %vm357_vm2, %v782_v53  ;;  %v11779_v37 = vpack.c.bf16 %v885_v32, %v884_v27  ;;  %v820_v32 = vld [vmem:[#allocation2] sm:$0xff] }
  0x73   : > { %660 = vst.msk [vmem:[#allocation2 + $0xf9] sm:$0x3] %vm357_vm2, %v638_v50  ;;  %708 = vst.msk [vmem:[#allocation2 + $0xfb] sm:$0x3] %vm357_vm2, %v686_v51  ;;  %v883_v19 = vld [vmem:[#allocation2 + $0xb1] sm:$0xff] }
  0x74   : > { %756 = vst.msk [vmem:[#allocation2 + $0xfd] sm:$0x3] %vm357_vm2, %v734_v52  ;;  %804 = vst.msk [vmem:[#allocation2 + $0xff] sm:$0x3] %vm357_vm2, %v782_v53  ;;  %10215 = vmatprep.mubr.msk.bf16.mxu1 %vm354_vm1, %v11779_v37  ;;  %v506_v53 = vrot.slane %v9655_v47, %v11583_v9  ;;  %v698_v9 = vrot.slane %v9655_v47, %v11591_v14  ;;  %v794_v14 = vrot.slane %v9655_v47, %v11595_v16 }
  0x75   : > { %461 = vst.msk [vmem:[#allocation2 + $0x49] sm:$0x3] %vm357_vm2, %v433_v54  ;;  %509 = vst.msk [vmem:[#allocation2 + $0x4b] sm:$0x3] %vm357_vm2, %v482_v55  ;;  %v886_v22 = vld [vmem:[#allocation2 + $0xd9] sm:$0xff] }
  0x76   : > { %557 = vst.msk [vmem:[#allocation2 + $0x4d] sm:$0x3] %vm357_vm2, %v530_v56  ;;  %605 = vst.msk [vmem:[#allocation2 + $0x4f] sm:$0x3] %vm357_vm2, %v578_v57 }
  0x77   : > { %462 = vst.msk [vmem:[#allocation2 + $0x61] sm:$0x3] %vm357_vm2, %v433_v54  ;;  %510 = vst.msk [vmem:[#allocation2 + $0x63] sm:$0x3] %vm357_vm2, %v482_v55  ;;  %v888_v38 = vld [vmem:[#allocation2 + $0xf1] sm:$0xff]  ;;  %v554_v54 = vrot.slane %v9655_v47, %v11585_v10  ;;  %v602_v55 = vrot.slane %v9655_v47, %v11587_v11 }
  0x78   : > { %558 = vst.msk [vmem:[#allocation2 + $0x65] sm:$0x3] %vm357_vm2, %v530_v56  ;;  %606 = vst.msk [vmem:[#allocation2 + $0x67] sm:$0x3] %vm357_vm2, %v578_v57  ;;  %v11841_v56 = vld [vmem:[%s14558_s2 + $0xc] sm:$0xf] }
  0x79   : > { %653 = vst.msk [vmem:[#allocation2 + $0x51] sm:$0x3] %vm357_vm2, %v626_v58  ;;  %701 = vst.msk [vmem:[#allocation2 + $0x53] sm:$0x3] %vm357_vm2, %v674_v59  ;;  %v887_v43 = vld [vmem:[#allocation2 + $0xe1] sm:$0xff] }
  0x7a   : > { %749 = vst.msk [vmem:[#allocation2 + $0x55] sm:$0x3] %vm357_vm2, %v722_v60  ;;  %797 = vst.msk [vmem:[#allocation2 + $0x57] sm:$0x3] %vm357_vm2, %v770_v61  ;;  %v11816_v48 = vpack.c.bf16 %v887_v43, %v886_v22  ;;  %v1344_v22 = vld [vmem:[#allocation2 + $0x22] sm:$0xff] }
  0x7b   : > { %654 = vst.msk [vmem:[#allocation2 + $0x69] sm:$0x3] %vm357_vm2, %v626_v58  ;;  %702 = vst.msk [vmem:[#allocation2 + $0x6b] sm:$0x3] %vm357_vm2, %v674_v59  ;;  %v889_v44 = vld [vmem:[#allocation2 + $0xf9] sm:$0xff] }
  0x7c   : > { %750 = vst.msk [vmem:[#allocation2 + $0x6d] sm:$0x3] %vm357_vm2, %v722_v60  ;;  %798 = vst.msk [vmem:[#allocation2 + $0x6f] sm:$0x3] %vm357_vm2, %v770_v61  ;;  %v11820_v51 = vpack.c.bf16 %v889_v44, %v888_v38  ;;  %10216 = vmatmul.mubr.msk.bf16.vlgmr.msra.gmra.mxu1 %vm354_vm1, %v11816_v48  ;;  %v1345_v38 = vld [vmem:[#allocation2 + $0x32] sm:$0xff]  ;;  %v823_v43 = vld [vmem:[#allocation2 + $0x20] sm:$0xff] }
  0x7d   : > { %469 = vst.msk [vmem:[#allocation2 + $0x109] sm:$0x3] %vm357_vm2, %v449_v62  ;;  %517 = vst.msk [vmem:[#allocation2 + $0x10b] sm:$0x3] %vm357_vm2, %v498_v63  ;;  %v874_v50 = vld [vmem:[#allocation2 + $0x49] sm:$0xff]  ;;  %10232 = vmatpush3.bf16.msra.mxu1 %v1178_v49 }
  0x7e   : > { %565 = vst.msk [vmem:[#allocation2 + $0x10d] sm:$0x3] %vm357_vm2, %v546_v0  ;;  %613 = vst.msk [vmem:[#allocation2 + $0x10f] sm:$0x3] %vm357_vm2, %v594_v1  ;;  %10219 = vmatprep.mubr.msk.bf16.mxu1 %vm354_vm1, %v11820_v51  ;;  %11121 = vmatprep.subr.msk.bf16.mxu1 %vm964_vm0, %v11841_v56  ;;  %v11922_v47 = vld [vmem:[%s14558_s2 + $0x18] sm:$0xf] }
  0x7f   : > { %470 = vst.msk [vmem:[#allocation2 + $0x121] sm:$0x3] %vm357_vm2, %v449_v62  ;;  %518 = vst.msk [vmem:[#allocation2 + $0x123] sm:$0x3] %vm357_vm2, %v498_v63  ;;  %v876_v52 = vld [vmem:[#allocation2 + $0x61] sm:$0xff] }
  0x80   : > { %566 = vst.msk [vmem:[#allocation2 + $0x125] sm:$0x3] %vm357_vm2, %v546_v0  ;;  %614 = vst.msk [vmem:[#allocation2 + $0x127] sm:$0x3] %vm357_vm2, %v594_v1 }
  0x81   : > { %661 = vst.msk [vmem:[#allocation2 + $0x111] sm:$0x3] %vm357_vm2, %v642_v5  ;;  %709 = vst.msk [vmem:[#allocation2 + $0x113] sm:$0x3] %vm357_vm2, %v690_v6  ;;  %v875_v25 = vld [vmem:[#allocation2 + $0x51] sm:$0xff] }
  0x82   : > { %757 = vst.msk [vmem:[#allocation2 + $0x115] sm:$0x3] %vm357_vm2, %v738_v13  ;;  %805 = vst.msk [vmem:[#allocation2 + $0x117] sm:$0x3] %vm357_vm2, %v786_v17  ;;  %v11847_v57 = vpack.c.bf16 %v875_v25, %v874_v50  ;;  %v1730_v25 = vsel %vm964_vm0, %v11841_v56, 0  ;;  %v827_v56 = vld [vmem:[#allocation2 + $0x50] sm:$0xff] }
  0x83   : > { %662 = vst.msk [vmem:[#allocation2 + $0x129] sm:$0x3] %vm357_vm2, %v642_v5  ;;  %710 = vst.msk [vmem:[#allocation2 + $0x12b] sm:$0x3] %vm357_vm2, %v690_v6  ;;  %v877_v29 = vld [vmem:[#allocation2 + $0x69] sm:$0xff] }
  0x84   : > { %758 = vst.msk [vmem:[#allocation2 + $0x12d] sm:$0x3] %vm357_vm2, %v738_v13  ;;  %806 = vst.msk [vmem:[#allocation2 + $0x12f] sm:$0x3] %vm357_vm2, %v786_v17  ;;  %v11853_v58 = vpack.c.bf16 %v877_v29, %v876_v52  ;;  %10204 = vmatmul.mubr.msk.bf16.gmra.mxu0 %vm354_vm1, %v11847_v57  ;;  %v1347_v52 = vld [vmem:[#allocation2 + $0x4a] sm:$0xff]  ;;  %v1349_v29 = vld [vmem:[#allocation2 + $0x62] sm:$0xff] }
  0x85   : > { %463 = vst.msk [vmem:[#allocation2 + $0x79] sm:$0x3] %vm357_vm2, %v437_v20  ;;  %511 = vst.msk [vmem:[#allocation2 + $0x7b] sm:$0x3] %vm357_vm2, %v486_v21  ;;  %v890_v10 = vld [vmem:[#allocation2 + $0x109] sm:$0xff] }
  0x86   : > { %559 = vst.msk [vmem:[#allocation2 + $0x7d] sm:$0x3] %vm357_vm2, %v534_v23  ;;  %607 = vst.msk [vmem:[#allocation2 + $0x7f] sm:$0x3] %vm357_vm2, %v582_v24  ;;  %10207 = vmatprep.mubr.msk.bf16.mxu0 %vm354_vm1, %v11853_v58 }
  0x87   : > { %464 = vst.msk [vmem:[#allocation2 + $0x91] sm:$0x3] %vm357_vm2, %v437_v20  ;;  %512 = vst.msk [vmem:[#allocation2 + $0x93] sm:$0x3] %vm357_vm2, %v486_v21  ;;  %v892_v59 = vld [vmem:[#allocation2 + $0x121] sm:$0xff] }
  0x88   : > { %560 = vst.msk [vmem:[#allocation2 + $0x95] sm:$0x3] %vm357_vm2, %v534_v23  ;;  %608 = vst.msk [vmem:[#allocation2 + $0x97] sm:$0x3] %vm357_vm2, %v582_v24  ;;  %v1341_v21 = vld [vmem:[#allocation2 + $0x2] sm:$0xff]  ;;  %v1342_v23 = vld [vmem:[#allocation2 + $0xa] sm:$0xff]  ;;  %v11901_v24 = vpack.c.bf16 %v883_v19, %v882_v18 }
  0x89   : > { %655 = vst.msk [vmem:[#allocation2 + $0x81] sm:$0x3] %vm357_vm2, %v630_v30  ;;  %703 = vst.msk [vmem:[#allocation2 + $0x83] sm:$0x3] %vm357_vm2, %v678_v31  ;;  %v891_v11 = vld [vmem:[#allocation2 + $0x111] sm:$0xff] }
  0x8a   : > { %656 = vst.msk [vmem:[#allocation2 + $0x99] sm:$0x3] %vm357_vm2, %v630_v30  ;;  %704 = vst.msk [vmem:[#allocation2 + $0x9b] sm:$0x3] %vm357_vm2, %v678_v31  ;;  %v11877_v15 = vpack.c.bf16 %v891_v11, %v890_v10  ;;  %v1373_v31 = vpack.c.bf16 %v1342_v23, %v1341_v21  ;;  %v829_v10 = vld [vmem:[#allocation2 + $0x68] sm:$0xff]  ;;  %v1356_v21 = vld [vmem:[#allocation2 + $0xb2] sm:$0xff] }
  0x8b   : > { %751 = vst.msk [vmem:[#allocation2 + $0x85] sm:$0x3] %vm357_vm2, %v726_v33  ;;  %799 = vst.msk [vmem:[#allocation2 + $0x87] sm:$0x3] %vm357_vm2, %v774_v34  ;;  %v893_v60 = vld [vmem:[#allocation2 + $0x129] sm:$0xff] }
  0x8c   : > { %752 = vst.msk [vmem:[#allocation2 + $0x9d] sm:$0x3] %vm357_vm2, %v726_v33  ;;  %800 = vst.msk [vmem:[#allocation2 + $0x9f] sm:$0x3] %vm357_vm2, %v774_v34  ;;  %v11881_v62 = vpack.c.bf16 %v893_v60, %v892_v59  ;;  %10220 = vmatmul.mubr.msk.bf16.gmra.mxu1 %vm354_vm1, %v11877_v15  ;;  %v821_v33 = vld [vmem:[#allocation2 + $0x8] sm:$0xff] }
  0x8d   : > { %471 = vst.msk [vmem:[#allocation2 + $0x139] sm:$0x3] %vm357_vm2, %v453_v35  ;;  %519 = vst.msk [vmem:[#allocation2 + $0x13b] sm:$0x3] %vm357_vm2, %v502_v36  ;;  %v878_v16 = vld [vmem:[#allocation2 + $0x79] sm:$0xff]  ;;  %v1355_v19 = vld [vmem:[#allocation2 + $0xaa] sm:$0xff] }
  0x8e   : > { %472 = vst.msk [vmem:[#allocation2 + $0x151] sm:$0x3] %vm357_vm2, %v453_v35  ;;  %520 = vst.msk [vmem:[#allocation2 + $0x153] sm:$0x3] %vm357_vm2, %v502_v36  ;;  %10223 = vmatprep.mubr.msk.bf16.mxu1 %vm354_vm1, %v11881_v62  ;;  %v852_v35 = vpack.c.bf16 %v821_v33, %v820_v32  ;;  %v1343_v36 = vld [vmem:[#allocation2 + $0x1a] sm:$0xff]  ;;  %v1357_v23 = vld [vmem:[#allocation2 + $0xc2] sm:$0xff] }
  0x8f   : > { %567 = vst.msk [vmem:[#allocation2 + $0x13d] sm:$0x3] %vm357_vm2, %v550_v39  ;;  %615 = vst.msk [vmem:[#allocation2 + $0x13f] sm:$0x3] %vm357_vm2, %v598_v40  ;;  %v880_v63 = vld [vmem:[#allocation2 + $0x91] sm:$0xff] }
  0x90   : > { %663 = vst.msk [vmem:[#allocation2 + $0x141] sm:$0x3] %vm357_vm2, %v646_v41  ;;  %568 = vst.msk [vmem:[#allocation2 + $0x155] sm:$0x3] %vm357_vm2, %v550_v39  ;;  %v1346_v39 = vld [vmem:[#allocation2 + $0x3a] sm:$0xff]  ;;  %v835_v32 = vld [vmem:[#allocation2 + $0xb0] sm:$0xff] }
  0x91   : > { %616 = vst.msk [vmem:[#allocation2 + $0x157] sm:$0x3] %vm357_vm2, %v598_v40  ;;  %664 = vst.msk [vmem:[#allocation2 + $0x159] sm:$0x3] %vm357_vm2, %v646_v41  ;;  %v11912_v40 = vpack.c.bf16 %v1344_v22, %v1343_v36  ;;  %v822_v41 = vld [vmem:[#allocation2 + $0x18] sm:$0xff]  ;;  %v11915_v44 = vpack.c.bf16 %v1346_v39, %v1345_v38  ;;  %v837_v36 = vld [vmem:[#allocation2 + $0xc8] sm:$0xff] }
  0x92   : > { %711 = vst.msk [vmem:[#allocation2 + $0x143] sm:$0x3] %vm357_vm2, %v694_v45  ;;  %759 = vst.msk [vmem:[#allocation2 + $0x145] sm:$0x3] %vm357_vm2, %v742_v8  ;;  %v879_v61 = vld [vmem:[#allocation2 + $0x81] sm:$0xff]  ;;  %v11926_v49 = vpack.c.bf16 %v823_v43, %v822_v41  ;;  %v1353_v60 = vld [vmem:[#allocation2 + $0x92] sm:$0xff] }
  0x93   : > { %807 = vst.msk [vmem:[#allocation2 + $0x147] sm:$0x3] %vm357_vm2, %v790_v46  ;;  %712 = vst.msk [vmem:[#allocation2 + $0x15b] sm:$0x3] %vm357_vm2, %v694_v45  ;;  %v881_v0 = vld [vmem:[#allocation2 + $0x99] sm:$0xff]  ;;  %v11885_v1 = vpack.c.bf16 %v879_v61, %v878_v16  ;;  %v2022_v45 = vsel %vm964_vm0, %v11794_v42, 0 }
  0x94   : > { %760 = vst.msk [vmem:[#allocation2 + $0x15d] sm:$0x3] %vm357_vm2, %v742_v8  ;;  %808 = vst.msk [vmem:[#allocation2 + $0x15f] sm:$0x3] %vm357_vm2, %v790_v46  ;;  %v11889_v5 = vpack.c.bf16 %v881_v0, %v880_v63  ;;  %v824_v8 = vld [vmem:[#allocation2 + $0x30] sm:$0xff]  ;;  %v825_v46 = vld [vmem:[#allocation2 + $0x38] sm:$0xff] }
  0x95   : > { %473 = vst.msk [vmem:[#allocation2 + $0x169] sm:$0x3] %vm357_vm2, %v457_v4  ;;  %521 = vst.msk [vmem:[#allocation2 + $0x16b] sm:$0x3] %vm357_vm2, %v506_v53  ;;  %10208 = vmatmul.mubr.msk.bf16.gmra.mxu0 %vm354_vm1, %v11885_v1  ;;  %v11930_v50 = vpack.c.bf16 %v825_v46, %v824_v8  ;;  %v1348_v42 = vld [vmem:[#allocation2 + $0x52] sm:$0xff]  ;;  %v1352_v59 = vld [vmem:[#allocation2 + $0x82] sm:$0xff] }
  0x96   : > { %569 = vst.msk [vmem:[#allocation2 + $0x16d] sm:$0x3] %vm357_vm2, %v554_v54  ;;  %617 = vst.msk [vmem:[#allocation2 + $0x16f] sm:$0x3] %vm357_vm2, %v602_v55  ;;  %v894_v2 = vld [vmem:[#allocation2 + $0x139] sm:$0xff]  ;;  %10211 = vmatprep.mubr.msk.bf16.mxu0 %vm354_vm1, %v11889_v5  ;;  %v1360_v41 = vld [vmem:[#allocation2 + $0xe2] sm:$0xff] }
  0x97   : > { %474 = vst.msk [vmem:[#allocation2 + $0x181] sm:$0x3] %vm357_vm2, %v457_v4  ;;  %522 = vst.msk [vmem:[#allocation2 + $0x183] sm:$0x3] %vm357_vm2, %v506_v53  ;;  %v1350_v4 = vld [vmem:[#allocation2 + $0x6a] sm:$0xff]  ;;  %v1354_v16 = vld [vmem:[#allocation2 + $0x9a] sm:$0xff] }
  0x98   : > { %570 = vst.msk [vmem:[#allocation2 + $0x185] sm:$0x3] %vm357_vm2, %v554_v54  ;;  %618 = vst.msk [vmem:[#allocation2 + $0x187] sm:$0x3] %vm357_vm2, %v602_v55  ;;  %v896_v6 = vld [vmem:[#allocation2 + $0x151] sm:$0xff]  ;;  %v11943_v54 = vpack.c.bf16 %v1348_v42, %v1347_v52  ;;  %v826_v55 = vld [vmem:[#allocation2 + $0x48] sm:$0xff] }
  0x99   : > { %665 = vst.msk [vmem:[#allocation2 + $0x171] sm:$0x3] %vm357_vm2, %v650_v7  ;;  %713 = vst.msk [vmem:[#allocation2 + $0x173] sm:$0x3] %vm357_vm2, %v698_v9  ;;  %v11939_v53 = vld [vmem:[%s14558_s2 + $0x14] sm:$0xf]  ;;  %v11953_v11 = vpack.c.bf16 %v827_v56, %v826_v55 }
  0x9a   : > { %666 = vst.msk [vmem:[#allocation2 + $0x189] sm:$0x3] %vm357_vm2, %v650_v7  ;;  %714 = vst.msk [vmem:[#allocation2 + $0x18b] sm:$0x3] %vm357_vm2, %v698_v9  ;;  %v895_v3 = vld [vmem:[#allocation2 + $0x141] sm:$0xff]  ;;  %v11947_v7 = vpack.c.bf16 %v1350_v4, %v1349_v29  ;;  %v830_v63 = vld [vmem:[#allocation2 + $0x78] sm:$0xff] }
  0x9b   : > { %761 = vst.msk [vmem:[#allocation2 + $0x175] sm:$0x3] %vm357_vm2, %v746_v12  ;;  %809 = vst.msk [vmem:[#allocation2 + $0x177] sm:$0x3] %vm357_vm2, %v794_v14  ;;  %v897_v13 = vld [vmem:[#allocation2 + $0x159] sm:$0xff]  ;;  %v11893_v17 = vpack.c.bf16 %v895_v3, %v894_v2  ;;  %v11965_v2 = vpack.c.bf16 %v1354_v16, %v1353_v60  ;;  %v832_v3 = vld [vmem:[#allocation2 + $0x90] sm:$0xff] }
  0x9c   : > { %762 = vst.msk [vmem:[#allocation2 + $0x18d] sm:$0x3] %vm357_vm2, %v746_v12  ;;  %810 = vst.msk [vmem:[#allocation2 + $0x18f] sm:$0x3] %vm357_vm2, %v794_v14  ;;  %v11897_v20 = vpack.c.bf16 %v897_v13, %v896_v6  ;;  %v828_v9 = vld [vmem:[#allocation2 + $0x60] sm:$0xff]  ;;  %v833_v6 = vld [vmem:[#allocation2 + $0x98] sm:$0xff] }
  0x9d   : > { %10224 = vmatmul.mubr.msk.bf16.gmra.mxu1 %vm354_vm1, %v11893_v17  ;;  %v898_v27 = vld [vmem:[#allocation2 + $0x169] sm:$0xff]  ;;  %10212 = vmatmul.mubr.msk.bf16.gmra.mxu0 %vm354_vm1, %v11901_v24  ;;  %v11957_v12 = vpack.c.bf16 %v829_v10, %v828_v9  ;;  %v1351_v14 = vld [vmem:[#allocation2 + $0x7a] sm:$0xff]  ;;  %v11973_v18 = vpack.c.bf16 %v833_v6, %v832_v3  ;;  %v1361_v43 = vld [vmem:[#allocation2 + $0xf2] sm:$0xff] }
  0x9e   : > { %10227 = vmatprep.mubr.msk.bf16.mxu1 %vm354_vm1, %v11897_v20  ;;  %10267 = vmatprep.mubr.msk.bf16.mxu0 %vm354_vm1, %v1373_v31  ;;  %v11961_v61 = vpack.c.bf16 %v1352_v59, %v1351_v14  ;;  %v831_v0 = vld [vmem:[#allocation2 + $0x80] sm:$0xff]  ;;  %v834_v31 = vld [vmem:[#allocation2 + $0xa8] sm:$0xff]  ;;  %v838_v46 = vld [vmem:[#allocation2 + $0xd8] sm:$0xff] }
  0x9f   : > { %v11969_v13 = vpack.c.bf16 %v831_v0, %v830_v63  ;;  %v11985_v22 = vpack.c.bf16 %v835_v32, %v834_v31  ;;  %v1359_v39 = vld [vmem:[#allocation2 + $0xda] sm:$0xff]  ;;  %v1363_v56 = vld [vmem:[#allocation2 + $0x10a] sm:$0xff]  ;;  %v1364_v9 = vld [vmem:[#allocation2 + $0x112] sm:$0xff] }
  0xa0   : > { %v11993_v8 = vpack.c.bf16 %v1360_v41, %v1359_v39  ;;  %v839_v52 = vld [vmem:[#allocation2 + $0xe0] sm:$0xff]  ;;  %v841_v29 = vld [vmem:[#allocation2 + $0xf8] sm:$0xff]  ;;  %v1366_v14 = vld [vmem:[#allocation2 + $0x12a] sm:$0xff]  ;;  %v12009_v59 = vpack.c.bf16 %v1364_v9, %v1363_v56 }
  0xa1   : > { %v12001_v4 = vpack.c.bf16 %v839_v52, %v838_v46  ;;  %v1365_v10 = vld [vmem:[#allocation2 + $0x122] sm:$0xff]  ;;  %v843_v16 = vld [vmem:[#allocation2 + $0x110] sm:$0xff]  ;;  %v1370_v31 = vld [vmem:[#allocation2 + $0x15a] sm:$0xff] }
  0xa2   : > { %v899_v30 = vld [vmem:[#allocation2 + $0x171] sm:$0xff]  ;;  %v842_v60 = vld [vmem:[#allocation2 + $0x108] sm:$0xff]  ;;  %v12013_v63 = vpack.c.bf16 %v1366_v14, %v1365_v10  ;;  %v844_v0 = vld [vmem:[#allocation2 + $0x120] sm:$0xff]  ;;  %v2607_v14 = vsel %vm964_vm0, %v11922_v47, 0 }
  0xa3   : > { %v11907_v34 = vpack.c.bf16 %v899_v30, %v898_v27  ;;  %v1358_v27 = vld [vmem:[#allocation2 + $0xca] sm:$0xff]  ;;  %v11977_v30 = vpack.c.bf16 %v1356_v21, %v1355_v19  ;;  %v12017_v6 = vpack.c.bf16 %v843_v16, %v842_v60  ;;  %v1367_v21 = vld [vmem:[#allocation2 + $0x13a] sm:$0xff] }
  0xa4   : > { %v11981_v33 = vpack.c.bf16 %v1358_v27, %v1357_v23  ;;  %v845_v3 = vld [vmem:[#allocation2 + $0x128] sm:$0xff]  ;;  %v1369_v27 = vld [vmem:[#allocation2 + $0x152] sm:$0xff]  ;;  %v819_v60 = vld [vmem:[%s14558_s2 + $0x20] sm:$0xf] }
  0xa5   : > { %10228 = vmatmul.mubr.msk.bf16.gmra.mxu1 %vm354_vm1, %v11907_v34  ;;  %10268 = vmatmul.mubr.msk.bf16.vlgmr.msra.gmra.mxu0 %vm354_vm1, %v11912_v40  ;;  %v12021_v19 = vpack.c.bf16 %v845_v3, %v844_v0  ;;  %v1368_v23 = vld [vmem:[#allocation2 + $0x142] sm:$0xff]  ;;  %v12029_v39 = vpack.c.bf16 %v1370_v31, %v1369_v27  ;;  %v848_v41 = vld [vmem:[#allocation2 + $0x150] sm:$0xff] }
  0xa6   : > { %10233 = vmatprep.mubr.msk.bf16.mxu1 %vm354_vm1, %v852_v35  ;;  %10334 = vmatpush3.bf16.msra.mxu0 %v2022_v45  ;;  %v836_v35 = vld [vmem:[#allocation2 + $0xc0] sm:$0xff]  ;;  %v12025_v32 = vpack.c.bf16 %v1368_v23, %v1367_v21  ;;  %v1371_v52 = vld [vmem:[#allocation2 + $0x16a] sm:$0xff] }
  0xa7   : > { %10271 = vmatprep.mubr.msk.bf16.mxu0 %vm354_vm1, %v11915_v44  ;;  %11124 = vmatprep.subr.msk.bf16.mxu0 %vm964_vm0, %v11922_v47  ;;  %v11989_v38 = vpack.c.bf16 %v837_v36, %v836_v35  ;;  %v1362_v45 = vld [vmem:[#allocation2 + $0xfa] sm:$0xff]  ;;  %v850_v56 = vld [vmem:[#allocation2 + $0x168] sm:$0xff]  ;;  %v851_v9 = vld [vmem:[#allocation2 + $0x170] sm:$0xff] }
  0xa8   : > { %v11997_v42 = vpack.c.bf16 %v1362_v45, %v1361_v43  ;;  %v846_v35 = vld [vmem:[#allocation2 + $0x138] sm:$0xff]  ;;  %v847_v36 = vld [vmem:[#allocation2 + $0x140] sm:$0xff]  ;;  %v12047_v10 = vpack.c.bf16 %v851_v9, %v850_v56  ;;  %v2248_v23 = vld [vmem:[#allocation2 + $0x18a] sm:$0xff] }
  0xa9   : > { %v849_v43 = vld [vmem:[#allocation2 + $0x158] sm:$0xff]  ;;  %v12033_v45 = vpack.c.bf16 %v847_v36, %v846_v35  ;;  %v2247_v21 = vld [vmem:[#allocation2 + $0x182] sm:$0xff] }
  0xaa   : > { %v12037_v46 = vpack.c.bf16 %v849_v43, %v848_v41  ;;  %v818_v47 = vld [vmem:[%s14558_s2 + $0x1c] sm:$0xf]  ;;  %v2802_v35 = vld [vmem:[#allocation2 + $0x31] sm:$0xff] }
  0xab   : > { %v2803_v36 = vld [vmem:[#allocation2 + $0x39] sm:$0xff] }
  0xad   : > { %10234 = vmatmul.mubr.msk.bf16.vlgmr.msra.gmra.mxu1 %vm354_vm1, %v11926_v49  ;;  %10272 = vmatmul.mubr.msk.bf16.gmra.mxu0 %vm354_vm1, %v11943_v54 }
  0xae   : > { %10300 = vmatpush3.bf16.msra.mxu1 %v1730_v25  ;;  %10237 = vmatprep.mubr.msk.bf16.mxu1 %vm354_vm1, %v11930_v50  ;;  %v840_v25 = vld [vmem:[#allocation2 + $0xf0] sm:$0xff] }
  0xaf   : > { %11123 = vmatprep.subr.msk.bf16.mxu1 %vm964_vm0, %v11939_v53  ;;  %10275 = vmatprep.mubr.msk.bf16.mxu0 %vm354_vm1, %v11947_v7  ;;  %v12005_v55 = vpack.c.bf16 %v841_v29, %v840_v25  ;;  %v1372_v25 = vld [vmem:[#allocation2 + $0x172] sm:$0xff] }
  0xb0   : > { %v12041_v29 = vpack.c.bf16 %v1372_v25, %v1371_v52 }
  0xb5   : > { %10238 = vmatmul.mubr.msk.bf16.gmra.mxu1 %vm354_vm1, %v11953_v11  ;;  %10276 = vmatmul.mubr.msk.bf16.gmra.mxu0 %vm354_vm1, %v11961_v61 }
  0xb6   : > { %10241 = vmatprep.mubr.msk.bf16.mxu1 %vm354_vm1, %v11957_v12  ;;  %10279 = vmatprep.mubr.msk.bf16.mxu0 %vm354_vm1, %v11965_v2 }
  0xbd   : > { %10242 = vmatmul.mubr.msk.bf16.gmra.mxu1 %vm354_vm1, %v11969_v13  ;;  %10280 = vmatmul.mubr.msk.bf16.gmra.mxu0 %vm354_vm1, %v11977_v30 }
  0xbe   : > { %10245 = vmatprep.mubr.msk.bf16.mxu1 %vm354_vm1, %v11973_v18  ;;  %10283 = vmatprep.mubr.msk.bf16.mxu0 %vm354_vm1, %v11981_v33 }
  0xc5   : > { %10246 = vmatmul.mubr.msk.bf16.gmra.mxu1 %vm354_vm1, %v11985_v22  ;;  %10284 = vmatmul.mubr.msk.bf16.gmra.mxu0 %vm354_vm1, %v11993_v8 }
  0xc6   : > { %10249 = vmatprep.mubr.msk.bf16.mxu1 %vm354_vm1, %v11989_v38  ;;  %10287 = vmatprep.mubr.msk.bf16.mxu0 %vm354_vm1, %v11997_v42 }
  0xcd   : > { %10250 = vmatmul.mubr.msk.bf16.gmra.mxu1 %vm354_vm1, %v12001_v4  ;;  %10288 = vmatmul.mubr.msk.bf16.gmra.mxu0 %vm354_vm1, %v12009_v59 }
  0xce   : > { %10253 = vmatprep.mubr.msk.bf16.mxu1 %vm354_vm1, %v12005_v55  ;;  %10291 = vmatprep.mubr.msk.bf16.mxu0 %vm354_vm1, %v12013_v63 }
  0xd5   : > { %10254 = vmatmul.mubr.msk.bf16.gmra.mxu1 %vm354_vm1, %v12017_v6  ;;  %10292 = vmatmul.mubr.msk.bf16.gmra.mxu0 %vm354_vm1, %v12025_v32 }
  0xd6   : > { %10257 = vmatprep.mubr.msk.bf16.mxu1 %vm354_vm1, %v12021_v19  ;;  %10295 = vmatprep.mubr.msk.bf16.mxu0 %vm354_vm1, %v12029_v39 }
  0xdd   : > { %10258 = vmatmul.mubr.msk.bf16.gmra.mxu1 %vm354_vm1, %v12033_v45  ;;  %10296 = vmatmul.mubr.msk.bf16.gmra.mxu0 %vm354_vm1, %v12041_v29 }
  0xde   : > { %10261 = vmatprep.mubr.msk.bf16.mxu1 %vm354_vm1, %v12037_v46  ;;  %10335 = vmatprep.mubr.msk.bf16.mxu0 %vm354_vm1, %v11745_v26  ;;  %v2314_v26 = vsel %vm964_vm0, %v11939_v53, 0 }
  0xe5   : > { %10262 = vmatmul.mubr.msk.bf16.gmra.mxu1 %vm354_vm1, %v12047_v10  ;;  %10336 = vmatmul.mubr.msk.bf16.vlgmr.msra.gmra.mxu0 %vm354_vm1, %v11747_v28  ;;  %v1955_v28 = vld [vmem:[#allocation2 + $0x181] sm:$0xff] }
  0xe6   : > { %10301 = vmatprep.mubr.msk.bf16.mxu1 %vm354_vm1, %v11926_v49  ;;  %10402 = vmatpush3.bf16.msra.mxu0 %v2607_v14  ;;  %v2805_v14 = vld [vmem:[#allocation2 + $0x51] sm:$0xff] }
  0xe7   : > { %10339 = vmatprep.mubr.msk.bf16.mxu0 %vm354_vm1, %v11847_v57  ;;  %11126 = vmatprep.subr.msk.bf16.mxu0 %vm964_vm0, %v819_v60  ;;  %v1664_v57 = vld [vmem:[#allocation2 + $0x188] sm:$0xff] }
  0xed   : > { %10302 = vmatmul.mubr.msk.bf16.vlgmr.msra.gmra.mxu1 %vm354_vm1, %v11930_v50  ;;  %10340 = vmatmul.mubr.msk.bf16.gmra.mxu0 %vm354_vm1, %v11853_v58 }
  0xee   : > { %10368 = vmatpush3.bf16.msra.mxu1 %v2314_v26  ;;  %10305 = vmatprep.mubr.msk.bf16.mxu1 %vm354_vm1, %v11953_v11  ;;  %v2806_v26 = vld [vmem:[#allocation2 + $0x61] sm:$0xff] }
  0xef   : > { %11125 = vmatprep.subr.msk.bf16.mxu1 %vm964_vm0, %v818_v47  ;;  %10343 = vmatprep.mubr.msk.bf16.mxu0 %vm354_vm1, %v11885_v1 }
  0xf5   : > { %10306 = vmatmul.mubr.msk.bf16.gmra.mxu1 %vm354_vm1, %v11957_v12  ;;  %10344 = vmatmul.mubr.msk.bf16.gmra.mxu0 %vm354_vm1, %v11889_v5 }
  0xf6   : > { %10309 = vmatprep.mubr.msk.bf16.mxu1 %vm354_vm1, %v11969_v13  ;;  %10347 = vmatprep.mubr.msk.bf16.mxu0 %vm354_vm1, %v11901_v24 }
  0xfd   : > { %10310 = vmatmul.mubr.msk.bf16.gmra.mxu1 %vm354_vm1, %v11973_v18  ;;  %10348 = vmatmul.mubr.msk.bf16.gmra.mxu0 %vm354_vm1, %v11779_v37  ;;  %v1956_v37 = vld [vmem:[#allocation2 + $0x189] sm:$0xff] }
  0xfe   : > { %10313 = vmatprep.mubr.msk.bf16.mxu1 %vm354_vm1, %v11985_v22  ;;  %10351 = vmatprep.mubr.msk.bf16.mxu0 %vm354_vm1, %v11816_v48  ;;  %v12121_v48 = vpack.c.bf16 %v1956_v37, %v1955_v28 }
 0x105   : > { %10314 = vmatmul.mubr.msk.bf16.gmra.mxu1 %vm354_vm1, %v11989_v38  ;;  %10352 = vmatmul.mubr.msk.bf16.gmra.mxu0 %vm354_vm1, %v11820_v51  ;;  %v1663_v51 = vld [vmem:[#allocation2 + $0x180] sm:$0xff] }
 0x106   : > { %10317 = vmatprep.mubr.msk.bf16.mxu1 %vm354_vm1, %v12001_v4  ;;  %10355 = vmatprep.mubr.msk.bf16.mxu0 %vm354_vm1, %v11877_v15  ;;  %v1680_v58 = vpack.c.bf16 %v1664_v57, %v1663_v51  ;;  %v3191_v15 = vsel %vm964_vm0, %v819_v60, 0 }
 0x10d   : > { %10318 = vmatmul.mubr.msk.bf16.gmra.mxu1 %vm354_vm1, %v12005_v55  ;;  %10356 = vmatmul.mubr.msk.bf16.gmra.mxu0 %vm354_vm1, %v11881_v62  ;;  %v2899_v62 = vsel %vm964_vm0, %v818_v47, 0  ;;  %v2807_v47 = vld [vmem:[#allocation2 + $0x69] sm:$0xff] }
 0x10e   : > { %10321 = vmatprep.mubr.msk.bf16.mxu1 %vm354_vm1, %v12017_v6  ;;  %10359 = vmatprep.mubr.msk.bf16.mxu0 %vm354_vm1, %v11893_v17  ;;  %v2836_v57 = vpack.c.bf16 %v2807_v47, %v2806_v26 }
 0x115   : > { %10322 = vmatmul.mubr.msk.bf16.gmra.mxu1 %vm354_vm1, %v12021_v19  ;;  %10360 = vmatmul.mubr.msk.bf16.gmra.mxu0 %vm354_vm1, %v11897_v20 }
 0x116   : > { %10325 = vmatprep.mubr.msk.bf16.mxu1 %vm354_vm1, %v12033_v45  ;;  %10363 = vmatprep.mubr.msk.bf16.mxu0 %vm354_vm1, %v11907_v34 }
 0x11d   : > { %10326 = vmatmul.mubr.msk.bf16.gmra.mxu1 %vm354_vm1, %v12037_v46  ;;  %10364 = vmatmul.mubr.msk.bf16.gmra.mxu0 %vm354_vm1, %v12121_v48 }
 0x11e   : > { %10329 = vmatprep.mubr.msk.bf16.mxu1 %vm354_vm1, %v12047_v10  ;;  %10403 = vmatprep.mubr.msk.bf16.mxu0 %vm354_vm1, %v11930_v50 }
 0x125   : > { %10330 = vmatmul.mubr.msk.bf16.gmra.mxu1 %vm354_vm1, %v1680_v58  ;;  %10404 = vmatmul.mubr.msk.bf16.vlgmr.msra.gmra.mxu0 %vm354_vm1, %v11953_v11 }
 0x126   : > { %10369 = vmatprep.mubr.msk.bf16.mxu1 %vm354_vm1, %v11912_v40  ;;  %10470 = vmatpush3.bf16.msra.mxu0 %v3191_v15 }
 0x127   : > { %10407 = vmatprep.mubr.msk.bf16.mxu0 %vm354_vm1, %v11957_v12 }
 0x12c   : > { %v12166_v1 = vpop.f32.mrf.mxu0 }
 0x12d   : > { %10370 = vmatmul.mubr.msk.bf16.vlgmr.msra.gmra.mxu1 %vm354_vm1, %v11915_v44  ;;  %10408 = vmatmul.mubr.msk.bf16.gmra.mxu0 %vm354_vm1, %v11969_v13 }
 0x12e   : > { %10436 = vmatpush3.bf16.msra.mxu1 %v2899_v62  ;;  %10373 = vmatprep.mubr.msk.bf16.mxu1 %vm354_vm1, %v11943_v54  ;;  %v12172_v5 = vpop.f32.mrf.mxu0 }
 0x12f   : > { %10411 = vmatprep.mubr.msk.bf16.mxu0 %vm354_vm1, %v11973_v18 }
 0x130   : > { %v12178_v20 = vpop.f32.mrf.mxu0 }
 0x132   : > { %v12184_v34 = vpop.f32.mrf.mxu0 }
 0x135   : > { %10374 = vmatmul.mubr.msk.bf16.gmra.mxu1 %vm354_vm1, %v11947_v7  ;;  %10412 = vmatmul.mubr.msk.bf16.gmra.mxu0 %vm354_vm1, %v11985_v22 }
 0x136   : > { %10377 = vmatprep.mubr.msk.bf16.mxu1 %vm354_vm1, %v11961_v61  ;;  %10415 = vmatprep.mubr.msk.bf16.mxu0 %vm354_vm1, %v11989_v38 }
 0x13c   : > { %v12174_v17 = vpop.f32.mrf.mxu1 }
 0x13d   : > { %10378 = vmatmul.mubr.msk.bf16.gmra.mxu1 %vm354_vm1, %v11965_v2  ;;  %10416 = vmatmul.mubr.msk.bf16.gmra.mxu0 %vm354_vm1, %v12001_v4  ;;  %v2540_v4 = vld [vmem:[#allocation2 + $0x198] sm:$0xff] }
 0x13e   : > { %10381 = vmatprep.mubr.msk.bf16.mxu1 %vm354_vm1, %v11977_v30  ;;  %10419 = vmatprep.mubr.msk.bf16.mxu0 %vm354_vm1, %v12005_v55  ;;  %v12182_v24 = vpop.f32.mrf.mxu1  ;;  %v2541_v55 = vld [vmem:[#allocation2 + $0x1a0] sm:$0xff] }
 0x140   : > { %v12186_v40 = vpop.f32.mrf.mxu1 }
 0x142   : > { %v12194_v50 = vpop.f32.mrf.mxu1 }
 0x144   : > { %v12188_v49 = vpop.f32.mrf.mxu0 }
 0x145   : > { %10382 = vmatmul.mubr.msk.bf16.gmra.mxu1 %vm354_vm1, %v11981_v33  ;;  %10420 = vmatmul.mubr.msk.bf16.gmra.mxu0 %vm354_vm1, %v12017_v6 }
 0x146   : > { %10385 = vmatprep.mubr.msk.bf16.mxu1 %vm354_vm1, %v11993_v8  ;;  %10423 = vmatprep.mubr.msk.bf16.mxu0 %vm354_vm1, %v12021_v19  ;;  %v12196_v53 = vpop.f32.mrf.mxu0  ;;  %v2557_v19 = vpack.c.bf16 %v2541_v55, %v2540_v4 }
 0x148   : > { %v12202_v12 = vpop.f32.mrf.mxu0 }
 0x14a   : > { %v12208_v18 = vpop.f32.mrf.mxu0 }
 0x14c   : > { %v12198_v11 = vpop.f32.mrf.mxu1 }
 0x14d   : > { %10386 = vmatmul.mubr.msk.bf16.gmra.mxu1 %vm354_vm1, %v11997_v42  ;;  %10424 = vmatmul.mubr.msk.bf16.gmra.mxu0 %vm354_vm1, %v12033_v45  ;;  %v12238_v45 = vpack.c.bf16 %v2248_v23, %v2247_v21  ;;  %v2809_v21 = vld [vmem:[#allocation2 + $0x81] sm:$0xff] }
 0x14e   : > { %10389 = vmatprep.mubr.msk.bf16.mxu1 %vm354_vm1, %v12009_v59  ;;  %10427 = vmatprep.mubr.msk.bf16.mxu0 %vm354_vm1, %v12037_v46  ;;  %v12206_v13 = vpop.f32.mrf.mxu1  ;;  %v2834_v46 = vpack.c.bf16 %v2803_v36, %v2802_v35  ;;  %v2810_v35 = vld [vmem:[#allocation2 + $0x91] sm:$0xff]  ;;  %v2811_v36 = vld [vmem:[#allocation2 + $0x99] sm:$0xff] }
 0x14f   : > { %v2838_v47 = vpack.c.bf16 %v2811_v36, %v2810_v35 }
 0x150   : > { %v12210_v22 = vpop.f32.mrf.mxu1 }
 0x152   : > { %v12217_v16 = vpop.f32.mrf.mxu1 }
 0x155   : > { %10390 = vmatmul.mubr.msk.bf16.gmra.mxu1 %vm354_vm1, %v12013_v63  ;;  %v12212_v38 = vpop.f32.mrf.mxu0  ;;  %10428 = vmatmul.mubr.msk.bf16.gmra.mxu0 %vm354_vm1, %v12047_v10  ;;  %v2804_v10 = vld [vmem:[#allocation2 + $0x49] sm:$0xff] }
 0x156   : > { %10393 = vmatprep.mubr.msk.bf16.mxu1 %vm354_vm1, %v12025_v32  ;;  %10431 = vmatprep.mubr.msk.bf16.mxu0 %vm354_vm1, %v1680_v58  ;;  %v2835_v51 = vpack.c.bf16 %v2805_v14, %v2804_v10 }
 0x157   : > { %v12219_v0 = vpop.f32.mrf.mxu0 }
 0x159   : > { %v12225_v6 = vpop.f32.mrf.mxu0 }
 0x15b   : > { %v12231_v31 = vpop.f32.mrf.mxu0 }
 0x15d   : > { %v12221_v3 = vpop.f32.mrf.mxu1  ;;  %10394 = vmatmul.mubr.msk.bf16.gmra.mxu1 %vm354_vm1, %v12029_v39  ;;  %v12235_v43 = vpop.f32.mrf.mxu0  ;;  %10432 = vmatmul.mubr.msk.bf16.gmra.mxu0 %vm354_vm1, %v2557_v19  ;;  %v2808_v19 = vld [vmem:[#allocation2 + $0x79] sm:$0xff] }
 0x15e   : > { %10397 = vmatprep.mubr.msk.bf16.mxu1 %vm354_vm1, %v12041_v29  ;;  %10471 = vmatprep.mubr.msk.bf16.mxu0 %vm354_vm1, %v11915_v44  ;;  %v2837_v14 = vpack.c.bf16 %v2809_v21, %v2808_v19  ;;  %v2813_v19 = vld [vmem:[#allocation2 + $0xb1] sm:$0xff] }
 0x15f   : > { %v12229_v27 = vpop.f32.mrf.mxu1  ;;  %v12244_v25 = vpop.f32.mrf.mxu0 }
 0x161   : > { %v12233_v41 = vpop.f32.mrf.mxu1  ;;  %v12250_v9 = vpop.f32.mrf.mxu0 }
 0x163   : > { %v12242_v52 = vpop.f32.mrf.mxu1  ;;  %v12255_v44 = vpop.f32.mrf.mxu0 }
 0x165   : > { %v12246_v56 = vpop.f32.mrf.mxu1  ;;  %10398 = vmatmul.mubr.msk.bf16.gmra.mxu1 %vm354_vm1, %v12238_v45  ;;  %v10269_v37 = vpop.f32.mrf.mxu0  ;;  %10472 = vmatmul.mubr.msk.bf16.vlgmr.msra.gmra.mxu0 %vm354_vm1, %v11943_v54 }
 0x166   : > { %10437 = vmatprep.mubr.msk.bf16.mxu1 %vm354_vm1, %v2834_v46  ;;  %10475 = vmatprep.mubr.msk.bf16.mxu0 %vm354_vm1, %v11947_v7 }
 0x167   : > { %v12253_v60 = vpop.f32.mrf.mxu1  ;;  %v1474_v15 = vpop.f32.mrf.mxu0 }
 0x169   : > { %v12257_v28 = vpop.f32.mrf.mxu1  ;;  %v10270_v4 = vpop.f32.mrf.mxu0 }
 0x16b   : > { %v12263_v58 = vpop.f32.mrf.mxu1  ;;  %v1477_v23 = vpop.f32.mrf.mxu0 }
 0x16c   : > { %14568 = vst [vmem:[#allocation5_spill] sm:$0xff] %v12263_v58  ;;  %v9657_v58 = vld [vmem:[%s12272_s17] sm:$0xff]  }
 0x16d   : > { %v10235_v62 = vpop.f32.mrf.mxu1  ;;  %10438 = vmatmul.mubr.msk.bf16.vlgmr.msra.gmra.mxu1 %vm354_vm1, %v2835_v51  ;;  %10476 = vmatmul.mubr.msk.bf16.gmra.mxu0 %vm354_vm1, %v11961_v61 }
 0x16e   : > { %v1223_v55 = vadd.f32 %v10235_v62, %v12166_v1  ;;  %10441 = vmatprep.mubr.msk.bf16.mxu1 %vm354_vm1, %v2836_v57  ;;  %v10273_v1 = vpop.f32.mrf.mxu0  ;;  %10479 = vmatprep.mubr.msk.bf16.mxu0 %vm354_vm1, %v11965_v2  ;;  %v12292_v2 = vld [vmem:[%s14560_s4] ss:$0 sm:$0xff] }
 0x16f   : > { %v1214_v54 = vpop.f32.mrf.mxu1 }
 0x170   : > { %v1215_v7 = vadd.f32 %v1214_v54, %v12172_v5  ;;  %v12275_v46 = vadd.f32 %v10269_v37, %v1223_v55  ;;  %v1490_v62 = vpop.f32.mrf.mxu0  ;;  %v9658_v55 = vunpack.c.l.bf16 %v9657_v58  ;;  %v9659_v54 = vunpack.c.h.bf16 %v9657_v58 }
 0x171   : > { %v10236_v10 = vpop.f32.mrf.mxu1 }
 0x172   : > { %14569 = vst [vmem:[#allocation6_spill] sm:$0xff] %v12275_v46  ;;  %v1226_v26 = vadd.f32 %v10236_v10, %v12178_v20  ;;  %v12282_v51 = vadd.f32 %v1474_v15, %v1215_v7  ;;  %v10274_v61 = vpop.f32.mrf.mxu0  ;;  %v2812_v20 = vld [vmem:[#allocation2 + $0xa9] sm:$0xff]  ;;  %v3669_v58 = vmul.f32 %v9658_v55, %v12292_v2  ;;  %v3670_v35 = vmul.f32 %v9659_v54, %v12292_v2  ;;  %v12303_v10 = vld [vmem:[%s14561_s5] ss:$0 sm:$0xff] }
 0x173   : > { %v1217_v57 = vpop.f32.mrf.mxu1 }
 0x174   : > { %v1218_v5 = vadd.f32 %v1217_v57, %v12184_v34  ;;  %v12286_v37 = vadd.f32 %v10270_v4, %v1226_v26  ;;  %v2814_v34 = vld [vmem:[#allocation2 + $0xc1] sm:$0xff]  ;;  %v2815_v4 = vld [vmem:[#allocation2 + $0xc9] sm:$0xff]  ;;  %v1493_v7 = vpop.f32.mrf.mxu0  ;;  %v2839_v57 = vpack.c.bf16 %v2813_v19, %v2812_v20 }
 0x175   : > { %v10239_v46 = vpop.f32.mrf.mxu1  ;;  %10442 = vmatmul.mubr.msk.bf16.gmra.mxu1 %vm354_vm1, %v2837_v14  ;;  %v3708_v14 = vadd.f32 %v12303_v10, %v3669_v58  ;;  %10480 = vmatmul.mubr.msk.bf16.gmra.mxu0 %vm354_vm1, %v11977_v30 }
 0x176   : > { %v1239_v15 = vadd.f32 %v10239_v46, %v12188_v49  ;;  %10445 = vmatprep.mubr.msk.bf16.mxu1 %vm354_vm1, %v2838_v47  ;;  %v12296_v21 = vadd.f32 %v1477_v23, %v1218_v5  ;;  %v3709_v23 = vadd.f32 %v12303_v10, %v3670_v35  ;;  %v10277_v47 = vpop.f32.mrf.mxu0  ;;  %v2840_v5 = vpack.c.bf16 %v2815_v4, %v2814_v34  ;;  %v2816_v34 = vld [vmem:[#allocation2 + $0xd9] sm:$0xff] }
 0x177   : > { %v1230_v36 = vpop.f32.mrf.mxu1  ;;  %10483 = vmatprep.mubr.msk.bf16.mxu0 %vm354_vm1, %v11981_v33 }
 0x178   : > { %14570 = vst [vmem:[#allocation7_spill] sm:$0xff] %v12296_v21  ;;  %v1231_v49 = vadd.f32 %v1230_v36, %v12196_v53  ;;  %v12306_v46 = vadd.f32 %v10273_v1, %v1239_v15  ;;  %v3740_v1 = vmax.f32 %v3708_v14, 0.0  ;;  %v3741_v54 = vmax.f32 %v3709_v23, 0.0  ;;  %v9723_v15 = vld [vmem:[%s12272_s17 + $0x8] sm:$0xff]   ;;  %v1506_v35 = vpop.f32.mrf.mxu0  ;;  %v9724_v21 = vld [vmem:[%s12272_s17 + $0x10] sm:$0xff]   ;;  %v2819_v23 = vld [vmem:[#allocation2 + $0xf9] sm:$0xff] }
 0x179   : > { %v10240_v26 = vpop.f32.mrf.mxu1  ;;  %v9662_v36 = vunpack.c.l.bf16 %v9723_v15  ;;  %v9666_v33 = vunpack.c.l.bf16 %v9724_v21 }
 0x17a   : > { %14571 = vst [vmem:[#allocation8_spill] sm:$0xff] %v12306_v46  ;;  %v1242_v55 = vadd.f32 %v10240_v26, %v12202_v12  ;;  %v12315_v53 = vadd.f32 %v1490_v62, %v1231_v49  ;;  %v9663_v46 = vunpack.c.h.bf16 %v9723_v15  ;;  %3774 = vst.msk [vmem:[#allocation4 + $0x19] sm:$0xff] %vm3773_vm3, %v3740_v1  ;;  %v9667_v12 = vunpack.c.h.bf16 %v9724_v21  ;;  %v10278_v19 = vpop.f32.mrf.mxu0 }
 0x17b   : > { %v1233_v58 = vpop.f32.mrf.mxu1  ;;  %3775 = vst.msk [vmem:[#allocation4 + $0x21] sm:$0xff] %vm3773_vm3, %v3741_v54  ;;  %v3671_v4 = vmul.f32 %v9662_v36, %v12292_v2  ;;  %v3673_v21 = vmul.f32 %v9666_v33, %v12292_v2 }
 0x17c   : > { %v1234_v30 = vadd.f32 %v1233_v58, %v12208_v18  ;;  %v12320_v20 = vadd.f32 %v10274_v61, %v1242_v55  ;;  %v3672_v49 = vmul.f32 %v9663_v46, %v12292_v2  ;;  %v2817_v18 = vld [vmem:[#allocation2 + $0xe1] sm:$0xff]  ;;  %v2818_v61 = vld [vmem:[#allocation2 + $0xf1] sm:$0xff]  ;;  %v3674_v55 = vmul.f32 %v9667_v12, %v12292_v2  ;;  %v1509_v1 = vpop.f32.mrf.mxu0 }
 0x17d   : > { %v10243_v62 = vpop.f32.mrf.mxu1  ;;  %10446 = vmatmul.mubr.msk.bf16.gmra.mxu1 %vm354_vm1, %v2839_v57  ;;  %v3710_v54 = vadd.f32 %v12303_v10, %v3671_v4  ;;  %10484 = vmatmul.mubr.msk.bf16.gmra.mxu0 %vm354_vm1, %v11993_v8  ;;  %v2842_v33 = vpack.c.bf16 %v2819_v23, %v2818_v61  ;;  %v3815_v12 = vld [vmem:[%s14563_s7] sm:$0xf] }
 0x17e   : > { %v1255_v14 = vadd.f32 %v10243_v62, %v12212_v38  ;;  %10449 = vmatprep.mubr.msk.bf16.mxu1 %vm354_vm1, %v2840_v5  ;;  %v12329_v26 = vadd.f32 %v1493_v7, %v1234_v30  ;;  %v3711_v15 = vadd.f32 %v12303_v10, %v3672_v49  ;;  %v3712_v5 = vadd.f32 %v12303_v10, %v3673_v21  ;;  %v10281_v36 = vpop.f32.mrf.mxu0  ;;  %v9725_v49 = vld [vmem:[%s12272_s17 + $0x18] sm:$0xff]   ;;  %v9726_v21 = vld [vmem:[%s12272_s17 + $0x20] sm:$0xff]  }
 0x17f   : > { %v1246_v57 = vpop.f32.mrf.mxu1  ;;  %v3713_v7 = vadd.f32 %v12303_v10, %v3674_v55  ;;  %v2841_v30 = vpack.c.bf16 %v2817_v18, %v2816_v34  ;;  %v3742_v62 = vmax.f32 %v3710_v54, 0.0  ;;  %10487 = vmatprep.mubr.msk.bf16.mxu0 %vm354_vm1, %v11997_v42  ;;  %11127 = vmatprep.subr.msk.bf16.mxu1 %vm964_vm0, %v3815_v12  ;;  %v3969_v8 = vsel %vm964_vm0, %v3815_v12, 0 }
 0x180   : > { %v1247_v46 = vadd.f32 %v1246_v57, %v12219_v0  ;;  %v12336_v38 = vadd.f32 %v10277_v47, %v1255_v14  ;;  %v3743_v0 = vmax.f32 %v3711_v15, 0.0  ;;  %v3744_v34 = vmax.f32 %v3712_v5, 0.0  ;;  %v1522_v18 = vpop.f32.mrf.mxu0  ;;  %10504 = vmatpush3.bf16.msra.mxu1 %v3969_v8  ;;  %v2823_v8 = vld [vmem:[#allocation2 + $0x129] sm:$0xff] }
 0x181   : > { %v10244_v58 = vpop.f32.mrf.mxu1  ;;  %3776 = vst.msk [vmem:[#allocation4 + $0x31] sm:$0xff] %vm3773_vm3, %v3742_v62  ;;  %v3745_v61 = vmax.f32 %v3713_v7, 0.0  ;;  %v9671_v23 = vunpack.c.h.bf16 %v9725_v49  ;;  %v9674_v55 = vunpack.c.l.bf16 %v9726_v21  ;;  %v9675_v5 = vunpack.c.h.bf16 %v9726_v21 }
 0x182   : > { %v1258_v47 = vadd.f32 %v10244_v58, %v12225_v6  ;;  %v12348_v4 = vadd.f32 %v1506_v35, %v1247_v46  ;;  %3777 = vst.msk [vmem:[#allocation4 + $0x39] sm:$0xff] %vm3773_vm3, %v3743_v0  ;;  %v9670_v6 = vunpack.c.l.bf16 %v9725_v49  ;;  %3778 = vst.msk [vmem:[#allocation4 + $0x49] sm:$0xff] %vm3773_vm3, %v3744_v34  ;;  %v10282_v54 = vpop.f32.mrf.mxu0 }
 0x183   : > { %v1249_v14 = vpop.f32.mrf.mxu1  ;;  %3779 = vst.msk [vmem:[#allocation4 + $0x51] sm:$0xff] %vm3773_vm3, %v3745_v61  ;;  %v3676_v46 = vmul.f32 %v9671_v23, %v12292_v2  ;;  %v3677_v12 = vmul.f32 %v9674_v55, %v12292_v2 }
 0x184   : > { %v1250_v42 = vadd.f32 %v1249_v14, %v12231_v31  ;;  %v12357_v35 = vadd.f32 %v10278_v19, %v1258_v47  ;;  %v3675_v15 = vmul.f32 %v9670_v6, %v12292_v2  ;;  %v2820_v31 = vld [vmem:[#allocation2 + $0x109] sm:$0xff]  ;;  %v2821_v19 = vld [vmem:[#allocation2 + $0x111] sm:$0xff]  ;;  %v1525_v0 = vpop.f32.mrf.mxu0  ;;  %v2822_v47 = vld [vmem:[#allocation2 + $0x121] sm:$0xff] }
 0x185   : > { %v10247_v57 = vpop.f32.mrf.mxu1  ;;  %10450 = vmatmul.mubr.msk.bf16.gmra.mxu1 %vm354_vm1, %v2841_v30  ;;  %v3806_v30 = vld [vmem:[%s14562_s6] sm:$0xf]  ;;  %v3715_v34 = vadd.f32 %v12303_v10, %v3676_v46  ;;  %v3716_v61 = vadd.f32 %v12303_v10, %v3677_v12  ;;  %10488 = vmatmul.mubr.msk.bf16.gmra.mxu0 %vm354_vm1, %v12009_v59  ;;  %v2843_v21 = vpack.c.bf16 %v2821_v19, %v2820_v31  ;;  %v9728_v12 = vld [vmem:[%s12272_s17 + $0x30] sm:$0xff]  }
 0x186   : > { %v1271_v7 = vadd.f32 %v10247_v57, %v12235_v43  ;;  %10453 = vmatprep.mubr.msk.bf16.mxu1 %vm354_vm1, %v2842_v33  ;;  %v12366_v58 = vadd.f32 %v1509_v1, %v1250_v42  ;;  %11128 = vmatprep.subr.msk.bf16.mxu0 %vm964_vm0, %v3806_v30  ;;  %v4181_v43 = vsel %vm964_vm0, %v3806_v30, 0  ;;  %v3714_v33 = vadd.f32 %v12303_v10, %v3675_v15  ;;  %v10285_v23 = vpop.f32.mrf.mxu0 }
 0x187   : > { %v1262_v62 = vpop.f32.mrf.mxu1  ;;  %v3678_v1 = vmul.f32 %v9675_v5, %v12292_v2  ;;  %10538 = vmatpush3.bf16.msra.mxu0 %v4181_v43  ;;  %v3747_v55 = vmax.f32 %v3715_v34, 0.0  ;;  %10491 = vmatprep.mubr.msk.bf16.mxu0 %vm354_vm1, %v12013_v63  ;;  %v3748_v46 = vmax.f32 %v3716_v61, 0.0  ;;  %v9727_v5 = vld [vmem:[%s12272_s17 + $0x28] sm:$0xff]   ;;  %v9682_v63 = vunpack.c.l.bf16 %v9728_v12  ;;  %v2824_v43 = vld [vmem:[#allocation2 + $0x139] sm:$0xff] }
 0x188   : > { %v1263_v49 = vadd.f32 %v1262_v62, %v12244_v25  ;;  %v12378_v14 = vadd.f32 %v10281_v36, %v1271_v7  ;;  %v3746_v42 = vmax.f32 %v3714_v33, 0.0  ;;  %v2844_v25 = vpack.c.bf16 %v2823_v8, %v2822_v47  ;;  %v1538_v30 = vpop.f32.mrf.mxu0 }
 0x189   : > { %v10248_v6 = vpop.f32.mrf.mxu1  ;;  %v3717_v57 = vadd.f32 %v12303_v10, %v3678_v1  ;;  %3781 = vst.msk [vmem:[#allocation4 + $0x69] sm:$0xff] %vm3773_vm3, %v3747_v55  ;;  %v9678_v31 = vunpack.c.l.bf16 %v9727_v5  ;;  %v9679_v19 = vunpack.c.h.bf16 %v9727_v5  ;;  %3782 = vst.msk [vmem:[#allocation4 + $0x79] sm:$0xff] %vm3773_vm3, %v3748_v46 }
 0x18a   : > { %v1274_v15 = vadd.f32 %v10248_v6, %v12250_v9  ;;  %v12387_v36 = vadd.f32 %v1522_v18, %v1263_v49  ;;  %3780 = vst.msk [vmem:[#allocation4 + $0x61] sm:$0xff] %vm3773_vm3, %v3746_v42  ;;  %v9683_v18 = vunpack.c.h.bf16 %v9728_v12  ;;  %v10286_v8 = vpop.f32.mrf.mxu0  ;;  %v2827_v49 = vld [vmem:[#allocation2 + $0x159] sm:$0xff]  ;;  %v3681_v6 = vmul.f32 %v9682_v63, %v12292_v2 }
 0x18b   : > { %v1265_v7 = vpop.f32.mrf.mxu1  ;;  %v3749_v59 = vmax.f32 %v3717_v57, 0.0  ;;  %v3679_v33 = vmul.f32 %v9678_v31, %v12292_v2  ;;  %v3680_v34 = vmul.f32 %v9679_v19, %v12292_v2 }
 0x18c   : > { %v1266_v9 = vadd.f32 %v1265_v7, %v12255_v44  ;;  %v12394_v62 = vadd.f32 %v10282_v54, %v1274_v15  ;;  %v2825_v44 = vld [vmem:[#allocation2 + $0x141] sm:$0xff]  ;;  %v2826_v54 = vld [vmem:[#allocation2 + $0x151] sm:$0xff]  ;;  %v12407_v55 = vpop.f32.mrf.mxu0  ;;  %v3720_v46 = vadd.f32 %v12303_v10, %v3681_v6 }
 0x18d   : > { %v10251_v47 = vpop.f32.mrf.mxu1  ;;  %10454 = vmatmul.mubr.msk.bf16.gmra.mxu1 %vm354_vm1, %v2843_v21  ;;  %3783 = vst.msk [vmem:[#allocation4 + $0x81] sm:$0xff] %vm3773_vm3, %v3749_v59  ;;  %v3682_v21 = vmul.f32 %v9683_v18, %v12292_v2  ;;  %v3718_v57 = vadd.f32 %v12303_v10, %v3679_v33  ;;  %v3719_v15 = vadd.f32 %v12303_v10, %v3680_v34  ;;  %v9729_v18 = vld [vmem:[%s12272_s17 + $0x38] sm:$0xff]   ;;  %v9730_v34 = vld [vmem:[%s12272_s17 + $0x40] sm:$0xff]  }
 0x18e   : > { %v1287_v1 = vadd.f32 %v10251_v47, %v12174_v17  ;;  %10457 = vmatprep.mubr.msk.bf16.mxu1 %vm354_vm1, %v2844_v25  ;;  %v12403_v61 = vadd.f32 %v1525_v0, %v1266_v9  ;;  %v10289_v7 = vpop.f32.mrf.mxu0  ;;  %10492 = vmatmul.mubr.msk.bf16.gmra.mxu0 %vm354_vm1, %v12025_v32  ;;  %v2845_v59 = vpack.c.bf16 %v2825_v44, %v2824_v43  ;;  %v9686_v32 = vunpack.c.l.bf16 %v9729_v18 }
 0x18f   : > { %v1278_v42 = vpop.f32.mrf.mxu1  ;;  %v3721_v0 = vadd.f32 %v12303_v10, %v3682_v21  ;;  %v2846_v31 = vpack.c.bf16 %v2827_v49, %v2826_v54  ;;  %v3750_v19 = vmax.f32 %v3718_v57, 0.0  ;;  %v3751_v12 = vmax.f32 %v3719_v15, 0.0  ;;  %10495 = vmatprep.mubr.msk.bf16.mxu0 %vm354_vm1, %v12029_v39 }
 0x190   : > { %v1279_v17 = vadd.f32 %v1278_v42, %v12182_v24  ;;  %v12412_v25 = vadd.f32 %v10285_v23, %v1287_v1  ;;  %v3752_v23 = vmax.f32 %v3720_v46, 0.0  ;;  %v1554_v33 = vpop.f32.mrf.mxu0  ;;  %v9687_v43 = vunpack.c.h.bf16 %v9729_v18 }
 0x191   : > { %v10252_v5 = vpop.f32.mrf.mxu1  ;;  %v3753_v63 = vmax.f32 %v3721_v0, 0.0  ;;  %3784 = vst.msk [vmem:[#allocation4 + $0x91] sm:$0xff] %vm3773_vm3, %v3750_v19  ;;  %3785 = vst.msk [vmem:[#allocation4 + $0x99] sm:$0xff] %vm3773_vm3, %v3751_v12  ;;  %v9690_v39 = vunpack.c.l.bf16 %v9730_v34  ;;  %v3683_v49 = vmul.f32 %v9686_v32, %v12292_v2 }
 0x192   : > { %v1290_v9 = vadd.f32 %v10252_v5, %v12186_v40  ;;  %v12421_v24 = vadd.f32 %v1538_v30, %v1279_v17  ;;  %3786 = vst.msk [vmem:[#allocation4 + $0xa9] sm:$0xff] %vm3773_vm3, %v3752_v23  ;;  %v9691_v30 = vunpack.c.h.bf16 %v9730_v34  ;;  %v10290_v54 = vpop.f32.mrf.mxu0  ;;  %v3684_v6 = vmul.f32 %v9687_v43, %v12292_v2  ;;  %v9731_v34 = vld [vmem:[%s12272_s17 + $0x48] sm:$0xff]  }
 0x193   : > { %v1281_v47 = vpop.f32.mrf.mxu1  ;;  %3787 = vst.msk [vmem:[#allocation4 + $0xb1] sm:$0xff] %vm3773_vm3, %v3753_v63  ;;  %v3685_v42 = vmul.f32 %v9690_v39, %v12292_v2  ;;  %v3722_v46 = vadd.f32 %v12303_v10, %v3683_v49  ;;  %v9732_v49 = vld [vmem:[%s12272_s17 + $0x50] sm:$0xff]  }
 0x194   : > { %v12428_v1 = vadd.f32 %v1281_v47, %v12194_v50  ;;  %v12430_v40 = vadd.f32 %v10286_v8, %v1290_v9  ;;  %v2828_v50 = vld [vmem:[#allocation2 + $0x169] sm:$0xff]  ;;  %v2829_v8 = vld [vmem:[#allocation2 + $0x171] sm:$0xff]  ;;  %v3686_v57 = vmul.f32 %v9691_v30, %v12292_v2  ;;  %v12441_v17 = vpop.f32.mrf.mxu0  ;;  %v3723_v0 = vadd.f32 %v12303_v10, %v3684_v6 }
 0x195   : > { %v10255_v44 = vpop.f32.mrf.mxu1  ;;  %10458 = vmatmul.mubr.msk.bf16.gmra.mxu1 %vm354_vm1, %v2845_v59  ;;  %v2847_v9 = vpack.c.bf16 %v2829_v8, %v2828_v50  ;;  %v3754_v23 = vmax.f32 %v3722_v46, 0.0 }
 0x196   : > { %v1303_v21 = vadd.f32 %v10255_v44, %v12198_v11  ;;  %10461 = vmatprep.mubr.msk.bf16.mxu1 %vm354_vm1, %v2846_v31  ;;  %v3724_v11 = vadd.f32 %v12303_v10, %v3685_v42  ;;  %v3725_v31 = vadd.f32 %v12303_v10, %v3686_v57  ;;  %v10293_v12 = vpop.f32.mrf.mxu0  ;;  %10496 = vmatmul.mubr.msk.bf16.gmra.mxu0 %vm354_vm1, %v12041_v29  ;;  %v3755_v63 = vmax.f32 %v3723_v0, 0.0 }
 0x197   : > { %v1294_v15 = vpop.f32.mrf.mxu1  ;;  %10499 = vmatprep.mubr.msk.bf16.mxu0 %vm354_vm1, %v12238_v45  ;;  %3788 = vst.msk [vmem:[#allocation4 + $0xc1] sm:$0xff] %vm3773_vm3, %v3754_v23  ;;  %v9694_v29 = vunpack.c.l.bf16 %v9731_v34  ;;  %v9695_v44 = vunpack.c.h.bf16 %v9731_v34  ;;  %v9699_v57 = vunpack.c.h.bf16 %v9732_v49 }
 0x198   : > { %v1295_v5 = vadd.f32 %v1294_v15, %v12206_v13  ;;  %v12446_v59 = vadd.f32 %v10289_v7, %v1303_v21  ;;  %v3124_v13 = vld [vmem:[#allocation2 + $0x19a] sm:$0xff]  ;;  %v3125_v7 = vld [vmem:[#allocation2 + $0x1a2] sm:$0xff]  ;;  %v3756_v32 = vmax.f32 %v3724_v11, 0.0  ;;  %v3757_v43 = vmax.f32 %v3725_v31, 0.0  ;;  %v1570_v30 = vpop.f32.mrf.mxu0  ;;  %3789 = vst.msk [vmem:[#allocation4 + $0xc9] sm:$0xff] %vm3773_vm3, %v3755_v63 }
 0x199   : > { %v10256_v19 = vpop.f32.mrf.mxu1  ;;  %v3141_v50 = vpack.c.bf16 %v3125_v7, %v3124_v13  ;;  %v3687_v8 = vmul.f32 %v9694_v29, %v12292_v2  ;;  %v3688_v42 = vmul.f32 %v9695_v44, %v12292_v2  ;;  %v2833_v15 = vld [vmem:[#allocation2 + $0x1a1] sm:$0xff]  ;;  %v3690_v23 = vmul.f32 %v9699_v57, %v12292_v2 }
 0x19a   : > { %v1306_v18 = vadd.f32 %v10256_v19, %v12210_v22  ;;  %v12455_v47 = vadd.f32 %v1554_v33, %v1295_v5  ;;  %3790 = vst.msk [vmem:[#allocation4 + $0xd9] sm:$0xff] %vm3773_vm3, %v3756_v32  ;;  %3791 = vst.msk [vmem:[#allocation4 + $0xe1] sm:$0xff] %vm3773_vm3, %v3757_v43  ;;  %v9698_v33 = vunpack.c.l.bf16 %v9732_v49  ;;  %v10294_v21 = vpop.f32.mrf.mxu0  ;;  %v3872_v11 = vld [vmem:[#allocation4] sm:$0xff]  ;;  %v3873_v31 = vld [vmem:[#allocation4 + $0x8] sm:$0xff] }
 0x19b   : > { %v1297_v39 = vpop.f32.mrf.mxu1  ;;  %v3726_v19 = vadd.f32 %v12303_v10, %v3687_v8  ;;  %v3729_v34 = vadd.f32 %v12303_v10, %v3690_v23  ;;  %v3904_v44 = vpack.c.bf16 %v3873_v31, %v3872_v11  ;;  %v3876_v23 = vld [vmem:[#allocation4 + $0x30] sm:$0xff] }
 0x19c   : > { %v12462_v22 = vadd.f32 %v1297_v39, %v12217_v16  ;;  %v12464_v45 = vadd.f32 %v10290_v54, %v1306_v18  ;;  %v2832_v54 = vld [vmem:[#allocation2 + $0x199] sm:$0xff]  ;;  %v3689_v46 = vmul.f32 %v9698_v33, %v12292_v2  ;;  %v12475_v5 = vpop.f32.mrf.mxu0 }
 0x19d   : > { %v10259_v6 = vpop.f32.mrf.mxu1  ;;  %10462 = vmatmul.mubr.msk.bf16.gmra.mxu1 %vm354_vm1, %v2847_v9  ;;  %v3727_v9 = vadd.f32 %v12303_v10, %v3688_v42  ;;  %v2849_v7 = vpack.c.bf16 %v2833_v15, %v2832_v54  ;;  %v3758_v32 = vmax.f32 %v3726_v19, 0.0  ;;  %v9734_v42 = vld [vmem:[%s12272_s17 + $0x60] sm:$0xff]  }
 0x19e   : > { %v1319_v16 = vadd.f32 %v10259_v6, %v12221_v3  ;;  %10465 = vmatprep.mubr.msk.bf16.mxu1 %vm354_vm1, %v12121_v48  ;;  %v3728_v48 = vadd.f32 %v12303_v10, %v3689_v46  ;;  %v10297_v13 = vpop.f32.mrf.mxu0  ;;  %10500 = vmatmul.mubr.msk.bf16.gmra.mxu0 %vm354_vm1, %v3141_v50  ;;  %v3761_v6 = vmax.f32 %v3729_v34, 0.0 }
 0x19f   : > { %v1310_v0 = vpop.f32.mrf.mxu1  ;;  %v3759_v43 = vmax.f32 %v3727_v9, 0.0  ;;  %3792 = vst.msk [vmem:[#allocation4 + $0xf1] sm:$0xff] %vm3773_vm3, %v3758_v32 }
 0x1a0   : > { %v1311_v3 = vadd.f32 %v1310_v0, %v12229_v27  ;;  %v12481_v63 = vadd.f32 %v10293_v12, %v1319_v16  ;;  %v3760_v27 = vmax.f32 %v3728_v48, 0.0  ;;  %v9733_v12 = vld [vmem:[%s12272_s17 + $0x58] sm:$0xff]   ;;  %v1586_v33 = vpop.f32.mrf.mxu0  ;;  %3795 = vst.msk [vmem:[#allocation4 + $0x111] sm:$0xff] %vm3773_vm3, %v3761_v6  ;;  %v9707_v0 = vunpack.c.h.bf16 %v9734_v42 }
 0x1a1   : > { %v10260_v18 = vpop.f32.mrf.mxu1  ;;  %3793 = vst.msk [vmem:[#allocation4 + $0xf9] sm:$0xff] %vm3773_vm3, %v3759_v43  ;;  %v9702_v50 = vunpack.c.l.bf16 %v9733_v12  ;;  %v9703_v8 = vunpack.c.h.bf16 %v9733_v12 }
 0x1a2   : > { %v1322_v39 = vadd.f32 %v10260_v18, %v12233_v41  ;;  %v12487_v29 = vadd.f32 %v1570_v30, %v1311_v3  ;;  %3794 = vst.msk [vmem:[#allocation4 + $0x109] sm:$0xff] %vm3773_vm3, %v3760_v27  ;;  %v9706_v41 = vunpack.c.l.bf16 %v9734_v42  ;;  %v10298_v54 = vpop.f32.mrf.mxu0  ;;  %v3877_v3 = vld [vmem:[#allocation4 + $0x38] sm:$0xff] }
 0x1a3   : > { %v1313_v49 = vpop.f32.mrf.mxu1  ;;  %v3691_v15 = vmul.f32 %v9702_v50, %v12292_v2  ;;  %v3692_v46 = vmul.f32 %v9703_v8, %v12292_v2  ;;  %v3906_v8 = vpack.c.bf16 %v3877_v3, %v3876_v23  ;;  %v3878_v23 = vld [vmem:[#allocation4 + $0x48] sm:$0xff] }
 0x1a4   : > { %v12494_v57 = vadd.f32 %v1313_v49, %v12242_v52  ;;  %v12496_v16 = vadd.f32 %v10294_v21, %v1322_v39  ;;  %v3874_v52 = vld [vmem:[#allocation4 + $0x18] sm:$0xff]  ;;  %v3875_v21 = vld [vmem:[#allocation4 + $0x20] sm:$0xff]  ;;  %v3693_v31 = vmul.f32 %v9706_v41, %v12292_v2  ;;  %v12506_v9 = vpop.f32.mrf.mxu0  ;;  %v9735_v41 = vld [vmem:[%s12272_s17 + $0x68] sm:$0xff]  }
 0x1a5   : > { %v10263_v30 = vpop.f32.mrf.mxu1  ;;  %10466 = vmatmul.mubr.msk.bf16.gmra.mxu1 %vm354_vm1, %v2849_v7  ;;  %14572 = vst [vmem:[#allocation9_spill] sm:$0xff] %v12506_v9  ;;  %v3730_v48 = vadd.f32 %v12303_v10, %v3691_v15  ;;  %v3731_v18 = vadd.f32 %v12303_v10, %v3692_v46  ;;  %v3694_v7 = vmul.f32 %v9707_v0, %v12292_v2  ;;  %v9710_v15 = vunpack.c.l.bf16 %v9735_v41  ;;  %v9736_v0 = vld [vmem:[%s12272_s17 + $0x70] sm:$0xff]  }
 0x1a6   : > { %v1335_v11 = vadd.f32 %v10263_v30, %v12246_v56  ;;  %10505 = vmatprep.mubr.msk.bf16.mxu1 %vm354_vm1, %v3904_v44  ;;  %v3732_v43 = vadd.f32 %v12303_v10, %v3693_v31  ;;  %v10337_v39 = vpop.f32.mrf.mxu0  ;;  %v3905_v44 = vpack.c.bf16 %v3875_v21, %v3874_v52  ;;  %v9711_v46 = vunpack.c.h.bf16 %v9735_v41 }
 0x1a7   : > { %v1326_v19 = vpop.f32.mrf.mxu1  ;;  %v3762_v27 = vmax.f32 %v3730_v48, 0.0  ;;  %v3763_v12 = vmax.f32 %v3731_v18, 0.0  ;;  %v3733_v49 = vadd.f32 %v12303_v10, %v3694_v7  ;;  %v3695_v3 = vmul.f32 %v9710_v15, %v12292_v2  ;;  %v14575_v18 = vld [vmem:[#allocation6_spill] sm:$0xff] }
 0x1a8   : > { %v1327_v56 = vadd.f32 %v1326_v19, %v12253_v60  ;;  %v12512_v32 = vadd.f32 %v10297_v13, %v1335_v11  ;;  %v3764_v42 = vmax.f32 %v3732_v43, 0.0  ;;  %v2058_v13 = vpop.f32.mrf.mxu0  ;;  %v14573_v11 = vld [vmem:[#allocation5_spill] sm:$0xff]  ;;  %v3696_v48 = vmul.f32 %v9711_v46, %v12292_v2  ;;  %v3881_v43 = vld [vmem:[#allocation4 + $0x68] sm:$0xff] }
 0x1a9   : > { %v10264_v34 = vpop.f32.mrf.mxu1  ;;  %3796 = vst.msk [vmem:[#allocation4 + $0x121] sm:$0xff] %vm3773_vm3, %v3762_v27  ;;  %3797 = vst.msk [vmem:[#allocation4 + $0x129] sm:$0xff] %vm3773_vm3, %v3763_v12  ;;  %v3765_v30 = vmax.f32 %v3733_v49, 0.0  ;;  %v3734_v49 = vadd.f32 %v12303_v10, %v3695_v3 }
 0x1aa   : > { %v1338_v6 = vadd.f32 %v10264_v34, %v12257_v28  ;;  %v12517_v50 = vadd.f32 %v1586_v33, %v1327_v56  ;;  %3798 = vst.msk [vmem:[#allocation4 + $0x139] sm:$0xff] %vm3773_vm3, %v3764_v42  ;;  %v9714_v28 = vunpack.c.l.bf16 %v9736_v0  ;;  %v9715_v33 = vunpack.c.h.bf16 %v9736_v0  ;;  %v10338_v19 = vpop.f32.mrf.mxu0  ;;  %v3880_v56 = vld [vmem:[#allocation4 + $0x60] sm:$0xff] }
 0x1ab   : > { %v1329_v60 = vpop.f32.mrf.mxu1  ;;  %3799 = vst.msk [vmem:[#allocation4 + $0x141] sm:$0xff] %vm3773_vm3, %v3765_v30  ;;  %v3908_v0 = vpack.c.bf16 %v3881_v43, %v3880_v56  ;;  %v3883_v56 = vld [vmem:[#allocation4 + $0x80] sm:$0xff] }
 0x1ac   : > { %v12524_v52 = vadd.f32 %v1329_v60, %v14573_v11  ;;  %v12526_v21 = vadd.f32 %v10298_v54, %v1338_v6  ;;  %v3879_v54 = vld [vmem:[#allocation4 + $0x50] sm:$0xff]  ;;  %v3697_v34 = vmul.f32 %v9714_v28, %v12292_v2  ;;  %v3698_v27 = vmul.f32 %v9715_v33, %v12292_v2 }
 0x1ad   : > { %v10303_v31 = vpop.f32.mrf.mxu1  ;;  %10506 = vmatmul.mubr.msk.bf16.vlgmr.msra.gmra.mxu1 %vm354_vm1, %v3905_v44  ;;  %v12537_v44 = vpop.f32.mrf.mxu0  ;;  %v3735_v6 = vadd.f32 %v12303_v10, %v3696_v48  ;;  %v3907_v46 = vpack.c.bf16 %v3879_v54, %v3878_v23  ;;  %v3766_v2 = vmax.f32 %v3734_v49, 0.0  ;;  %v14577_v23 = vld [vmem:[#allocation8_spill] sm:$0xff]  ;;  %v3882_v54 = vld [vmem:[#allocation4 + $0x78] sm:$0xff] }
 0x1ae   : > { %14574 = vst [vmem:[#allocation5_spill] sm:$0xff] %v12524_v52  ;;  %v1895_v7 = vadd.f32 %v10303_v31, %v14575_v18  ;;  %10509 = vmatprep.mubr.msk.bf16.mxu1 %vm354_vm1, %v3906_v8  ;;  %v3736_v8 = vadd.f32 %v12303_v10, %v3697_v34  ;;  %v3737_v60 = vadd.f32 %v12303_v10, %v3698_v27  ;;  %v3884_v27 = vld [vmem:[#allocation4 + $0x90] sm:$0xff] }
 0x1af   : > { %v1766_v12 = vpop.f32.mrf.mxu1  ;;  %v10341_v15 = vpop.f32.mrf.mxu0  ;;  %v3767_v11 = vmax.f32 %v3735_v6, 0.0  ;;  %3800 = vst.msk [vmem:[#allocation4 + $0x151] sm:$0xff] %vm3773_vm3, %v3766_v2 }
 0x1b0   : > { %v1893_v42 = vadd.f32 %v1766_v12, %v12282_v51  ;;  %v12542_v41 = vadd.f32 %v10337_v39, %v1895_v7  ;;  %v3768_v31 = vmax.f32 %v3736_v8, 0.0  ;;  %v3769_v3 = vmax.f32 %v3737_v60, 0.0  ;;  %v14576_v39 = vld [vmem:[#allocation7_spill] sm:$0xff] }
 0x1b1   : > { %v10304_v30 = vpop.f32.mrf.mxu1  ;;  %v2074_v51 = vpop.f32.mrf.mxu0  ;;  %3801 = vst.msk [vmem:[#allocation4 + $0x159] sm:$0xff] %vm3773_vm3, %v3767_v11  ;;  %v3909_v8 = vpack.c.bf16 %v3883_v56, %v3882_v54 }
 0x1b2   : > { %v1896_v28 = vadd.f32 %v10304_v30, %v12286_v37  ;;  %v12547_v33 = vadd.f32 %v2058_v13, %v1893_v42  ;;  %3802 = vst.msk [vmem:[#allocation4 + $0x169] sm:$0xff] %vm3773_vm3, %v3768_v31  ;;  %3803 = vst.msk [vmem:[#allocation4 + $0x171] sm:$0xff] %vm3773_vm3, %v3769_v3 }
 0x1b3   : > { %v1769_v48 = vpop.f32.mrf.mxu1  ;;  %v10342_v13 = vpop.f32.mrf.mxu0 }
 0x1b4   : > { %v12552_v10 = vadd.f32 %v1769_v48, %v14576_v39  ;;  %v12554_v18 = vadd.f32 %v10338_v19, %v1896_v28  ;;  %v3885_v19 = vld [vmem:[#allocation4 + $0x98] sm:$0xff]  ;;  %v3888_v39 = vld [vmem:[#allocation4 + $0xc0] sm:$0xff] }
 0x1b5   : > { %v10307_v37 = vpop.f32.mrf.mxu1  ;;  %10510 = vmatmul.mubr.msk.bf16.gmra.mxu1 %vm354_vm1, %v3907_v46  ;;  %v12561_v34 = vpop.f32.mrf.mxu0  ;;  %v3910_v46 = vpack.c.bf16 %v3885_v19, %v3884_v27 }
 0x1b6   : > { %v1899_v7 = vadd.f32 %v10307_v37, %v14577_v23  ;;  %10513 = vmatprep.mubr.msk.bf16.mxu1 %vm354_vm1, %v3908_v0  ;;  %v3889_v37 = vld [vmem:[#allocation4 + $0xc8] sm:$0xff] }
 0x1b7   : > { %v1782_v43 = vpop.f32.mrf.mxu1  ;;  %v10345_v42 = vpop.f32.mrf.mxu0  ;;  %v3912_v27 = vpack.c.bf16 %v3889_v37, %v3888_v39 }
 0x1b8   : > { %v1897_v12 = vadd.f32 %v1782_v43, %v12315_v53  ;;  %v12564_v49 = vadd.f32 %v10341_v15, %v1899_v7  ;;  %v3886_v15 = vld [vmem:[#allocation4 + $0xa8] sm:$0xff] }
 0x1b9   : > { %v10308_v6 = vpop.f32.mrf.mxu1  ;;  %v2090_v2 = vpop.f32.mrf.mxu0 }
 0x1ba   : > { %v1900_v60 = vadd.f32 %v10308_v6, %v12320_v20  ;;  %v12567_v30 = vadd.f32 %v2074_v51, %v1897_v12  ;;  %v3887_v20 = vld [vmem:[#allocation4 + $0xb0] sm:$0xff] }
 0x1bb   : > { %v1785_v0 = vpop.f32.mrf.mxu1  ;;  %v10346_v3 = vpop.f32.mrf.mxu0  ;;  %v3911_v54 = vpack.c.bf16 %v3887_v20, %v3886_v15  ;;  %v3824_v12 = vld [vmem:[#allocation3] sm:$0xff] }
 0x1bc   : > { %v12570_v11 = vadd.f32 %v1785_v0, %v12329_v26  ;;  %v12572_v28 = vadd.f32 %v10342_v13, %v1900_v60 }
 0x1bd   : > { %v10311_v31 = vpop.f32.mrf.mxu1  ;;  %10514 = vmatmul.mubr.msk.bf16.gmra.mxu1 %vm354_vm1, %v3909_v8  ;;  %v12577_v51 = vpop.f32.mrf.mxu0 }
 0x1be   : > { %v1903_v53 = vadd.f32 %v10311_v31, %v12336_v38  ;;  %10517 = vmatprep.mubr.msk.bf16.mxu1 %vm354_vm1, %v3910_v46  ;;  %v3807_v38 = vld [vmem:[%s14562_s6 + $0x4] sm:$0xf]  ;;  %v3890_v31 = vld [vmem:[#allocation4 + $0xd8] sm:$0xff] }
 0x1bf   : > { %v1798_v48 = vpop.f32.mrf.mxu1  ;;  %v10349_v7 = vpop.f32.mrf.mxu0  ;;  %11129 = vmatprep.subr.msk.bf16.mxu1 %vm964_vm0, %v3807_v38  ;;  %v4489_v19 = vsel %vm964_vm0, %v3807_v38, 0 }
 0x1c0   : > { %v1901_v26 = vadd.f32 %v1798_v48, %v12348_v4  ;;  %v12580_v23 = vadd.f32 %v10345_v42, %v1903_v53  ;;  %v3825_v4 = vld [vmem:[#allocation3 + $0x8] sm:$0xff]  ;;  %10572 = vmatpush3.bf16.msra.mxu1 %v4489_v19  ;;  %v3891_v53 = vld [vmem:[#allocation4 + $0xe0] sm:$0xff]  ;;  %v3892_v48 = vld [vmem:[#allocation4 + $0xf0] sm:$0xff] }
 0x1c1   : > { %v10312_v13 = vpop.f32.mrf.mxu1  ;;  %v2106_v42 = vpop.f32.mrf.mxu0  ;;  %v3856_v8 = vpack.c.bf16 %v3825_v4, %v3824_v12 }
 0x1c2   : > { %v1904_v56 = vadd.f32 %v10312_v13, %v12357_v35  ;;  %v12586_v43 = vadd.f32 %v2090_v2, %v1901_v26  ;;  %v3913_v13 = vpack.c.bf16 %v3891_v53, %v3890_v31 }
 0x1c3   : > { %v1801_v6 = vpop.f32.mrf.mxu1  ;;  %v10350_v35 = vpop.f32.mrf.mxu0  ;;  %10539 = vmatprep.mubr.msk.bf16.mxu0 %vm354_vm1, %v3856_v8 }
 0x1c4   : > { %v12591_v60 = vadd.f32 %v1801_v6, %v12366_v58  ;;  %v12593_v46 = vadd.f32 %v10346_v3, %v1904_v56  ;;  %v3893_v58 = vld [vmem:[#allocation4 + $0xf8] sm:$0xff] }
 0x1c5   : > { %v10315_v0 = vpop.f32.mrf.mxu1  ;;  %10518 = vmatmul.mubr.msk.bf16.gmra.mxu1 %vm354_vm1, %v3911_v54  ;;  %v12599_v20 = vpop.f32.mrf.mxu0 }
 0x1c6   : > { %v1907_v2 = vadd.f32 %v10315_v0, %v12378_v14  ;;  %10521 = vmatprep.mubr.msk.bf16.mxu1 %vm354_vm1, %v3912_v27  ;;  %v3914_v14 = vpack.c.bf16 %v3893_v58, %v3892_v48  ;;  %v3896_v0 = vld [vmem:[#allocation4 + $0x120] sm:$0xff] }
 0x1c7   : > { %v1814_v15 = vpop.f32.mrf.mxu1  ;;  %v10353_v26 = vpop.f32.mrf.mxu0 }
 0x1c8   : > { %v1905_v3 = vadd.f32 %v1814_v15, %v12387_v36  ;;  %v12602_v39 = vadd.f32 %v10349_v7, %v1907_v2  ;;  %v3894_v7 = vld [vmem:[#allocation4 + $0x108] sm:$0xff] }
 0x1c9   : > { %v10316_v37 = vpop.f32.mrf.mxu1  ;;  %v2122_v27 = vpop.f32.mrf.mxu0 }
 0x1ca   : > { %v1908_v54 = vadd.f32 %v10316_v37, %v12394_v62  ;;  %v12605_v38 = vadd.f32 %v2106_v42, %v1905_v3  ;;  %v3895_v62 = vld [vmem:[#allocation4 + $0x110] sm:$0xff]  ;;  %v12618_v42 = vld [vmem:[%s14563_s7 + $0x4] sm:$0xf] }
 0x1cb   : > { %v1817_v56 = vpop.f32.mrf.mxu1  ;;  %v10354_v6 = vpop.f32.mrf.mxu0  ;;  %14578 = vst [vmem:[#allocation6_spill] sm:$0xff] %v12618_v42  ;;  %11130 = vmatprep.subr.msk.bf16.mxu0 %vm964_vm0, %v12618_v42  ;;  %v3915_v15 = vpack.c.bf16 %v3895_v62, %v3894_v7  ;;  %v3901_v7 = vld [vmem:[#allocation4 + $0x158] sm:$0xff] }
 0x1cc   : > { %v12608_v19 = vadd.f32 %v1817_v56, %v12403_v61  ;;  %v12610_v12 = vadd.f32 %v10350_v35, %v1908_v54  ;;  %v3897_v35 = vld [vmem:[#allocation4 + $0x128] sm:$0xff] }
 0x1cd   : > { %v10319_v4 = vpop.f32.mrf.mxu1  ;;  %10522 = vmatmul.mubr.msk.bf16.gmra.mxu1 %vm354_vm1, %v3913_v13  ;;  %v12620_v61 = vpop.f32.mrf.mxu0  ;;  %v3916_v3 = vpack.c.bf16 %v3897_v35, %v3896_v0 }
 0x1ce   : > { %v1911_v36 = vadd.f32 %v10319_v4, %v12412_v25  ;;  %10525 = vmatprep.mubr.msk.bf16.mxu1 %vm354_vm1, %v3914_v14  ;;  %14579 = vst [vmem:[#allocation7_spill] sm:$0xff] %v12620_v61  ;;  %v3899_v4 = vld [vmem:[#allocation4 + $0x140] sm:$0xff] }
 0x1cf   : > { %v1830_v8 = vpop.f32.mrf.mxu1  ;;  %v10357_v53 = vpop.f32.mrf.mxu0 }
 0x1d0   : > { %v1909_v2 = vadd.f32 %v1830_v8, %v12421_v24  ;;  %v12625_v25 = vadd.f32 %v10353_v26, %v1911_v36  ;;  %v3898_v26 = vld [vmem:[#allocation4 + $0x138] sm:$0xff] }
 0x1d1   : > { %v10320_v31 = vpop.f32.mrf.mxu1  ;;  %v2138_v13 = vpop.f32.mrf.mxu0  ;;  %v3917_v35 = vpack.c.bf16 %v3899_v4, %v3898_v26  ;;  %v4345_v4 = vld [vmem:[#allocation3 + $0x9] sm:$0xff] }
 0x1d2   : > { %14580 = vst [vmem:[#allocation8_spill] sm:$0xff] %v12625_v25  ;;  %v1912_v48 = vadd.f32 %v10320_v31, %v12430_v40  ;;  %v12628_v58 = vadd.f32 %v2122_v27, %v1909_v2  ;;  %v3900_v27 = vld [vmem:[#allocation4 + $0x150] sm:$0xff] }
 0x1d3   : > { %v12630_v37 = vpop.f32.mrf.mxu1  ;;  %v10358_v56 = vpop.f32.mrf.mxu0 }
 0x1d4   : > { %14581 = vst [vmem:[#allocation10_spill] sm:$0xff] %v12628_v58  ;;  %v12632_v54 = vadd.f32 %v10354_v6, %v1912_v48 }
 0x1d5   : > { %v10323_v14 = vpop.f32.mrf.mxu1  ;;  %10526 = vmatmul.mubr.msk.bf16.gmra.mxu1 %vm354_vm1, %v3915_v15  ;;  %v12637_v40 = vpop.f32.mrf.mxu0 }
 0x1d6   : > { %14582 = vst [vmem:[#allocation11_spill] sm:$0xff] %v12632_v54  ;;  %v1915_v24 = vadd.f32 %v10323_v14, %v12446_v59  ;;  %10529 = vmatprep.mubr.msk.bf16.mxu1 %vm354_vm1, %v3916_v3  ;;  %14583 = vst [vmem:[#allocation12_spill] sm:$0xff] %v12637_v40  ;;  %v3918_v59 = vpack.c.bf16 %v3901_v7, %v3900_v27 }
 0x1d7   : > { %v1846_v36 = vpop.f32.mrf.mxu1  ;;  %v10361_v0 = vpop.f32.mrf.mxu0 }
 0x1d8   : > { %v1913_v62 = vadd.f32 %v1846_v36, %v12455_v47  ;;  %v12640_v8 = vadd.f32 %v10357_v53, %v1915_v24  ;;  %v3902_v53 = vld [vmem:[#allocation4 + $0x168] sm:$0xff]  ;;  %v3903_v24 = vld [vmem:[#allocation4 + $0x170] sm:$0xff] }
 0x1d9   : > { %v10324_v6 = vpop.f32.mrf.mxu1  ;;  %v2154_v48 = vpop.f32.mrf.mxu0 }
 0x1da   : > { %14584 = vst [vmem:[#allocation13_spill] sm:$0xff] %v12640_v8  ;;  %v1916_v2 = vadd.f32 %v10324_v6, %v12464_v45  ;;  %v12643_v31 = vadd.f32 %v2138_v13, %v1913_v62  ;;  %v4344_v13 = vld [vmem:[#allocation3 + $0x1] sm:$0xff]  ;;  %v3919_v62 = vpack.c.bf16 %v3903_v24, %v3902_v53 }
 0x1db   : > { %v12645_v15 = vpop.f32.mrf.mxu1  ;;  %v10362_v40 = vpop.f32.mrf.mxu0 }
 0x1dc   : > { %14585 = vst [vmem:[#allocation14_spill] sm:$0xff] %v12643_v31  ;;  %14586 = vst [vmem:[#allocation15_spill] sm:$0xff] %v12645_v15  ;;  %v12647_v3 = vadd.f32 %v10358_v56, %v1916_v2 }
 0x1dd   : > { %v10327_v14 = vpop.f32.mrf.mxu1  ;;  %10530 = vmatmul.mubr.msk.bf16.gmra.mxu1 %vm354_vm1, %v3917_v35  ;;  %v12652_v45 = vpop.f32.mrf.mxu0 }
 0x1de   : > { %14587 = vst [vmem:[#allocation16_spill] sm:$0xff] %v12647_v3  ;;  %v1919_v47 = vadd.f32 %v10327_v14, %v12481_v63  ;;  %10533 = vmatprep.mubr.msk.bf16.mxu1 %vm354_vm1, %v3918_v59  ;;  %14588 = vst [vmem:[#allocation17_spill] sm:$0xff] %v12652_v45  ;;  %v4376_v63 = vpack.c.bf16 %v4345_v4, %v4344_v13 }
 0x1df   : > { %v1862_v26 = vpop.f32.mrf.mxu1  ;;  %v10365_v7 = vpop.f32.mrf.mxu0 }
 0x1e0   : > { %v1917_v36 = vadd.f32 %v1862_v26, %v12487_v29  ;;  %v12655_v27 = vadd.f32 %v10361_v0, %v1919_v47 }
 0x1e1   : > { %v10328_v56 = vpop.f32.mrf.mxu1  ;;  %v2170_v59 = vpop.f32.mrf.mxu0 }
 0x1e2   : > { %14589 = vst [vmem:[#allocation18_spill] sm:$0xff] %v12655_v27  ;;  %v1920_v6 = vadd.f32 %v10328_v56, %v12496_v16  ;;  %v12658_v35 = vadd.f32 %v2154_v48, %v1917_v36 }
 0x1e3   : > { %v12660_v2 = vpop.f32.mrf.mxu1  ;;  %v10366_v3 = vpop.f32.mrf.mxu0 }
 0x1e4   : > { %14590 = vst [vmem:[#allocation19_spill] sm:$0xff] %v12658_v35  ;;  %14591 = vst [vmem:[#allocation20_spill] sm:$0xff] %v12660_v2  ;;  %v12662_v14 = vadd.f32 %v10362_v40, %v1920_v6 }
 0x1e5   : > { %v10331_v45 = vpop.f32.mrf.mxu1  ;;  %10534 = vmatmul.mubr.msk.bf16.gmra.mxu1 %vm354_vm1, %v3919_v62  ;;  %v12667_v47 = vpop.f32.mrf.mxu0 }
 0x1e6   : > { %14592 = vst [vmem:[#allocation21_spill] sm:$0xff] %v12662_v14  ;;  %v1923_v29 = vadd.f32 %v10331_v45, %v12512_v32  ;;  %10573 = vmatprep.mubr.msk.bf16.mxu1 %vm354_vm1, %v4376_v63  ;;  %14593 = vst [vmem:[#allocation22_spill] sm:$0xff] %v12667_v47  ;;  %v12724_v14 = vld [vmem:[%s14562_s6 + $0x8] sm:$0xf] }
 0x1e7   : > { %v1878_v0 = vpop.f32.mrf.mxu1  ;;  %v12672_v24 = vpop.f32.mrf.mxu0  ;;  %14599 = vst [vmem:[#allocation28_spill] sm:$0xff] %v12724_v14  ;;  %11131 = vmatprep.subr.msk.bf16.mxu1 %vm964_vm0, %v12724_v14 }
 0x1e8   : > { %v1921_v16 = vadd.f32 %v1878_v0, %v12517_v50  ;;  %v12670_v48 = vadd.f32 %v10365_v7, %v1923_v29 }
 0x1e9   : > { %v10332_v53 = vpop.f32.mrf.mxu1  ;;  %v12679_v4 = vpop.f32.mrf.mxu0 }
 0x1ea   : > { %14594 = vst [vmem:[#allocation23_spill] sm:$0xff] %v12670_v48  ;;  %v1924_v40 = vadd.f32 %v10332_v53, %v12526_v21  ;;  %v12675_v26 = vadd.f32 %v2170_v59, %v1921_v16 }
 0x1eb   : > { %v12677_v13 = vpop.f32.mrf.mxu1  ;;  %v12683_v36 = vpop.f32.mrf.mxu0 }
 0x1ec   : > { %14595 = vst [vmem:[#allocation24_spill] sm:$0xff] %v12675_v26  ;;  %14596 = vst [vmem:[#allocation25_spill] sm:$0xff] %v12677_v13  ;;  %v12681_v32 = vadd.f32 %v10366_v3, %v1924_v40 }
 0x1ed   : > { %v10371_v45 = vpop.f32.mrf.mxu1  ;;  %v12687_v50 = vpop.f32.mrf.mxu0 }
 0x1ee   : > { %14597 = vst [vmem:[#allocation26_spill] sm:$0xff] %v12681_v32 }
 0x1ef   : > { %v12685_v56 = vpop.f32.mrf.mxu1  ;;  %v12691_v62 = vpop.f32.mrf.mxu0 }
 0x1f1   : > { %v12689_v7 = vpop.f32.mrf.mxu1  ;;  %v12695_v6 = vpop.f32.mrf.mxu0 }
 0x1f3   : > { %v12693_v21 = vpop.f32.mrf.mxu1  ;;  %v12699_v59 = vpop.f32.mrf.mxu0 }
 0x1f5   : > { %v12697_v63 = vpop.f32.mrf.mxu1  ;;  %v12703_v29 = vpop.f32.mrf.mxu0 }
 0x1f7   : > { %v12701_v3 = vpop.f32.mrf.mxu1  ;;  %v12707_v16 = vpop.f32.mrf.mxu0 }
 0x1f9   : > { %v12705_v0 = vpop.f32.mrf.mxu1  ;;  %v12711_v40 = vpop.f32.mrf.mxu0 }
 0x1fb   : > { %v12709_v53 = vpop.f32.mrf.mxu1  ;;  %v12715_v47 = vpop.f32.mrf.mxu0 }
 0x1fd   : > { %v12713_v32 = vpop.f32.mrf.mxu1  ;;  %v12719_v48 = vpop.f32.mrf.mxu0 }
 0x1fe   : > { %14598 = vst [vmem:[#allocation27_spill] sm:$0xff] %v12719_v48 }
 0x1ff   : > { %v12717_v26 = vpop.f32.mrf.mxu1  ;;  %v12730_v35 = vpop.f32.mrf.mxu0 }
 0x200   : > { %14600 = vst [vmem:[#allocation29_spill] sm:$0xff] %v12730_v35 }
 0x201   : > { %v12728_v13 = vpop.f32.mrf.mxu1  ;;  %v12734_v9 = vpop.f32.mrf.mxu0 }
 0x202   : > { %14601 = vst [vmem:[#allocation30_spill] sm:$0xff] %v12734_v9 }
 0x203   : > { %v12732_v27 = vpop.f32.mrf.mxu1  ;;  %v12738_v2 = vpop.f32.mrf.mxu0 }
 0x204   : > { %14602 = vst [vmem:[#allocation31_spill] sm:$0xff] %v12738_v2 }
 0x205   : > { %v12736_v52 = vpop.f32.mrf.mxu1  ;;  %v12742_v8 = vpop.f32.mrf.mxu0 }
 0x206   : > { %14603 = vst [vmem:[#allocation32_spill] sm:$0xff] %v12742_v8 }
 0x207   : > { %v12740_v31 = vpop.f32.mrf.mxu1  ;;  %v12746_v61 = vpop.f32.mrf.mxu0 }
 0x208   : > { %14604 = vst [vmem:[#allocation33_spill] sm:$0xff] %v12746_v61 }
 0x209   : > { %v12744_v54 = vpop.f32.mrf.mxu1  ;;  %v12750_v58 = vpop.f32.mrf.mxu0 }
 0x20a   : > { %14606 = vst [vmem:[#allocation35_spill] sm:$0xff] %v12750_v58 }
 0x20b   : > { %v12748_v15 = vpop.f32.mrf.mxu1  ;;  %v12754_v14 = vpop.f32.mrf.mxu0 }
 0x20c   : > { %14605 = vst [vmem:[#allocation34_spill] sm:$0xff] %v12748_v15  ;;  %14608 = vst [vmem:[#allocation37_spill] sm:$0xff] %v12754_v14 }
 0x20d   : > { %v12752_v25 = vpop.f32.mrf.mxu1  ;;  %v12758_v35 = vpop.f32.mrf.mxu0 }
 0x20e   : > { %14607 = vst [vmem:[#allocation36_spill] sm:$0xff] %v12752_v25  ;;  %14610 = vst [vmem:[#allocation39_spill] sm:$0xff] %v12758_v35 }
 0x20f   : > { %v12756_v9 = vpop.f32.mrf.mxu1  ;;  %v12762_v42 = vpop.f32.mrf.mxu0 }
 0x210   : > { %14609 = vst [vmem:[#allocation38_spill] sm:$0xff] %v12756_v9  ;;  %14612 = vst [vmem:[#allocation41_spill] sm:$0xff] %v12762_v42 }
 0x211   : > { %v12760_v2 = vpop.f32.mrf.mxu1  ;;  %v12766_v48 = vpop.f32.mrf.mxu0 }
 0x212   : > { %14611 = vst [vmem:[#allocation40_spill] sm:$0xff] %v12760_v2  ;;  %14614 = vst [vmem:[#allocation43_spill] sm:$0xff] %v12766_v48 }
 0x213   : > { %v12764_v8 = vpop.f32.mrf.mxu1  ;;  %v12770_v15 = vpop.f32.mrf.mxu0 }
 0x214   : > { %14613 = vst [vmem:[#allocation42_spill] sm:$0xff] %v12764_v8  ;;  %14616 = vst [vmem:[#allocation45_spill] sm:$0xff] %v12770_v15 }
 0x215   : > { %v12768_v61 = vpop.f32.mrf.mxu1  ;;  %v12774_v25 = vpop.f32.mrf.mxu0 }
 0x216   : > { %14615 = vst [vmem:[#allocation44_spill] sm:$0xff] %v12768_v61  ;;  %14618 = vst [vmem:[#allocation47_spill] sm:$0xff] %v12774_v25 }
 0x217   : > { %v12772_v58 = vpop.f32.mrf.mxu1  ;;  %v12778_v9 = vpop.f32.mrf.mxu0 }
 0x218   : > { %14617 = vst [vmem:[#allocation46_spill] sm:$0xff] %v12772_v58  ;;  %14620 = vst [vmem:[#allocation49_spill] sm:$0xff] %v12778_v9 }
 0x219   : > { %v12776_v14 = vpop.f32.mrf.mxu1  ;;  %v12782_v2 = vpop.f32.mrf.mxu0 }
 0x21a   : > { %14619 = vst [vmem:[#allocation48_spill] sm:$0xff] %v12776_v14  ;;  %14622 = vst [vmem:[#allocation51_spill] sm:$0xff] %v12782_v2 }
 0x21b   : > { %v12780_v35 = vpop.f32.mrf.mxu1  ;;  %v12786_v8 = vpop.f32.mrf.mxu0 }
 0x21c   : > { %14621 = vst [vmem:[#allocation50_spill] sm:$0xff] %v12780_v35  ;;  %14624 = vst [vmem:[#allocation53_spill] sm:$0xff] %v12786_v8  ;;  %v2479_v8 = vadd.f32 %v10371_v45, %v12542_v41 }
 0x21d   : > { %v12784_v42 = vpop.f32.mrf.mxu1  ;;  %v12790_v61 = vpop.f32.mrf.mxu0 }
 0x21e   : > { %14623 = vst [vmem:[#allocation52_spill] sm:$0xff] %v12784_v42  ;;  %14626 = vst [vmem:[#allocation55_spill] sm:$0xff] %v12790_v61 }
 0x21f   : > { %v12788_v48 = vpop.f32.mrf.mxu1  ;;  %v12794_v58 = vpop.f32.mrf.mxu0 }
 0x220   : > { %14625 = vst [vmem:[#allocation54_spill] sm:$0xff] %v12788_v48  ;;  %14628 = vst [vmem:[#allocation57_spill] sm:$0xff] %v12794_v58  ;;  %v2477_v58 = vadd.f32 %v12685_v56, %v12547_v33  ;;  %v2483_v33 = vadd.f32 %v12697_v63, %v12564_v49  ;;  %v12827_v56 = vld [vmem:[%s14559_s3] ss:$0 sm:$0xff] }
 0x221   : > { %v12792_v15 = vpop.f32.mrf.mxu1  ;;  %v12798_v14 = vpop.f32.mrf.mxu0 }
 0x222   : > { %14627 = vst [vmem:[#allocation56_spill] sm:$0xff] %v12792_v15  ;;  %14630 = vst [vmem:[#allocation59_spill] sm:$0xff] %v12798_v14  ;;  %v2480_v14 = vadd.f32 %v12689_v7, %v12554_v18 }
 0x223   : > { %v12796_v25 = vpop.f32.mrf.mxu1  ;;  %v12802_v35 = vpop.f32.mrf.mxu0 }
 0x224   : > { %14629 = vst [vmem:[#allocation58_spill] sm:$0xff] %v12796_v25  ;;  %14632 = vst [vmem:[#allocation61_spill] sm:$0xff] %v12802_v35  ;;  %v2186_v35 = vadd.f32 %v12537_v44, %v12552_v10 }
 0x225   : > { %v12800_v9 = vpop.f32.mrf.mxu1  ;;  %v12806_v42 = vpop.f32.mrf.mxu0 }
 0x226   : > { %14631 = vst [vmem:[#allocation60_spill] sm:$0xff] %v12800_v9  ;;  %14634 = vst [vmem:[#allocation63_spill] sm:$0xff] %v12806_v42  ;;  %v2478_v41 = vadd.f32 %v12693_v21, %v2186_v35  ;;  %v2481_v35 = vadd.f32 %v12701_v3, %v12567_v30  ;;  %v2484_v21 = vadd.f32 %v12705_v0, %v12572_v28 }
 0x227   : > { %v12804_v2 = vpop.f32.mrf.mxu1  ;;  %v10473_v61 = vpop.f32.mrf.mxu0 }
 0x228   : > { %14633 = vst [vmem:[#allocation62_spill] sm:$0xff] %v12804_v2  ;;  %v2772_v2 = vadd.f32 %v12672_v24, %v2479_v8  ;;  %v2773_v8 = vadd.f32 %v12683_v36, %v2480_v14  ;;  %v2776_v14 = vadd.f32 %v12691_v62, %v2483_v33  ;;  %v2487_v62 = vadd.f32 %v12713_v32, %v12580_v23 }
 0x229   : > { %v12809_v48 = vpop.f32.mrf.mxu1  ;;  %v3227_v25 = vpop.f32.mrf.mxu0 }
 0x22a   : > { %14635 = vst [vmem:[#allocation64_spill] sm:$0xff] %v12809_v48  ;;  %v2770_v48 = vadd.f32 %v12679_v4, %v2477_v58  ;;  %v2771_v4 = vadd.f32 %v12687_v50, %v2478_v41  ;;  %v2774_v50 = vadd.f32 %v12695_v6, %v2481_v35  ;;  %v2485_v35 = vadd.f32 %v12717_v26, %v12586_v43 }
 0x22b   : > { %v12813_v15 = vpop.f32.mrf.mxu1  ;;  %v10474_v9 = vpop.f32.mrf.mxu0  ;;  %v2194_v43 = vadd.f32 %v12577_v51, %v12591_v60 }
 0x22d   : > { %v10439_v42 = vpop.f32.mrf.mxu1  ;;  %v3230_v7 = vpop.f32.mrf.mxu0  ;;  %v2486_v51 = vadd.f32 %v12732_v27, %v2194_v43 }
 0x22e   : > { %v3064_v45 = vadd.f32 %v10439_v42, %v2772_v2 }
 0x22f   : > { %v2935_v18 = vpop.f32.mrf.mxu1  ;;  %v10477_v2 = vpop.f32.mrf.mxu0 }
 0x230   : > { %v3356_v44 = vadd.f32 %v10473_v61, %v3064_v45  ;;  %v3062_v10 = vadd.f32 %v2935_v18, %v2770_v48  ;;  %v2190_v61 = vadd.f32 %v12561_v34, %v12570_v11 }
 0x231   : > { %v10440_v42 = vpop.f32.mrf.mxu1  ;;  %v3243_v36 = vpop.f32.mrf.mxu0 }
 0x232   : > { %v3395_v58 = vadd.f32 %v12827_v56, %v3356_v44  ;;  %v3354_v24 = vadd.f32 %v3227_v25, %v3062_v10  ;;  %v3065_v49 = vadd.f32 %v10440_v42, %v2773_v8  ;;  %v2482_v25 = vadd.f32 %v12709_v53, %v2190_v61 }
 0x233   : > { %v2938_v48 = vpop.f32.mrf.mxu1  ;;  %v10478_v41 = vpop.f32.mrf.mxu0 }
 0x234   : > { %v3427_v63 = vmax.f32 %v3395_v58, 0.0  ;;  %v3393_v30 = vadd.f32 %v12827_v56, %v3354_v24  ;;  %v3357_v3 = vadd.f32 %v10474_v9, %v3065_v49  ;;  %v3063_v45 = vadd.f32 %v2938_v48, %v2771_v4 }
 0x235   : > { %v10443_v18 = vpop.f32.mrf.mxu1  ;;  %v2777_v9 = vadd.f32 %v12699_v59, %v2484_v21  ;;  %v3246_v44 = vpop.f32.mrf.mxu0  ;;  %v1618_v49 = vadd.f32 %v12407_v55, %v12428_v1  ;;  %v12865_v55 = vadd.f32 %v12441_v17, %v12462_v22  ;;  %v12869_v1 = vadd.f32 %v12475_v5, %v12494_v57 }
 0x236   : > { %3514 = vst.msk [vmem:[#allocation3 + $0x31] sm:$0xff] %vm354_vm1, %v3427_v63  ;;  %v3425_v28 = vmax.f32 %v3393_v30, 0.0  ;;  %v3396_v34 = vadd.f32 %v12827_v56, %v3357_v3  ;;  %v3355_v11 = vadd.f32 %v3230_v7, %v3063_v45  ;;  %v3068_v0 = vadd.f32 %v10443_v18, %v2776_v14 }
 0x237   : > { %v2951_v33 = vpop.f32.mrf.mxu1  ;;  %v2775_v7 = vadd.f32 %v12703_v29, %v2482_v25  ;;  %v10481_v58 = vpop.f32.mrf.mxu0  ;;  %v2780_v29 = vadd.f32 %v12707_v16, %v2487_v62  ;;  %v2491_v17 = vadd.f32 %v12736_v52, %v12602_v39  ;;  %v2489_v22 = vadd.f32 %v12740_v31, %v12605_v38  ;;  %v14636_v38 = vld [vmem:[#allocation27_spill] sm:$0xff]  ;;  %v14638_v62 = vld [vmem:[#allocation34_spill] sm:$0xff] }
 0x238   : > { %3512 = vst.msk [vmem:[#allocation3 + $0x19] sm:$0xff] %vm354_vm1, %v3425_v28  ;;  %v3428_v53 = vmax.f32 %v3396_v34, 0.0  ;;  %v3394_v6 = vadd.f32 %v12827_v56, %v3355_v11  ;;  %v3360_v10 = vadd.f32 %v10477_v2, %v3068_v0  ;;  %v3066_v8 = vadd.f32 %v2951_v33, %v2774_v50 }
 0x239   : > { %v10444_v42 = vpop.f32.mrf.mxu1  ;;  %v2488_v2 = vadd.f32 %v12728_v13, %v12593_v46  ;;  %v3259_v4 = vpop.f32.mrf.mxu0  ;;  %v2778_v46 = vadd.f32 %v12711_v40, %v2485_v35  ;;  %v2198_v5 = vadd.f32 %v12599_v20, %v12608_v19  ;;  %v1910_v50 = vadd.f32 %v12630_v37, %v1618_v49  ;;  %v14637_v19 = vld [vmem:[#allocation6_spill] sm:$0xff]  ;;  %v14641_v35 = vld [vmem:[#allocation28_spill] sm:$0xff] }
 0x23a   : > { %3515 = vst.msk [vmem:[#allocation3 + $0x39] sm:$0xff] %vm354_vm1, %v3428_v53  ;;  %v3426_v23 = vmax.f32 %v3394_v6, 0.0  ;;  %v3399_v32 = vadd.f32 %v12827_v56, %v3360_v10  ;;  %v3358_v59 = vadd.f32 %v3243_v36, %v3066_v8  ;;  %v3069_v24 = vadd.f32 %v10444_v42, %v2777_v9  ;;  %v14639_v9 = vld [vmem:[#allocation29_spill] sm:$0xff]  ;;  %v14640_v6 = vld [vmem:[#allocation30_spill] sm:$0xff] }
 0x23b   : > { %v2954_v26 = vpop.f32.mrf.mxu1  ;;  %v10482_v13 = vpop.f32.mrf.mxu0  ;;  %v2781_v27 = vadd.f32 %v12715_v47, %v2488_v2  ;;  %v2492_v52 = vadd.f32 %v12744_v54, %v12610_v12  ;;  %v2779_v31 = vadd.f32 %v14636_v38, %v2486_v51  ;;  %v4733_v47 = vsel %vm964_vm0, %v14637_v19, 0  ;;  %v14648_v38 = vld [vmem:[#allocation7_spill] sm:$0xff] }
 0x23c   : > { %3513 = vst.msk [vmem:[#allocation3 + $0x21] sm:$0xff] %vm354_vm1, %v3426_v23  ;;  %v3431_v21 = vmax.f32 %v3399_v32, 0.0  ;;  %v3397_v61 = vadd.f32 %v12827_v56, %v3358_v59  ;;  %v3361_v48 = vadd.f32 %v10478_v41, %v3069_v24  ;;  %v3067_v14 = vadd.f32 %v2954_v26, %v2775_v7 }
 0x23d   : > { %v10447_v60 = vpop.f32.mrf.mxu1  ;;  %v3262_v40 = vpop.f32.mrf.mxu0  ;;  %v2490_v37 = vadd.f32 %v14638_v62, %v2198_v5  ;;  %v2784_v12 = vadd.f32 %v14639_v9, %v2491_v17  ;;  %v2782_v10 = vadd.f32 %v14640_v6, %v2489_v22  ;;  %v3828_v8 = vld [vmem:[#allocation3 + $0x30] sm:$0xff]  ;;  %v5073_v42 = vsel %vm964_vm0, %v14641_v35, 0  ;;  %v14652_v9 = vld [vmem:[#allocation42_spill] sm:$0xff] }
 0x23e   : > { %3518 = vst.msk [vmem:[#allocation3 + $0x61] sm:$0xff] %vm354_vm1, %v3431_v21  ;;  %v3429_v16 = vmax.f32 %v3397_v61, 0.0  ;;  %v3400_v36 = vadd.f32 %v12827_v56, %v3361_v48  ;;  %v3359_v63 = vadd.f32 %v3246_v44, %v3067_v14  ;;  %v3072_v30 = vadd.f32 %v10447_v60, %v2780_v29  ;;  %v14642_v21 = vld [vmem:[#allocation31_spill] sm:$0xff] }
 0x23f   : > { %v2967_v57 = vpop.f32.mrf.mxu1  ;;  %v10485_v20 = vpop.f32.mrf.mxu0  ;;  %v3826_v59 = vld [vmem:[#allocation3 + $0x18] sm:$0xff]  ;;  %v2785_v61 = vadd.f32 %v14642_v21, %v2492_v52  ;;  %v14647_v52 = vld [vmem:[#allocation15_spill] sm:$0xff] }
 0x240   : > { %3516 = vst.msk [vmem:[#allocation3 + $0x49] sm:$0xff] %vm354_vm1, %v3429_v16  ;;  %v3432_v3 = vmax.f32 %v3400_v36, 0.0  ;;  %v3398_v45 = vadd.f32 %v12827_v56, %v3359_v63  ;;  %v3364_v25 = vadd.f32 %v10481_v58, %v3072_v30  ;;  %v3070_v18 = vadd.f32 %v2967_v57, %v2778_v46  ;;  %v4346_v24 = vld [vmem:[#allocation3 + $0x19] sm:$0xff]  ;;  %v4348_v46 = vld [vmem:[#allocation3 + $0x31] sm:$0xff]  ;;  %v14645_v63 = vld [vmem:[#allocation10_spill] sm:$0xff] }
 0x241   : > { %v10448_v39 = vpop.f32.mrf.mxu1  ;;  %v3829_v0 = vld [vmem:[#allocation3 + $0x38] sm:$0xff]  ;;  %v3275_v54 = vpop.f32.mrf.mxu0  ;;  %v14646_v30 = vld [vmem:[#allocation38_spill] sm:$0xff]  ;;  %v14654_v35 = vld [vmem:[#allocation35_spill] sm:$0xff] }
 0x242   : > { %3519 = vst.msk [vmem:[#allocation3 + $0x69] sm:$0xff] %vm354_vm1, %v3432_v3  ;;  %v3430_v41 = vmax.f32 %v3398_v45, 0.0  ;;  %v3403_v28 = vadd.f32 %v12827_v56, %v3364_v25  ;;  %v3362_v34 = vadd.f32 %v3259_v4, %v3070_v18  ;;  %v3073_v11 = vadd.f32 %v10448_v39, %v2781_v27  ;;  %v4349_v49 = vld [vmem:[#allocation3 + $0x39] sm:$0xff] }
 0x243   : > { %v2970_v33 = vpop.f32.mrf.mxu1  ;;  %v3827_v44 = vld [vmem:[#allocation3 + $0x20] sm:$0xff]  ;;  %v12901_v29 = vpack.c.bf16 %v3829_v0, %v3828_v8  ;;  %v10486_v4 = vpop.f32.mrf.mxu0  ;;  %v14644_v16 = vld [vmem:[#allocation36_spill] sm:$0xff]  ;;  %v2493_v17 = vadd.f32 %v14646_v30, %v14645_v63  ;;  %v4378_v5 = vpack.c.bf16 %v4349_v49, %v4348_v46  ;;  %v1914_v39 = vadd.f32 %v14647_v52, %v12865_v55  ;;  %v14650_v55 = vld [vmem:[#allocation11_spill] sm:$0xff] }
 0x244   : > { %v4347_v53 = vld [vmem:[#allocation3 + $0x21] sm:$0xff]  ;;  %3517 = vst.msk [vmem:[#allocation3 + $0x51] sm:$0xff] %vm354_vm1, %v3430_v41  ;;  %v3435_v7 = vmax.f32 %v3403_v28, 0.0  ;;  %v3401_v58 = vadd.f32 %v12827_v56, %v3362_v34  ;;  %v3365_v23 = vadd.f32 %v10482_v13, %v3073_v11  ;;  %v3071_v32 = vadd.f32 %v2970_v33, %v2779_v31  ;;  %v14643_v13 = vld [vmem:[#allocation8_spill] sm:$0xff] }
 0x245   : > { %v10451_v2 = vpop.f32.mrf.mxu1  ;;  %v12899_v43 = vpack.c.bf16 %v3827_v44, %v3826_v59  ;;  %v4377_v26 = vpack.c.bf16 %v4347_v53, %v4346_v24  ;;  %v2495_v36 = vadd.f32 %v14644_v16, %v14643_v13  ;;  %v3278_v57 = vpop.f32.mrf.mxu0  ;;  %v12916_v27 = vld [vmem:[%s14563_s7 + $0x8] sm:$0xf]  ;;  %v2202_v31 = vadd.f32 %v14648_v38, %v1910_v50  ;;  %v14653_v53 = vld [vmem:[#allocation33_spill] sm:$0xff]  ;;  %v14657_v30 = vld [vmem:[#allocation14_spill] sm:$0xff] }
 0x246   : > { %3522 = vst.msk [vmem:[#allocation3 + $0x91] sm:$0xff] %vm354_vm1, %v3435_v7  ;;  %v3433_v48 = vmax.f32 %v3401_v58, 0.0  ;;  %v3404_v14 = vadd.f32 %v12827_v56, %v3365_v23  ;;  %v3363_v51 = vadd.f32 %v3262_v40, %v3071_v32  ;;  %v3076_v60 = vadd.f32 %v10451_v2, %v2784_v12  ;;  %v12921_v40 = vld [vmem:[%s14562_s6 + $0xc] sm:$0xf]  ;;  %v3832_v7 = vld [vmem:[#allocation3 + $0x60] sm:$0xff] }
 0x247   : > { %10540 = vmatmul.mubr.msk.bf16.vlgmr.msra.gmra.mxu0 %vm354_vm1, %v12899_v43  ;;  %10574 = vmatmul.mubr.msk.bf16.vlgmr.msra.gmra.mxu1 %vm354_vm1, %v4377_v26  ;;  %v2983_v22 = vpop.f32.mrf.mxu1  ;;  %v14649_v41 = vld [vmem:[#allocation32_spill] sm:$0xff]  ;;  %v10489_v34 = vpop.f32.mrf.mxu0  ;;  %v2494_v12 = vadd.f32 %v14652_v9, %v2202_v31  ;;  %v2788_v6 = vadd.f32 %v14653_v53, %v2495_v36  ;;  %v3830_v24 = vld [vmem:[#allocation3 + $0x48] sm:$0xff] }
 0x248   : > { %3520 = vst.msk [vmem:[#allocation3 + $0x79] sm:$0xff] %vm354_vm1, %v3433_v48  ;;  %v3436_v3 = vmax.f32 %v3404_v14, 0.0  ;;  %v3402_v45 = vadd.f32 %v12827_v56, %v3363_v51  ;;  %v3368_v25 = vadd.f32 %v10485_v20, %v3076_v60  ;;  %10606 = vmatpush3.bf16.msra.mxu0 %v4733_v47  ;;  %v3074_v18 = vadd.f32 %v2983_v22, %v2782_v10  ;;  %v14651_v50 = vld [vmem:[#allocation40_spill] sm:$0xff]  ;;  %v4350_v49 = vld [vmem:[#allocation3 + $0x49] sm:$0xff]  ;;  %v4352_v2 = vld [vmem:[#allocation3 + $0x61] sm:$0xff] }
 0x249   : > { %10543 = vmatprep.mubr.msk.bf16.mxu0 %vm354_vm1, %v12901_v29  ;;  %10577 = vmatprep.mubr.msk.bf16.mxu1 %vm354_vm1, %v4378_v5  ;;  %v10452_v19 = vpop.f32.mrf.mxu1  ;;  %v2783_v28 = vadd.f32 %v14649_v41, %v2490_v37  ;;  %v3833_v62 = vld [vmem:[#allocation3 + $0x68] sm:$0xff]  ;;  %v2496_v37 = vadd.f32 %v14651_v50, %v14650_v55  ;;  %v3291_v10 = vpop.f32.mrf.mxu0  ;;  %v14656_v36 = vld [vmem:[#allocation44_spill] sm:$0xff]  ;;  %v14661_v41 = vld [vmem:[#allocation5_spill] sm:$0xff] }
 0x24a   : > { %10640 = vmatpush3.bf16.msra.mxu1 %v5073_v42  ;;  %3523 = vst.msk [vmem:[#allocation3 + $0x99] sm:$0xff] %vm354_vm1, %v3436_v3  ;;  %v3434_v20 = vmax.f32 %v3402_v45, 0.0  ;;  %v3407_v47 = vadd.f32 %v12827_v56, %v3368_v25  ;;  %v3366_v11 = vadd.f32 %v3275_v54, %v3074_v18  ;;  %v3077_v0 = vadd.f32 %v10452_v19, %v2785_v61  ;;  %v4353_v33 = vld [vmem:[#allocation3 + $0x69] sm:$0xff]  ;;  %v14659_v3 = vld [vmem:[#allocation37_spill] sm:$0xff]  ;;  %v14660_v31 = vld [vmem:[#allocation20_spill] sm:$0xff] }
 0x24b   : > { %11132 = vmatprep.subr.msk.bf16.mxu0 %vm964_vm0, %v12916_v27  ;;  %11133 = vmatprep.subr.msk.bf16.mxu1 %vm964_vm0, %v12921_v40  ;;  %v2986_v44 = vpop.f32.mrf.mxu1  ;;  %v3831_v8 = vld [vmem:[#allocation3 + $0x50] sm:$0xff]  ;;  %v2786_v42 = vadd.f32 %v14654_v35, %v2493_v17  ;;  %v12947_v48 = vpack.c.bf16 %v3833_v62, %v3832_v7  ;;  %v4380_v14 = vpack.c.bf16 %v4353_v33, %v4352_v2  ;;  %v10490_v51 = vpop.f32.mrf.mxu0  ;;  %v14658_v17 = vld [vmem:[#allocation46_spill] sm:$0xff] }
 0x24c   : > { %v4351_v54 = vld [vmem:[#allocation3 + $0x51] sm:$0xff]  ;;  %3521 = vst.msk [vmem:[#allocation3 + $0x81] sm:$0xff] %vm354_vm1, %v3434_v20  ;;  %v3439_v58 = vmax.f32 %v3407_v47, 0.0  ;;  %v3405_v23 = vadd.f32 %v12827_v56, %v3366_v11  ;;  %v3369_v32 = vadd.f32 %v10486_v4, %v3077_v0  ;;  %v3075_v59 = vadd.f32 %v2986_v44, %v2783_v28  ;;  %v14655_v4 = vld [vmem:[#allocation13_spill] sm:$0xff] }
 0x24d   : > { %v10455_v26 = vpop.f32.mrf.mxu1  ;;  %v12945_v21 = vpack.c.bf16 %v3831_v8, %v3830_v24  ;;  %v4379_v61 = vpack.c.bf16 %v4351_v54, %v4350_v49  ;;  %v2499_v63 = vadd.f32 %v14656_v36, %v14655_v4  ;;  %v2497_v22 = vadd.f32 %v14658_v17, %v14657_v30  ;;  %v3294_v25 = vpop.f32.mrf.mxu0  ;;  %v14662_v28 = vld [vmem:[#allocation9_spill] sm:$0xff]  ;;  %v14663_v47 = vld [vmem:[#allocation12_spill] sm:$0xff]  ;;  %v14664_v62 = vld [vmem:[#allocation39_spill] sm:$0xff] }
 0x24e   : > { %3526 = vst.msk [vmem:[#allocation3 + $0xc1] sm:$0xff] %vm354_vm1, %v3439_v58  ;;  %v3437_v60 = vmax.f32 %v3405_v23, 0.0  ;;  %v3408_v46 = vadd.f32 %v12827_v56, %v3369_v32  ;;  %v3367_v13 = vadd.f32 %v3278_v57, %v3075_v59  ;;  %v3080_v16 = vadd.f32 %v10455_v26, %v2788_v6  ;;  %v14665_v6 = vld [vmem:[#allocation16_spill] sm:$0xff]  ;;  %v14667_v54 = vld [vmem:[#allocation50_spill] sm:$0xff]  ;;  %v14669_v32 = vld [vmem:[#allocation43_spill] sm:$0xff] }
 0x24f   : > { %10544 = vmatmul.mubr.msk.bf16.gmra.mxu0 %vm354_vm1, %v12945_v21  ;;  %10578 = vmatmul.mubr.msk.bf16.gmra.mxu1 %vm354_vm1, %v4379_v61  ;;  %v2999_v5 = vpop.f32.mrf.mxu1  ;;  %v2789_v45 = vadd.f32 %v14659_v3, %v2496_v37  ;;  %v1918_v19 = vadd.f32 %v14660_v31, %v12869_v1  ;;  %v1630_v20 = vadd.f32 %v14662_v28, %v14661_v41  ;;  %v10493_v55 = vpop.f32.mrf.mxu0  ;;  %v14666_v1 = vld [vmem:[#allocation48_spill] sm:$0xff]  ;;  %v3836_v24 = vld [vmem:[#allocation3 + $0x90] sm:$0xff]  ;;  %v14674_v31 = vld [vmem:[#allocation45_spill] sm:$0xff] }
 0x250   : > { %3524 = vst.msk [vmem:[#allocation3 + $0xa9] sm:$0xff] %vm354_vm1, %v3437_v60  ;;  %v3440_v18 = vmax.f32 %v3408_v46, 0.0  ;;  %v3406_v57 = vadd.f32 %v12827_v56, %v3367_v13  ;;  %v3372_v52 = vadd.f32 %v10489_v34, %v3080_v16  ;;  %v3078_v38 = vadd.f32 %v2999_v5, %v2786_v42  ;;  %10547 = vmatprep.mubr.msk.bf16.mxu0 %vm354_vm1, %v12947_v48  ;;  %v3834_v61 = vld [vmem:[#allocation3 + $0x78] sm:$0xff] }
 0x251   : > { %10581 = vmatprep.mubr.msk.bf16.mxu1 %vm354_vm1, %v4380_v14  ;;  %v2206_v11 = vadd.f32 %v14663_v47, %v1914_v39  ;;  %v10456_v0 = vpop.f32.mrf.mxu1  ;;  %v2787_v33 = vadd.f32 %v14664_v62, %v2494_v12  ;;  %v3837_v44 = vld [vmem:[#allocation3 + $0x98] sm:$0xff]  ;;  %v2500_v8 = vadd.f32 %v14666_v1, %v14665_v6  ;;  %v14668_v39 = vld [vmem:[#allocation41_spill] sm:$0xff]  ;;  %v3307_v58 = vpop.f32.mrf.mxu0  ;;  %v2790_v59 = vadd.f32 %v14669_v32, %v2497_v22 }
 0x252   : > { %3527 = vst.msk [vmem:[#allocation3 + $0xc9] sm:$0xff] %vm354_vm1, %v3440_v18  ;;  %v3438_v34 = vmax.f32 %v3406_v57, 0.0  ;;  %v3411_v50 = vadd.f32 %v12827_v56, %v3372_v52  ;;  %v3370_v37 = vadd.f32 %v3291_v10, %v3078_v38  ;;  %v3081_v9 = vadd.f32 %v10456_v0, %v2789_v45  ;;  %v4357_v53 = vld [vmem:[#allocation3 + $0x99] sm:$0xff]  ;;  %v4356_v60 = vld [vmem:[#allocation3 + $0x91] sm:$0xff]  ;;  %v14673_v57 = vld [vmem:[#allocation54_spill] sm:$0xff] }
 0x253   : > { %v2498_v35 = vadd.f32 %v14667_v54, %v2206_v11  ;;  %v3002_v42 = vpop.f32.mrf.mxu1  ;;  %v2792_v7 = vadd.f32 %v14668_v39, %v2499_v63  ;;  %v3835_v12 = vld [vmem:[#allocation3 + $0x80] sm:$0xff]  ;;  %v12981_v4 = vpack.c.bf16 %v3837_v44, %v3836_v24  ;;  %v4382_v36 = vpack.c.bf16 %v4357_v53, %v4356_v60  ;;  %v10494_v63 = vpop.f32.mrf.mxu0  ;;  %v14671_v3 = vld [vmem:[#allocation52_spill] sm:$0xff]  ;;  %v14672_v18 = vld [vmem:[#allocation19_spill] sm:$0xff] }
 0x254   : > { %v4355_v23 = vld [vmem:[#allocation3 + $0x81] sm:$0xff]  ;;  %3525 = vst.msk [vmem:[#allocation3 + $0xb1] sm:$0xff] %vm354_vm1, %v3438_v34  ;;  %v3443_v10 = vmax.f32 %v3411_v50, 0.0  ;;  %v3409_v49 = vadd.f32 %v12827_v56, %v3370_v37  ;;  %v3373_v2 = vadd.f32 %v10490_v51, %v3081_v9  ;;  %v3079_v26 = vadd.f32 %v3002_v42, %v2787_v33  ;;  %v4354_v14 = vld [vmem:[#allocation3 + $0x79] sm:$0xff]  ;;  %v14677_v9 = vld [vmem:[#allocation47_spill] sm:$0xff] }
 0x255   : > { %v10459_v46 = vpop.f32.mrf.mxu1  ;;  %v12979_v13 = vpack.c.bf16 %v3835_v12, %v3834_v61  ;;  %v4381_v16 = vpack.c.bf16 %v4355_v23, %v4354_v14  ;;  %v14670_v51 = vld [vmem:[#allocation18_spill] sm:$0xff]  ;;  %v2501_v52 = vadd.f32 %v14673_v57, %v14672_v18  ;;  %v2793_v41 = vadd.f32 %v14674_v31, %v2500_v8  ;;  %v3310_v28 = vpop.f32.mrf.mxu0  ;;  %v14675_v62 = vld [vmem:[#allocation25_spill] sm:$0xff] }
 0x256   : > { %3530 = vst.msk [vmem:[#allocation3 + $0xf1] sm:$0xff] %vm354_vm1, %v3443_v10  ;;  %v3441_v30 = vmax.f32 %v3409_v49, 0.0  ;;  %v3412_v17 = vadd.f32 %v12827_v56, %v3373_v2  ;;  %v3371_v22 = vadd.f32 %v3294_v25, %v3079_v26  ;;  %v3084_v5 = vadd.f32 %v10459_v46, %v2792_v7  ;;  %v14676_v34 = vld [vmem:[#allocation17_spill] sm:$0xff]  ;;  %v14679_v7 = vld [vmem:[#allocation56_spill] sm:$0xff]  ;;  %v14680_v23 = vld [vmem:[#allocation58_spill] sm:$0xff] }
 0x257   : > { %v2503_v45 = vadd.f32 %v14671_v3, %v14670_v51  ;;  %10548 = vmatmul.mubr.msk.bf16.gmra.mxu0 %vm354_vm1, %v12979_v13  ;;  %10582 = vmatmul.mubr.msk.bf16.gmra.mxu1 %vm354_vm1, %v4381_v16  ;;  %v3015_v38 = vpop.f32.mrf.mxu1  ;;  %v1922_v33 = vadd.f32 %v14675_v62, %v1630_v20  ;;  %v2210_v50 = vadd.f32 %v14676_v34, %v1918_v19  ;;  %v10497_v53 = vpop.f32.mrf.mxu0  ;;  %v14678_v39 = vld [vmem:[#allocation21_spill] sm:$0xff]  ;;  %v14682_v49 = vld [vmem:[#allocation51_spill] sm:$0xff]  ;;  %v3838_v46 = vld [vmem:[#allocation3 + $0xa8] sm:$0xff] }
 0x258   : > { %3528 = vst.msk [vmem:[#allocation3 + $0xd9] sm:$0xff] %vm354_vm1, %v3441_v30  ;;  %v3444_v47 = vmax.f32 %v3412_v17, 0.0  ;;  %v3410_v25 = vadd.f32 %v12827_v56, %v3371_v22  ;;  %v3376_v11 = vadd.f32 %v10493_v55, %v3084_v5  ;;  %v3082_v0 = vadd.f32 %v3015_v38, %v2790_v59  ;;  %10551 = vmatprep.mubr.msk.bf16.mxu0 %vm354_vm1, %v12981_v4  ;;  %v14681_v19 = vld [vmem:[#allocation49_spill] sm:$0xff]  ;;  %v4358_v16 = vld [vmem:[#allocation3 + $0xa9] sm:$0xff]  ;;  %v14684_v38 = vld [vmem:[#allocation60_spill] sm:$0xff] }
 0x259   : > { %10585 = vmatprep.mubr.msk.bf16.mxu1 %vm354_vm1, %v4382_v36  ;;  %v10460_v37 = vpop.f32.mrf.mxu1  ;;  %v2791_v44 = vadd.f32 %v14677_v9, %v2498_v35  ;;  %v3841_v54 = vld [vmem:[#allocation3 + $0xc8] sm:$0xff]  ;;  %v2504_v12 = vadd.f32 %v14679_v7, %v14678_v39  ;;  %v2502_v20 = vadd.f32 %v14680_v23, %v2210_v50  ;;  %v2796_v59 = vadd.f32 %v14681_v19, %v2503_v45  ;;  %v3323_v24 = vpop.f32.mrf.mxu0  ;;  %v3840_v26 = vld [vmem:[#allocation3 + $0xc0] sm:$0xff]  ;;  %v14691_v19 = vld [vmem:[#allocation64_spill] sm:$0xff] }
 0x25a   : > { %3531 = vst.msk [vmem:[#allocation3 + $0xf9] sm:$0xff] %vm354_vm1, %v3444_v47  ;;  %v3442_v6 = vmax.f32 %v3410_v25, 0.0  ;;  %v3415_v1 = vadd.f32 %v12827_v56, %v3376_v11  ;;  %v3374_v55 = vadd.f32 %v3307_v58, %v3082_v0  ;;  %v3085_v8 = vadd.f32 %v10460_v37, %v2793_v41  ;;  %v4361_v42 = vld [vmem:[#allocation3 + $0xc9] sm:$0xff]  ;;  %v4360_v36 = vld [vmem:[#allocation3 + $0xc1] sm:$0xff]  ;;  %v14685_v41 = vld [vmem:[#allocation24_spill] sm:$0xff] }
 0x25b   : > { %v3018_v32 = vpop.f32.mrf.mxu1  ;;  %v3839_v35 = vld [vmem:[#allocation3 + $0xb0] sm:$0xff]  ;;  %v2794_v2 = vadd.f32 %v14682_v49, %v2501_v52  ;;  %v13012_v5 = vpack.c.bf16 %v3841_v54, %v3840_v26  ;;  %v4384_v51 = vpack.c.bf16 %v4361_v42, %v4360_v36  ;;  %v10498_v3 = vpop.f32.mrf.mxu0  ;;  %v14686_v47 = vld [vmem:[#allocation62_spill] sm:$0xff]  ;;  %v14687_v0 = vld [vmem:[#allocation53_spill] sm:$0xff] }
 0x25c   : > { %v4359_v10 = vld [vmem:[#allocation3 + $0xb1] sm:$0xff]  ;;  %3529 = vst.msk [vmem:[#allocation3 + $0xe1] sm:$0xff] %vm354_vm1, %v3442_v6  ;;  %v3447_v58 = vmax.f32 %v3415_v1, 0.0  ;;  %v3413_v61 = vadd.f32 %v12827_v56, %v3374_v55  ;;  %v3377_v14 = vadd.f32 %v10494_v63, %v3085_v8  ;;  %v3083_v60 = vadd.f32 %v3018_v32, %v2791_v44  ;;  %v14688_v44 = vld [vmem:[#allocation22_spill] sm:$0xff] }
 0x25d   : > { %v10463_v30 = vpop.f32.mrf.mxu1  ;;  %v13010_v17 = vpack.c.bf16 %v3839_v35, %v3838_v46  ;;  %v4383_v22 = vpack.c.bf16 %v4359_v10, %v4358_v16  ;;  %v14683_v63 = vld [vmem:[#allocation23_spill] sm:$0xff]  ;;  %v2505_v25 = vadd.f32 %v14686_v47, %v14685_v41  ;;  %v2797_v62 = vadd.f32 %v14687_v0, %v2504_v12  ;;  %v3326_v34 = vpop.f32.mrf.mxu0  ;;  %v14690_v32 = vld [vmem:[#allocation26_spill] sm:$0xff]  ;;  %v14694_v41 = vld [vmem:[#allocation61_spill] sm:$0xff] }
 0x25e   : > { %3534 = vst.msk [vmem:[#allocation3 + $0x121] sm:$0xff] %vm354_vm1, %v3447_v58  ;;  %v3445_v45 = vmax.f32 %v3413_v61, 0.0  ;;  %v3416_v18 = vadd.f32 %v12827_v56, %v3377_v14  ;;  %v3375_v57 = vadd.f32 %v3310_v28, %v3083_v60  ;;  %v3088_v52 = vadd.f32 %v10463_v30, %v2796_v59  ;;  %v14689_v55 = vld [vmem:[#allocation55_spill] sm:$0xff] }
 0x25f   : > { %v2507_v31 = vadd.f32 %v14684_v38, %v14683_v63  ;;  %10552 = vmatmul.mubr.msk.bf16.gmra.mxu0 %vm354_vm1, %v13010_v17  ;;  %10586 = vmatmul.mubr.msk.bf16.gmra.mxu1 %vm354_vm1, %v4383_v22  ;;  %v3031_v11 = vpop.f32.mrf.mxu1  ;;  %v2214_v6 = vadd.f32 %v14688_v44, %v1922_v33  ;;  %v2795_v8 = vadd.f32 %v14689_v55, %v2502_v20  ;;  %v10501_v54 = vpop.f32.mrf.mxu0  ;;  %v14692_v33 = vld [vmem:[#allocation57_spill] sm:$0xff]  ;;  %v14693_v26 = vld [vmem:[#allocation59_spill] sm:$0xff]  ;;  %v3842_v16 = vld [vmem:[#allocation3 + $0xd8] sm:$0xff] }
 0x260   : > { %3532 = vst.msk [vmem:[#allocation3 + $0x109] sm:$0xff] %vm354_vm1, %v3445_v45  ;;  %v3448_v50 = vmax.f32 %v3416_v18, 0.0  ;;  %v3414_v28 = vadd.f32 %v12827_v56, %v3375_v57  ;;  %v3380_v37 = vadd.f32 %v10497_v53, %v3088_v52  ;;  %v3086_v9 = vadd.f32 %v3031_v11, %v2794_v2  ;;  %10555 = vmatprep.mubr.msk.bf16.mxu0 %vm354_vm1, %v13012_v5  ;;  %v3844_v61 = vld [vmem:[#allocation3 + $0xf0] sm:$0xff]  ;;  %v4362_v36 = vld [vmem:[#allocation3 + $0xd9] sm:$0xff] }
 0x261   : > { %10589 = vmatprep.mubr.msk.bf16.mxu1 %vm354_vm1, %v4384_v51  ;;  %v10464_v1 = vpop.f32.mrf.mxu1  ;;  %v3845_v53 = vld [vmem:[#allocation3 + $0xf8] sm:$0xff]  ;;  %v2508_v59 = vadd.f32 %v14691_v19, %v14690_v32  ;;  %v2506_v35 = vadd.f32 %v12813_v15, %v2214_v6  ;;  %v2800_v49 = vadd.f32 %v14692_v33, %v2507_v31  ;;  %v2798_v58 = vadd.f32 %v14693_v26, %v2505_v25  ;;  %v3339_v15 = vpop.f32.mrf.mxu0 }
 0x262   : > { %3535 = vst.msk [vmem:[#allocation3 + $0x129] sm:$0xff] %vm354_vm1, %v3448_v50  ;;  %v3446_v42 = vmax.f32 %v3414_v28, 0.0  ;;  %v3419_v39 = vadd.f32 %v12827_v56, %v3380_v37  ;;  %v3378_v7 = vadd.f32 %v3323_v24, %v3086_v9  ;;  %v3089_v12 = vadd.f32 %v10464_v1, %v2797_v62  ;;  %v4365_v23 = vld [vmem:[#allocation3 + $0xf9] sm:$0xff]  ;;  %v4364_v30 = vld [vmem:[#allocation3 + $0xf1] sm:$0xff] }
 0x263   : > { %v3034_v10 = vpop.f32.mrf.mxu1  ;;  %v3843_v2 = vld [vmem:[#allocation3 + $0xe0] sm:$0xff]  ;;  %v13044_v18 = vpack.c.bf16 %v3845_v53, %v3844_v61  ;;  %v4386_v57 = vpack.c.bf16 %v4365_v23, %v4364_v30  ;;  %v2801_v47 = vadd.f32 %v14694_v41, %v2508_v59  ;;  %v14695_v28 = vld [vmem:[#allocation63_spill] sm:$0xff] }
 0x264   : > { %v4363_v20 = vld [vmem:[#allocation3 + $0xe1] sm:$0xff]  ;;  %3533 = vst.msk [vmem:[#allocation3 + $0x111] sm:$0xff] %vm354_vm1, %v3446_v42  ;;  %v3451_v14 = vmax.f32 %v3419_v39, 0.0  ;;  %v3417_v24 = vadd.f32 %v12827_v56, %v3378_v7  ;;  %v3381_v60 = vadd.f32 %v10498_v3, %v3089_v12  ;;  %v3087_v46 = vadd.f32 %v3034_v10, %v2795_v8  ;;  %v4393_v41 = vld [vmem:[#allocation4 + $0x9] sm:$0xff] }
 0x265   : > { %v10467_v22 = vpop.f32.mrf.mxu1  ;;  %v13040_v51 = vpack.c.bf16 %v3843_v2, %v3842_v16  ;;  %v13042_v45 = vpack.c.bf16 %v4363_v20, %v4362_v36  ;;  %v2799_v37 = vadd.f32 %v14695_v28, %v2506_v35  ;;  %v3848_v59 = vld [vmem:[#allocation3 + $0x120] sm:$0xff] }
 0x266   : > { %3538 = vst.msk [vmem:[#allocation3 + $0x151] sm:$0xff] %vm354_vm1, %v3451_v14  ;;  %v3449_v52 = vmax.f32 %v3417_v24, 0.0  ;;  %v3420_v63 = vadd.f32 %v12827_v56, %v3381_v60  ;;  %v3379_v38 = vadd.f32 %v3326_v34, %v3087_v46  ;;  %v3092_v3 = vadd.f32 %v10467_v22, %v2800_v49  ;;  %v10502_v34 = vpop.f32.mrf.mxu0  ;;  %v4368_v2 = vld [vmem:[#allocation3 + $0x121] sm:$0xff] }
 0x267   : > { %10556 = vmatmul.mubr.msk.bf16.gmra.mxu0 %vm354_vm1, %v13040_v51  ;;  %10590 = vmatmul.mubr.msk.bf16.gmra.mxu1 %vm354_vm1, %v13042_v45  ;;  %v3047_v31 = vpop.f32.mrf.mxu1  ;;  %v3846_v32 = vld [vmem:[#allocation3 + $0x108] sm:$0xff] }
 0x268   : > { %3536 = vst.msk [vmem:[#allocation3 + $0x139] sm:$0xff] %vm354_vm1, %v3449_v52  ;;  %v3452_v25 = vmax.f32 %v3420_v63, 0.0  ;;  %v3418_v11 = vadd.f32 %v12827_v56, %v3379_v38  ;;  %v3384_v0 = vadd.f32 %v10501_v54, %v3092_v3  ;;  %v3090_v62 = vadd.f32 %v3047_v31, %v2798_v58  ;;  %10559 = vmatprep.mubr.msk.bf16.mxu0 %vm354_vm1, %v13044_v18  ;;  %v4366_v19 = vld [vmem:[#allocation3 + $0x109] sm:$0xff]  ;;  %v3342_v35 = vpop.f32.mrf.mxu0  ;;  %v4392_v31 = vld [vmem:[#allocation4 + $0x1] sm:$0xff] }
 0x269   : > { %10593 = vmatprep.mubr.msk.bf16.mxu1 %vm354_vm1, %v4386_v57  ;;  %v10468_v50 = vpop.f32.mrf.mxu1  ;;  %v3849_v55 = vld [vmem:[#allocation3 + $0x128] sm:$0xff] }
 0x26a   : > { %3539 = vst.msk [vmem:[#allocation3 + $0x159] sm:$0xff] %vm354_vm1, %v3452_v25  ;;  %v3450_v9 = vmax.f32 %v3418_v11, 0.0  ;;  %v3423_v44 = vadd.f32 %v12827_v56, %v3384_v0  ;;  %v3382_v6 = vadd.f32 %v3339_v15, %v3090_v62  ;;  %v3093_v1 = vadd.f32 %v10468_v50, %v2801_v47  ;;  %v4369_v39 = vld [vmem:[#allocation3 + $0x129] sm:$0xff] }
 0x26b   : > { %v3050_v8 = vpop.f32.mrf.mxu1  ;;  %v3847_v54 = vld [vmem:[#allocation3 + $0x110] sm:$0xff]  ;;  %v13067_v49 = vpack.c.bf16 %v3849_v55, %v3848_v59  ;;  %v4388_v61 = vpack.c.bf16 %v4369_v39, %v4368_v2  ;;  %v4928_v47 = vld [vmem:[#allocation3 + $0x2] sm:$0xff]  ;;  %v4930_v55 = vld [vmem:[#allocation3 + $0x1a] sm:$0xff] }
 0x26c   : > { %v4367_v42 = vld [vmem:[#allocation3 + $0x111] sm:$0xff]  ;;  %3537 = vst.msk [vmem:[#allocation3 + $0x141] sm:$0xff] %vm354_vm1, %v3450_v9  ;;  %v3455_v7 = vmax.f32 %v3423_v44, 0.0  ;;  %v3421_v12 = vadd.f32 %v12827_v56, %v3382_v6  ;;  %v3385_v53 = vadd.f32 %v10502_v34, %v3093_v1  ;;  %v3091_v23 = vadd.f32 %v3050_v8, %v2799_v37  ;;  %v4394_v44 = vld [vmem:[#allocation4 + $0x19] sm:$0xff]  ;;  %v4396_v1 = vld [vmem:[#allocation4 + $0x31] sm:$0xff] }
 0x26d   : > { %v13063_v10 = vpack.c.bf16 %v3847_v54, %v3846_v32  ;;  %v13065_v33 = vpack.c.bf16 %v4367_v42, %v4366_v19  ;;  %v4372_v63 = vld [vmem:[#allocation3 + $0x151] sm:$0xff]  ;;  %v4424_v37 = vpack.c.bf16 %v4393_v41, %v4392_v31  ;;  %v4931_v8 = vld [vmem:[#allocation3 + $0x22] sm:$0xff]  ;;  %v5657_v19 = vsel %vm964_vm0, %v12921_v40, 0  ;;  %v13111_v59 = vld [vmem:[%s14563_s7 + $0xc] sm:$0xf] }
 0x26e   : > { %3542 = vst.msk [vmem:[#allocation3 + $0x181] sm:$0xff] %vm354_vm1, %v3455_v7  ;;  %v3453_v20 = vmax.f32 %v3421_v12, 0.0  ;;  %v3424_v26 = vadd.f32 %v12827_v56, %v3385_v53  ;;  %v3383_v58 = vadd.f32 %v3342_v35, %v3091_v23  ;;  %v4929_v25 = vld [vmem:[#allocation3 + $0xa] sm:$0xff]  ;;  %v4932_v39 = vld [vmem:[#allocation3 + $0x32] sm:$0xff]  ;;  %v4933_v7 = vld [vmem:[#allocation3 + $0x3a] sm:$0xff]  ;;  %v4961_v12 = vpack.c.bf16 %v4931_v8, %v4930_v55  ;;  %v13113_v35 = vpop.f32.mrf.mxu1 }
 0x26f   : > { %10560 = vmatmul.mubr.msk.bf16.gmra.mxu0 %vm354_vm1, %v13063_v10  ;;  %10594 = vmatmul.mubr.msk.bf16.gmra.mxu1 %vm354_vm1, %v13065_v33  ;;  %v3850_v46 = vld [vmem:[#allocation3 + $0x138] sm:$0xff]  ;;  %v4960_v9 = vpack.c.bf16 %v4929_v25, %v4928_v47  ;;  %v4397_v54 = vld [vmem:[#allocation4 + $0x39] sm:$0xff]  ;;  %v5317_v53 = vsel %vm964_vm0, %v12916_v27, 0  ;;  %v4962_v32 = vpack.c.bf16 %v4933_v7, %v4932_v39  ;;  %v13118_v27 = vld [vmem:[%s14562_s6 + $0x10] sm:$0xf] }
 0x270   : > { %3540 = vst.msk [vmem:[#allocation3 + $0x169] sm:$0xff] %vm354_vm1, %v3453_v20  ;;  %v3456_v14 = vmax.f32 %v3424_v26, 0.0  ;;  %v3422_v24 = vadd.f32 %v12827_v56, %v3383_v58  ;;  %10563 = vmatprep.mubr.msk.bf16.mxu0 %vm354_vm1, %v13067_v49  ;;  %10597 = vmatprep.mubr.msk.bf16.mxu1 %vm354_vm1, %v4388_v61  ;;  %v4370_v16 = vld [vmem:[#allocation3 + $0x139] sm:$0xff]  ;;  %v3852_v56 = vld [vmem:[#allocation3 + $0x150] sm:$0xff]  ;;  %v4426_v23 = vpack.c.bf16 %v4397_v54, %v4396_v1  ;;  %v4399_v2 = vld [vmem:[#allocation4 + $0x51] sm:$0xff] }
 0x271   : > { %v3853_v36 = vld [vmem:[#allocation3 + $0x158] sm:$0xff]  ;;  %v4934_v58 = vld [vmem:[#allocation3 + $0x4a] sm:$0xff]  ;;  %v4939_v41 = vld [vmem:[#allocation3 + $0x82] sm:$0xff] }
 0x272   : > { %3543 = vst.msk [vmem:[#allocation3 + $0x189] sm:$0xff] %vm354_vm1, %v3456_v14  ;;  %v3454_v60 = vmax.f32 %v3422_v24, 0.0  ;;  %v4373_v15 = vld [vmem:[#allocation3 + $0x159] sm:$0xff]  ;;  %v13086_v38 = vpack.c.bf16 %v3853_v36, %v3852_v56  ;;  %v4395_v6 = vld [vmem:[#allocation4 + $0x21] sm:$0xff]  ;;  %v4936_v24 = vld [vmem:[#allocation3 + $0x62] sm:$0xff] }
 0x273   : > { %v3851_v30 = vld [vmem:[#allocation3 + $0x140] sm:$0xff]  ;;  %v4390_v3 = vpack.c.bf16 %v4373_v15, %v4372_v63  ;;  %v4425_v42 = vpack.c.bf16 %v4395_v6, %v4394_v44  ;;  %v4400_v20 = vld [vmem:[#allocation4 + $0x61] sm:$0xff]  ;;  %v4402_v15 = vld [vmem:[#allocation4 + $0x79] sm:$0xff] }
 0x274   : > { %v4371_v22 = vld [vmem:[#allocation3 + $0x141] sm:$0xff]  ;;  %3541 = vst.msk [vmem:[#allocation3 + $0x171] sm:$0xff] %vm354_vm1, %v3454_v60  ;;  %v13082_v57 = vpack.c.bf16 %v3851_v30, %v3850_v46  ;;  %v4398_v40 = vld [vmem:[#allocation4 + $0x49] sm:$0xff]  ;;  %v4937_v60 = vld [vmem:[#allocation3 + $0x6a] sm:$0xff]  ;;  %v13126_v46 = vpop.f32.mrf.mxu1 }
 0x275   : > { %v13084_v52 = vpack.c.bf16 %v4371_v22, %v4370_v16  ;;  %v4401_v26 = vld [vmem:[#allocation4 + $0x69] sm:$0xff]  ;;  %v4427_v14 = vpack.c.bf16 %v4399_v2, %v4398_v40  ;;  %v4964_v30 = vpack.c.bf16 %v4937_v60, %v4936_v24  ;;  %v4403_v56 = vld [vmem:[#allocation4 + $0x81] sm:$0xff]  ;;  %v4404_v63 = vld [vmem:[#allocation4 + $0x91] sm:$0xff] }
 0x276   : > { %v4935_v61 = vld [vmem:[#allocation3 + $0x52] sm:$0xff]  ;;  %v4428_v16 = vpack.c.bf16 %v4401_v26, %v4400_v20  ;;  %v13130_v22 = vpop.f32.mrf.mxu1  ;;  %v4938_v31 = vld [vmem:[#allocation3 + $0x7a] sm:$0xff]  ;;  %v4429_v47 = vpack.c.bf16 %v4403_v56, %v4402_v15  ;;  %v4942_v55 = vld [vmem:[#allocation3 + $0xaa] sm:$0xff] }
 0x277   : > { %10564 = vmatmul.mubr.msk.bf16.gmra.mxu0 %vm354_vm1, %v13082_v57  ;;  %10598 = vmatmul.mubr.msk.bf16.gmra.mxu1 %vm354_vm1, %v13084_v52  ;;  %v3854_v11 = vld [vmem:[#allocation3 + $0x168] sm:$0xff]  ;;  %v4963_v36 = vpack.c.bf16 %v4935_v61, %v4934_v58  ;;  %v4940_v25 = vld [vmem:[#allocation3 + $0x92] sm:$0xff]  ;;  %v4946_v26 = vld [vmem:[#allocation3 + $0xda] sm:$0xff] }
 0x278   : > { %10567 = vmatprep.mubr.msk.bf16.mxu0 %vm354_vm1, %v13086_v38  ;;  %10601 = vmatprep.mubr.msk.bf16.mxu1 %vm354_vm1, %v4390_v3  ;;  %v4374_v62 = vld [vmem:[#allocation3 + $0x169] sm:$0xff]  ;;  %v4407_v44 = vld [vmem:[#allocation4 + $0xb1] sm:$0xff]  ;;  %v4408_v6 = vld [vmem:[#allocation4 + $0xc1] sm:$0xff] }
 0x279   : > { %v4405_v3 = vld [vmem:[#allocation4 + $0x99] sm:$0xff]  ;;  %v4409_v1 = vld [vmem:[#allocation4 + $0xc9] sm:$0xff]  ;;  %v4411_v40 = vld [vmem:[#allocation4 + $0xe1] sm:$0xff] }
 0x27a   : > { %v4943_v8 = vld [vmem:[#allocation3 + $0xb2] sm:$0xff]  ;;  %v4945_v39 = vld [vmem:[#allocation3 + $0xca] sm:$0xff]  ;;  %v4412_v2 = vld [vmem:[#allocation4 + $0xf1] sm:$0xff] }
 0x27b   : > { %v3855_v0 = vld [vmem:[#allocation3 + $0x170] sm:$0xff]  ;;  %v4947_v58 = vld [vmem:[#allocation3 + $0xe2] sm:$0xff]  ;;  %v4949_v24 = vld [vmem:[#allocation3 + $0xfa] sm:$0xff] }
 0x27c   : > { %v4375_v34 = vld [vmem:[#allocation3 + $0x171] sm:$0xff]  ;;  %v13095_v50 = vpack.c.bf16 %v3855_v0, %v3854_v11  ;;  %v4941_v11 = vld [vmem:[#allocation3 + $0x9a] sm:$0xff]  ;;  %v13134_v0 = vpop.f32.mrf.mxu1  ;;  %v4413_v20 = vld [vmem:[#allocation4 + $0xf9] sm:$0xff] }
 0x27d   : > { %v4391_v28 = vpack.c.bf16 %v4375_v34, %v4374_v62  ;;  %v4430_v62 = vpack.c.bf16 %v4405_v3, %v4404_v63  ;;  %v4965_v34 = vpack.c.bf16 %v4939_v41, %v4938_v31  ;;  %v4414_v56 = vld [vmem:[#allocation4 + $0x109] sm:$0xff]  ;;  %v4415_v63 = vld [vmem:[#allocation4 + $0x111] sm:$0xff]  ;;  %v4416_v3 = vld [vmem:[#allocation4 + $0x121] sm:$0xff] }
 0x27e   : > { %v4417_v31 = vld [vmem:[#allocation4 + $0x129] sm:$0xff]  ;;  %v4950_v41 = vld [vmem:[#allocation3 + $0x10a] sm:$0xff] }
 0x27f   : > { %10568 = vmatmul.mubr.msk.bf16.gmra.mxu0 %vm354_vm1, %v13095_v50  ;;  %10602 = vmatmul.mubr.msk.bf16.gmra.mxu1 %vm354_vm1, %v4391_v28  ;;  %v4966_v28 = vpack.c.bf16 %v4941_v11, %v4940_v25  ;;  %v4435_v25 = vpack.c.bf16 %v4415_v63, %v4414_v56  ;;  %v4952_v11 = vld [vmem:[#allocation3 + $0x122] sm:$0xff] }
 0x280   : > { %10607 = vmatprep.mubr.msk.bf16.mxu0 %vm354_vm1, %v4424_v37  ;;  %10641 = vmatprep.mubr.msk.bf16.mxu1 %vm354_vm1, %v4960_v9  ;;  %v13138_v37 = vpop.f32.mrf.mxu1  ;;  %v4406_v9 = vld [vmem:[#allocation4 + $0xa9] sm:$0xff] }
 0x281   : > { %v4431_v54 = vpack.c.bf16 %v4407_v44, %v4406_v9 }
 0x282   : > { %v13142_v7 = vpop.f32.mrf.mxu1 }
 0x287   : > { %10608 = vmatmul.mubr.msk.bf16.vlgmr.msra.gmra.mxu0 %vm354_vm1, %v4425_v42  ;;  %10642 = vmatmul.mubr.msk.bf16.vlgmr.msra.gmra.mxu1 %vm354_vm1, %v4961_v12  ;;  %v4944_v42 = vld [vmem:[#allocation3 + $0xc2] sm:$0xff]  ;;  %v4432_v12 = vpack.c.bf16 %v4409_v1, %v4408_v6 }
 0x288   : > { %10674 = vmatpush3.bf16.msra.mxu0 %v5317_v53  ;;  %10645 = vmatprep.mubr.msk.bf16.mxu1 %vm354_vm1, %v4962_v32  ;;  %v4967_v53 = vpack.c.bf16 %v4943_v8, %v4942_v55  ;;  %v13146_v32 = vpop.f32.mrf.mxu1  ;;  %v4418_v1 = vld [vmem:[#allocation4 + $0x139] sm:$0xff]  ;;  %v4419_v55 = vld [vmem:[#allocation4 + $0x141] sm:$0xff] }
 0x289   : > { %10611 = vmatprep.mubr.msk.bf16.mxu0 %vm354_vm1, %v4426_v23  ;;  %10708 = vmatpush3.bf16.msra.mxu1 %v5657_v19  ;;  %v4968_v23 = vpack.c.bf16 %v4945_v39, %v4944_v42  ;;  %v4410_v19 = vld [vmem:[#allocation4 + $0xd9] sm:$0xff] }
 0x28a   : > { %11134 = vmatprep.subr.msk.bf16.mxu0 %vm964_vm0, %v13111_v59  ;;  %11135 = vmatprep.subr.msk.bf16.mxu1 %vm964_vm0, %v13118_v27  ;;  %v4433_v61 = vpack.c.bf16 %v4411_v40, %v4410_v19  ;;  %v13150_v60 = vpop.f32.mrf.mxu1  ;;  %v9737_v8 = vld [vmem:[%s12272_s17 + $0x78] sm:$0xff]   ;;  %v4437_v19 = vpack.c.bf16 %v4419_v55, %v4418_v1  ;;  %v4956_v40 = vld [vmem:[#allocation3 + $0x152] sm:$0xff] }
 0x28b   : > { %v4421_v42 = vld [vmem:[#allocation4 + $0x159] sm:$0xff]  ;;  %v9718_v39 = vunpack.c.l.bf16 %v9737_v8 }
 0x28c   : > { %v13154_v15 = vpop.f32.mrf.mxu1 }
 0x28f   : > { %10612 = vmatmul.mubr.msk.bf16.gmra.mxu0 %vm354_vm1, %v4427_v14  ;;  %10646 = vmatmul.mubr.msk.bf16.gmra.mxu1 %vm354_vm1, %v4963_v36  ;;  %v4948_v14 = vld [vmem:[#allocation3 + $0xf2] sm:$0xff]  ;;  %v4969_v36 = vpack.c.bf16 %v4947_v58, %v4946_v26  ;;  %v11154_v26 = vld [vmem:[%s14560_s4] ss:$0 sm:$0xff] }
 0x290   : > { %10649 = vmatprep.mubr.msk.bf16.mxu1 %vm354_vm1, %v4964_v30  ;;  %10615 = vmatprep.mubr.msk.bf16.mxu0 %vm354_vm1, %v4428_v16  ;;  %v4434_v16 = vpack.c.bf16 %v4413_v20, %v4412_v2  ;;  %v4970_v30 = vpack.c.bf16 %v4949_v24, %v4948_v14  ;;  %v4957_v2 = vld [vmem:[#allocation3 + $0x15a] sm:$0xff]  ;;  %v3699_v58 = vmul.f32 %v11154_v26, %v9718_v39  ;;  %v4980_v39 = vld [vmem:[#allocation4 + $0x32] sm:$0xff] }
 0x291   : > { %v4974_v56 = vpack.c.bf16 %v4957_v2, %v4956_v40  ;;  %v6241_v2 = vsel %vm964_vm0, %v13118_v27, 0  ;;  %v4982_v27 = vld [vmem:[#allocation4 + $0x4a] sm:$0xff] }
 0x297   : > { %10616 = vmatmul.mubr.msk.bf16.gmra.mxu0 %vm354_vm1, %v4429_v47  ;;  %10650 = vmatmul.mubr.msk.bf16.gmra.mxu1 %vm354_vm1, %v4965_v34  ;;  %v4951_v47 = vld [vmem:[#allocation3 + $0x112] sm:$0xff]  ;;  %v13158_v34 = vpop.f32.mrf.mxu1 }
 0x298   : > { %10653 = vmatprep.mubr.msk.bf16.mxu1 %vm354_vm1, %v4966_v28  ;;  %10619 = vmatprep.mubr.msk.bf16.mxu0 %vm354_vm1, %v4430_v62  ;;  %v4953_v62 = vld [vmem:[#allocation3 + $0x12a] sm:$0xff]  ;;  %v4436_v28 = vpack.c.bf16 %v4417_v31, %v4416_v3  ;;  %v4971_v9 = vpack.c.bf16 %v4951_v47, %v4950_v41  ;;  %v4422_v41 = vld [vmem:[#allocation4 + $0x169] sm:$0xff]  ;;  %v4423_v47 = vld [vmem:[#allocation4 + $0x171] sm:$0xff] }
 0x299   : > { %v4972_v44 = vpack.c.bf16 %v4953_v62, %v4952_v11  ;;  %v13162_v6 = vpop.f32.mrf.mxu1  ;;  %v4977_v11 = vld [vmem:[#allocation4 + $0xa] sm:$0xff]  ;;  %v4958_v62 = vld [vmem:[#allocation3 + $0x16a] sm:$0xff] }
 0x29b   : > { %v13167_v20 = vpop.f32.mrf.mxu1 }
 0x29d   : > { %v13177_v63 = vpop.f32.mrf.mxu1 }
 0x29f   : > { %10620 = vmatmul.mubr.msk.bf16.gmra.mxu0 %vm354_vm1, %v4431_v54  ;;  %10654 = vmatmul.mubr.msk.bf16.gmra.mxu1 %vm354_vm1, %v4967_v53  ;;  %v4420_v54 = vld [vmem:[#allocation4 + $0x151] sm:$0xff] }
 0x2a0   : > { %10657 = vmatprep.mubr.msk.bf16.mxu1 %vm354_vm1, %v4968_v23  ;;  %10623 = vmatprep.mubr.msk.bf16.mxu0 %vm354_vm1, %v4432_v12  ;;  %v9719_v12 = vunpack.c.h.bf16 %v9737_v8  ;;  %v4954_v53 = vld [vmem:[#allocation3 + $0x13a] sm:$0xff]  ;;  %v4955_v23 = vld [vmem:[#allocation3 + $0x142] sm:$0xff]  ;;  %v4438_v14 = vpack.c.bf16 %v4421_v42, %v4420_v54  ;;  %v4978_v54 = vld [vmem:[#allocation4 + $0x1a] sm:$0xff] }
 0x2a1   : > { %v4973_v24 = vpack.c.bf16 %v4955_v23, %v4954_v53  ;;  %v4979_v42 = vld [vmem:[#allocation4 + $0x22] sm:$0xff] }
 0x2a2   : > { %v5009_v53 = vpack.c.bf16 %v4979_v42, %v4978_v54  ;;  %v4996_v54 = vld [vmem:[#allocation4 + $0xf2] sm:$0xff]  ;;  %v4997_v42 = vld [vmem:[#allocation4 + $0xfa] sm:$0xff] }
 0x2a7   : > { %10624 = vmatmul.mubr.msk.bf16.gmra.mxu0 %vm354_vm1, %v4433_v61  ;;  %10658 = vmatmul.mubr.msk.bf16.gmra.mxu1 %vm354_vm1, %v4969_v36  ;;  %v3700_v61 = vmul.f32 %v11154_v26, %v9719_v12  ;;  %v4981_v12 = vld [vmem:[#allocation4 + $0x3a] sm:$0xff]  ;;  %v13206_v26 = vld [vmem:[%s14563_s7 + $0x10] sm:$0xf] }
 0x2a8   : > { %10661 = vmatprep.mubr.msk.bf16.mxu1 %vm354_vm1, %v4970_v30  ;;  %10627 = vmatprep.mubr.msk.bf16.mxu0 %vm354_vm1, %v4434_v16  ;;  %v11155_v16 = vld [vmem:[%s14561_s5] ss:$0 sm:$0xff]  ;;  %v5010_v40 = vpack.c.bf16 %v4981_v12, %v4980_v39 }
 0x2a9   : > { %v3738_v36 = vadd.f32 %v11155_v16, %v3699_v58  ;;  %v3739_v30 = vadd.f32 %v11155_v16, %v3700_v61  ;;  %v4983_v58 = vld [vmem:[#allocation4 + $0x52] sm:$0xff]  ;;  %v4985_v61 = vld [vmem:[#allocation4 + $0x6a] sm:$0xff] }
 0x2ab   : > { %v3770_v3 = vmax.f32 %v3738_v36, 0.0  ;;  %v3771_v31 = vmax.f32 %v3739_v30, 0.0  ;;  %v4986_v36 = vld [vmem:[#allocation4 + $0x7a] sm:$0xff]  ;;  %v4987_v30 = vld [vmem:[#allocation4 + $0x82] sm:$0xff] }
 0x2ad   : > { %3804 = vst.msk [vmem:[#allocation4 + $0x181] sm:$0xff] %vm3773_vm3, %v3770_v3  ;;  %3805 = vst.msk [vmem:[#allocation4 + $0x189] sm:$0xff] %vm3773_vm3, %v3771_v31  ;;  %v4989_v3 = vld [vmem:[#allocation4 + $0x9a] sm:$0xff]  ;;  %v5013_v31 = vpack.c.bf16 %v4987_v30, %v4986_v36 }
 0x2af   : > { %10628 = vmatmul.mubr.msk.bf16.gmra.mxu0 %vm354_vm1, %v4435_v25  ;;  %10662 = vmatmul.mubr.msk.bf16.gmra.mxu1 %vm354_vm1, %v4971_v9  ;;  %v4976_v25 = vld [vmem:[#allocation4 + $0x2] sm:$0xff]  ;;  %v4439_v9 = vpack.c.bf16 %v4423_v47, %v4422_v41 }
 0x2b0   : > { %10665 = vmatprep.mubr.msk.bf16.mxu1 %vm354_vm1, %v4972_v44  ;;  %10631 = vmatprep.mubr.msk.bf16.mxu0 %vm354_vm1, %v4436_v28  ;;  %v4959_v28 = vld [vmem:[#allocation3 + $0x172] sm:$0xff]  ;;  %v13183_v44 = vpop.f32.mrf.mxu1  ;;  %v5008_v1 = vpack.c.bf16 %v4977_v11, %v4976_v25  ;;  %v4991_v25 = vld [vmem:[#allocation4 + $0xb2] sm:$0xff] }
 0x2b1   : > { %v4975_v55 = vpack.c.bf16 %v4959_v28, %v4958_v62  ;;  %v4992_v11 = vld [vmem:[#allocation4 + $0xc2] sm:$0xff]  ;;  %v4993_v62 = vld [vmem:[#allocation4 + $0xca] sm:$0xff] }
 0x2b2   : > { %v13187_v8 = vpop.f32.mrf.mxu1 }
 0x2b4   : > { %v13192_v23 = vpop.f32.mrf.mxu1 }
 0x2b7   : > { %10632 = vmatmul.mubr.msk.bf16.gmra.mxu0 %vm354_vm1, %v4437_v19  ;;  %10666 = vmatmul.mubr.msk.bf16.gmra.mxu1 %vm354_vm1, %v4973_v24  ;;  %v5901_v19 = vsel %vm964_vm0, %v13111_v59, 0  ;;  %v13211_v59 = vld [vmem:[%s14562_s6 + $0x14] sm:$0xf] }
 0x2b8   : > { %10669 = vmatprep.mubr.msk.bf16.mxu1 %vm354_vm1, %v4974_v56  ;;  %10635 = vmatprep.mubr.msk.bf16.mxu0 %vm354_vm1, %v4438_v14  ;;  %v5011_v14 = vpack.c.bf16 %v4983_v58, %v4982_v27  ;;  %v4988_v56 = vld [vmem:[#allocation4 + $0x92] sm:$0xff] }
 0x2b9   : > { %v5014_v47 = vpack.c.bf16 %v4989_v3, %v4988_v56  ;;  %v5007_v3 = vld [vmem:[#allocation4 + $0x172] sm:$0xff] }
 0x2bf   : > { %10636 = vmatmul.mubr.msk.bf16.gmra.mxu0 %vm354_vm1, %v4439_v9  ;;  %10670 = vmatmul.mubr.msk.bf16.gmra.mxu1 %vm354_vm1, %v4975_v55  ;;  %v4995_v55 = vld [vmem:[#allocation4 + $0xe2] sm:$0xff] }
 0x2c0   : > { %10709 = vmatprep.mubr.msk.bf16.mxu1 %vm354_vm1, %v12899_v43  ;;  %10675 = vmatprep.mubr.msk.bf16.mxu0 %vm354_vm1, %v5008_v1  ;;  %v13201_v43 = vpop.f32.mrf.mxu1  ;;  %v5016_v1 = vpack.c.bf16 %v4993_v62, %v4992_v11  ;;  %v6097_v11 = vld [vmem:[#allocation3 + $0x21] sm:$0xff] }
 0x2c2   : > { %v13220_v24 = vpop.f32.mrf.mxu1 }
 0x2c7   : > { %10676 = vmatmul.mubr.msk.bf16.vlgmr.msra.gmra.mxu0 %vm354_vm1, %v5009_v53  ;;  %10710 = vmatmul.mubr.msk.bf16.vlgmr.msra.gmra.mxu1 %vm354_vm1, %v12901_v29  ;;  %v4984_v29 = vld [vmem:[#allocation4 + $0x62] sm:$0xff]  ;;  %v5018_v53 = vpack.c.bf16 %v4997_v42, %v4996_v54  ;;  %v5562_v54 = vld [vmem:[#allocation4 + $0x30] sm:$0xff]  ;;  %v5563_v42 = vld [vmem:[#allocation4 + $0x38] sm:$0xff] }
 0x2c8   : > { %10742 = vmatpush3.bf16.msra.mxu0 %v5901_v19  ;;  %10713 = vmatprep.mubr.msk.bf16.mxu1 %vm354_vm1, %v12945_v21  ;;  %v5012_v16 = vpack.c.bf16 %v4985_v61, %v4984_v29  ;;  %v13225_v21 = vpop.f32.mrf.mxu1  ;;  %v4999_v19 = vld [vmem:[#allocation4 + $0x112] sm:$0xff]  ;;  %v5003_v61 = vld [vmem:[#allocation4 + $0x142] sm:$0xff] }
 0x2c9   : > { %10679 = vmatprep.mubr.msk.bf16.mxu0 %vm354_vm1, %v5010_v40  ;;  %10776 = vmatpush3.bf16.msra.mxu1 %v6241_v2  ;;  %v5000_v40 = vld [vmem:[#allocation4 + $0x122] sm:$0xff]  ;;  %v5001_v2 = vld [vmem:[#allocation4 + $0x12a] sm:$0xff] }
 0x2ca   : > { %11136 = vmatprep.subr.msk.bf16.mxu0 %vm964_vm0, %v13206_v26  ;;  %11137 = vmatprep.subr.msk.bf16.mxu1 %vm964_vm0, %v13211_v59  ;;  %v13230_v41 = vpop.f32.mrf.mxu1  ;;  %v5020_v29 = vpack.c.bf16 %v5001_v2, %v5000_v40  ;;  %v5593_v40 = vpack.c.bf16 %v5563_v42, %v5562_v54  ;;  %v6101_v2 = vld [vmem:[#allocation3 + $0x51] sm:$0xff]  ;;  %v6105_v42 = vld [vmem:[#allocation3 + $0x81] sm:$0xff] }
 0x2cf   : > { %10680 = vmatmul.mubr.msk.bf16.gmra.mxu0 %vm354_vm1, %v5011_v14  ;;  %10714 = vmatmul.mubr.msk.bf16.gmra.mxu1 %vm354_vm1, %v12947_v48  ;;  %v13235_v48 = vpop.f32.mrf.mxu1  ;;  %v5004_v14 = vld [vmem:[#allocation4 + $0x152] sm:$0xff] }
 0x2d0   : > { %10717 = vmatprep.mubr.msk.bf16.mxu1 %vm354_vm1, %v12979_v13  ;;  %10683 = vmatprep.mubr.msk.bf16.mxu0 %vm354_vm1, %v5012_v16  ;;  %v4990_v13 = vld [vmem:[#allocation4 + $0xaa] sm:$0xff]  ;;  %v5005_v16 = vld [vmem:[#allocation4 + $0x15a] sm:$0xff] }
 0x2d1   : > { %v5015_v28 = vpack.c.bf16 %v4991_v25, %v4990_v13  ;;  %v13240_v9 = vpop.f32.mrf.mxu1  ;;  %v5022_v56 = vpack.c.bf16 %v5005_v16, %v5004_v14  ;;  %v5543_v13 = vld [vmem:[#allocation3 + $0x188] sm:$0xff] }
 0x2d7   : > { %10684 = vmatmul.mubr.msk.bf16.gmra.mxu0 %vm354_vm1, %v5013_v31  ;;  %10718 = vmatmul.mubr.msk.bf16.gmra.mxu1 %vm354_vm1, %v12981_v4  ;;  %v13245_v4 = vpop.f32.mrf.mxu1  ;;  %v5560_v31 = vld [vmem:[#allocation4 + $0x18] sm:$0xff] }
 0x2d8   : > { %10721 = vmatprep.mubr.msk.bf16.mxu1 %vm354_vm1, %v13010_v17  ;;  %10687 = vmatprep.mubr.msk.bf16.mxu0 %vm354_vm1, %v5014_v47  ;;  %v4994_v17 = vld [vmem:[#allocation4 + $0xda] sm:$0xff] }
 0x2d9   : > { %v5017_v39 = vpack.c.bf16 %v4995_v55, %v4994_v17  ;;  %v13250_v12 = vpop.f32.mrf.mxu1  ;;  %v5561_v47 = vld [vmem:[#allocation4 + $0x20] sm:$0xff] }
 0x2df   : > { %10688 = vmatmul.mubr.msk.bf16.gmra.mxu0 %vm354_vm1, %v5015_v28  ;;  %10722 = vmatmul.mubr.msk.bf16.gmra.mxu1 %vm354_vm1, %v13012_v5  ;;  %v13255_v5 = vpop.f32.mrf.mxu1  ;;  %v5542_v28 = vld [vmem:[#allocation3 + $0x180] sm:$0xff] }
 0x2e0   : > { %10725 = vmatprep.mubr.msk.bf16.mxu1 %vm354_vm1, %v13040_v51  ;;  %10691 = vmatprep.mubr.msk.bf16.mxu0 %vm354_vm1, %v5016_v1  ;;  %v4998_v51 = vld [vmem:[#allocation4 + $0x10a] sm:$0xff]  ;;  %v5592_v1 = vpack.c.bf16 %v5561_v47, %v5560_v31  ;;  %v5559_v17 = vpack.c.bf16 %v5543_v13, %v5542_v28  ;;  %v5569_v28 = vld [vmem:[#allocation4 + $0x80] sm:$0xff] }
 0x2e1   : > { %v5019_v27 = vpack.c.bf16 %v4999_v19, %v4998_v51  ;;  %v13260_v58 = vpop.f32.mrf.mxu1  ;;  %v5565_v51 = vld [vmem:[#allocation4 + $0x50] sm:$0xff]  ;;  %v5567_v47 = vld [vmem:[#allocation4 + $0x68] sm:$0xff] }
 0x2e7   : > { %10692 = vmatmul.mubr.msk.bf16.gmra.mxu0 %vm354_vm1, %v5017_v39  ;;  %10726 = vmatmul.mubr.msk.bf16.gmra.mxu1 %vm354_vm1, %v13044_v18  ;;  %v13265_v18 = vpop.f32.mrf.mxu1  ;;  %v6099_v39 = vld [vmem:[#allocation3 + $0x39] sm:$0xff] }
 0x2e8   : > { %10729 = vmatprep.mubr.msk.bf16.mxu1 %vm354_vm1, %v13063_v10  ;;  %10695 = vmatprep.mubr.msk.bf16.mxu0 %vm354_vm1, %v5018_v53  ;;  %v5002_v10 = vld [vmem:[#allocation4 + $0x13a] sm:$0xff]  ;;  %v5564_v53 = vld [vmem:[#allocation4 + $0x48] sm:$0xff] }
 0x2e9   : > { %v5021_v36 = vpack.c.bf16 %v5003_v61, %v5002_v10  ;;  %v13270_v30 = vpop.f32.mrf.mxu1  ;;  %v6485_v10 = vsel %vm964_vm0, %v13206_v26, 0  ;;  %v6100_v61 = vld [vmem:[#allocation3 + $0x49] sm:$0xff]  ;;  %v5594_v14 = vpack.c.bf16 %v5565_v51, %v5564_v53  ;;  %v6102_v51 = vld [vmem:[#allocation3 + $0x61] sm:$0xff] }
 0x2ea   : > { %v6130_v16 = vpack.c.bf16 %v6101_v2, %v6100_v61  ;;  %v13304_v26 = vld [vmem:[%s14562_s6 + $0x18] sm:$0xf] }
 0x2ef   : > { %10696 = vmatmul.mubr.msk.bf16.gmra.mxu0 %vm354_vm1, %v5019_v27  ;;  %10730 = vmatmul.mubr.msk.bf16.gmra.mxu1 %vm354_vm1, %v13067_v49  ;;  %v13275_v49 = vpop.f32.mrf.mxu1  ;;  %v6098_v27 = vld [vmem:[#allocation3 + $0x31] sm:$0xff] }
 0x2f0   : > { %10733 = vmatprep.mubr.msk.bf16.mxu1 %vm354_vm1, %v13082_v57  ;;  %10699 = vmatprep.mubr.msk.bf16.mxu0 %vm354_vm1, %v5020_v29  ;;  %v5006_v57 = vld [vmem:[#allocation4 + $0x16a] sm:$0xff]  ;;  %v6129_v29 = vpack.c.bf16 %v6099_v39, %v6098_v27 }
 0x2f1   : > { %v5023_v25 = vpack.c.bf16 %v5007_v3, %v5006_v57  ;;  %v13280_v62 = vpop.f32.mrf.mxu1  ;;  %v13299_v3 = vld [vmem:[%s14563_s7 + $0x14] sm:$0xf] }
 0x2f7   : > { %10700 = vmatmul.mubr.msk.bf16.gmra.mxu0 %vm354_vm1, %v5021_v36  ;;  %10734 = vmatmul.mubr.msk.bf16.gmra.mxu1 %vm354_vm1, %v13086_v38  ;;  %v6096_v38 = vld [vmem:[#allocation3 + $0x19] sm:$0xff]  ;;  %v6825_v36 = vsel %vm964_vm0, %v13211_v59, 0  ;;  %v5566_v59 = vld [vmem:[#allocation4 + $0x60] sm:$0xff] }
 0x2f8   : > { %10737 = vmatprep.mubr.msk.bf16.mxu1 %vm354_vm1, %v13095_v50  ;;  %10703 = vmatprep.mubr.msk.bf16.mxu0 %vm354_vm1, %v5022_v56  ;;  %v6128_v55 = vpack.c.bf16 %v6097_v11, %v6096_v38  ;;  %v13284_v50 = vpop.f32.mrf.mxu1  ;;  %v5568_v11 = vld [vmem:[#allocation4 + $0x78] sm:$0xff]  ;;  %v5595_v54 = vpack.c.bf16 %v5567_v47, %v5566_v59 }
 0x2f9   : > { %v6103_v38 = vld [vmem:[#allocation3 + $0x69] sm:$0xff] }
 0x2fa   : > { %v13288_v19 = vpop.f32.mrf.mxu1 }
 0x2ff   : > { %10704 = vmatmul.mubr.msk.bf16.gmra.mxu0 %vm354_vm1, %v5023_v25  ;;  %10738 = vmatmul.mubr.msk.bf16.gmra.mxu1 %vm354_vm1, %v5559_v17 }
 0x300   : > { %10777 = vmatprep.mubr.msk.bf16.mxu1 %vm354_vm1, %v6128_v55  ;;  %10743 = vmatprep.mubr.msk.bf16.mxu0 %vm354_vm1, %v5592_v1 }
 0x307   : > { %v10541_v56 = vpop.f32.mrf.mxu0  ;;  %v10575_v57 = vpop.f32.mrf.mxu1  ;;  %10744 = vmatmul.mubr.msk.bf16.vlgmr.msra.gmra.mxu0 %vm354_vm1, %v5593_v40  ;;  %10778 = vmatmul.mubr.msk.bf16.vlgmr.msra.gmra.mxu1 %vm354_vm1, %v6129_v29  ;;  %v5596_v40 = vpack.c.bf16 %v5569_v28, %v5568_v11  ;;  %v6104_v29 = vld [vmem:[#allocation3 + $0x79] sm:$0xff] }
 0x308   : > { %v4226_v31 = vadd.f32 %v10541_v56, %v13113_v35  ;;  %10810 = vmatpush3.bf16.msra.mxu0 %v6485_v10  ;;  %10781 = vmatprep.mubr.msk.bf16.mxu1 %vm354_vm1, %v6130_v16  ;;  %v6107_v28 = vld [vmem:[#allocation3 + $0x99] sm:$0xff] }
 0x309   : > { %v4217_v13 = vpop.f32.mrf.mxu0  ;;  %v4525_v25 = vpop.f32.mrf.mxu1  ;;  %10747 = vmatprep.mubr.msk.bf16.mxu0 %vm354_vm1, %v5594_v14  ;;  %10844 = vmatpush3.bf16.msra.mxu1 %v6825_v36  ;;  %v6132_v14 = vpack.c.bf16 %v6105_v42, %v6104_v29  ;;  %v6106_v42 = vld [vmem:[#allocation3 + $0x91] sm:$0xff] }
 0x30a   : > { %v13309_v1 = vadd.f32 %v10575_v57, %v4226_v31  ;;  %v4218_v17 = vadd.f32 %v4217_v13, %v13126_v46  ;;  %11138 = vmatprep.subr.msk.bf16.mxu0 %vm964_vm0, %v13299_v3  ;;  %11139 = vmatprep.subr.msk.bf16.mxu1 %vm964_vm0, %v13304_v26  ;;  %v6131_v46 = vpack.c.bf16 %v6103_v38, %v6102_v51  ;;  %v5570_v57 = vld [vmem:[#allocation4 + $0x90] sm:$0xff]  ;;  %v5571_v31 = vld [vmem:[#allocation4 + $0x98] sm:$0xff] }
 0x30b   : > { %v10542_v35 = vpop.f32.mrf.mxu0  ;;  %v10576_v55 = vpop.f32.mrf.mxu1  ;;  %v5573_v13 = vld [vmem:[#allocation4 + $0xb0] sm:$0xff] }
 0x30c   : > { %v13316_v39 = vadd.f32 %v4525_v25, %v4218_v17  ;;  %v4229_v53 = vadd.f32 %v10542_v35, %v13130_v22  ;;  %v5597_v35 = vpack.c.bf16 %v5571_v31, %v5570_v57 }
 0x30d   : > { %v4220_v2 = vpop.f32.mrf.mxu0  ;;  %v4528_v27 = vpop.f32.mrf.mxu1 }
 0x30e   : > { %v13319_v10 = vadd.f32 %v10576_v55, %v4229_v53  ;;  %v4221_v61 = vadd.f32 %v4220_v2, %v13134_v0  ;;  %v5572_v0 = vld [vmem:[#allocation4 + $0xa8] sm:$0xff]  ;;  %v6133_v2 = vpack.c.bf16 %v6107_v28, %v6106_v42 }
 0x30f   : > { %v10545_v16 = vpop.f32.mrf.mxu0  ;;  %v10579_v36 = vpop.f32.mrf.mxu1  ;;  %10748 = vmatmul.mubr.msk.bf16.gmra.mxu0 %vm354_vm1, %v5595_v54  ;;  %10782 = vmatmul.mubr.msk.bf16.gmra.mxu1 %vm354_vm1, %v6131_v46  ;;  %v6109_v55 = vld [vmem:[#allocation3 + $0xb1] sm:$0xff]  ;;  %v5598_v53 = vpack.c.bf16 %v5573_v13, %v5572_v0  ;;  %v6111_v13 = vld [vmem:[#allocation3 + $0xc9] sm:$0xff] }
 0x310   : > { %v13324_v56 = vadd.f32 %v4528_v27, %v4221_v61  ;;  %v4242_v22 = vadd.f32 %v10545_v16, %v13138_v37  ;;  %10785 = vmatprep.mubr.msk.bf16.mxu1 %vm354_vm1, %v6132_v14  ;;  %10751 = vmatprep.mubr.msk.bf16.mxu0 %vm354_vm1, %v5596_v40  ;;  %v6108_v27 = vld [vmem:[#allocation3 + $0xa9] sm:$0xff] }
 0x311   : > { %v4233_v59 = vpop.f32.mrf.mxu0  ;;  %v4541_v47 = vpop.f32.mrf.mxu1 }
 0x312   : > { %v13329_v25 = vadd.f32 %v10579_v36, %v4242_v22  ;;  %v4234_v11 = vadd.f32 %v4233_v59, %v13142_v7  ;;  %v6134_v7 = vpack.c.bf16 %v6109_v55, %v6108_v27  ;;  %v5574_v36 = vld [vmem:[#allocation4 + $0xc0] sm:$0xff]  ;;  %v5575_v22 = vld [vmem:[#allocation4 + $0xc8] sm:$0xff] }
 0x313   : > { %v10546_v17 = vpop.f32.mrf.mxu0  ;;  %v10580_v38 = vpop.f32.mrf.mxu1  ;;  %v5577_v59 = vld [vmem:[#allocation4 + $0xe0] sm:$0xff] }
 0x314   : > { %v13332_v37 = vadd.f32 %v4541_v47, %v4234_v11  ;;  %v4245_v54 = vadd.f32 %v10546_v17, %v13146_v32  ;;  %v5599_v17 = vpack.c.bf16 %v5575_v22, %v5574_v36 }
 0x315   : > { %v4236_v51 = vpop.f32.mrf.mxu0  ;;  %v4544_v40 = vpop.f32.mrf.mxu1 }
 0x316   : > { %v13335_v46 = vadd.f32 %v10580_v38, %v4245_v54  ;;  %v4237_v29 = vadd.f32 %v4236_v51, %v13150_v60  ;;  %v5576_v60 = vld [vmem:[#allocation4 + $0xd8] sm:$0xff] }
 0x317   : > { %v10549_v61 = vpop.f32.mrf.mxu0  ;;  %v10583_v14 = vpop.f32.mrf.mxu1  ;;  %10752 = vmatmul.mubr.msk.bf16.gmra.mxu0 %vm354_vm1, %v5597_v35  ;;  %10786 = vmatmul.mubr.msk.bf16.gmra.mxu1 %vm354_vm1, %v6133_v2  ;;  %v6110_v35 = vld [vmem:[#allocation3 + $0xc1] sm:$0xff]  ;;  %v5600_v55 = vpack.c.bf16 %v5577_v59, %v5576_v60 }
 0x318   : > { %v13340_v16 = vadd.f32 %v4544_v40, %v4237_v29  ;;  %v4258_v32 = vadd.f32 %v10549_v61, %v13154_v15  ;;  %10789 = vmatprep.mubr.msk.bf16.mxu1 %vm354_vm1, %v6134_v7  ;;  %10755 = vmatprep.mubr.msk.bf16.mxu0 %vm354_vm1, %v5598_v53  ;;  %v6135_v53 = vpack.c.bf16 %v6111_v13, %v6110_v35  ;;  %v5579_v7 = vld [vmem:[#allocation4 + $0xf8] sm:$0xff] }
 0x319   : > { %v4249_v57 = vpop.f32.mrf.mxu0  ;;  %v4557_v31 = vpop.f32.mrf.mxu1 }
 0x31a   : > { %v13345_v47 = vadd.f32 %v10583_v14, %v4258_v32  ;;  %v4250_v0 = vadd.f32 %v4249_v57, %v13158_v34  ;;  %v5581_v32 = vld [vmem:[#allocation4 + $0x110] sm:$0xff] }
 0x31b   : > { %v10550_v11 = vpop.f32.mrf.mxu0  ;;  %v10584_v28 = vpop.f32.mrf.mxu1  ;;  %v6115_v57 = vld [vmem:[#allocation3 + $0xf9] sm:$0xff] }
 0x31c   : > { %v13348_v38 = vadd.f32 %v4557_v31, %v4250_v0  ;;  %v4261_v15 = vadd.f32 %v10550_v11, %v13162_v6  ;;  %v5578_v6 = vld [vmem:[#allocation4 + $0xf0] sm:$0xff]  ;;  %v6114_v0 = vld [vmem:[#allocation3 + $0xf1] sm:$0xff] }
 0x31d   : > { %v4252_v54 = vpop.f32.mrf.mxu0  ;;  %v4560_v42 = vpop.f32.mrf.mxu1  ;;  %v5601_v59 = vpack.c.bf16 %v5579_v7, %v5578_v6  ;;  %v6119_v7 = vld [vmem:[#allocation3 + $0x129] sm:$0xff] }
 0x31e   : > { %v13351_v51 = vadd.f32 %v10584_v28, %v4261_v15  ;;  %v4253_v40 = vadd.f32 %v4252_v54, %v13167_v20  ;;  %v5580_v20 = vld [vmem:[#allocation4 + $0x108] sm:$0xff] }
 0x31f   : > { %v10553_v2 = vpop.f32.mrf.mxu0  ;;  %v10587_v27 = vpop.f32.mrf.mxu1  ;;  %10756 = vmatmul.mubr.msk.bf16.gmra.mxu0 %vm354_vm1, %v5599_v17  ;;  %10790 = vmatmul.mubr.msk.bf16.gmra.mxu1 %vm354_vm1, %v6135_v53  ;;  %v5602_v13 = vpack.c.bf16 %v5581_v32, %v5580_v20  ;;  %v6137_v17 = vpack.c.bf16 %v6115_v57, %v6114_v0  ;;  %v5583_v53 = vld [vmem:[#allocation4 + $0x128] sm:$0xff]  ;;  %v6118_v32 = vld [vmem:[#allocation3 + $0x121] sm:$0xff] }
 0x320   : > { %v13356_v34 = vadd.f32 %v4560_v42, %v4253_v40  ;;  %v4274_v29 = vadd.f32 %v10553_v2, %v13177_v63  ;;  %10793 = vmatprep.mubr.msk.bf16.mxu1 %vm354_vm1, %v13042_v45  ;;  %10759 = vmatprep.mubr.msk.bf16.mxu0 %vm354_vm1, %v5600_v55 }
 0x321   : > { %v4265_v61 = vpop.f32.mrf.mxu0  ;;  %v4573_v14 = vpop.f32.mrf.mxu1 }
 0x322   : > { %v13362_v36 = vadd.f32 %v10587_v27, %v4274_v29  ;;  %v4266_v22 = vadd.f32 %v4265_v61, %v13183_v44  ;;  %v5585_v27 = vld [vmem:[#allocation4 + $0x140] sm:$0xff] }
 0x323   : > { %v10554_v31 = vpop.f32.mrf.mxu0  ;;  %v10588_v60 = vpop.f32.mrf.mxu1 }
 0x324   : > { %v13365_v63 = vadd.f32 %v4573_v14, %v4266_v22  ;;  %v4277_v45 = vadd.f32 %v10554_v31, %v13187_v8  ;;  %v5582_v8 = vld [vmem:[#allocation4 + $0x120] sm:$0xff] }
 0x325   : > { %v4268_v11 = vpop.f32.mrf.mxu0  ;;  %v4576_v28 = vpop.f32.mrf.mxu1  ;;  %v5603_v20 = vpack.c.bf16 %v5583_v53, %v5582_v8  ;;  %v6123_v8 = vld [vmem:[#allocation3 + $0x159] sm:$0xff] }
 0x326   : > { %v13368_v15 = vadd.f32 %v10588_v60, %v4277_v45  ;;  %v4269_v35 = vadd.f32 %v4268_v11, %v13192_v23  ;;  %v5584_v23 = vld [vmem:[#allocation4 + $0x138] sm:$0xff]  ;;  %v6139_v60 = vpack.c.bf16 %v6119_v7, %v6118_v32 }
 0x327   : > { %v10557_v55 = vpop.f32.mrf.mxu0  ;;  %v10591_v54 = vpop.f32.mrf.mxu1  ;;  %10760 = vmatmul.mubr.msk.bf16.gmra.mxu0 %vm354_vm1, %v5601_v59  ;;  %10794 = vmatmul.mubr.msk.bf16.gmra.mxu1 %vm354_vm1, %v6137_v17  ;;  %v5604_v22 = vpack.c.bf16 %v5585_v27, %v5584_v23  ;;  %v6122_v27 = vld [vmem:[#allocation3 + $0x151] sm:$0xff] }
 0x328   : > { %v13373_v44 = vadd.f32 %v4576_v28, %v4269_v35  ;;  %v4290_v42 = vadd.f32 %v10557_v55, %v13201_v43  ;;  %10797 = vmatprep.mubr.msk.bf16.mxu1 %vm354_vm1, %v13065_v33  ;;  %10763 = vmatprep.mubr.msk.bf16.mxu0 %vm354_vm1, %v5602_v13  ;;  %v5587_v28 = vld [vmem:[#allocation4 + $0x158] sm:$0xff]  ;;  %v5589_v55 = vld [vmem:[#allocation4 + $0x170] sm:$0xff] }
 0x329   : > { %v4281_v40 = vpop.f32.mrf.mxu0  ;;  %v4589_v2 = vpop.f32.mrf.mxu1 }
 0x32a   : > { %v13379_v29 = vadd.f32 %v10591_v54, %v4290_v42  ;;  %v4282_v6 = vadd.f32 %v4281_v40, %v13220_v24 }
 0x32b   : > { %v10558_v61 = vpop.f32.mrf.mxu0  ;;  %v10592_v14 = vpop.f32.mrf.mxu1 }
 0x32c   : > { %v13382_v43 = vadd.f32 %v4589_v2, %v4282_v6  ;;  %v4293_v33 = vadd.f32 %v10558_v61, %v13225_v21  ;;  %v5586_v21 = vld [vmem:[#allocation4 + $0x150] sm:$0xff] }
 0x32d   : > { %v4284_v57 = vpop.f32.mrf.mxu0  ;;  %v4592_v31 = vpop.f32.mrf.mxu1  ;;  %v5605_v2 = vpack.c.bf16 %v5587_v28, %v5586_v21 }
 0x32e   : > { %v13385_v59 = vadd.f32 %v10592_v14, %v4293_v33  ;;  %v4285_v45 = vadd.f32 %v4284_v57, %v13230_v41  ;;  %v5588_v41 = vld [vmem:[#allocation4 + $0x168] sm:$0xff]  ;;  %v6141_v14 = vpack.c.bf16 %v6123_v8, %v6122_v27 }
 0x32f   : > { %v10561_v0 = vpop.f32.mrf.mxu0  ;;  %v10595_v13 = vpop.f32.mrf.mxu1  ;;  %10764 = vmatmul.mubr.msk.bf16.gmra.mxu0 %vm354_vm1, %v5603_v20  ;;  %10798 = vmatmul.mubr.msk.bf16.gmra.mxu1 %vm354_vm1, %v6139_v60  ;;  %v5606_v6 = vpack.c.bf16 %v5589_v55, %v5588_v41  ;;  %v6124_v20 = vld [vmem:[#allocation3 + $0x169] sm:$0xff] }
 0x330   : > { %v13390_v24 = vadd.f32 %v4592_v31, %v4285_v45  ;;  %v4306_v11 = vadd.f32 %v10561_v0, %v13235_v48  ;;  %10801 = vmatprep.mubr.msk.bf16.mxu1 %vm354_vm1, %v13084_v52  ;;  %10767 = vmatprep.mubr.msk.bf16.mxu0 %vm354_vm1, %v5604_v22  ;;  %v6125_v48 = vld [vmem:[#allocation3 + $0x171] sm:$0xff] }
 0x331   : > { %v4297_v17 = vpop.f32.mrf.mxu0  ;;  %v4605_v35 = vpop.f32.mrf.mxu1  ;;  %v5590_v60 = vld [vmem:[#allocation4 + $0x180] sm:$0xff]  ;;  %v5591_v45 = vld [vmem:[#allocation4 + $0x188] sm:$0xff] }
 0x332   : > { %v13396_v54 = vadd.f32 %v10595_v13, %v4306_v11  ;;  %v4298_v42 = vadd.f32 %v4297_v17, %v13240_v9  ;;  %v6142_v9 = vpack.c.bf16 %v6125_v48, %v6124_v20  ;;  %v6145_v11 = vld [vmem:[#allocation4 + $0x21] sm:$0xff]  ;;  %v6127_v17 = vld [vmem:[#allocation3 + $0x189] sm:$0xff]  ;;  %v5607_v55 = vpack.c.bf16 %v5591_v45, %v5590_v60  ;;  %v6683_v45 = vld [vmem:[#allocation3 + $0x3a] sm:$0xff] }
 0x333   : > { %v10562_v53 = vpop.f32.mrf.mxu0  ;;  %v10596_v40 = vpop.f32.mrf.mxu1 }
 0x334   : > { %v13399_v23 = vadd.f32 %v4605_v35, %v4298_v42  ;;  %v4309_v52 = vadd.f32 %v10562_v53, %v13245_v4  ;;  %v6680_v42 = vld [vmem:[#allocation3 + $0x1a] sm:$0xff] }
 0x335   : > { %v4300_v7 = vpop.f32.mrf.mxu0  ;;  %v4608_v61 = vpop.f32.mrf.mxu1 }
 0x336   : > { %v13402_v33 = vadd.f32 %v10596_v40, %v4309_v52  ;;  %v4301_v32 = vadd.f32 %v4300_v7, %v13250_v12  ;;  %v6144_v12 = vld [vmem:[#allocation4 + $0x19] sm:$0xff]  ;;  %v6126_v40 = vld [vmem:[#allocation3 + $0x181] sm:$0xff] }
 0x337   : > { %v10565_v22 = vpop.f32.mrf.mxu0  ;;  %v10599_v57 = vpop.f32.mrf.mxu1  ;;  %10768 = vmatmul.mubr.msk.bf16.gmra.mxu0 %vm354_vm1, %v5605_v2  ;;  %10802 = vmatmul.mubr.msk.bf16.gmra.mxu1 %vm354_vm1, %v6141_v14  ;;  %v6176_v2 = vpack.c.bf16 %v6145_v11, %v6144_v12  ;;  %v6143_v27 = vpack.c.bf16 %v6127_v17, %v6126_v40  ;;  %v6685_v17 = vld [vmem:[#allocation3 + $0x52] sm:$0xff] }
 0x338   : > { %v13407_v31 = vadd.f32 %v4608_v61, %v4301_v32  ;;  %v4322_v4 = vadd.f32 %v10565_v22, %v13255_v5  ;;  %10805 = vmatprep.mubr.msk.bf16.mxu1 %vm354_vm1, %v6142_v9  ;;  %10771 = vmatprep.mubr.msk.bf16.mxu0 %vm354_vm1, %v5606_v6  ;;  %v6681_v5 = vld [vmem:[#allocation3 + $0x22] sm:$0xff] }
 0x339   : > { %v4313_v0 = vpop.f32.mrf.mxu0  ;;  %v4621_v13 = vpop.f32.mrf.mxu1  ;;  %v6146_v32 = vld [vmem:[#allocation4 + $0x31] sm:$0xff]  ;;  %v6147_v9 = vld [vmem:[#allocation4 + $0x39] sm:$0xff] }
 0x33a   : > { %v13412_v21 = vadd.f32 %v10599_v57, %v4322_v4  ;;  %v4314_v28 = vadd.f32 %v4313_v0, %v13260_v58  ;;  %v6712_v58 = vpack.c.bf16 %v6681_v5, %v6680_v42  ;;  %v6148_v0 = vld [vmem:[#allocation4 + $0x49] sm:$0xff] }
 0x33b   : > { %v10566_v35 = vpop.f32.mrf.mxu0  ;;  %v10600_v41 = vpop.f32.mrf.mxu1 }
 0x33c   : > { %v13415_v8 = vadd.f32 %v4621_v13, %v4314_v28  ;;  %v4325_v53 = vadd.f32 %v10566_v35, %v13265_v18  ;;  %v6149_v13 = vld [vmem:[#allocation4 + $0x51] sm:$0xff]  ;;  %v6177_v28 = vpack.c.bf16 %v6147_v9, %v6146_v32  ;;  %v6152_v32 = vld [vmem:[#allocation4 + $0x79] sm:$0xff]  ;;  %v6153_v9 = vld [vmem:[#allocation4 + $0x81] sm:$0xff] }
 0x33d   : > { %v4316_v48 = vpop.f32.mrf.mxu0  ;;  %v4624_v52 = vpop.f32.mrf.mxu1  ;;  %v6178_v40 = vpack.c.bf16 %v6149_v13, %v6148_v0  ;;  %v6688_v13 = vld [vmem:[#allocation3 + $0x7a] sm:$0xff] }
 0x33e   : > { %v13418_v6 = vadd.f32 %v10600_v41, %v4325_v53  ;;  %v4317_v7 = vadd.f32 %v4316_v48, %v13270_v30  ;;  %v6682_v30 = vld [vmem:[#allocation3 + $0x32] sm:$0xff]  ;;  %v7069_v53 = vsel %vm964_vm0, %v13299_v3, 0  ;;  %v13451_v3 = vld [vmem:[%s14562_s6 + $0x1c] sm:$0xf] }
 0x33f   : > { %v10569_v61 = vpop.f32.mrf.mxu0  ;;  %v10603_v14 = vpop.f32.mrf.mxu1  ;;  %10772 = vmatmul.mubr.msk.bf16.gmra.mxu0 %vm354_vm1, %v5607_v55  ;;  %10806 = vmatmul.mubr.msk.bf16.gmra.mxu1 %vm354_vm1, %v6143_v27  ;;  %v6713_v5 = vpack.c.bf16 %v6683_v45, %v6682_v30  ;;  %v6686_v30 = vld [vmem:[#allocation3 + $0x62] sm:$0xff] }
 0x340   : > { %v13423_v20 = vadd.f32 %v4624_v52, %v4317_v7  ;;  %v4338_v18 = vadd.f32 %v10569_v61, %v13275_v49  ;;  %10845 = vmatprep.mubr.msk.bf16.mxu1 %vm354_vm1, %v6712_v58  ;;  %10811 = vmatprep.mubr.msk.bf16.mxu0 %vm354_vm1, %v6176_v2  ;;  %v6684_v49 = vld [vmem:[#allocation3 + $0x4a] sm:$0xff]  ;;  %v7411_v52 = vsel %vm964_vm0, %v13304_v26, 0  ;;  %v6151_v61 = vld [vmem:[#allocation4 + $0x69] sm:$0xff] }
 0x341   : > { %v4329_v22 = vpop.f32.mrf.mxu0  ;;  %v4637_v57 = vpop.f32.mrf.mxu1  ;;  %v6714_v48 = vpack.c.bf16 %v6685_v17, %v6684_v49  ;;  %v6150_v58 = vld [vmem:[#allocation4 + $0x61] sm:$0xff]  ;;  %v6180_v49 = vpack.c.bf16 %v6153_v9, %v6152_v32 }
 0x342   : > { %v13428_v4 = vadd.f32 %v10603_v14, %v4338_v18  ;;  %v4330_v60 = vadd.f32 %v4329_v22, %v13280_v62  ;;  %v6179_v0 = vpack.c.bf16 %v6151_v61, %v6150_v58 }
 0x343   : > { %v10570_v12 = vpop.f32.mrf.mxu0  ;;  %v10604_v11 = vpop.f32.mrf.mxu1 }
 0x344   : > { %v13431_v35 = vadd.f32 %v4637_v57, %v4330_v60  ;;  %v4341_v41 = vadd.f32 %v10570_v12, %v13284_v50  ;;  %v13446_v50 = vld [vmem:[%s14563_s7 + $0x18] sm:$0xf] }
 0x345   : > { %v4332_v55 = vpop.f32.mrf.mxu0  ;;  %v4640_v42 = vpop.f32.mrf.mxu1  ;;  %v6687_v60 = vld [vmem:[#allocation3 + $0x6a] sm:$0xff]  ;;  %v6689_v12 = vld [vmem:[#allocation3 + $0x82] sm:$0xff] }
 0x346   : > { %v13436_v62 = vadd.f32 %v10604_v11, %v4341_v41  ;;  %v4333_v2 = vadd.f32 %v4332_v55, %v13288_v19  ;;  %v6715_v41 = vpack.c.bf16 %v6687_v60, %v6686_v30  ;;  %v6693_v30 = vld [vmem:[#allocation3 + $0xb2] sm:$0xff] }
 0x347   : > { %v10609_v27 = vpop.f32.mrf.mxu0  ;;  %v10643_v7 = vpop.f32.mrf.mxu1  ;;  %10812 = vmatmul.mubr.msk.bf16.vlgmr.msra.gmra.mxu0 %vm354_vm1, %v6177_v28  ;;  %10846 = vmatmul.mubr.msk.bf16.vlgmr.msra.gmra.mxu1 %vm354_vm1, %v6713_v5  ;;  %v6716_v5 = vpack.c.bf16 %v6689_v12, %v6688_v13 }
 0x348   : > { %v13453_v19 = vadd.f32 %v4640_v42, %v4333_v2  ;;  %v4898_v26 = vadd.f32 %v10609_v27, %v13309_v1  ;;  %10878 = vmatpush3.bf16.msra.mxu0 %v7069_v53  ;;  %10849 = vmatprep.mubr.msk.bf16.mxu1 %vm354_vm1, %v6714_v48 }
 0x349   : > { %v4769_v14 = vpop.f32.mrf.mxu0  ;;  %v5109_v18 = vpop.f32.mrf.mxu1  ;;  %10815 = vmatprep.mubr.msk.bf16.mxu0 %vm354_vm1, %v6178_v40  ;;  %10912 = vmatpush3.bf16.msra.mxu1 %v7411_v52  ;;  %v6155_v52 = vld [vmem:[#allocation4 + $0x99] sm:$0xff] }
 0x34a   : > { %v13458_v22 = vadd.f32 %v10643_v7, %v4898_v26  ;;  %v4896_v57 = vadd.f32 %v4769_v14, %v13316_v39  ;;  %11140 = vmatprep.subr.msk.bf16.mxu0 %vm964_vm0, %v13446_v50  ;;  %11141 = vmatprep.subr.msk.bf16.mxu1 %vm964_vm0, %v13451_v3  ;;  %v6157_v26 = vld [vmem:[#allocation4 + $0xb1] sm:$0xff]  ;;  %v6690_v14 = vld [vmem:[#allocation3 + $0x92] sm:$0xff] }
 0x34b   : > { %v10610_v1 = vpop.f32.mrf.mxu0  ;;  %v10644_v45 = vpop.f32.mrf.mxu1 }
 0x34c   : > { %v13465_v11 = vadd.f32 %v5109_v18, %v4896_v57  ;;  %v4899_v28 = vadd.f32 %v10610_v1, %v13319_v10  ;;  %v6154_v10 = vld [vmem:[#allocation4 + $0x91] sm:$0xff] }
 0x34d   : > { %v4772_v17 = vpop.f32.mrf.mxu0  ;;  %v5112_v39 = vpop.f32.mrf.mxu1  ;;  %v6691_v18 = vld [vmem:[#allocation3 + $0x9a] sm:$0xff]  ;;  %v6181_v57 = vpack.c.bf16 %v6155_v52, %v6154_v10 }
 0x34e   : > { %v13468_v55 = vadd.f32 %v10644_v45, %v4899_v28  ;;  %v4897_v42 = vadd.f32 %v4772_v17, %v13324_v56  ;;  %v6156_v56 = vld [vmem:[#allocation4 + $0xa9] sm:$0xff]  ;;  %v6717_v12 = vpack.c.bf16 %v6691_v18, %v6690_v14  ;;  %v6697_v14 = vld [vmem:[#allocation3 + $0xe2] sm:$0xff] }
 0x34f   : > { %v10613_v53 = vpop.f32.mrf.mxu0  ;;  %v10647_v40 = vpop.f32.mrf.mxu1  ;;  %10816 = vmatmul.mubr.msk.bf16.gmra.mxu0 %vm354_vm1, %v6179_v0  ;;  %10850 = vmatmul.mubr.msk.bf16.gmra.mxu1 %vm354_vm1, %v6715_v41  ;;  %v6182_v45 = vpack.c.bf16 %v6157_v26, %v6156_v56 }
 0x350   : > { %v13473_v2 = vadd.f32 %v5112_v39, %v4897_v42  ;;  %v4902_v48 = vadd.f32 %v10613_v53, %v13329_v25  ;;  %10853 = vmatprep.mubr.msk.bf16.mxu1 %vm354_vm1, %v6716_v5  ;;  %10819 = vmatprep.mubr.msk.bf16.mxu0 %vm354_vm1, %v6180_v49  ;;  %v6692_v25 = vld [vmem:[#allocation3 + $0xaa] sm:$0xff]  ;;  %v6159_v5 = vld [vmem:[#allocation4 + $0xc9] sm:$0xff] }
 0x351   : > { %v4785_v27 = vpop.f32.mrf.mxu0  ;;  %v5125_v7 = vpop.f32.mrf.mxu1 }
 0x352   : > { %v13478_v58 = vadd.f32 %v10647_v40, %v4902_v48  ;;  %v4900_v61 = vadd.f32 %v4785_v27, %v13332_v37  ;;  %v6718_v37 = vpack.c.bf16 %v6693_v30, %v6692_v25  ;;  %v6161_v48 = vld [vmem:[#allocation4 + $0xe1] sm:$0xff]  ;;  %v6694_v27 = vld [vmem:[#allocation3 + $0xc2] sm:$0xff] }
 0x353   : > { %v10614_v32 = vpop.f32.mrf.mxu0  ;;  %v10648_v9 = vpop.f32.mrf.mxu1 }
 0x354   : > { %v13481_v60 = vadd.f32 %v5125_v7, %v4900_v61  ;;  %v4903_v1 = vadd.f32 %v10614_v32, %v13335_v46  ;;  %v6158_v46 = vld [vmem:[#allocation4 + $0xc1] sm:$0xff] }
 0x355   : > { %v4788_v0 = vpop.f32.mrf.mxu0  ;;  %v5128_v13 = vpop.f32.mrf.mxu1  ;;  %v6695_v7 = vld [vmem:[#allocation3 + $0xca] sm:$0xff]  ;;  %v6183_v61 = vpack.c.bf16 %v6159_v5, %v6158_v46 }
 0x356   : > { %v13484_v28 = vadd.f32 %v10648_v9, %v4903_v1  ;;  %v4901_v49 = vadd.f32 %v4788_v0, %v13340_v16  ;;  %v6160_v16 = vld [vmem:[#allocation4 + $0xd9] sm:$0xff]  ;;  %v6719_v30 = vpack.c.bf16 %v6695_v7, %v6694_v27  ;;  %v6701_v27 = vld [vmem:[#allocation3 + $0x112] sm:$0xff] }
 0x357   : > { %v10617_v17 = vpop.f32.mrf.mxu0  ;;  %v10651_v39 = vpop.f32.mrf.mxu1  ;;  %10820 = vmatmul.mubr.msk.bf16.gmra.mxu0 %vm354_vm1, %v6181_v57  ;;  %10854 = vmatmul.mubr.msk.bf16.gmra.mxu1 %vm354_vm1, %v6717_v12  ;;  %v6184_v9 = vpack.c.bf16 %v6161_v48, %v6160_v16 }
 0x358   : > { %v13489_v41 = vadd.f32 %v5128_v13, %v4901_v49  ;;  %v4906_v42 = vadd.f32 %v10617_v17, %v13345_v47  ;;  %10857 = vmatprep.mubr.msk.bf16.mxu1 %vm354_vm1, %v6718_v37  ;;  %10823 = vmatprep.mubr.msk.bf16.mxu0 %vm354_vm1, %v6182_v45  ;;  %v6696_v47 = vld [vmem:[#allocation3 + $0xda] sm:$0xff]  ;;  %v6163_v37 = vld [vmem:[#allocation4 + $0xf9] sm:$0xff] }
 0x359   : > { %v4801_v53 = vpop.f32.mrf.mxu0  ;;  %v5141_v40 = vpop.f32.mrf.mxu1 }
 0x35a   : > { %v13494_v10 = vadd.f32 %v10651_v39, %v4906_v42  ;;  %v4904_v52 = vadd.f32 %v4801_v53, %v13348_v38  ;;  %v6720_v38 = vpack.c.bf16 %v6697_v14, %v6696_v47  ;;  %v6165_v42 = vld [vmem:[#allocation4 + $0x111] sm:$0xff]  ;;  %v6698_v53 = vld [vmem:[#allocation3 + $0xf2] sm:$0xff] }
 0x35b   : > { %v10618_v56 = vpop.f32.mrf.mxu0  ;;  %v10652_v26 = vpop.f32.mrf.mxu1 }
 0x35c   : > { %v13497_v18 = vadd.f32 %v5141_v40, %v4904_v52  ;;  %v4907_v32 = vadd.f32 %v10618_v56, %v13351_v51  ;;  %v6162_v51 = vld [vmem:[#allocation4 + $0xf1] sm:$0xff] }
 0x35d   : > { %v4804_v57 = vpop.f32.mrf.mxu0  ;;  %v5144_v25 = vpop.f32.mrf.mxu1  ;;  %v6699_v40 = vld [vmem:[#allocation3 + $0xfa] sm:$0xff]  ;;  %v6185_v52 = vpack.c.bf16 %v6163_v37, %v6162_v51 }
 0x35e   : > { %v13500_v1 = vadd.f32 %v10652_v26, %v4907_v32  ;;  %v4905_v45 = vadd.f32 %v4804_v57, %v13356_v34  ;;  %v6164_v34 = vld [vmem:[#allocation4 + $0x109] sm:$0xff]  ;;  %v6721_v14 = vpack.c.bf16 %v6699_v40, %v6698_v53  ;;  %v6705_v53 = vld [vmem:[#allocation3 + $0x142] sm:$0xff] }
 0x35f   : > { %v10621_v0 = vpop.f32.mrf.mxu0  ;;  %v10655_v13 = vpop.f32.mrf.mxu1  ;;  %10824 = vmatmul.mubr.msk.bf16.gmra.mxu0 %vm354_vm1, %v6183_v61  ;;  %10858 = vmatmul.mubr.msk.bf16.gmra.mxu1 %vm354_vm1, %v6719_v30  ;;  %v6186_v26 = vpack.c.bf16 %v6165_v42, %v6164_v34 }
 0x360   : > { %v13505_v12 = vadd.f32 %v5144_v25, %v4905_v45  ;;  %v4910_v49 = vadd.f32 %v10621_v0, %v13362_v36  ;;  %10861 = vmatprep.mubr.msk.bf16.mxu1 %vm354_vm1, %v6720_v38  ;;  %10827 = vmatprep.mubr.msk.bf16.mxu0 %vm354_vm1, %v6184_v9  ;;  %v6700_v36 = vld [vmem:[#allocation3 + $0x10a] sm:$0xff]  ;;  %v6167_v38 = vld [vmem:[#allocation4 + $0x129] sm:$0xff] }
 0x361   : > { %v4817_v17 = vpop.f32.mrf.mxu0  ;;  %v5157_v39 = vpop.f32.mrf.mxu1 }
 0x362   : > { %v13510_v46 = vadd.f32 %v10655_v13, %v4910_v49  ;;  %v4908_v5 = vadd.f32 %v4817_v17, %v13365_v63  ;;  %v6722_v63 = vpack.c.bf16 %v6701_v27, %v6700_v36  ;;  %v6169_v49 = vld [vmem:[#allocation4 + $0x141] sm:$0xff]  ;;  %v6702_v17 = vld [vmem:[#allocation3 + $0x122] sm:$0xff] }
 0x363   : > { %v10622_v16 = vpop.f32.mrf.mxu0  ;;  %v10656_v48 = vpop.f32.mrf.mxu1 }
 0x364   : > { %v13513_v7 = vadd.f32 %v5157_v39, %v4908_v5  ;;  %v4911_v56 = vadd.f32 %v10622_v16, %v13368_v15  ;;  %v6166_v15 = vld [vmem:[#allocation4 + $0x121] sm:$0xff] }
 0x365   : > { %v4820_v61 = vpop.f32.mrf.mxu0  ;;  %v5160_v47 = vpop.f32.mrf.mxu1  ;;  %v6703_v39 = vld [vmem:[#allocation3 + $0x12a] sm:$0xff]  ;;  %v6187_v5 = vpack.c.bf16 %v6167_v38, %v6166_v15 }
 0x366   : > { %v13516_v32 = vadd.f32 %v10656_v48, %v4911_v56  ;;  %v4909_v9 = vadd.f32 %v4820_v61, %v13373_v44  ;;  %v6168_v44 = vld [vmem:[#allocation4 + $0x139] sm:$0xff]  ;;  %v6723_v27 = vpack.c.bf16 %v6703_v39, %v6702_v17  ;;  %v6709_v17 = vld [vmem:[#allocation3 + $0x172] sm:$0xff] }
 0x367   : > { %v10625_v57 = vpop.f32.mrf.mxu0  ;;  %v10659_v25 = vpop.f32.mrf.mxu1  ;;  %10828 = vmatmul.mubr.msk.bf16.gmra.mxu0 %vm354_vm1, %v6185_v52  ;;  %10862 = vmatmul.mubr.msk.bf16.gmra.mxu1 %vm354_vm1, %v6721_v14  ;;  %v6188_v48 = vpack.c.bf16 %v6169_v49, %v6168_v44 }
 0x368   : > { %v13521_v30 = vadd.f32 %v5160_v47, %v4909_v9  ;;  %v4914_v45 = vadd.f32 %v10625_v57, %v13379_v29  ;;  %10865 = vmatprep.mubr.msk.bf16.mxu1 %vm354_vm1, %v6722_v63  ;;  %10831 = vmatprep.mubr.msk.bf16.mxu0 %vm354_vm1, %v6186_v26  ;;  %v6704_v29 = vld [vmem:[#allocation3 + $0x13a] sm:$0xff]  ;;  %v6171_v63 = vld [vmem:[#allocation4 + $0x159] sm:$0xff] }
 0x369   : > { %v4833_v0 = vpop.f32.mrf.mxu0  ;;  %v5173_v13 = vpop.f32.mrf.mxu1 }
 0x36a   : > { %v13526_v51 = vadd.f32 %v10659_v25, %v4914_v45  ;;  %v4912_v37 = vadd.f32 %v4833_v0, %v13382_v43  ;;  %v6724_v43 = vpack.c.bf16 %v6705_v53, %v6704_v29  ;;  %v6173_v45 = vld [vmem:[#allocation4 + $0x171] sm:$0xff]  ;;  %v6706_v0 = vld [vmem:[#allocation3 + $0x152] sm:$0xff] }
 0x36b   : > { %v10626_v34 = vpop.f32.mrf.mxu0  ;;  %v10660_v42 = vpop.f32.mrf.mxu1 }
 0x36c   : > { %v13529_v40 = vadd.f32 %v5173_v13, %v4912_v37  ;;  %v4915_v16 = vadd.f32 %v10626_v34, %v13385_v59  ;;  %v6170_v59 = vld [vmem:[#allocation4 + $0x151] sm:$0xff] }
 0x36d   : > { %v4836_v52 = vpop.f32.mrf.mxu0  ;;  %v5176_v36 = vpop.f32.mrf.mxu1  ;;  %v6707_v13 = vld [vmem:[#allocation3 + $0x15a] sm:$0xff]  ;;  %v6189_v37 = vpack.c.bf16 %v6171_v63, %v6170_v59 }
 0x36e   : > { %v13532_v56 = vadd.f32 %v10660_v42, %v4915_v16  ;;  %v4913_v26 = vadd.f32 %v4836_v52, %v13390_v24  ;;  %v6172_v24 = vld [vmem:[#allocation4 + $0x169] sm:$0xff]  ;;  %v6725_v53 = vpack.c.bf16 %v6707_v13, %v6706_v0 }
 0x36f   : > { %v10629_v61 = vpop.f32.mrf.mxu0  ;;  %v10663_v47 = vpop.f32.mrf.mxu1  ;;  %10832 = vmatmul.mubr.msk.bf16.gmra.mxu0 %vm354_vm1, %v6187_v5  ;;  %10866 = vmatmul.mubr.msk.bf16.gmra.mxu1 %vm354_vm1, %v6723_v27  ;;  %v6190_v42 = vpack.c.bf16 %v6173_v45, %v6172_v24 }
 0x370   : > { %v13537_v14 = vadd.f32 %v5176_v36, %v4913_v26  ;;  %v4918_v9 = vadd.f32 %v10629_v61, %v13396_v54  ;;  %10869 = vmatprep.mubr.msk.bf16.mxu1 %vm354_vm1, %v6724_v43  ;;  %10835 = vmatprep.mubr.msk.bf16.mxu0 %vm354_vm1, %v6188_v48  ;;  %v6708_v54 = vld [vmem:[#allocation3 + $0x16a] sm:$0xff]  ;;  %v6175_v43 = vld [vmem:[#allocation4 + $0x189] sm:$0xff] }
 0x371   : > { %v4849_v57 = vpop.f32.mrf.mxu0  ;;  %v5189_v25 = vpop.f32.mrf.mxu1 }
 0x372   : > { %v13542_v15 = vadd.f32 %v10663_v47, %v4918_v9  ;;  %v4916_v38 = vadd.f32 %v4849_v57, %v13399_v23  ;;  %v6726_v23 = vpack.c.bf16 %v6709_v17, %v6708_v54  ;;  %v6729_v9 = vld [vmem:[#allocation4 + $0x22] sm:$0xff]  ;;  %v6710_v57 = vld [vmem:[#allocation3 + $0x182] sm:$0xff] }
 0x373   : > { %v10630_v44 = vpop.f32.mrf.mxu0  ;;  %v10664_v49 = vpop.f32.mrf.mxu1  ;;  %v7265_v17 = vld [vmem:[#allocation3 + $0x30] sm:$0xff] }
 0x374   : > { %v13545_v39 = vadd.f32 %v5189_v25, %v4916_v38  ;;  %v4919_v34 = vadd.f32 %v10630_v44, %v13402_v33  ;;  %v6174_v33 = vld [vmem:[#allocation4 + $0x181] sm:$0xff] }
 0x375   : > { %v4852_v5 = vpop.f32.mrf.mxu0  ;;  %v5192_v29 = vpop.f32.mrf.mxu1  ;;  %v6711_v25 = vld [vmem:[#allocation3 + $0x18a] sm:$0xff]  ;;  %v6191_v38 = vpack.c.bf16 %v6175_v43, %v6174_v33  ;;  %v6732_v43 = vld [vmem:[#allocation4 + $0x4a] sm:$0xff] }
 0x376   : > { %v13548_v16 = vadd.f32 %v10664_v49, %v4919_v34  ;;  %v4917_v48 = vadd.f32 %v4852_v5, %v13407_v31  ;;  %v6728_v31 = vld [vmem:[#allocation4 + $0x1a] sm:$0xff]  ;;  %v6727_v54 = vpack.c.bf16 %v6711_v25, %v6710_v57 }
 0x377   : > { %v10633_v52 = vpop.f32.mrf.mxu0  ;;  %v10667_v36 = vpop.f32.mrf.mxu1  ;;  %10836 = vmatmul.mubr.msk.bf16.gmra.mxu0 %vm354_vm1, %v6189_v37  ;;  %10870 = vmatmul.mubr.msk.bf16.gmra.mxu1 %vm354_vm1, %v6725_v53  ;;  %v6760_v44 = vpack.c.bf16 %v6729_v9, %v6728_v31  ;;  %v7268_v33 = vld [vmem:[#allocation3 + $0x50] sm:$0xff]  ;;  %v7267_v25 = vld [vmem:[#allocation3 + $0x48] sm:$0xff] }
 0x378   : > { %v13553_v27 = vadd.f32 %v5192_v29, %v4917_v48  ;;  %v4922_v26 = vadd.f32 %v10633_v52, %v13412_v21  ;;  %10873 = vmatprep.mubr.msk.bf16.mxu1 %vm354_vm1, %v6726_v23  ;;  %10839 = vmatprep.mubr.msk.bf16.mxu0 %vm354_vm1, %v6190_v42  ;;  %v7266_v21 = vld [vmem:[#allocation3 + $0x38] sm:$0xff]  ;;  %v6730_v48 = vld [vmem:[#allocation4 + $0x32] sm:$0xff]  ;;  %v6731_v23 = vld [vmem:[#allocation4 + $0x3a] sm:$0xff] }
 0x379   : > { %v4865_v61 = vpop.f32.mrf.mxu0  ;;  %v5205_v47 = vpop.f32.mrf.mxu1  ;;  %v6761_v9 = vpack.c.bf16 %v6731_v23, %v6730_v48  ;;  %v6736_v48 = vld [vmem:[#allocation4 + $0x7a] sm:$0xff]  ;;  %v6737_v23 = vld [vmem:[#allocation4 + $0x82] sm:$0xff] }
 0x37a   : > { %v13558_v59 = vadd.f32 %v10667_v36, %v4922_v26  ;;  %v4920_v63 = vadd.f32 %v4865_v61, %v13415_v8  ;;  %v7297_v8 = vpack.c.bf16 %v7266_v21, %v7265_v17  ;;  %v6733_v61 = vld [vmem:[#allocation4 + $0x52] sm:$0xff]  ;;  %v7655_v21 = vsel %vm964_vm0, %v13446_v50, 0  ;;  %v13597_v50 = vld [vmem:[%s14562_s6 + $0x20] sm:$0xf] }
 0x37b   : > { %v10634_v24 = vpop.f32.mrf.mxu0  ;;  %v10668_v45 = vpop.f32.mrf.mxu1 }
 0x37c   : > { %v13561_v0 = vadd.f32 %v5205_v47, %v4920_v63  ;;  %v4923_v13 = vadd.f32 %v10634_v24, %v13418_v6  ;;  %v7270_v63 = vld [vmem:[#allocation3 + $0x68] sm:$0xff] }
 0x37d   : > { %v4868_v49 = vpop.f32.mrf.mxu0  ;;  %v5208_v37 = vpop.f32.mrf.mxu1 }
 0x37e   : > { %v13564_v34 = vadd.f32 %v10668_v45, %v4923_v13  ;;  %v4921_v42 = vadd.f32 %v4868_v49, %v13423_v20  ;;  %v7269_v13 = vld [vmem:[#allocation3 + $0x60] sm:$0xff] }
 0x37f   : > { %v10637_v5 = vpop.f32.mrf.mxu0  ;;  %v10671_v29 = vpop.f32.mrf.mxu1  ;;  %10840 = vmatmul.mubr.msk.bf16.gmra.mxu0 %vm354_vm1, %v6191_v38  ;;  %10874 = vmatmul.mubr.msk.bf16.gmra.mxu1 %vm354_vm1, %v6727_v54  ;;  %v7298_v38 = vpack.c.bf16 %v7268_v33, %v7267_v25  ;;  %v7995_v54 = vsel %vm964_vm0, %v13451_v3, 0 }
 0x380   : > { %v13569_v53 = vadd.f32 %v5208_v37, %v4921_v42  ;;  %v4926_v6 = vadd.f32 %v10637_v5, %v13428_v4  ;;  %10913 = vmatprep.mubr.msk.bf16.mxu1 %vm354_vm1, %v7297_v8  ;;  %10879 = vmatprep.mubr.msk.bf16.mxu0 %vm354_vm1, %v6760_v44  ;;  %v7299_v37 = vpack.c.bf16 %v7270_v63, %v7269_v13  ;;  %v6734_v8 = vld [vmem:[#allocation4 + $0x62] sm:$0xff]  ;;  %v6735_v5 = vld [vmem:[#allocation4 + $0x6a] sm:$0xff] }
 0x381   : > { %v4881_v52 = vpop.f32.mrf.mxu0  ;;  %v5221_v36 = vpop.f32.mrf.mxu1  ;;  %v6764_v63 = vpack.c.bf16 %v6737_v23, %v6736_v48 }
 0x382   : > { %v13574_v20 = vadd.f32 %v10671_v29, %v4926_v6  ;;  %v4924_v26 = vadd.f32 %v4881_v52, %v13431_v35  ;;  %v6762_v35 = vpack.c.bf16 %v6733_v61, %v6732_v43  ;;  %v6763_v43 = vpack.c.bf16 %v6735_v5, %v6734_v8  ;;  %v7274_v61 = vld [vmem:[#allocation3 + $0x98] sm:$0xff] }
 0x383   : > { %v10638_v47 = vpop.f32.mrf.mxu0  ;;  %v10672_v31 = vpop.f32.mrf.mxu1 }
 0x384   : > { %v13577_v4 = vadd.f32 %v5221_v36, %v4924_v26  ;;  %v4927_v57 = vadd.f32 %v10638_v47, %v13436_v62  ;;  %v13592_v62 = vld [vmem:[%s14563_s7 + $0x1c] sm:$0xf]  ;;  %v7272_v26 = vld [vmem:[#allocation3 + $0x80] sm:$0xff] }
 0x385   : > { %v4884_v24 = vpop.f32.mrf.mxu0  ;;  %v5224_v45 = vpop.f32.mrf.mxu1 }
 0x386   : > { %v13582_v44 = vadd.f32 %v10672_v31, %v4927_v57  ;;  %v4925_v49 = vadd.f32 %v4884_v24, %v13453_v19  ;;  %v7273_v24 = vld [vmem:[#allocation3 + $0x90] sm:$0xff] }
 0x387   : > { %v10677_v17 = vpop.f32.mrf.mxu0  ;;  %v10711_v42 = vpop.f32.mrf.mxu1  ;;  %10880 = vmatmul.mubr.msk.bf16.vlgmr.msra.gmra.mxu0 %vm354_vm1, %v6761_v9  ;;  %10914 = vmatmul.mubr.msk.bf16.vlgmr.msra.gmra.mxu1 %vm354_vm1, %v7298_v38  ;;  %v7271_v9 = vld [vmem:[#allocation3 + $0x78] sm:$0xff] }
 0x388   : > { %v13599_v19 = vadd.f32 %v5224_v45, %v4925_v49  ;;  %v5482_v3 = vadd.f32 %v10677_v17, %v13458_v22  ;;  %10946 = vmatpush3.bf16.msra.mxu0 %v7655_v21  ;;  %10917 = vmatprep.mubr.msk.bf16.mxu1 %vm354_vm1, %v7299_v37  ;;  %v7301_v21 = vpack.c.bf16 %v7274_v61, %v7273_v24  ;;  %v6738_v37 = vld [vmem:[#allocation4 + $0x92] sm:$0xff] }
 0x389   : > { %v5353_v29 = vpop.f32.mrf.mxu0  ;;  %v5693_v6 = vpop.f32.mrf.mxu1  ;;  %10883 = vmatprep.mubr.msk.bf16.mxu0 %vm354_vm1, %v6762_v35  ;;  %10980 = vmatpush3.bf16.msra.mxu1 %v7995_v54  ;;  %v6739_v54 = vld [vmem:[#allocation4 + $0x9a] sm:$0xff] }
 0x38a   : > { %v13604_v52 = vadd.f32 %v10711_v42, %v5482_v3  ;;  %v5480_v36 = vadd.f32 %v5353_v29, %v13465_v11  ;;  %11142 = vmatprep.subr.msk.bf16.mxu0 %vm964_vm0, %v13592_v62  ;;  %11143 = vmatprep.subr.msk.bf16.mxu1 %vm964_vm0, %v13597_v50  ;;  %v7300_v11 = vpack.c.bf16 %v7272_v26, %v7271_v9  ;;  %v6741_v3 = vld [vmem:[#allocation4 + $0xb2] sm:$0xff]  ;;  %v7276_v29 = vld [vmem:[#allocation3 + $0xb0] sm:$0xff] }
 0x38b   : > { %v10678_v22 = vpop.f32.mrf.mxu0  ;;  %v10712_v33 = vpop.f32.mrf.mxu1  ;;  %v6765_v23 = vpack.c.bf16 %v6739_v54, %v6738_v37  ;;  %v7277_v9 = vld [vmem:[#allocation3 + $0xc0] sm:$0xff] }
 0x38c   : > { %v13611_v47 = vadd.f32 %v5693_v6, %v5480_v36  ;;  %v5483_v31 = vadd.f32 %v10678_v22, %v13468_v55  ;;  %v7278_v36 = vld [vmem:[#allocation3 + $0xc8] sm:$0xff] }
 0x38d   : > { %v5356_v57 = vpop.f32.mrf.mxu0  ;;  %v5696_v25 = vpop.f32.mrf.mxu1  ;;  %v7275_v22 = vld [vmem:[#allocation3 + $0xa8] sm:$0xff] }
 0x38e   : > { %v13614_v45 = vadd.f32 %v10712_v33, %v5483_v31  ;;  %v5481_v38 = vadd.f32 %v5356_v57, %v13473_v2  ;;  %v6740_v2 = vld [vmem:[#allocation4 + $0xaa] sm:$0xff]  ;;  %v7302_v31 = vpack.c.bf16 %v7276_v29, %v7275_v22  ;;  %v7281_v22 = vld [vmem:[#allocation3 + $0xf0] sm:$0xff] }
 0x38f   : > { %v10681_v13 = vpop.f32.mrf.mxu0  ;;  %v10715_v35 = vpop.f32.mrf.mxu1  ;;  %10884 = vmatmul.mubr.msk.bf16.gmra.mxu0 %vm354_vm1, %v6763_v43  ;;  %10918 = vmatmul.mubr.msk.bf16.gmra.mxu1 %vm354_vm1, %v7300_v11  ;;  %v6766_v33 = vpack.c.bf16 %v6741_v3, %v6740_v2 }
 0x390   : > { %v13619_v49 = vadd.f32 %v5696_v25, %v5481_v38  ;;  %v5486_v55 = vadd.f32 %v10681_v13, %v13478_v58  ;;  %10921 = vmatprep.mubr.msk.bf16.mxu1 %vm354_vm1, %v7301_v21  ;;  %10887 = vmatprep.mubr.msk.bf16.mxu0 %vm354_vm1, %v6764_v63  ;;  %v6742_v38 = vld [vmem:[#allocation4 + $0xc2] sm:$0xff]  ;;  %v6743_v21 = vld [vmem:[#allocation4 + $0xca] sm:$0xff] }
 0x391   : > { %v5369_v17 = vpop.f32.mrf.mxu0  ;;  %v5709_v42 = vpop.f32.mrf.mxu1  ;;  %v6767_v3 = vpack.c.bf16 %v6743_v21, %v6742_v38 }
 0x392   : > { %v13624_v8 = vadd.f32 %v10715_v35, %v5486_v55  ;;  %v5484_v5 = vadd.f32 %v5369_v17, %v13481_v60  ;;  %v7303_v60 = vpack.c.bf16 %v7278_v36, %v7277_v9  ;;  %v6745_v55 = vld [vmem:[#allocation4 + $0xe2] sm:$0xff]  ;;  %v7280_v17 = vld [vmem:[#allocation3 + $0xe0] sm:$0xff] }
 0x393   : > { %v10682_v6 = vpop.f32.mrf.mxu0  ;;  %v10716_v48 = vpop.f32.mrf.mxu1 }
 0x394   : > { %v13627_v58 = vadd.f32 %v5709_v42, %v5484_v5  ;;  %v5487_v26 = vadd.f32 %v10682_v6, %v13484_v28  ;;  %v7282_v5 = vld [vmem:[#allocation3 + $0xf8] sm:$0xff] }
 0x395   : > { %v5372_v43 = vpop.f32.mrf.mxu0  ;;  %v5712_v61 = vpop.f32.mrf.mxu1  ;;  %v7279_v6 = vld [vmem:[#allocation3 + $0xd8] sm:$0xff] }
 0x396   : > { %v13630_v63 = vadd.f32 %v10716_v48, %v5487_v26  ;;  %v5485_v57 = vadd.f32 %v5372_v43, %v13489_v41  ;;  %v6744_v41 = vld [vmem:[#allocation4 + $0xda] sm:$0xff]  ;;  %v7304_v26 = vpack.c.bf16 %v7280_v17, %v7279_v6  ;;  %v7285_v6 = vld [vmem:[#allocation3 + $0x120] sm:$0xff] }
 0x397   : > { %v10685_v25 = vpop.f32.mrf.mxu0  ;;  %v10719_v11 = vpop.f32.mrf.mxu1  ;;  %10888 = vmatmul.mubr.msk.bf16.gmra.mxu0 %vm354_vm1, %v6765_v23  ;;  %10922 = vmatmul.mubr.msk.bf16.gmra.mxu1 %vm354_vm1, %v7302_v31  ;;  %v6768_v48 = vpack.c.bf16 %v6745_v55, %v6744_v41 }
 0x398   : > { %v13635_v24 = vadd.f32 %v5712_v61, %v5485_v57  ;;  %v5490_v28 = vadd.f32 %v10685_v25, %v13494_v10  ;;  %10925 = vmatprep.mubr.msk.bf16.mxu1 %vm354_vm1, %v7303_v60  ;;  %10891 = vmatprep.mubr.msk.bf16.mxu0 %vm354_vm1, %v6766_v33  ;;  %v6746_v57 = vld [vmem:[#allocation4 + $0xf2] sm:$0xff]  ;;  %v6747_v60 = vld [vmem:[#allocation4 + $0xfa] sm:$0xff] }
 0x399   : > { %v5385_v13 = vpop.f32.mrf.mxu0  ;;  %v5725_v35 = vpop.f32.mrf.mxu1  ;;  %v6769_v55 = vpack.c.bf16 %v6747_v60, %v6746_v57 }
 0x39a   : > { %v13640_v37 = vadd.f32 %v10719_v11, %v5490_v28  ;;  %v5488_v54 = vadd.f32 %v5385_v13, %v13497_v18  ;;  %v7305_v18 = vpack.c.bf16 %v7282_v5, %v7281_v22  ;;  %v6749_v28 = vld [vmem:[#allocation4 + $0x112] sm:$0xff]  ;;  %v7284_v13 = vld [vmem:[#allocation3 + $0x110] sm:$0xff] }
 0x39b   : > { %v10686_v42 = vpop.f32.mrf.mxu0  ;;  %v10720_v2 = vpop.f32.mrf.mxu1 }
 0x39c   : > { %v13643_v10 = vadd.f32 %v5725_v35, %v5488_v54  ;;  %v5491_v29 = vadd.f32 %v10686_v42, %v13500_v1  ;;  %v7286_v54 = vld [vmem:[#allocation3 + $0x128] sm:$0xff] }
 0x39d   : > { %v5388_v23 = vpop.f32.mrf.mxu0  ;;  %v5728_v36 = vpop.f32.mrf.mxu1  ;;  %v7283_v42 = vld [vmem:[#allocation3 + $0x108] sm:$0xff] }
 0x39e   : > { %v13646_v33 = vadd.f32 %v10720_v2, %v5491_v29  ;;  %v5489_v43 = vadd.f32 %v5388_v23, %v13505_v12  ;;  %v6748_v12 = vld [vmem:[#allocation4 + $0x10a] sm:$0xff]  ;;  %v7306_v29 = vpack.c.bf16 %v7284_v13, %v7283_v42  ;;  %v7289_v42 = vld [vmem:[#allocation3 + $0x150] sm:$0xff] }
 0x39f   : > { %v10689_v61 = vpop.f32.mrf.mxu0  ;;  %v10723_v31 = vpop.f32.mrf.mxu1  ;;  %10892 = vmatmul.mubr.msk.bf16.gmra.mxu0 %vm354_vm1, %v6767_v3  ;;  %10926 = vmatmul.mubr.msk.bf16.gmra.mxu1 %vm354_vm1, %v7304_v26  ;;  %v6770_v2 = vpack.c.bf16 %v6749_v28, %v6748_v12 }
 0x3a0   : > { %v13651_v9 = vadd.f32 %v5728_v36, %v5489_v43  ;;  %v5494_v1 = vadd.f32 %v10689_v61, %v13510_v46  ;;  %10929 = vmatprep.mubr.msk.bf16.mxu1 %vm354_vm1, %v7305_v18  ;;  %10895 = vmatprep.mubr.msk.bf16.mxu0 %vm354_vm1, %v6768_v48  ;;  %v6750_v43 = vld [vmem:[#allocation4 + $0x122] sm:$0xff]  ;;  %v6751_v18 = vld [vmem:[#allocation4 + $0x12a] sm:$0xff] }
 0x3a1   : > { %v5401_v25 = vpop.f32.mrf.mxu0  ;;  %v5741_v11 = vpop.f32.mrf.mxu1  ;;  %v6771_v28 = vpack.c.bf16 %v6751_v18, %v6750_v43 }
 0x3a2   : > { %v13656_v38 = vadd.f32 %v10723_v31, %v5494_v1  ;;  %v5492_v21 = vadd.f32 %v5401_v25, %v13513_v7  ;;  %v7307_v7 = vpack.c.bf16 %v7286_v54, %v7285_v6  ;;  %v6753_v1 = vld [vmem:[#allocation4 + $0x142] sm:$0xff]  ;;  %v7288_v25 = vld [vmem:[#allocation3 + $0x140] sm:$0xff] }
 0x3a3   : > { %v10690_v35 = vpop.f32.mrf.mxu0  ;;  %v10724_v41 = vpop.f32.mrf.mxu1 }
 0x3a4   : > { %v13659_v46 = vadd.f32 %v5741_v11, %v5492_v21  ;;  %v5495_v17 = vadd.f32 %v10690_v35, %v13516_v32  ;;  %v7290_v21 = vld [vmem:[#allocation3 + $0x158] sm:$0xff] }
 0x3a5   : > { %v5404_v3 = vpop.f32.mrf.mxu0  ;;  %v5744_v5 = vpop.f32.mrf.mxu1  ;;  %v7287_v35 = vld [vmem:[#allocation3 + $0x138] sm:$0xff] }
 0x3a6   : > { %v13662_v48 = vadd.f32 %v10724_v41, %v5495_v17  ;;  %v5493_v23 = vadd.f32 %v5404_v3, %v13521_v30  ;;  %v6752_v30 = vld [vmem:[#allocation4 + $0x13a] sm:$0xff]  ;;  %v7308_v17 = vpack.c.bf16 %v7288_v25, %v7287_v35  ;;  %v7293_v35 = vld [vmem:[#allocation3 + $0x180] sm:$0xff] }
 0x3a7   : > { %v10693_v36 = vpop.f32.mrf.mxu0  ;;  %v10727_v26 = vpop.f32.mrf.mxu1  ;;  %10896 = vmatmul.mubr.msk.bf16.gmra.mxu0 %vm354_vm1, %v6769_v55  ;;  %10930 = vmatmul.mubr.msk.bf16.gmra.mxu1 %vm354_vm1, %v7306_v29  ;;  %v6772_v41 = vpack.c.bf16 %v6753_v1, %v6752_v30 }
 0x3a8   : > { %v13667_v22 = vadd.f32 %v5744_v5, %v5493_v23  ;;  %v5498_v32 = vadd.f32 %v10693_v36, %v13526_v51  ;;  %10933 = vmatprep.mubr.msk.bf16.mxu1 %vm354_vm1, %v7307_v7  ;;  %10899 = vmatprep.mubr.msk.bf16.mxu0 %vm354_vm1, %v6770_v2  ;;  %v6754_v23 = vld [vmem:[#allocation4 + $0x152] sm:$0xff]  ;;  %v6755_v7 = vld [vmem:[#allocation4 + $0x15a] sm:$0xff] }
 0x3a9   : > { %v5417_v61 = vpop.f32.mrf.mxu0  ;;  %v5757_v31 = vpop.f32.mrf.mxu1  ;;  %v6773_v1 = vpack.c.bf16 %v6755_v7, %v6754_v23  ;;  %v7314_v23 = vld [vmem:[#allocation4 + $0x30] sm:$0xff]  ;;  %v7315_v7 = vld [vmem:[#allocation4 + $0x38] sm:$0xff] }
 0x3aa   : > { %v13672_v57 = vadd.f32 %v10727_v26, %v5498_v32  ;;  %v5496_v60 = vadd.f32 %v5417_v61, %v13529_v40  ;;  %v7309_v40 = vpack.c.bf16 %v7290_v21, %v7289_v42  ;;  %v6757_v32 = vld [vmem:[#allocation4 + $0x172] sm:$0xff]  ;;  %v7292_v61 = vld [vmem:[#allocation3 + $0x170] sm:$0xff] }
 0x3ab   : > { %v10694_v11 = vpop.f32.mrf.mxu0  ;;  %v10728_v12 = vpop.f32.mrf.mxu1  ;;  %v6758_v42 = vld [vmem:[#allocation4 + $0x182] sm:$0xff] }
 0x3ac   : > { %v13675_v51 = vadd.f32 %v5757_v31, %v5496_v60  ;;  %v5499_v13 = vadd.f32 %v10694_v11, %v13532_v56  ;;  %v7294_v60 = vld [vmem:[#allocation3 + $0x188] sm:$0xff] }
 0x3ad   : > { %v5420_v55 = vpop.f32.mrf.mxu0  ;;  %v5760_v54 = vpop.f32.mrf.mxu1  ;;  %v7291_v11 = vld [vmem:[#allocation3 + $0x168] sm:$0xff] }
 0x3ae   : > { %v13678_v2 = vadd.f32 %v10728_v12, %v5499_v13  ;;  %v5497_v3 = vadd.f32 %v5420_v55, %v13537_v14  ;;  %v6756_v14 = vld [vmem:[#allocation4 + $0x16a] sm:$0xff]  ;;  %v7310_v13 = vpack.c.bf16 %v7292_v61, %v7291_v11  ;;  %v7850_v11 = vld [vmem:[#allocation3 + $0x31] sm:$0xff] }
 0x3af   : > { %v10697_v5 = vpop.f32.mrf.mxu0  ;;  %v10731_v29 = vpop.f32.mrf.mxu1  ;;  %10900 = vmatmul.mubr.msk.bf16.gmra.mxu0 %vm354_vm1, %v6771_v28  ;;  %10934 = vmatmul.mubr.msk.bf16.gmra.mxu1 %vm354_vm1, %v7308_v17  ;;  %v6774_v12 = vpack.c.bf16 %v6757_v32, %v6756_v14 }
 0x3b0   : > { %v13683_v6 = vadd.f32 %v5760_v54, %v5497_v3  ;;  %v5502_v56 = vadd.f32 %v10697_v5, %v13542_v15  ;;  %10937 = vmatprep.mubr.msk.bf16.mxu1 %vm354_vm1, %v7309_v40  ;;  %10903 = vmatprep.mubr.msk.bf16.mxu0 %vm354_vm1, %v6772_v41  ;;  %v6759_v40 = vld [vmem:[#allocation4 + $0x18a] sm:$0xff] }
 0x3b1   : > { %v5433_v36 = vpop.f32.mrf.mxu0  ;;  %v5773_v26 = vpop.f32.mrf.mxu1  ;;  %v7295_v5 = vld [vmem:[#allocation3 + $0x198] sm:$0xff] }
 0x3b2   : > { %v13688_v43 = vadd.f32 %v10731_v29, %v5502_v56  ;;  %v5500_v18 = vadd.f32 %v5433_v36, %v13545_v39  ;;  %v7311_v39 = vpack.c.bf16 %v7294_v60, %v7293_v35  ;;  %v7296_v29 = vld [vmem:[#allocation3 + $0x1a0] sm:$0xff] }
 0x3b3   : > { %v10698_v31 = vpop.f32.mrf.mxu0  ;;  %v10732_v30 = vpop.f32.mrf.mxu1  ;;  %v7312_v61 = vpack.c.bf16 %v7296_v29, %v7295_v5  ;;  %v7319_v5 = vld [vmem:[#allocation4 + $0x68] sm:$0xff] }
 0x3b4   : > { %v13691_v15 = vadd.f32 %v5773_v26, %v5500_v18  ;;  %v5503_v25 = vadd.f32 %v10698_v31, %v13548_v16  ;;  %v6775_v18 = vpack.c.bf16 %v6759_v40, %v6758_v42  ;;  %v7318_v40 = vld [vmem:[#allocation4 + $0x60] sm:$0xff] }
 0x3b5   : > { %v5436_v28 = vpop.f32.mrf.mxu0  ;;  %v5776_v21 = vpop.f32.mrf.mxu1 }
 0x3b6   : > { %v13694_v41 = vadd.f32 %v10732_v30, %v5503_v25  ;;  %v5501_v55 = vadd.f32 %v5436_v28, %v13553_v27 }
 0x3b7   : > { %v10701_v54 = vpop.f32.mrf.mxu0  ;;  %v10735_v17 = vpop.f32.mrf.mxu1  ;;  %10904 = vmatmul.mubr.msk.bf16.gmra.mxu0 %vm354_vm1, %v6773_v1  ;;  %10938 = vmatmul.mubr.msk.bf16.gmra.mxu1 %vm354_vm1, %v7310_v13  ;;  %v7346_v1 = vpack.c.bf16 %v7315_v7, %v7314_v23  ;;  %v7855_v23 = vld [vmem:[#allocation3 + $0x69] sm:$0xff] }
 0x3b8   : > { %v13699_v3 = vadd.f32 %v5776_v21, %v5501_v55  ;;  %v5506_v16 = vadd.f32 %v10701_v54, %v13558_v59  ;;  %10941 = vmatprep.mubr.msk.bf16.mxu1 %vm354_vm1, %v7311_v39  ;;  %10907 = vmatprep.mubr.msk.bf16.mxu0 %vm354_vm1, %v6774_v12  ;;  %v7851_v59 = vld [vmem:[#allocation3 + $0x39] sm:$0xff] }
 0x3b9   : > { %v5449_v27 = vpop.f32.mrf.mxu0  ;;  %v5789_v56 = vpop.f32.mrf.mxu1  ;;  %v7882_v21 = vpack.c.bf16 %v7851_v59, %v7850_v11  ;;  %v7317_v39 = vld [vmem:[#allocation4 + $0x50] sm:$0xff] }
 0x3ba   : > { %v13704_v36 = vadd.f32 %v10735_v17, %v5506_v16  ;;  %v5504_v26 = vadd.f32 %v5449_v27, %v13561_v0  ;;  %v7853_v16 = vld [vmem:[#allocation3 + $0x51] sm:$0xff]  ;;  %v7854_v59 = vld [vmem:[#allocation3 + $0x61] sm:$0xff] }
 0x3bb   : > { %v10702_v14 = vpop.f32.mrf.mxu0  ;;  %v10736_v32 = vpop.f32.mrf.mxu1 }
 0x3bc   : > { %v13707_v31 = vadd.f32 %v5789_v56, %v5504_v26  ;;  %v5507_v30 = vadd.f32 %v10702_v14, %v13564_v34  ;;  %v7316_v34 = vld [vmem:[#allocation4 + $0x48] sm:$0xff]  ;;  %v7852_v26 = vld [vmem:[#allocation3 + $0x49] sm:$0xff] }
 0x3bd   : > { %v5452_v60 = vpop.f32.mrf.mxu0  ;;  %v5792_v25 = vpop.f32.mrf.mxu1  ;;  %v7347_v56 = vpack.c.bf16 %v7317_v39, %v7316_v34  ;;  %v7323_v34 = vld [vmem:[#allocation4 + $0x98] sm:$0xff] }
 0x3be   : > { %v13710_v12 = vadd.f32 %v10736_v32, %v5507_v30  ;;  %v5505_v28 = vadd.f32 %v5452_v60, %v13569_v53  ;;  %v7884_v60 = vpack.c.bf16 %v7855_v23, %v7854_v59 }
 0x3bf   : > { %v10705_v13 = vpop.f32.mrf.mxu0  ;;  %v10739_v0 = vpop.f32.mrf.mxu1  ;;  %10908 = vmatmul.mubr.msk.bf16.gmra.mxu0 %vm354_vm1, %v6775_v18  ;;  %10942 = vmatmul.mubr.msk.bf16.gmra.mxu1 %vm354_vm1, %v7312_v61  ;;  %v7883_v18 = vpack.c.bf16 %v7853_v16, %v7852_v26  ;;  %v8239_v61 = vsel %vm964_vm0, %v13592_v62, 0 }
 0x3c0   : > { %v13715_v35 = vadd.f32 %v5792_v25, %v5505_v28  ;;  %v5510_v55 = vadd.f32 %v10705_v13, %v13574_v20  ;;  %10981 = vmatprep.mubr.msk.bf16.mxu1 %vm354_vm1, %v7882_v21  ;;  %10947 = vmatprep.mubr.msk.bf16.mxu0 %vm354_vm1, %v7346_v1  ;;  %v8579_v25 = vsel %vm964_vm0, %v13597_v50, 0  ;;  %v7321_v50 = vld [vmem:[#allocation4 + $0x80] sm:$0xff] }
 0x3c1   : > { %v5465_v54 = vpop.f32.mrf.mxu0  ;;  %v5805_v17 = vpop.f32.mrf.mxu1 }
 0x3c2   : > { %v13720_v53 = vadd.f32 %v10739_v0, %v5510_v55  ;;  %v5508_v42 = vadd.f32 %v5465_v54, %v13577_v4  ;;  %v7348_v4 = vpack.c.bf16 %v7319_v5, %v7318_v40  ;;  %v7322_v55 = vld [vmem:[#allocation4 + $0x90] sm:$0xff] }
 0x3c3   : > { %v10706_v29 = vpop.f32.mrf.mxu0  ;;  %v10740_v27 = vpop.f32.mrf.mxu1  ;;  %v7859_v40 = vld [vmem:[#allocation3 + $0x99] sm:$0xff] }
 0x3c4   : > { %v13723_v20 = vadd.f32 %v5805_v17, %v5508_v42  ;;  %v5511_v7 = vadd.f32 %v10706_v29, %v13582_v44  ;;  %v13738_v44 = vld [vmem:[%s14563_s7 + $0x20] sm:$0xf]  ;;  %v7857_v17 = vld [vmem:[#allocation3 + $0x81] sm:$0xff] }
 0x3c5   : > { %v5468_v14 = vpop.f32.mrf.mxu0  ;;  %v5808_v32 = vpop.f32.mrf.mxu1 }
 0x3c6   : > { %v13728_v30 = vadd.f32 %v10740_v27, %v5511_v7  ;;  %v5509_v1 = vadd.f32 %v5468_v14, %v13599_v19  ;;  %v7320_v19 = vld [vmem:[#allocation4 + $0x78] sm:$0xff]  ;;  %v7856_v27 = vld [vmem:[#allocation3 + $0x79] sm:$0xff]  ;;  %v7858_v14 = vld [vmem:[#allocation3 + $0x91] sm:$0xff] }
 0x3c7   : > { %v10745_v11 = vpop.f32.mrf.mxu0  ;;  %v10779_v28 = vpop.f32.mrf.mxu1  ;;  %10948 = vmatmul.mubr.msk.bf16.vlgmr.msra.gmra.mxu0 %vm354_vm1, %v7347_v56  ;;  %10982 = vmatmul.mubr.msk.bf16.vlgmr.msra.gmra.mxu1 %vm354_vm1, %v7883_v18  ;;  %v7349_v16 = vpack.c.bf16 %v7321_v50, %v7320_v19  ;;  %v7350_v56 = vpack.c.bf16 %v7323_v34, %v7322_v55  ;;  %v7885_v26 = vpack.c.bf16 %v7857_v17, %v7856_v27  ;;  %v7861_v50 = vld [vmem:[#allocation3 + $0xb1] sm:$0xff]  ;;  %v7863_v34 = vld [vmem:[#allocation3 + $0xc9] sm:$0xff] }
 0x3c8   : > { %v13740_v62 = vadd.f32 %v5808_v32, %v5509_v1  ;;  %v6066_v21 = vadd.f32 %v10745_v11, %v13604_v52  ;;  %11014 = vmatpush3.bf16.msra.mxu0 %v8239_v61  ;;  %10985 = vmatprep.mubr.msk.bf16.mxu1 %vm354_vm1, %v7884_v60  ;;  %v7886_v18 = vpack.c.bf16 %v7859_v40, %v7858_v14  ;;  %v7324_v1 = vld [vmem:[#allocation4 + $0xa8] sm:$0xff]  ;;  %v7325_v60 = vld [vmem:[#allocation4 + $0xb0] sm:$0xff]  ;;  %v7860_v17 = vld [vmem:[#allocation3 + $0xa9] sm:$0xff] }
 0x3c9   : > { %v5937_v13 = vpop.f32.mrf.mxu0  ;;  %v6277_v0 = vpop.f32.mrf.mxu1  ;;  %10951 = vmatprep.mubr.msk.bf16.mxu0 %vm354_vm1, %v7348_v4  ;;  %11048 = vmatpush3.bf16.msra.mxu1 %v8579_v25  ;;  %v7351_v55 = vpack.c.bf16 %v7325_v60, %v7324_v1  ;;  %v7887_v40 = vpack.c.bf16 %v7861_v50, %v7860_v17  ;;  %v7328_v14 = vld [vmem:[#allocation4 + $0xd8] sm:$0xff]  ;;  %v7864_v50 = vld [vmem:[#allocation3 + $0xd9] sm:$0xff] }
 0x3ca   : > { %v13745_v39 = vadd.f32 %v10779_v28, %v6066_v21  ;;  %v6064_v54 = vadd.f32 %v5937_v13, %v13611_v47  ;;  %11144 = vmatprep.subr.msk.bf16.mxu0 %vm964_vm0, %v13738_v44  ;;  %v7327_v28 = vld [vmem:[#allocation4 + $0xc8] sm:$0xff]  ;;  %v7865_v60 = vld [vmem:[#allocation3 + $0xe1] sm:$0xff] }
 0x3cb   : > { %v10746_v52 = vpop.f32.mrf.mxu0  ;;  %v10780_v42 = vpop.f32.mrf.mxu1 }
 0x3cc   : > { %v13750_v5 = vadd.f32 %v6277_v0, %v6064_v54  ;;  %v6067_v29 = vadd.f32 %v10746_v52, %v13614_v45 }
 0x3cd   : > { %v5940_v23 = vpop.f32.mrf.mxu0  ;;  %v6280_v7 = vpop.f32.mrf.mxu1 }
 0x3ce   : > { %v13753_v32 = vadd.f32 %v10780_v42, %v6067_v29  ;;  %v6065_v47 = vadd.f32 %v5940_v23, %v13619_v49  ;;  %v7326_v49 = vld [vmem:[#allocation4 + $0xc0] sm:$0xff]  ;;  %v7862_v29 = vld [vmem:[#allocation3 + $0xc1] sm:$0xff] }
 0x3cf   : > { %v10749_v61 = vpop.f32.mrf.mxu0  ;;  %v10783_v59 = vpop.f32.mrf.mxu1  ;;  %10952 = vmatmul.mubr.msk.bf16.gmra.mxu0 %vm354_vm1, %v7349_v16  ;;  %10986 = vmatmul.mubr.msk.bf16.gmra.mxu1 %vm354_vm1, %v7885_v26  ;;  %v7352_v52 = vpack.c.bf16 %v7327_v28, %v7326_v49  ;;  %v7867_v28 = vld [vmem:[#allocation3 + $0xf9] sm:$0xff] }
 0x3d0   : > { %v13758_v4 = vadd.f32 %v6280_v7, %v6065_v47  ;;  %v6070_v45 = vadd.f32 %v10749_v61, %v13624_v8  ;;  %10989 = vmatprep.mubr.msk.bf16.mxu1 %vm354_vm1, %v7886_v18  ;;  %10955 = vmatprep.mubr.msk.bf16.mxu0 %vm354_vm1, %v7350_v56  ;;  %v7329_v47 = vld [vmem:[#allocation4 + $0xe0] sm:$0xff] }
 0x3d1   : > { %v5953_v25 = vpop.f32.mrf.mxu0  ;;  %v6293_v11 = vpop.f32.mrf.mxu1  ;;  %v7353_v49 = vpack.c.bf16 %v7329_v47, %v7328_v14  ;;  %v7869_v47 = vld [vmem:[#allocation3 + $0x111] sm:$0xff] }
 0x3d2   : > { %v13763_v21 = vadd.f32 %v10783_v59, %v6070_v45  ;;  %v6068_v19 = vadd.f32 %v5953_v25, %v13627_v58  ;;  %v7888_v58 = vpack.c.bf16 %v7863_v34, %v7862_v29  ;;  %v7331_v59 = vld [vmem:[#allocation4 + $0xf8] sm:$0xff]  ;;  %v7889_v34 = vpack.c.bf16 %v7865_v60, %v7864_v50  ;;  %v7332_v29 = vld [vmem:[#allocation4 + $0x108] sm:$0xff] }
 0x3d3   : > { %v10750_v13 = vpop.f32.mrf.mxu0  ;;  %v10784_v0 = vpop.f32.mrf.mxu1  ;;  %v7868_v60 = vld [vmem:[#allocation3 + $0x109] sm:$0xff] }
 0x3d4   : > { %v13766_v8 = vadd.f32 %v6293_v11, %v6068_v19  ;;  %v6071_v54 = vadd.f32 %v10750_v13, %v13630_v63 }
 0x3d5   : > { %v5956_v42 = vpop.f32.mrf.mxu0  ;;  %v6296_v16 = vpop.f32.mrf.mxu1 }
 0x3d6   : > { %v13769_v27 = vadd.f32 %v10784_v0, %v6071_v54  ;;  %v6069_v56 = vadd.f32 %v5956_v42, %v13635_v24  ;;  %v7330_v24 = vld [vmem:[#allocation4 + $0xf0] sm:$0xff]  ;;  %v7866_v54 = vld [vmem:[#allocation3 + $0xf1] sm:$0xff] }
 0x3d7   : > { %v10753_v23 = vpop.f32.mrf.mxu0  ;;  %v10787_v7 = vpop.f32.mrf.mxu1  ;;  %10956 = vmatmul.mubr.msk.bf16.gmra.mxu0 %vm354_vm1, %v7351_v55  ;;  %10990 = vmatmul.mubr.msk.bf16.gmra.mxu1 %vm354_vm1, %v7887_v40  ;;  %v7354_v13 = vpack.c.bf16 %v7331_v59, %v7330_v24  ;;  %v7871_v59 = vld [vmem:[#allocation3 + $0x129] sm:$0xff] }
 0x3d8   : > { %v13774_v26 = vadd.f32 %v6296_v16, %v6069_v56  ;;  %v6074_v63 = vadd.f32 %v10753_v23, %v13640_v37  ;;  %10993 = vmatprep.mubr.msk.bf16.mxu1 %vm354_vm1, %v7888_v58  ;;  %10959 = vmatprep.mubr.msk.bf16.mxu0 %vm354_vm1, %v7352_v52  ;;  %v7333_v56 = vld [vmem:[#allocation4 + $0x110] sm:$0xff] }
 0x3d9   : > { %v5969_v18 = vpop.f32.mrf.mxu0  ;;  %v6309_v61 = vpop.f32.mrf.mxu1  ;;  %v7355_v24 = vpack.c.bf16 %v7333_v56, %v7332_v29  ;;  %v7873_v56 = vld [vmem:[#allocation3 + $0x141] sm:$0xff] }
 0x3da   : > { %v13779_v45 = vadd.f32 %v10787_v7, %v6074_v63  ;;  %v6072_v1 = vadd.f32 %v5969_v18, %v13643_v10  ;;  %v7890_v10 = vpack.c.bf16 %v7867_v28, %v7866_v54  ;;  %v7335_v7 = vld [vmem:[#allocation4 + $0x128] sm:$0xff]  ;;  %v7891_v28 = vpack.c.bf16 %v7869_v47, %v7868_v60  ;;  %v7336_v54 = vld [vmem:[#allocation4 + $0x138] sm:$0xff] }
 0x3db   : > { %v10754_v25 = vpop.f32.mrf.mxu0  ;;  %v10788_v11 = vpop.f32.mrf.mxu1  ;;  %v7872_v47 = vld [vmem:[#allocation3 + $0x139] sm:$0xff] }
 0x3dc   : > { %v13782_v37 = vadd.f32 %v6309_v61, %v6072_v1  ;;  %v6075_v19 = vadd.f32 %v10754_v25, %v13646_v33 }
 0x3dd   : > { %v5972_v0 = vpop.f32.mrf.mxu0  ;;  %v6312_v55 = vpop.f32.mrf.mxu1 }
 0x3de   : > { %v13785_v17 = vadd.f32 %v10788_v11, %v6075_v19  ;;  %v6073_v52 = vadd.f32 %v5972_v0, %v13651_v9  ;;  %v7334_v9 = vld [vmem:[#allocation4 + $0x120] sm:$0xff]  ;;  %v7870_v19 = vld [vmem:[#allocation3 + $0x121] sm:$0xff] }
 0x3df   : > { %v10757_v42 = vpop.f32.mrf.mxu0  ;;  %v10791_v16 = vpop.f32.mrf.mxu1  ;;  %10960 = vmatmul.mubr.msk.bf16.gmra.mxu0 %vm354_vm1, %v7353_v49  ;;  %10994 = vmatmul.mubr.msk.bf16.gmra.mxu1 %vm354_vm1, %v7889_v34  ;;  %v7356_v25 = vpack.c.bf16 %v7335_v7, %v7334_v9  ;;  %v7875_v7 = vld [vmem:[#allocation3 + $0x159] sm:$0xff] }
 0x3e0   : > { %v13790_v40 = vadd.f32 %v6312_v55, %v6073_v52  ;;  %v6078_v33 = vadd.f32 %v10757_v42, %v13656_v38  ;;  %10997 = vmatprep.mubr.msk.bf16.mxu1 %vm354_vm1, %v7890_v10  ;;  %10963 = vmatprep.mubr.msk.bf16.mxu0 %vm354_vm1, %v7354_v13  ;;  %v7337_v52 = vld [vmem:[#allocation4 + $0x140] sm:$0xff] }
 0x3e1   : > { %v5985_v58 = vpop.f32.mrf.mxu0  ;;  %v6325_v23 = vpop.f32.mrf.mxu1  ;;  %v7357_v9 = vpack.c.bf16 %v7337_v52, %v7336_v54  ;;  %v7877_v52 = vld [vmem:[#allocation3 + $0x171] sm:$0xff] }
 0x3e2   : > { %v13795_v63 = vadd.f32 %v10791_v16, %v6078_v33  ;;  %v6076_v14 = vadd.f32 %v5985_v58, %v13659_v46  ;;  %v7892_v46 = vpack.c.bf16 %v7871_v59, %v7870_v19  ;;  %v7339_v16 = vld [vmem:[#allocation4 + $0x158] sm:$0xff]  ;;  %v7893_v59 = vpack.c.bf16 %v7873_v56, %v7872_v47  ;;  %v7340_v19 = vld [vmem:[#allocation4 + $0x168] sm:$0xff] }
 0x3e3   : > { %v10758_v18 = vpop.f32.mrf.mxu0  ;;  %v10792_v61 = vpop.f32.mrf.mxu1  ;;  %v7876_v56 = vld [vmem:[#allocation3 + $0x169] sm:$0xff] }
 0x3e4   : > { %v13798_v38 = vadd.f32 %v6325_v23, %v6076_v14  ;;  %v6079_v1 = vadd.f32 %v10758_v18, %v13662_v48 }
 0x3e5   : > { %v5988_v11 = vpop.f32.mrf.mxu0  ;;  %v6328_v49 = vpop.f32.mrf.mxu1 }
 0x3e6   : > { %v13801_v50 = vadd.f32 %v10792_v61, %v6079_v1  ;;  %v6077_v13 = vadd.f32 %v5988_v11, %v13667_v22  ;;  %v7338_v22 = vld [vmem:[#allocation4 + $0x150] sm:$0xff]  ;;  %v7874_v1 = vld [vmem:[#allocation3 + $0x151] sm:$0xff] }
 0x3e7   : > { %v10761_v0 = vpop.f32.mrf.mxu0  ;;  %v10795_v55 = vpop.f32.mrf.mxu1  ;;  %10964 = vmatmul.mubr.msk.bf16.gmra.mxu0 %vm354_vm1, %v7355_v24  ;;  %10998 = vmatmul.mubr.msk.bf16.gmra.mxu1 %vm354_vm1, %v7891_v28  ;;  %v7358_v18 = vpack.c.bf16 %v7339_v16, %v7338_v22  ;;  %v7879_v16 = vld [vmem:[#allocation3 + $0x189] sm:$0xff] }
 0x3e8   : > { %v13806_v34 = vadd.f32 %v6328_v49, %v6077_v13  ;;  %v6082_v48 = vadd.f32 %v10761_v0, %v13672_v57  ;;  %11001 = vmatprep.mubr.msk.bf16.mxu1 %vm354_vm1, %v7892_v46  ;;  %10967 = vmatprep.mubr.msk.bf16.mxu0 %vm354_vm1, %v7356_v25  ;;  %v7341_v13 = vld [vmem:[#allocation4 + $0x170] sm:$0xff] }
 0x3e9   : > { %v6001_v10 = vpop.f32.mrf.mxu0  ;;  %v6341_v42 = vpop.f32.mrf.mxu1  ;;  %v7359_v22 = vpack.c.bf16 %v7341_v13, %v7340_v19  ;;  %v7899_v19 = vld [vmem:[#allocation4 + $0x39] sm:$0xff] }
 0x3ea   : > { %v13811_v33 = vadd.f32 %v10795_v55, %v6082_v48  ;;  %v6080_v29 = vadd.f32 %v6001_v10, %v13675_v51  ;;  %v7894_v51 = vpack.c.bf16 %v7875_v7, %v7874_v1  ;;  %v7343_v55 = vld [vmem:[#allocation4 + $0x188] sm:$0xff]  ;;  %v7895_v7 = vpack.c.bf16 %v7877_v52, %v7876_v56 }
 0x3eb   : > { %v10762_v58 = vpop.f32.mrf.mxu0  ;;  %v10796_v23 = vpop.f32.mrf.mxu1  ;;  %v8435_v52 = vld [vmem:[#allocation3 + $0x3a] sm:$0xff] }
 0x3ec   : > { %v13814_v57 = vadd.f32 %v6341_v42, %v6080_v29  ;;  %v6083_v14 = vadd.f32 %v10762_v58, %v13678_v2 }
 0x3ed   : > { %v6004_v61 = vpop.f32.mrf.mxu0  ;;  %v6344_v24 = vpop.f32.mrf.mxu1 }
 0x3ee   : > { %v13817_v60 = vadd.f32 %v10796_v23, %v6083_v14  ;;  %v6081_v25 = vadd.f32 %v6004_v61, %v13683_v6  ;;  %v7342_v6 = vld [vmem:[#allocation4 + $0x180] sm:$0xff]  ;;  %v7878_v14 = vld [vmem:[#allocation3 + $0x181] sm:$0xff] }
 0x3ef   : > { %v10765_v11 = vpop.f32.mrf.mxu0  ;;  %v10799_v49 = vpop.f32.mrf.mxu1  ;;  %10968 = vmatmul.mubr.msk.bf16.gmra.mxu0 %vm354_vm1, %v7357_v9  ;;  %11002 = vmatmul.mubr.msk.bf16.gmra.mxu1 %vm354_vm1, %v7893_v59  ;;  %v7360_v58 = vpack.c.bf16 %v7343_v55, %v7342_v6  ;;  %v7344_v59 = vld [vmem:[#allocation4 + $0x198] sm:$0xff] }
 0x3f0   : > { %v13822_v28 = vadd.f32 %v6344_v24, %v6081_v25  ;;  %v6086_v2 = vadd.f32 %v10765_v11, %v13688_v43  ;;  %11005 = vmatprep.mubr.msk.bf16.mxu1 %vm354_vm1, %v7894_v51  ;;  %10971 = vmatprep.mubr.msk.bf16.mxu0 %vm354_vm1, %v7358_v18  ;;  %v7345_v25 = vld [vmem:[#allocation4 + $0x1a0] sm:$0xff]  ;;  %v7880_v51 = vld [vmem:[#allocation3 + $0x199] sm:$0xff]  ;;  %v7881_v11 = vld [vmem:[#allocation3 + $0x1a1] sm:$0xff] }
 0x3f1   : > { %v6017_v46 = vpop.f32.mrf.mxu0  ;;  %v6357_v0 = vpop.f32.mrf.mxu1  ;;  %v7361_v55 = vpack.c.bf16 %v7345_v25, %v7344_v59  ;;  %v7902_v25 = vld [vmem:[#allocation4 + $0x61] sm:$0xff] }
 0x3f2   : > { %v13827_v48 = vadd.f32 %v10799_v49, %v6086_v2  ;;  %v6084_v54 = vadd.f32 %v6017_v46, %v13691_v15  ;;  %v7896_v15 = vpack.c.bf16 %v7879_v16, %v7878_v14  ;;  %v7898_v2 = vld [vmem:[#allocation4 + $0x31] sm:$0xff] }
 0x3f3   : > { %v10766_v10 = vpop.f32.mrf.mxu0  ;;  %v10800_v42 = vpop.f32.mrf.mxu1 }
 0x3f4   : > { %v13830_v43 = vadd.f32 %v6357_v0, %v6084_v54  ;;  %v6087_v29 = vadd.f32 %v10766_v10, %v13694_v41  ;;  %v7897_v54 = vpack.c.bf16 %v7881_v11, %v7880_v51  ;;  %v7903_v51 = vld [vmem:[#allocation4 + $0x69] sm:$0xff] }
 0x3f5   : > { %v6020_v23 = vpop.f32.mrf.mxu0  ;;  %v6360_v9 = vpop.f32.mrf.mxu1 }
 0x3f6   : > { %v13833_v47 = vadd.f32 %v10800_v42, %v6087_v29  ;;  %v6085_v18 = vadd.f32 %v6020_v23, %v13699_v3 }
 0x3f7   : > { %v10769_v61 = vpop.f32.mrf.mxu0  ;;  %v10803_v24 = vpop.f32.mrf.mxu1  ;;  %10972 = vmatmul.mubr.msk.bf16.gmra.mxu0 %vm354_vm1, %v7359_v22  ;;  %11006 = vmatmul.mubr.msk.bf16.gmra.mxu1 %vm354_vm1, %v7895_v7  ;;  %v7930_v22 = vpack.c.bf16 %v7899_v19, %v7898_v2  ;;  %v8439_v2 = vld [vmem:[#allocation3 + $0x6a] sm:$0xff] }
 0x3f8   : > { %v13838_v1 = vadd.f32 %v6360_v9, %v6085_v18  ;;  %v6090_v41 = vadd.f32 %v10769_v61, %v13704_v36  ;;  %11009 = vmatprep.mubr.msk.bf16.mxu1 %vm354_vm1, %v7896_v15  ;;  %10975 = vmatprep.mubr.msk.bf16.mxu0 %vm354_vm1, %v7360_v58  ;;  %v8434_v36 = vld [vmem:[#allocation3 + $0x32] sm:$0xff]  ;;  %v7901_v18 = vld [vmem:[#allocation4 + $0x51] sm:$0xff] }
 0x3f9   : > { %v6033_v3 = vpop.f32.mrf.mxu0  ;;  %v6373_v49 = vpop.f32.mrf.mxu1  ;;  %v8466_v23 = vpack.c.bf16 %v8435_v52, %v8434_v36  ;;  %v7932_v36 = vpack.c.bf16 %v7903_v51, %v7902_v25 }
 0x3fa   : > { %v13843_v13 = vadd.f32 %v10803_v24, %v6090_v41  ;;  %v6088_v46 = vadd.f32 %v6033_v3, %v13707_v31  ;;  %v8437_v41 = vld [vmem:[#allocation3 + $0x52] sm:$0xff] }
 0x3fb   : > { %v10770_v0 = vpop.f32.mrf.mxu0  ;;  %v10804_v6 = vpop.f32.mrf.mxu1 }
 0x3fc   : > { %v13846_v10 = vadd.f32 %v6373_v49, %v6088_v46  ;;  %v6091_v42 = vadd.f32 %v10770_v0, %v13710_v12  ;;  %v7900_v12 = vld [vmem:[#allocation4 + $0x49] sm:$0xff] }
 0x3fd   : > { %v6036_v16 = vpop.f32.mrf.mxu0  ;;  %v6376_v29 = vpop.f32.mrf.mxu1  ;;  %v7931_v49 = vpack.c.bf16 %v7901_v18, %v7900_v12  ;;  %v8440_v18 = vld [vmem:[#allocation3 + $0x7a] sm:$0xff] }
 0x3fe   : > { %v13849_v56 = vadd.f32 %v10804_v6, %v6091_v42  ;;  %v6089_v58 = vadd.f32 %v6036_v16, %v13715_v35  ;;  %v8436_v35 = vld [vmem:[#allocation3 + $0x4a] sm:$0xff] }
 0x3ff   : > { %v10773_v9 = vpop.f32.mrf.mxu0  ;;  %v10807_v31 = vpop.f32.mrf.mxu1  ;;  %10976 = vmatmul.mubr.msk.bf16.gmra.mxu0 %vm354_vm1, %v7361_v55  ;;  %11010 = vmatmul.mubr.msk.bf16.gmra.mxu1 %vm354_vm1, %v7897_v54  ;;  %v8467_v55 = vpack.c.bf16 %v8437_v41, %v8436_v35  ;;  %v8823_v54 = vsel %vm964_vm0, %v13738_v44, 0  ;;  %v7904_v44 = vld [vmem:[#allocation4 + $0x79] sm:$0xff]  ;;  %v8443_v41 = vld [vmem:[#allocation3 + $0x9a] sm:$0xff] }
 0x400   : > { %v13854_v7 = vadd.f32 %v6376_v29, %v6089_v58  ;;  %v6094_v14 = vadd.f32 %v10773_v9, %v13720_v53  ;;  %11049 = vmatprep.mubr.msk.bf16.mxu1 %vm354_vm1, %v8466_v23  ;;  %11015 = vmatprep.mubr.msk.bf16.mxu0 %vm354_vm1, %v7930_v22  ;;  %v8438_v53 = vld [vmem:[#allocation3 + $0x62] sm:$0xff]  ;;  %v7905_v58 = vld [vmem:[#allocation4 + $0x81] sm:$0xff] }
 0x401   : > { %v6049_v15 = vpop.f32.mrf.mxu0  ;;  %v6389_v61 = vpop.f32.mrf.mxu1  ;;  %v8468_v42 = vpack.c.bf16 %v8439_v2, %v8438_v53 }
 0x402   : > { %v13859_v24 = vadd.f32 %v10807_v31, %v6094_v14  ;;  %v6092_v59 = vadd.f32 %v6049_v15, %v13723_v20  ;;  %v7907_v31 = vld [vmem:[#allocation4 + $0x99] sm:$0xff] }
 0x403   : > { %v10774_v11 = vpop.f32.mrf.mxu0  ;;  %v10808_v3 = vpop.f32.mrf.mxu1  ;;  %v8441_v15 = vld [vmem:[#allocation3 + $0x82] sm:$0xff] }
 0x404   : > { %v13862_v19 = vadd.f32 %v6389_v61, %v6092_v59  ;;  %v6095_v46 = vadd.f32 %v10774_v11, %v13728_v30  ;;  %v8442_v59 = vld [vmem:[#allocation3 + $0x92] sm:$0xff]  ;;  %v8469_v53 = vpack.c.bf16 %v8441_v15, %v8440_v18 }
 0x405   : > { %v6052_v0 = vpop.f32.mrf.mxu0  ;;  %v6392_v6 = vpop.f32.mrf.mxu1 }
 0x406   : > { %v13867_v20 = vadd.f32 %v10808_v3, %v6095_v46  ;;  %v6093_v52 = vadd.f32 %v6052_v0, %v13740_v62  ;;  %v7906_v62 = vld [vmem:[#allocation4 + $0x91] sm:$0xff] }
 0x407   : > { %v10813_v22 = vpop.f32.mrf.mxu0  ;;  %v10847_v16 = vpop.f32.mrf.mxu1  ;;  %11016 = vmatmul.mubr.msk.bf16.vlgmr.msra.gmra.mxu0 %vm354_vm1, %v7931_v49  ;;  %11050 = vmatmul.mubr.msk.bf16.vlgmr.msra.gmra.mxu1 %vm354_vm1, %v8467_v55  ;;  %v7934_v11 = vpack.c.bf16 %v7907_v31, %v7906_v62  ;;  %v8447_v31 = vld [vmem:[#allocation3 + $0xca] sm:$0xff] }
 0x408   : > { %v13872_v29 = vadd.f32 %v6392_v6, %v6093_v52  ;;  %v6650_v30 = vadd.f32 %v10813_v22, %v13745_v39  ;;  %11082 = vmatpush3.bf16.msra.mxu0 %v8823_v54  ;;  %11053 = vmatprep.mubr.msk.bf16.mxu1 %vm354_vm1, %v8468_v42  ;;  %v7933_v39 = vpack.c.bf16 %v7905_v58, %v7904_v44  ;;  %v7911_v22 = vld [vmem:[#allocation4 + $0xc9] sm:$0xff]  ;;  %v8444_v44 = vld [vmem:[#allocation3 + $0xaa] sm:$0xff] }
 0x409   : > { %v6521_v23 = vpop.f32.mrf.mxu0  ;;  %v6861_v9 = vpop.f32.mrf.mxu1  ;;  %11019 = vmatprep.mubr.msk.bf16.mxu0 %vm354_vm1, %v7932_v36  ;;  %v7909_v36 = vld [vmem:[#allocation4 + $0xb1] sm:$0xff]  ;;  %v8445_v58 = vld [vmem:[#allocation3 + $0xb2] sm:$0xff] }
 0x40a   : > { %v13877_v14 = vadd.f32 %v10847_v16, %v6650_v30  ;;  %v6648_v12 = vadd.f32 %v6521_v23, %v13750_v5  ;;  %v8470_v5 = vpack.c.bf16 %v8443_v41, %v8442_v59 }
 0x40b   : > { %v10814_v61 = vpop.f32.mrf.mxu0  ;;  %v10848_v35 = vpop.f32.mrf.mxu1 }
 0x40c   : > { %v13880_v25 = vadd.f32 %v6861_v9, %v6648_v12  ;;  %v6651_v51 = vadd.f32 %v10814_v61, %v13753_v32  ;;  %v7908_v32 = vld [vmem:[#allocation4 + $0xa9] sm:$0xff] }
 0x40d   : > { %v6524_v3 = vpop.f32.mrf.mxu0  ;;  %v6864_v49 = vpop.f32.mrf.mxu1  ;;  %v7935_v62 = vpack.c.bf16 %v7909_v36, %v7908_v32  ;;  %v8448_v32 = vld [vmem:[#allocation3 + $0xda] sm:$0xff]  ;;  %v8449_v36 = vld [vmem:[#allocation3 + $0xe2] sm:$0xff] }
 0x40e   : > { %v13883_v2 = vadd.f32 %v10848_v35, %v6651_v51  ;;  %v6649_v46 = vadd.f32 %v6524_v3, %v13758_v4  ;;  %v7910_v4 = vld [vmem:[#allocation4 + $0xc1] sm:$0xff] }
 0x40f   : > { %v10817_v0 = vpop.f32.mrf.mxu0  ;;  %v10851_v6 = vpop.f32.mrf.mxu1  ;;  %11020 = vmatmul.mubr.msk.bf16.gmra.mxu0 %vm354_vm1, %v7933_v39  ;;  %11054 = vmatmul.mubr.msk.bf16.gmra.mxu1 %vm354_vm1, %v8469_v53  ;;  %v7936_v15 = vpack.c.bf16 %v7911_v22, %v7910_v4  ;;  %v8471_v39 = vpack.c.bf16 %v8445_v58, %v8444_v44  ;;  %v7913_v53 = vld [vmem:[#allocation4 + $0xe1] sm:$0xff]  ;;  %v8451_v22 = vld [vmem:[#allocation3 + $0xfa] sm:$0xff] }
 0x410   : > { %v13888_v55 = vadd.f32 %v6864_v49, %v6649_v46  ;;  %v6654_v54 = vadd.f32 %v10817_v0, %v13763_v21  ;;  %11057 = vmatprep.mubr.msk.bf16.mxu1 %vm354_vm1, %v8470_v5  ;;  %11023 = vmatprep.mubr.msk.bf16.mxu0 %vm354_vm1, %v7934_v11  ;;  %v8446_v21 = vld [vmem:[#allocation3 + $0xc2] sm:$0xff] }
 0x411   : > { %v6537_v52 = vpop.f32.mrf.mxu0  ;;  %v6877_v42 = vpop.f32.mrf.mxu1  ;;  %v7915_v0 = vld [vmem:[#allocation4 + $0xf9] sm:$0xff] }
 0x412   : > { %v13893_v16 = vadd.f32 %v10851_v6, %v6654_v54  ;;  %v6652_v30 = vadd.f32 %v6537_v52, %v13766_v8  ;;  %v8472_v8 = vpack.c.bf16 %v8447_v31, %v8446_v21 }
 0x413   : > { %v10818_v23 = vpop.f32.mrf.mxu0  ;;  %v10852_v9 = vpop.f32.mrf.mxu1 }
 0x414   : > { %v13896_v12 = vadd.f32 %v6877_v42, %v6652_v30  ;;  %v6655_v18 = vadd.f32 %v10818_v23, %v13769_v27  ;;  %v7912_v27 = vld [vmem:[#allocation4 + $0xd9] sm:$0xff] }
 0x415   : > { %v6540_v61 = vpop.f32.mrf.mxu0  ;;  %v6880_v35 = vpop.f32.mrf.mxu1  ;;  %v7937_v4 = vpack.c.bf16 %v7913_v53, %v7912_v27  ;;  %v8452_v27 = vld [vmem:[#allocation3 + $0x10a] sm:$0xff]  ;;  %v8453_v53 = vld [vmem:[#allocation3 + $0x112] sm:$0xff] }
 0x416   : > { %v13899_v59 = vadd.f32 %v10852_v9, %v6655_v18  ;;  %v6653_v41 = vadd.f32 %v6540_v61, %v13774_v26  ;;  %v7914_v26 = vld [vmem:[#allocation4 + $0xf1] sm:$0xff] }
 0x417   : > { %v10821_v51 = vpop.f32.mrf.mxu0  ;;  %v10855_v11 = vpop.f32.mrf.mxu1  ;;  %11024 = vmatmul.mubr.msk.bf16.gmra.mxu0 %vm354_vm1, %v7935_v62  ;;  %11058 = vmatmul.mubr.msk.bf16.gmra.mxu1 %vm354_vm1, %v8471_v39  ;;  %v7938_v58 = vpack.c.bf16 %v7915_v0, %v7914_v26  ;;  %v8473_v62 = vpack.c.bf16 %v8449_v36, %v8448_v32  ;;  %v7917_v39 = vld [vmem:[#allocation4 + $0x111] sm:$0xff]  ;;  %v8455_v0 = vld [vmem:[#allocation3 + $0x12a] sm:$0xff] }
 0x418   : > { %v13904_v3 = vadd.f32 %v6880_v35, %v6653_v41  ;;  %v6658_v49 = vadd.f32 %v10821_v51, %v13779_v45  ;;  %11061 = vmatprep.mubr.msk.bf16.mxu1 %vm354_vm1, %v8472_v8  ;;  %11027 = vmatprep.mubr.msk.bf16.mxu0 %vm354_vm1, %v7936_v15  ;;  %v8450_v45 = vld [vmem:[#allocation3 + $0xf2] sm:$0xff] }
 0x419   : > { %v6553_v46 = vpop.f32.mrf.mxu0  ;;  %v6893_v5 = vpop.f32.mrf.mxu1  ;;  %v7919_v51 = vld [vmem:[#allocation4 + $0x129] sm:$0xff] }
 0x41a   : > { %v13909_v6 = vadd.f32 %v10855_v11, %v6658_v49  ;;  %v6656_v54 = vadd.f32 %v6553_v46, %v13782_v37  ;;  %v8474_v37 = vpack.c.bf16 %v8451_v22, %v8450_v45 }
 0x41b   : > { %v10822_v52 = vpop.f32.mrf.mxu0  ;;  %v10856_v42 = vpop.f32.mrf.mxu1 }
 0x41c   : > { %v13912_v30 = vadd.f32 %v6893_v5, %v6656_v54  ;;  %v6659_v44 = vadd.f32 %v10822_v52, %v13785_v17  ;;  %v7916_v17 = vld [vmem:[#allocation4 + $0x109] sm:$0xff] }
 0x41d   : > { %v6556_v23 = vpop.f32.mrf.mxu0  ;;  %v6896_v9 = vpop.f32.mrf.mxu1  ;;  %v7939_v26 = vpack.c.bf16 %v7917_v39, %v7916_v17  ;;  %v8456_v17 = vld [vmem:[#allocation3 + $0x13a] sm:$0xff]  ;;  %v8457_v39 = vld [vmem:[#allocation3 + $0x142] sm:$0xff] }
 0x41e   : > { %v13915_v21 = vadd.f32 %v10856_v42, %v6659_v44  ;;  %v6657_v31 = vadd.f32 %v6556_v23, %v13790_v40  ;;  %v7918_v40 = vld [vmem:[#allocation4 + $0x121] sm:$0xff] }
 0x41f   : > { %v10825_v18 = vpop.f32.mrf.mxu0  ;;  %v10859_v15 = vpop.f32.mrf.mxu1  ;;  %11028 = vmatmul.mubr.msk.bf16.gmra.mxu0 %vm354_vm1, %v7937_v4  ;;  %11062 = vmatmul.mubr.msk.bf16.gmra.mxu1 %vm354_vm1, %v8473_v62  ;;  %v7940_v36 = vpack.c.bf16 %v7919_v51, %v7918_v40  ;;  %v8475_v4 = vpack.c.bf16 %v8453_v53, %v8452_v27  ;;  %v7921_v62 = vld [vmem:[#allocation4 + $0x141] sm:$0xff]  ;;  %v8459_v51 = vld [vmem:[#allocation3 + $0x15a] sm:$0xff] }
 0x420   : > { %v13920_v61 = vadd.f32 %v6896_v9, %v6657_v31  ;;  %v6662_v35 = vadd.f32 %v10825_v18, %v13795_v63  ;;  %11065 = vmatprep.mubr.msk.bf16.mxu1 %vm354_vm1, %v8474_v37  ;;  %11031 = vmatprep.mubr.msk.bf16.mxu0 %vm354_vm1, %v7938_v58  ;;  %v8454_v63 = vld [vmem:[#allocation3 + $0x122] sm:$0xff] }
 0x421   : > { %v6569_v41 = vpop.f32.mrf.mxu0  ;;  %v6909_v8 = vpop.f32.mrf.mxu1  ;;  %v7923_v18 = vld [vmem:[#allocation4 + $0x159] sm:$0xff] }
 0x422   : > { %v13925_v11 = vadd.f32 %v10859_v15, %v6662_v35  ;;  %v6660_v49 = vadd.f32 %v6569_v41, %v13798_v38  ;;  %v8476_v38 = vpack.c.bf16 %v8455_v0, %v8454_v63 }
 0x423   : > { %v10826_v46 = vpop.f32.mrf.mxu0  ;;  %v10860_v5 = vpop.f32.mrf.mxu1 }
 0x424   : > { %v13928_v54 = vadd.f32 %v6909_v8, %v6660_v49  ;;  %v6663_v32 = vadd.f32 %v10826_v46, %v13801_v50  ;;  %v7920_v50 = vld [vmem:[#allocation4 + $0x139] sm:$0xff] }
 0x425   : > { %v6572_v52 = vpop.f32.mrf.mxu0  ;;  %v6912_v42 = vpop.f32.mrf.mxu1  ;;  %v7941_v40 = vpack.c.bf16 %v7921_v62, %v7920_v50  ;;  %v8460_v50 = vld [vmem:[#allocation3 + $0x16a] sm:$0xff]  ;;  %v8461_v62 = vld [vmem:[#allocation3 + $0x172] sm:$0xff] }
 0x426   : > { %v13931_v45 = vadd.f32 %v10860_v5, %v6663_v32  ;;  %v6661_v22 = vadd.f32 %v6572_v52, %v13806_v34  ;;  %v7922_v34 = vld [vmem:[#allocation4 + $0x151] sm:$0xff] }
 0x427   : > { %v10829_v44 = vpop.f32.mrf.mxu0  ;;  %v10863_v58 = vpop.f32.mrf.mxu1  ;;  %11032 = vmatmul.mubr.msk.bf16.gmra.mxu0 %vm354_vm1, %v7939_v26  ;;  %11066 = vmatmul.mubr.msk.bf16.gmra.mxu1 %vm354_vm1, %v8475_v4  ;;  %v7942_v53 = vpack.c.bf16 %v7923_v18, %v7922_v34  ;;  %v8477_v26 = vpack.c.bf16 %v8457_v39, %v8456_v17  ;;  %v7925_v4 = vld [vmem:[#allocation4 + $0x171] sm:$0xff]  ;;  %v8463_v18 = vld [vmem:[#allocation3 + $0x18a] sm:$0xff] }
 0x428   : > { %v13936_v23 = vadd.f32 %v6912_v42, %v6661_v22  ;;  %v6666_v9 = vadd.f32 %v10829_v44, %v13811_v33  ;;  %11069 = vmatprep.mubr.msk.bf16.mxu1 %vm354_vm1, %v8476_v38  ;;  %11035 = vmatprep.mubr.msk.bf16.mxu0 %vm354_vm1, %v7940_v36  ;;  %v8458_v33 = vld [vmem:[#allocation3 + $0x152] sm:$0xff] }
 0x429   : > { %v6585_v31 = vpop.f32.mrf.mxu0  ;;  %v6925_v37 = vpop.f32.mrf.mxu1  ;;  %v7927_v44 = vld [vmem:[#allocation4 + $0x189] sm:$0xff] }
 0x42a   : > { %v13941_v15 = vadd.f32 %v10863_v58, %v6666_v9  ;;  %v6664_v35 = vadd.f32 %v6585_v31, %v13814_v57  ;;  %v8478_v57 = vpack.c.bf16 %v8459_v51, %v8458_v33 }
 0x42b   : > { %v10830_v41 = vpop.f32.mrf.mxu0  ;;  %v10864_v8 = vpop.f32.mrf.mxu1 }
 0x42c   : > { %v13944_v49 = vadd.f32 %v6925_v37, %v6664_v35  ;;  %v6667_v27 = vadd.f32 %v10830_v41, %v13817_v60  ;;  %v7924_v60 = vld [vmem:[#allocation4 + $0x169] sm:$0xff] }
 0x42d   : > { %v6588_v46 = vpop.f32.mrf.mxu0  ;;  %v6928_v5 = vpop.f32.mrf.mxu1  ;;  %v7943_v34 = vpack.c.bf16 %v7925_v4, %v7924_v60 }
 0x42e   : > { %v13947_v63 = vadd.f32 %v10864_v8, %v6667_v27  ;;  %v6665_v0 = vadd.f32 %v6588_v46, %v13822_v28  ;;  %v7926_v28 = vld [vmem:[#allocation4 + $0x181] sm:$0xff]  ;;  %v7928_v46 = vld [vmem:[#allocation4 + $0x199] sm:$0xff] }
 0x42f   : > { %v10833_v32 = vpop.f32.mrf.mxu0  ;;  %v10867_v36 = vpop.f32.mrf.mxu1  ;;  %11036 = vmatmul.mubr.msk.bf16.gmra.mxu0 %vm354_vm1, %v7941_v40  ;;  %11070 = vmatmul.mubr.msk.bf16.gmra.mxu1 %vm354_vm1, %v8477_v26  ;;  %v7944_v39 = vpack.c.bf16 %v7927_v44, %v7926_v28  ;;  %v8479_v40 = vpack.c.bf16 %v8461_v62, %v8460_v50  ;;  %v7929_v26 = vld [vmem:[#allocation4 + $0x1a1] sm:$0xff] }
 0x430   : > { %v13952_v52 = vadd.f32 %v6928_v5, %v6665_v0  ;;  %v6670_v42 = vadd.f32 %v10833_v32, %v13827_v48  ;;  %11073 = vmatprep.mubr.msk.bf16.mxu1 %vm354_vm1, %v8478_v57  ;;  %11039 = vmatprep.mubr.msk.bf16.mxu0 %vm354_vm1, %v7942_v53  ;;  %v8462_v48 = vld [vmem:[#allocation3 + $0x182] sm:$0xff]  ;;  %v8464_v0 = vld [vmem:[#allocation3 + $0x19a] sm:$0xff]  ;;  %v7945_v28 = vpack.c.bf16 %v7929_v26, %v7928_v46 }
 0x431   : > { %v6601_v22 = vpop.f32.mrf.mxu0  ;;  %v6941_v38 = vpop.f32.mrf.mxu1  ;;  %v8465_v57 = vld [vmem:[#allocation3 + $0x1a2] sm:$0xff] }
 0x432   : > { %v13957_v58 = vadd.f32 %v10867_v36, %v6670_v42  ;;  %v6668_v9 = vadd.f32 %v6601_v22, %v13830_v43  ;;  %v8480_v43 = vpack.c.bf16 %v8463_v18, %v8462_v48  ;;  %v8482_v36 = vld [vmem:[#allocation4 + $0x32] sm:$0xff]  ;;  %v8483_v42 = vld [vmem:[#allocation4 + $0x3a] sm:$0xff]  ;;  %v8481_v44 = vpack.c.bf16 %v8465_v57, %v8464_v0 }
 0x433   : > { %v10834_v31 = vpop.f32.mrf.mxu0  ;;  %v10868_v37 = vpop.f32.mrf.mxu1  ;;  %v8514_v50 = vpack.c.bf16 %v8483_v42, %v8482_v36 }
 0x434   : > { %v13960_v35 = vadd.f32 %v6941_v38, %v6668_v9  ;;  %v6671_v17 = vadd.f32 %v10834_v31, %v13833_v47 }
 0x435   : > { %v6604_v41 = vpop.f32.mrf.mxu0  ;;  %v6944_v8 = vpop.f32.mrf.mxu1 }
 0x436   : > { %v13963_v33 = vadd.f32 %v10868_v37, %v6671_v17  ;;  %v6669_v51 = vadd.f32 %v6604_v41, %v13838_v1 }
 0x437   : > { %v10837_v27 = vpop.f32.mrf.mxu0  ;;  %v10871_v53 = vpop.f32.mrf.mxu1  ;;  %11040 = vmatmul.mubr.msk.bf16.gmra.mxu0 %vm354_vm1, %v7943_v34  ;;  %11074 = vmatmul.mubr.msk.bf16.gmra.mxu1 %vm354_vm1, %v8479_v40  ;;  %v8486_v40 = vld [vmem:[#allocation4 + $0x62] sm:$0xff] }
 0x438   : > { %v13968_v5 = vadd.f32 %v6944_v8, %v6669_v51  ;;  %v6674_v47 = vadd.f32 %v10837_v27, %v13843_v13  ;;  %11077 = vmatprep.mubr.msk.bf16.mxu1 %vm354_vm1, %v8480_v43  ;;  %11043 = vmatprep.mubr.msk.bf16.mxu0 %vm354_vm1, %v7944_v39  ;;  %v8485_v39 = vld [vmem:[#allocation4 + $0x52] sm:$0xff]  ;;  %v8487_v51 = vld [vmem:[#allocation4 + $0x6a] sm:$0xff] }
 0x439   : > { %v6617_v1 = vpop.f32.mrf.mxu0  ;;  %v6957_v32 = vpop.f32.mrf.mxu1 }
 0x43a   : > { %v13973_v60 = vadd.f32 %v10871_v53, %v6674_v47  ;;  %v6672_v4 = vadd.f32 %v6617_v1, %v13846_v10 }
 0x43b   : > { %v10838_v22 = vpop.f32.mrf.mxu0  ;;  %v10872_v38 = vpop.f32.mrf.mxu1 }
 0x43c   : > { %v13976_v13 = vadd.f32 %v6957_v32, %v6672_v4  ;;  %v6675_v9 = vadd.f32 %v10838_v22, %v13849_v56  ;;  %v8484_v56 = vld [vmem:[#allocation4 + $0x4a] sm:$0xff]  ;;  %v8488_v22 = vld [vmem:[#allocation4 + $0x7a] sm:$0xff] }
 0x43d   : > { %v6620_v62 = vpop.f32.mrf.mxu0  ;;  %v6960_v31 = vpop.f32.mrf.mxu1  ;;  %v8515_v46 = vpack.c.bf16 %v8485_v39, %v8484_v56 }
 0x43e   : > { %v13979_v37 = vadd.f32 %v10872_v38, %v6675_v9  ;;  %v6673_v34 = vadd.f32 %v6620_v62, %v13854_v7  ;;  %v8489_v38 = vld [vmem:[#allocation4 + $0x82] sm:$0xff]  ;;  %v8491_v9 = vld [vmem:[#allocation4 + $0x9a] sm:$0xff] }
 0x43f   : > { %v10841_v48 = vpop.f32.mrf.mxu0  ;;  %v10875_v18 = vpop.f32.mrf.mxu1  ;;  %11044 = vmatmul.mubr.msk.bf16.gmra.mxu0 %vm354_vm1, %v7945_v28  ;;  %11078 = vmatmul.mubr.msk.bf16.gmra.mxu1 %vm354_vm1, %v8481_v44  ;;  %v8490_v44 = vld [vmem:[#allocation4 + $0x92] sm:$0xff] }
 0x440   : > { %v13984_v10 = vadd.f32 %v6960_v31, %v6673_v34  ;;  %v6678_v17 = vadd.f32 %v10841_v48, %v13859_v24  ;;  %11083 = vmatprep.mubr.msk.bf16.mxu0 %vm354_vm1, %v8514_v50  ;;  %v8516_v24 = vpack.c.bf16 %v8487_v51, %v8486_v40  ;;  %v8517_v34 = vpack.c.bf16 %v8489_v38, %v8488_v22 }
 0x441   : > { %v6633_v41 = vpop.f32.mrf.mxu0  ;;  %v6973_v8 = vpop.f32.mrf.mxu1 }
 0x442   : > { %v13988_v43 = vadd.f32 %v10875_v18, %v6678_v17  ;;  %v6676_v7 = vadd.f32 %v6633_v41, %v13862_v19 }
 0x443   : > { %v10842_v27 = vpop.f32.mrf.mxu0  ;;  %v10876_v53 = vpop.f32.mrf.mxu1 }
 0x444   : > { %v13991_v47 = vadd.f32 %v6973_v8, %v6676_v7  ;;  %v6679_v26 = vadd.f32 %v10842_v27, %v13867_v20  ;;  %v8492_v7 = vld [vmem:[#allocation4 + $0xaa] sm:$0xff]  ;;  %v8493_v27 = vld [vmem:[#allocation4 + $0xb2] sm:$0xff] }
 0x445   : > { %v6636_v0 = vpop.f32.mrf.mxu0  ;;  %v6976_v57 = vpop.f32.mrf.mxu1 }
 0x446   : > { %v13994_v1 = vadd.f32 %v10876_v53, %v6679_v26  ;;  %v6677_v32 = vadd.f32 %v6636_v0, %v13872_v29  ;;  %v8495_v26 = vld [vmem:[#allocation4 + $0xca] sm:$0xff] }
 0x447   : > { %v10881_v36 = vpop.f32.mrf.mxu0  ;;  %v10915_v42 = vpop.f32.mrf.mxu1  ;;  %11084 = vmatmul.mubr.msk.bf16.vlgmr.msra.gmra.mxu0 %vm354_vm1, %v8515_v46  ;;  %v8494_v46 = vld [vmem:[#allocation4 + $0xc2] sm:$0xff] }
 0x448   : > { %v13998_v4 = vadd.f32 %v6976_v57, %v6677_v32  ;;  %v7234_v19 = vadd.f32 %v10881_v36, %v13877_v14  ;;  %11087 = vmatprep.mubr.msk.bf16.mxu0 %vm354_vm1, %v8516_v24  ;;  %v8518_v14 = vpack.c.bf16 %v8491_v9, %v8490_v44  ;;  %v8519_v32 = vpack.c.bf16 %v8493_v27, %v8492_v7 }
 0x449   : > { %v7105_v20 = vpop.f32.mrf.mxu0  ;;  %v7447_v28 = vpop.f32.mrf.mxu1 }
 0x44a   : > { %v14002_v50 = vadd.f32 %v10915_v42, %v7234_v19  ;;  %v7232_v29 = vadd.f32 %v7105_v20, %v13880_v25 }
 0x44b   : > { %v10882_v62 = vpop.f32.mrf.mxu0  ;;  %v10916_v31 = vpop.f32.mrf.mxu1 }
 0x44c   : > { %v14005_v48 = vadd.f32 %v7447_v28, %v7232_v29  ;;  %v7235_v18 = vadd.f32 %v10882_v62, %v13883_v2  ;;  %v8496_v29 = vld [vmem:[#allocation4 + $0xda] sm:$0xff]  ;;  %v8497_v62 = vld [vmem:[#allocation4 + $0xe2] sm:$0xff] }
 0x44d   : > { %v7108_v17 = vpop.f32.mrf.mxu0  ;;  %v7450_v56 = vpop.f32.mrf.mxu1 }
 0x44e   : > { %v14008_v39 = vadd.f32 %v10916_v31, %v7235_v18  ;;  %v7233_v41 = vadd.f32 %v7108_v17, %v13888_v55  ;;  %v8499_v18 = vld [vmem:[#allocation4 + $0xfa] sm:$0xff] }
 0x44f   : > { %v10885_v8 = vpop.f32.mrf.mxu0  ;;  %v10919_v40 = vpop.f32.mrf.mxu1  ;;  %11088 = vmatmul.mubr.msk.bf16.gmra.mxu0 %vm354_vm1, %v8517_v34  ;;  %v8498_v34 = vld [vmem:[#allocation4 + $0xf2] sm:$0xff] }
 0x450   : > { %v14012_v51 = vadd.f32 %v7450_v56, %v7233_v41  ;;  %v7238_v25 = vadd.f32 %v10885_v8, %v13893_v16  ;;  %11091 = vmatprep.mubr.msk.bf16.mxu0 %vm354_vm1, %v8518_v14  ;;  %v8520_v16 = vpack.c.bf16 %v8495_v26, %v8494_v46  ;;  %v8521_v41 = vpack.c.bf16 %v8497_v62, %v8496_v29 }
 0x451   : > { %v7121_v2 = vpop.f32.mrf.mxu0  ;;  %v7463_v53 = vpop.f32.mrf.mxu1 }
 0x452   : > { %v14016_v24 = vadd.f32 %v10919_v40, %v7238_v25  ;;  %v7236_v55 = vadd.f32 %v7121_v2, %v13896_v12 }
 0x453   : > { %v10886_v0 = vpop.f32.mrf.mxu0  ;;  %v10920_v57 = vpop.f32.mrf.mxu1 }
 0x454   : > { %v14019_v36 = vadd.f32 %v7463_v53, %v7236_v55  ;;  %v7239_v42 = vadd.f32 %v10886_v0, %v13899_v59  ;;  %v8500_v55 = vld [vmem:[#allocation4 + $0x10a] sm:$0xff]  ;;  %v8501_v0 = vld [vmem:[#allocation4 + $0x112] sm:$0xff] }
 0x455   : > { %v7124_v19 = vpop.f32.mrf.mxu0  ;;  %v7466_v22 = vpop.f32.mrf.mxu1 }
 0x456   : > { %v14022_v38 = vadd.f32 %v10920_v57, %v7239_v42  ;;  %v7237_v20 = vadd.f32 %v7124_v19, %v13904_v3  ;;  %v8503_v42 = vld [vmem:[#allocation4 + $0x12a] sm:$0xff] }
 0x457   : > { %v10889_v28 = vpop.f32.mrf.mxu0  ;;  %v10923_v44 = vpop.f32.mrf.mxu1  ;;  %11092 = vmatmul.mubr.msk.bf16.gmra.mxu0 %vm354_vm1, %v8519_v32  ;;  %v8502_v32 = vld [vmem:[#allocation4 + $0x122] sm:$0xff] }
 0x458   : > { %v14026_v9 = vadd.f32 %v7466_v22, %v7237_v20  ;;  %v7242_v12 = vadd.f32 %v10889_v28, %v13909_v6  ;;  %11095 = vmatprep.mubr.msk.bf16.mxu0 %vm354_vm1, %v8520_v16  ;;  %v8522_v6 = vpack.c.bf16 %v8499_v18, %v8498_v34  ;;  %v8523_v20 = vpack.c.bf16 %v8501_v0, %v8500_v55 }
 0x459   : > { %v7137_v59 = vpop.f32.mrf.mxu0  ;;  %v7479_v31 = vpop.f32.mrf.mxu1 }
 0x45a   : > { %v14030_v14 = vadd.f32 %v10923_v44, %v7242_v12  ;;  %v7240_v3 = vadd.f32 %v7137_v59, %v13912_v30 }
 0x45b   : > { %v10890_v17 = vpop.f32.mrf.mxu0  ;;  %v10924_v56 = vpop.f32.mrf.mxu1 }
 0x45c   : > { %v14033_v8 = vadd.f32 %v7479_v31, %v7240_v3  ;;  %v7243_v40 = vadd.f32 %v10890_v17, %v13915_v21  ;;  %v8504_v3 = vld [vmem:[#allocation4 + $0x13a] sm:$0xff]  ;;  %v8505_v17 = vld [vmem:[#allocation4 + $0x142] sm:$0xff] }
 0x45d   : > { %v7140_v25 = vpop.f32.mrf.mxu0  ;;  %v7482_v7 = vpop.f32.mrf.mxu1 }
 0x45e   : > { %v14036_v27 = vadd.f32 %v10924_v56, %v7243_v40  ;;  %v7241_v2 = vadd.f32 %v7140_v25, %v13920_v61  ;;  %v8507_v40 = vld [vmem:[#allocation4 + $0x15a] sm:$0xff] }
 0x45f   : > { %v10893_v53 = vpop.f32.mrf.mxu0  ;;  %v10927_v46 = vpop.f32.mrf.mxu1  ;;  %11096 = vmatmul.mubr.msk.bf16.gmra.mxu0 %vm354_vm1, %v8521_v41  ;;  %v8506_v41 = vld [vmem:[#allocation4 + $0x152] sm:$0xff] }
 0x460   : > { %v14040_v26 = vadd.f32 %v7482_v7, %v7241_v2  ;;  %v7246_v30 = vadd.f32 %v10893_v53, %v13925_v11  ;;  %11099 = vmatprep.mubr.msk.bf16.mxu0 %vm354_vm1, %v8522_v6  ;;  %v8524_v11 = vpack.c.bf16 %v8503_v42, %v8502_v32  ;;  %v8525_v2 = vpack.c.bf16 %v8505_v17, %v8504_v3 }
 0x461   : > { %v7153_v21 = vpop.f32.mrf.mxu0  ;;  %v7495_v57 = vpop.f32.mrf.mxu1 }
 0x462   : > { %v14044_v16 = vadd.f32 %v10927_v46, %v7246_v30  ;;  %v7244_v61 = vadd.f32 %v7153_v21, %v13928_v54 }
 0x463   : > { %v10894_v19 = vpop.f32.mrf.mxu0  ;;  %v10928_v22 = vpop.f32.mrf.mxu1 }
 0x464   : > { %v14047_v28 = vadd.f32 %v7495_v57, %v7244_v61  ;;  %v7247_v44 = vadd.f32 %v10894_v19, %v13931_v45  ;;  %v8508_v61 = vld [vmem:[#allocation4 + $0x16a] sm:$0xff]  ;;  %v8509_v19 = vld [vmem:[#allocation4 + $0x172] sm:$0xff] }
 0x465   : > { %v7156_v12 = vpop.f32.mrf.mxu0  ;;  %v7498_v29 = vpop.f32.mrf.mxu1 }
 0x466   : > { %v14050_v62 = vadd.f32 %v10928_v22, %v7247_v44  ;;  %v7245_v59 = vadd.f32 %v7156_v12, %v13936_v23  ;;  %v8511_v44 = vld [vmem:[#allocation4 + $0x18a] sm:$0xff] }
 0x467   : > { %v10897_v31 = vpop.f32.mrf.mxu0  ;;  %v10931_v34 = vpop.f32.mrf.mxu1  ;;  %11100 = vmatmul.mubr.msk.bf16.gmra.mxu0 %vm354_vm1, %v8523_v20  ;;  %v8510_v20 = vld [vmem:[#allocation4 + $0x182] sm:$0xff] }
 0x468   : > { %v14054_v18 = vadd.f32 %v7498_v29, %v7245_v59  ;;  %v7250_v54 = vadd.f32 %v10897_v31, %v13941_v15  ;;  %11103 = vmatprep.mubr.msk.bf16.mxu0 %vm354_vm1, %v8524_v11  ;;  %v8526_v15 = vpack.c.bf16 %v8507_v40, %v8506_v41  ;;  %v8527_v59 = vpack.c.bf16 %v8509_v19, %v8508_v61 }
 0x469   : > { %v7169_v45 = vpop.f32.mrf.mxu0  ;;  %v7511_v56 = vpop.f32.mrf.mxu1 }
 0x46a   : > { %v14058_v6 = vadd.f32 %v10931_v34, %v7250_v54  ;;  %v7248_v23 = vadd.f32 %v7169_v45, %v13944_v49 }
 0x46b   : > { %v10898_v25 = vpop.f32.mrf.mxu0  ;;  %v10932_v7 = vpop.f32.mrf.mxu1 }
 0x46c   : > { %v14061_v53 = vadd.f32 %v7511_v56, %v7248_v23  ;;  %v7251_v46 = vadd.f32 %v10898_v25, %v13947_v63  ;;  %v8512_v23 = vld [vmem:[#allocation4 + $0x19a] sm:$0xff]  ;;  %v8513_v25 = vld [vmem:[#allocation4 + $0x1a2] sm:$0xff] }
 0x46d   : > { %v7172_v30 = vpop.f32.mrf.mxu0  ;;  %v7514_v55 = vpop.f32.mrf.mxu1 }
 0x46e   : > { %v14064_v0 = vadd.f32 %v10932_v7, %v7251_v46  ;;  %v7249_v21 = vadd.f32 %v7172_v30, %v13952_v52  ;;  %v8529_v30 = vpack.c.bf16 %v8513_v25, %v8512_v23 }
 0x46f   : > { %v10901_v57 = vpop.f32.mrf.mxu0  ;;  %v10935_v32 = vpop.f32.mrf.mxu1  ;;  %11104 = vmatmul.mubr.msk.bf16.gmra.mxu0 %vm354_vm1, %v8525_v2 }
 0x470   : > { %v14068_v42 = vadd.f32 %v7514_v55, %v7249_v21  ;;  %v7254_v49 = vadd.f32 %v10901_v57, %v13957_v58  ;;  %11107 = vmatprep.mubr.msk.bf16.mxu0 %vm354_vm1, %v8526_v15  ;;  %v8528_v58 = vpack.c.bf16 %v8511_v44, %v8510_v20 }
 0x471   : > { %v7185_v63 = vpop.f32.mrf.mxu0  ;;  %v7527_v22 = vpop.f32.mrf.mxu1 }
 0x472   : > { %v14072_v11 = vadd.f32 %v10935_v32, %v7254_v49  ;;  %v7252_v52 = vadd.f32 %v7185_v63, %v13960_v35 }
 0x473   : > { %v10902_v12 = vpop.f32.mrf.mxu0  ;;  %v10936_v29 = vpop.f32.mrf.mxu1 }
 0x474   : > { %v14075_v31 = vadd.f32 %v7527_v22, %v7252_v52  ;;  %v7255_v34 = vadd.f32 %v10902_v12, %v13963_v33 }
 0x475   : > { %v7188_v54 = vpop.f32.mrf.mxu0  ;;  %v7530_v3 = vpop.f32.mrf.mxu1 }
 0x476   : > { %v14078_v17 = vadd.f32 %v10936_v29, %v7255_v34  ;;  %v7253_v45 = vadd.f32 %v7188_v54, %v13968_v5 }
 0x477   : > { %v10905_v56 = vpop.f32.mrf.mxu0  ;;  %v10939_v41 = vpop.f32.mrf.mxu1  ;;  %11108 = vmatmul.mubr.msk.bf16.gmra.mxu0 %vm354_vm1, %v8527_v59 }
 0x478   : > { %v14082_v40 = vadd.f32 %v7530_v3, %v7253_v45  ;;  %v7258_v35 = vadd.f32 %v10905_v56, %v13973_v60  ;;  %11111 = vmatprep.mubr.msk.bf16.mxu0 %vm354_vm1, %v8528_v58 }
 0x479   : > { %v7201_v33 = vpop.f32.mrf.mxu0  ;;  %v7543_v7 = vpop.f32.mrf.mxu1 }
 0x47a   : > { %v14086_v2 = vadd.f32 %v10939_v41, %v7258_v35  ;;  %v7256_v46 = vadd.f32 %v7201_v33, %v13976_v13 }
 0x47b   : > { %v10906_v15 = vpop.f32.mrf.mxu0  ;;  %v10940_v5 = vpop.f32.mrf.mxu1 }
 0x47c   : > { %v14089_v55 = vadd.f32 %v7543_v7, %v7256_v46  ;;  %v7259_v21 = vadd.f32 %v10906_v15, %v13979_v37 }
 0x47d   : > { %v7204_v57 = vpop.f32.mrf.mxu0  ;;  %v7546_v32 = vpop.f32.mrf.mxu1 }
 0x47e   : > { %v14092_v60 = vadd.f32 %v10940_v5, %v7259_v21  ;;  %v7257_v49 = vadd.f32 %v7204_v57, %v13984_v10 }
 0x47f   : > { %v10909_v61 = vpop.f32.mrf.mxu0  ;;  %v10943_v19 = vpop.f32.mrf.mxu1  ;;  %11112 = vmatmul.mubr.msk.bf16.gmra.mxu0 %vm354_vm1, %v8529_v30 }
 0x480   : > { %v14096_v63 = vadd.f32 %v7546_v32, %v7257_v49  ;;  %v7262_v13 = vadd.f32 %v10909_v61, %v13988_v43 }
 0x481   : > { %v7217_v22 = vpop.f32.mrf.mxu0  ;;  %v7559_v20 = vpop.f32.mrf.mxu1 }
 0x482   : > { %v14099_v44 = vadd.f32 %v10943_v19, %v7262_v13  ;;  %v7260_v37 = vadd.f32 %v7217_v22, %v13991_v47 }
 0x483   : > { %v10910_v52 = vpop.f32.mrf.mxu0  ;;  %v10944_v12 = vpop.f32.mrf.mxu1 }
 0x484   : > { %v14102_v29 = vadd.f32 %v7559_v20, %v7260_v37  ;;  %v7263_v10 = vadd.f32 %v10910_v52, %v13994_v1 }
 0x485   : > { %v7220_v59 = vpop.f32.mrf.mxu0  ;;  %v7562_v34 = vpop.f32.mrf.mxu1 }
 0x486   : > { %v14105_v58 = vadd.f32 %v10944_v12, %v7263_v10  ;;  %v7261_v54 = vadd.f32 %v7220_v59, %v13998_v4 }
 0x487   : > { %v10949_v3 = vpop.f32.mrf.mxu0  ;;  %v14108_v43 = vpop.f32.mrf.mxu1 }
 0x488   : > { %v14110_v45 = vadd.f32 %v7562_v34, %v7261_v54  ;;  %v14113_v56 = vadd.f32 %v10949_v3, %v14002_v50 }
 0x489   : > { %v7691_v47 = vpop.f32.mrf.mxu0  ;;  %v14115_v41 = vpop.f32.mrf.mxu1 }
 0x48a   : > { %v14118_v35 = vadd.f32 %v7691_v47, %v14005_v48 }
 0x48b   : > { %v10950_v1 = vpop.f32.mrf.mxu0  ;;  %v14120_v23 = vpop.f32.mrf.mxu1 }
 0x48c   : > { %v14123_v25 = vadd.f32 %v10950_v1, %v14008_v39 }
 0x48d   : > { %v7694_v4 = vpop.f32.mrf.mxu0  ;;  %v14125_v33 = vpop.f32.mrf.mxu1 }
 0x48e   : > { %v14128_v7 = vadd.f32 %v7694_v4, %v14012_v51 }
 0x48f   : > { %v10953_v50 = vpop.f32.mrf.mxu0  ;;  %v14130_v46 = vpop.f32.mrf.mxu1 }
 0x490   : > { %v14133_v15 = vadd.f32 %v10953_v50, %v14016_v24 }
 0x491   : > { %v7707_v48 = vpop.f32.mrf.mxu0  ;;  %v14135_v5 = vpop.f32.mrf.mxu1 }
 0x492   : > { %v14138_v30 = vadd.f32 %v7707_v48, %v14019_v36 }
 0x493   : > { %v10954_v39 = vpop.f32.mrf.mxu0  ;;  %v14140_v21 = vpop.f32.mrf.mxu1 }
 0x494   : > { %v14143_v57 = vadd.f32 %v10954_v39, %v14022_v38 }
 0x495   : > { %v7710_v51 = vpop.f32.mrf.mxu0  ;;  %v14145_v32 = vpop.f32.mrf.mxu1 }
 0x496   : > { %v14148_v49 = vadd.f32 %v7710_v51, %v14026_v9 }
 0x497   : > { %v10957_v24 = vpop.f32.mrf.mxu0  ;;  %v14150_v61 = vpop.f32.mrf.mxu1 }
 0x498   : > { %v14153_v19 = vadd.f32 %v10957_v24, %v14030_v14 }
 0x499   : > { %v7723_v36 = vpop.f32.mrf.mxu0  ;;  %v14155_v13 = vpop.f32.mrf.mxu1 }
 0x49a   : > { %v14158_v22 = vadd.f32 %v7723_v36, %v14033_v8 }
 0x49b   : > { %v10958_v38 = vpop.f32.mrf.mxu0  ;;  %v14160_v20 = vpop.f32.mrf.mxu1 }
 0x49c   : > { %v14163_v37 = vadd.f32 %v10958_v38, %v14036_v27 }
 0x49d   : > { %v7726_v9 = vpop.f32.mrf.mxu0  ;;  %v14165_v52 = vpop.f32.mrf.mxu1 }
 0x49e   : > { %v14168_v12 = vadd.f32 %v7726_v9, %v14040_v26 }
 0x49f   : > { %v10961_v14 = vpop.f32.mrf.mxu0  ;;  %v14170_v10 = vpop.f32.mrf.mxu1 }
 0x4a0   : > { %v14173_v59 = vadd.f32 %v10961_v14, %v14044_v16 }
 0x4a1   : > { %v7739_v8 = vpop.f32.mrf.mxu0  ;;  %v14175_v34 = vpop.f32.mrf.mxu1 }
 0x4a2   : > { %v14178_v54 = vadd.f32 %v7739_v8, %v14047_v28 }
 0x4a3   : > { %v10962_v27 = vpop.f32.mrf.mxu0  ;;  %v14180_v3 = vpop.f32.mrf.mxu1 }
 0x4a4   : > { %14696 = vst [vmem:[#allocation27_spill] sm:$0xff] %v14180_v3  ;;  %v14183_v47 = vadd.f32 %v10962_v27, %v14050_v62 }
 0x4a5   : > { %v7742_v26 = vpop.f32.mrf.mxu0  ;;  %v14185_v1 = vpop.f32.mrf.mxu1 }
 0x4a6   : > { %14697 = vst [vmem:[#allocation6_spill] sm:$0xff] %v14185_v1  ;;  %v14188_v4 = vadd.f32 %v7742_v26, %v14054_v18 }
 0x4a7   : > { %v10965_v16 = vpop.f32.mrf.mxu0  ;;  %v14190_v50 = vpop.f32.mrf.mxu1 }
 0x4a8   : > { %14698 = vst [vmem:[#allocation34_spill] sm:$0xff] %v14188_v4  ;;  %14699 = vst [vmem:[#allocation29_spill] sm:$0xff] %v14190_v50  ;;  %v14193_v48 = vadd.f32 %v10965_v16, %v14058_v6 }
 0x4a9   : > { %v7755_v28 = vpop.f32.mrf.mxu0  ;;  %v14195_v39 = vpop.f32.mrf.mxu1 }
 0x4aa   : > { %14700 = vst [vmem:[#allocation30_spill] sm:$0xff] %v14193_v48  ;;  %14701 = vst [vmem:[#allocation28_spill] sm:$0xff] %v14195_v39  ;;  %v14198_v51 = vadd.f32 %v7755_v28, %v14061_v53 }
 0x4ab   : > { %v10966_v62 = vpop.f32.mrf.mxu0  ;;  %v14200_v24 = vpop.f32.mrf.mxu1 }
 0x4ac   : > { %14702 = vst [vmem:[#allocation31_spill] sm:$0xff] %v14198_v51  ;;  %14703 = vst [vmem:[#allocation8_spill] sm:$0xff] %v14200_v24  ;;  %v14203_v36 = vadd.f32 %v10966_v62, %v14064_v0 }
 0x4ad   : > { %v7758_v18 = vpop.f32.mrf.mxu0  ;;  %v14205_v38 = vpop.f32.mrf.mxu1 }
 0x4ae   : > { %14704 = vst [vmem:[#allocation36_spill] sm:$0xff] %v14203_v36  ;;  %14705 = vst [vmem:[#allocation10_spill] sm:$0xff] %v14205_v38  ;;  %v14208_v9 = vadd.f32 %v7758_v18, %v14068_v42 }
 0x4af   : > { %v10969_v6 = vpop.f32.mrf.mxu0  ;;  %v14210_v14 = vpop.f32.mrf.mxu1 }
 0x4b0   : > { %14706 = vst [vmem:[#allocation38_spill] sm:$0xff] %v14208_v9  ;;  %14707 = vst [vmem:[#allocation15_spill] sm:$0xff] %v14210_v14  ;;  %v14213_v8 = vadd.f32 %v10969_v6, %v14072_v11 }
 0x4b1   : > { %v7771_v53 = vpop.f32.mrf.mxu0  ;;  %v14215_v27 = vpop.f32.mrf.mxu1 }
 0x4b2   : > { %14708 = vst [vmem:[#allocation7_spill] sm:$0xff] %v14213_v8  ;;  %14709 = vst [vmem:[#allocation32_spill] sm:$0xff] %v14215_v27  ;;  %v14218_v26 = vadd.f32 %v7771_v53, %v14075_v31 }
 0x4b3   : > { %v10970_v0 = vpop.f32.mrf.mxu0  ;;  %v14220_v16 = vpop.f32.mrf.mxu1 }
 0x4b4   : > { %14710 = vst [vmem:[#allocation11_spill] sm:$0xff] %v14218_v26  ;;  %14711 = vst [vmem:[#allocation40_spill] sm:$0xff] %v14220_v16  ;;  %v14223_v28 = vadd.f32 %v10970_v0, %v14078_v17 }
 0x4b5   : > { %v7774_v42 = vpop.f32.mrf.mxu0  ;;  %v14225_v62 = vpop.f32.mrf.mxu1 }
 0x4b6   : > { %14712 = vst [vmem:[#allocation42_spill] sm:$0xff] %v14223_v28  ;;  %14713 = vst [vmem:[#allocation33_spill] sm:$0xff] %v14225_v62  ;;  %v14228_v18 = vadd.f32 %v7774_v42, %v14082_v40 }
 0x4b7   : > { %v10973_v11 = vpop.f32.mrf.mxu0  ;;  %v14230_v6 = vpop.f32.mrf.mxu1 }
 0x4b8   : > { %14714 = vst [vmem:[#allocation35_spill] sm:$0xff] %v14228_v18  ;;  %14715 = vst [vmem:[#allocation13_spill] sm:$0xff] %v14230_v6  ;;  %v14233_v27 = vadd.f32 %v10973_v11, %v14086_v2 }
 0x4b9   : > { %v7787_v31 = vpop.f32.mrf.mxu0  ;;  %v14235_v53 = vpop.f32.mrf.mxu1 }
 0x4ba   : > { %14716 = vst [vmem:[#allocation44_spill] sm:$0xff] %v14233_v27  ;;  %14717 = vst [vmem:[#allocation14_spill] sm:$0xff] %v14235_v53  ;;  %v14238_v16 = vadd.f32 %v7787_v31, %v14089_v55 }
 0x4bb   : > { %v10974_v17 = vpop.f32.mrf.mxu0  ;;  %v14240_v0 = vpop.f32.mrf.mxu1 }
 0x4bc   : > { %14718 = vst [vmem:[#allocation46_spill] sm:$0xff] %v14238_v16  ;;  %14719 = vst [vmem:[#allocation37_spill] sm:$0xff] %v14240_v0  ;;  %v14243_v62 = vadd.f32 %v10974_v17, %v14092_v60 }
 0x4bd   : > { %v7790_v40 = vpop.f32.mrf.mxu0  ;;  %v14245_v42 = vpop.f32.mrf.mxu1 }
 0x4be   : > { %14720 = vst [vmem:[#allocation20_spill] sm:$0xff] %v14243_v62  ;;  %14721 = vst [vmem:[#allocation5_spill] sm:$0xff] %v14245_v42  ;;  %v14248_v6 = vadd.f32 %v7790_v40, %v14096_v63 }
 0x4bf   : > { %v10977_v2 = vpop.f32.mrf.mxu0  ;;  %v14250_v11 = vpop.f32.mrf.mxu1 }
 0x4c0   : > { %14722 = vst [vmem:[#allocation9_spill] sm:$0xff] %v14248_v6  ;;  %14723 = vst [vmem:[#allocation12_spill] sm:$0xff] %v14250_v11  ;;  %v14253_v53 = vadd.f32 %v10977_v2, %v14099_v44 }
 0x4c1   : > { %v7803_v55 = vpop.f32.mrf.mxu0  ;;  %v14255_v31 = vpop.f32.mrf.mxu1 }
 0x4c2   : > { %14724 = vst [vmem:[#allocation39_spill] sm:$0xff] %v14253_v53  ;;  %14725 = vst [vmem:[#allocation16_spill] sm:$0xff] %v14255_v31  ;;  %v14258_v0 = vadd.f32 %v7803_v55, %v14102_v29 }
 0x4c3   : > { %v10978_v60 = vpop.f32.mrf.mxu0  ;;  %v14260_v17 = vpop.f32.mrf.mxu1 }
 0x4c4   : > { %14726 = vst [vmem:[#allocation48_spill] sm:$0xff] %v14258_v0  ;;  %14727 = vst [vmem:[#allocation50_spill] sm:$0xff] %v14260_v17  ;;  %v14263_v42 = vadd.f32 %v10978_v60, %v14105_v58 }
 0x4c5   : > { %v7806_v63 = vpop.f32.mrf.mxu0  ;;  %v14265_v40 = vpop.f32.mrf.mxu1 }
 0x4c6   : > { %14728 = vst [vmem:[#allocation41_spill] sm:$0xff] %v14263_v42  ;;  %14729 = vst [vmem:[#allocation43_spill] sm:$0xff] %v14265_v40  ;;  %v14268_v11 = vadd.f32 %v7806_v63, %v14110_v45 }
 0x4c7   : > { %v11017_v44 = vpop.f32.mrf.mxu0  ;;  %v11051_v2 = vpop.f32.mrf.mxu1 }
 0x4c8   : > { %14730 = vst [vmem:[#allocation18_spill] sm:$0xff] %v14268_v11 }
 0x4c9   : > { %v8275_v53 = vpop.f32.mrf.mxu0  ;;  %v8615_v6 = vpop.f32.mrf.mxu1 }
 0x4cb   : > { %v11018_v31 = vpop.f32.mrf.mxu0  ;;  %v11052_v29 = vpop.f32.mrf.mxu1 }
 0x4cd   : > { %v8278_v62 = vpop.f32.mrf.mxu0  ;;  %v14272_v17 = vpop.f32.mrf.mxu1 }
 0x4cf   : > { %v11021_v55 = vpop.f32.mrf.mxu0  ;;  %v14278_v40 = vpop.f32.mrf.mxu1 }
 0x4d1   : > { %v14270_v0 = vpop.f32.mrf.mxu0  ;;  %v14284_v11 = vpop.f32.mrf.mxu1 }
 0x4d3   : > { %v14274_v58 = vpop.f32.mrf.mxu0  ;;  %v14290_v27 = vpop.f32.mrf.mxu1 }
 0x4d5   : > { %v14276_v60 = vpop.f32.mrf.mxu0  ;;  %v14296_v26 = vpop.f32.mrf.mxu1 }
 0x4d7   : > { %v14280_v45 = vpop.f32.mrf.mxu0  ;;  %v14302_v38 = vpop.f32.mrf.mxu1 }
 0x4d9   : > { %v14282_v63 = vpop.f32.mrf.mxu0  ;;  %v14308_v36 = vpop.f32.mrf.mxu1 }
 0x4db   : > { %v14286_v42 = vpop.f32.mrf.mxu0  ;;  %v14314_v50 = vpop.f32.mrf.mxu1 }
 0x4dd   : > { %v14288_v16 = vpop.f32.mrf.mxu0 }
 0x4df   : > { %v14292_v18 = vpop.f32.mrf.mxu0 }
 0x4e1   : > { %v14294_v28 = vpop.f32.mrf.mxu0 }
 0x4e2   : > { %14731 = vst [vmem:[#allocation52_spill] sm:$0xff] %v14294_v28 }
 0x4e3   : > { %v14298_v14 = vpop.f32.mrf.mxu0 }
 0x4e4   : > { %14732 = vst [vmem:[#allocation19_spill] sm:$0xff] %v14298_v14  ;;  %v14320_v14 = vpop.f32.mrf.mxu1 }
 0x4e5   : > { %v14300_v8 = vpop.f32.mrf.mxu0 }
 0x4e6   : > { %14733 = vst [vmem:[#allocation54_spill] sm:$0xff] %v14300_v8 }
 0x4e7   : > { %v14304_v9 = vpop.f32.mrf.mxu0 }
 0x4e8   : > { %14734 = vst [vmem:[#allocation45_spill] sm:$0xff] %v14304_v9  ;;  %v14326_v9 = vpop.f32.mrf.mxu1 }
 0x4e9   : > { %v14306_v24 = vpop.f32.mrf.mxu0  ;;  %14742 = vst [vmem:[#allocation51_spill] sm:$0xff] %v14326_v9 }
 0x4ea   : > { %14735 = vst [vmem:[#allocation25_spill] sm:$0xff] %v14306_v24 }
 0x4eb   : > { %v14310_v39 = vpop.f32.mrf.mxu0 }
 0x4ec   : > { %14736 = vst [vmem:[#allocation17_spill] sm:$0xff] %v14310_v39  ;;  %v14332_v39 = vpop.f32.mrf.mxu1 }
 0x4ed   : > { %v14312_v51 = vpop.f32.mrf.mxu0  ;;  %14745 = vst [vmem:[#allocation24_spill] sm:$0xff] %v14332_v39 }
 0x4ee   : > { %14737 = vst [vmem:[#allocation47_spill] sm:$0xff] %v14312_v51 }
 0x4ef   : > { %v14316_v48 = vpop.f32.mrf.mxu0 }
 0x4f0   : > { %14738 = vst [vmem:[#allocation21_spill] sm:$0xff] %v14316_v48  ;;  %v14338_v48 = vpop.f32.mrf.mxu1 }
 0x4f1   : > { %v14318_v1 = vpop.f32.mrf.mxu0  ;;  %14748 = vst [vmem:[#allocation22_spill] sm:$0xff] %v14338_v48 }
 0x4f2   : > { %14739 = vst [vmem:[#allocation56_spill] sm:$0xff] %v14318_v1  ;;  %v14348_v9 = vpop.f32.mrf.mxu1 }
 0x4f3   : > { %v14322_v8 = vpop.f32.mrf.mxu0 }
 0x4f4   : > { %14740 = vst [vmem:[#allocation58_spill] sm:$0xff] %v14322_v8  ;;  %v8160_v8 = vadd.f32 %v14108_v43, %v14113_v56  ;;  %v8159_v43 = vadd.f32 %v14125_v33, %v14128_v7  ;;  %v8162_v33 = vadd.f32 %v14135_v5, %v14138_v30 }
 0x4f5   : > { %v14324_v4 = vpop.f32.mrf.mxu0 }
 0x4f6   : > { %14741 = vst [vmem:[#allocation49_spill] sm:$0xff] %v14324_v4 }
 0x4f7   : > { %v14328_v24 = vpop.f32.mrf.mxu0 }
 0x4f8   : > { %14743 = vst [vmem:[#allocation23_spill] sm:$0xff] %v14328_v24  ;;  %v8158_v24 = vadd.f32 %v14115_v41, %v14118_v35  ;;  %v14360_v41 = vpop.f32.mrf.mxu1 }
 0x4f9   : > { %v14330_v28 = vpop.f32.mrf.mxu0 }
 0x4fa   : > { %14744 = vst [vmem:[#allocation60_spill] sm:$0xff] %v14330_v28  ;;  %v8404_v28 = vadd.f32 %v11017_v44, %v8160_v8  ;;  %v14365_v8 = vld [vmem:[%s14564_s8] ss:$0 sm:$0xff] }
 0x4fb   : > { %v14334_v51 = vpop.f32.mrf.mxu0 }
 0x4fc   : > { %14746 = vst [vmem:[#allocation62_spill] sm:$0xff] %v14334_v51  ;;  %v8402_v51 = vadd.f32 %v8275_v53, %v8158_v24  ;;  %v8744_v56 = vadd.f32 %v11051_v2, %v8404_v28 }
 0x4fd   : > { %v14336_v3 = vpop.f32.mrf.mxu0 }
 0x4fe   : > { %14747 = vst [vmem:[#allocation53_spill] sm:$0xff] %v14336_v3  ;;  %v8161_v3 = vadd.f32 %v14120_v23, %v14123_v25  ;;  %v8742_v23 = vadd.f32 %v8615_v6, %v8402_v51  ;;  %v8403_v25 = vadd.f32 %v8278_v62, %v8159_v43  ;;  %v8165_v51 = vadd.f32 %v14140_v21, %v14143_v57  ;;  %v14379_v6 = vpop.f32.mrf.mxu1 }
 0x4ff   : > { %v14340_v1 = vpop.f32.mrf.mxu0  ;;  %v8406_v62 = vadd.f32 %v14270_v0, %v8162_v33 }
 0x500   : > { %14749 = vst [vmem:[#allocation55_spill] sm:$0xff] %v14340_v1  ;;  %v8405_v1 = vadd.f32 %v11018_v31, %v8161_v3  ;;  %v8743_v30 = vadd.f32 %v14272_v17, %v8403_v25  ;;  %v8163_v31 = vadd.f32 %v14145_v32, %v14148_v49  ;;  %v8409_v21 = vadd.f32 %v14274_v58, %v8165_v51  ;;  %v14392_v43 = vpop.f32.mrf.mxu1 }
 0x501   : > { %v14344_v4 = vpop.f32.mrf.mxu0  ;;  %v8168_v17 = vadd.f32 %v14150_v61, %v14153_v19  ;;  %v8172_v51 = vadd.f32 %v14170_v10, %v14173_v59 }
 0x502   : > { %14750 = vst [vmem:[#allocation26_spill] sm:$0xff] %v14344_v4  ;;  %v8164_v4 = vadd.f32 %v14130_v46, %v14133_v15  ;;  %v8745_v28 = vadd.f32 %v11052_v29, %v8405_v1  ;;  %v8407_v32 = vadd.f32 %v14276_v60, %v8163_v31  ;;  %v8749_v61 = vadd.f32 %v14290_v27, %v8409_v21  ;;  %v14751_v31 = vld [vmem:[#allocation27_spill] sm:$0xff] }
 0x503   : > { %v14350_v39 = vpop.f32.mrf.mxu0 }
 0x504   : > { %v8408_v7 = vadd.f32 %v11021_v55, %v8164_v4  ;;  %v8746_v55 = vadd.f32 %v14284_v11, %v8406_v62 }
 0x505   : > { %v14354_v48 = vpop.f32.mrf.mxu0 }
 0x506   : > { %v8748_v44 = vadd.f32 %v14278_v40, %v8408_v7  ;;  %v14406_v7 = vpop.f32.mrf.mxu1 }
 0x507   : > { %v11085_v35 = vpop.f32.mrf.mxu0 }
 0x508   : > { %v8988_v24 = vadd.f32 %v11085_v35, %v8744_v56  ;;  %v8166_v35 = vadd.f32 %v14155_v13, %v14158_v22  ;;  %v8747_v13 = vadd.f32 %v14296_v26, %v8407_v32 }
 0x509   : > { %v8859_v3 = vpop.f32.mrf.mxu0 }
 0x50a   : > { %v9027_v46 = vadd.f32 %v14365_v8, %v8988_v24  ;;  %v8986_v15 = vadd.f32 %v8859_v3, %v8742_v23  ;;  %v8412_v23 = vadd.f32 %v14280_v45, %v8168_v17  ;;  %v8169_v24 = vadd.f32 %v14160_v20, %v14163_v37  ;;  %v14754_v17 = vld [vmem:[#allocation6_spill] sm:$0xff] }
 0x50b   : > { %v11086_v5 = vpop.f32.mrf.mxu0  ;;  %v8410_v33 = vadd.f32 %v14282_v63, %v8166_v35 }
 0x50c   : > { %v9059_v1 = vmax.f32 %v9027_v46, 0.0  ;;  %v9025_v4 = vadd.f32 %v14365_v8, %v8986_v15  ;;  %v8989_v53 = vadd.f32 %v11086_v5, %v8745_v28  ;;  %v8167_v28 = vadd.f32 %v14165_v52, %v14168_v12  ;;  %v14420_v5 = vpop.f32.mrf.mxu1 }
 0x50d   : > { %v8862_v2 = vpop.f32.mrf.mxu0  ;;  %v8752_v46 = vadd.f32 %v14302_v38, %v8412_v23  ;;  %v8413_v20 = vadd.f32 %v14286_v42, %v8169_v24  ;;  %v8750_v62 = vadd.f32 %v14308_v36, %v8410_v33  ;;  %v14757_v23 = vld [vmem:[#allocation30_spill] sm:$0xff] }
 0x50e   : > { %9091 = vst [vmem:[%s14374_s12 + $0x10] sm:$0xff] %v9059_v1  ;;  %v9057_v57 = vmax.f32 %v9025_v4, 0.0  ;;  %v9028_v0 = vadd.f32 %v14365_v8, %v8989_v53  ;;  %v8987_v29 = vadd.f32 %v8862_v2, %v8743_v30  ;;  %v8411_v52 = vadd.f32 %v14288_v16, %v8167_v28  ;;  %v14752_v2 = vld [vmem:[#allocation52_spill] sm:$0xff]  ;;  %v14760_v33 = vld [vmem:[#allocation54_spill] sm:$0xff] }
 0x50f   : > { %v11089_v56 = vpop.f32.mrf.mxu0  ;;  %v8170_v1 = vadd.f32 %v14175_v34, %v14178_v54  ;;  %v8416_v4 = vadd.f32 %v14292_v18, %v8172_v51  ;;  %v8753_v10 = vadd.f32 %v14314_v50, %v8413_v20  ;;  %v14762_v28 = vld [vmem:[#allocation28_spill] sm:$0xff] }
 0x510   : > { %9089 = vst [vmem:[%s14374_s12] sm:$0xff] %v9057_v57  ;;  %v9060_v49 = vmax.f32 %v9028_v0, 0.0  ;;  %v9026_v40 = vadd.f32 %v14365_v8, %v8987_v29  ;;  %v8992_v58 = vadd.f32 %v11089_v56, %v8748_v44  ;;  %v8173_v44 = vadd.f32 %v14751_v31, %v14183_v47  ;;  %v14434_v57 = vpop.f32.mrf.mxu1  ;;  %v14753_v29 = vld [vmem:[#allocation34_spill] sm:$0xff]  ;;  %v14755_v56 = vld [vmem:[#allocation51_spill] sm:$0xff] }
 0x511   : > { %v8875_v25 = vpop.f32.mrf.mxu0  ;;  %v8414_v21 = vadd.f32 %v14752_v2, %v8170_v1  ;;  %v8751_v34 = vadd.f32 %v14320_v14, %v8411_v52  ;;  %v8756_v32 = vadd.f32 %v14755_v56, %v8416_v4  ;;  %v14756_v47 = vld [vmem:[#allocation19_spill] sm:$0xff]  ;;  %v14765_v52 = vld [vmem:[#allocation36_spill] sm:$0xff]  ;;  %v14768_v31 = vld [vmem:[#allocation38_spill] sm:$0xff] }
 0x512   : > { %9092 = vst [vmem:[%s14374_s12 + $0x18] sm:$0xff] %v9060_v49  ;;  %v9058_v19 = vmax.f32 %v9026_v40, 0.0  ;;  %v9031_v11 = vadd.f32 %v14365_v8, %v8992_v58  ;;  %v8990_v60 = vadd.f32 %v8875_v25, %v8746_v55  ;;  %v8171_v55 = vadd.f32 %v14754_v17, %v14753_v29  ;;  %v14758_v25 = vld [vmem:[#allocation29_spill] sm:$0xff]  ;;  %v14771_v29 = vld [vmem:[#allocation7_spill] sm:$0xff] }
 0x513   : > { %v11090_v3 = vpop.f32.mrf.mxu0  ;;  %v8417_v40 = vadd.f32 %v14756_v47, %v8173_v44  ;;  %v14769_v44 = vld [vmem:[#allocation10_spill] sm:$0xff]  ;;  %v14772_v17 = vld [vmem:[#allocation15_spill] sm:$0xff] }
 0x514   : > { %9090 = vst [vmem:[%s14374_s12 + $0x8] sm:$0xff] %v9058_v19  ;;  %v9063_v22 = vmax.f32 %v9031_v11, 0.0  ;;  %v9029_v27 = vadd.f32 %v14365_v8, %v8990_v60  ;;  %v8993_v45 = vadd.f32 %v11090_v3, %v8749_v61  ;;  %v8176_v61 = vadd.f32 %v14758_v25, %v14757_v23  ;;  %v14759_v19 = vld [vmem:[#allocation24_spill] sm:$0xff]  ;;  %v14448_v60 = vpop.f32.mrf.mxu1  ;;  %v14773_v47 = vld [vmem:[#allocation47_spill] sm:$0xff] }
 0x515   : > { %v8878_v15 = vpop.f32.mrf.mxu0  ;;  %v8754_v11 = vadd.f32 %v14759_v19, %v8414_v21  ;;  %v8415_v3 = vadd.f32 %v14760_v33, %v8171_v55  ;;  %v8175_v2 = vadd.f32 %v14769_v44, %v14768_v31  ;;  %v8180_v55 = vadd.f32 %v14772_v17, %v14771_v29  ;;  %v14775_v23 = vld [vmem:[#allocation32_spill] sm:$0xff]  ;;  %v14785_v44 = vld [vmem:[#allocation49_spill] sm:$0xff] }
 0x516   : > { %9095 = vst [vmem:[%s14374_s12 + $0x30] sm:$0xff] %v9063_v22  ;;  %v9061_v37 = vmax.f32 %v9029_v27, 0.0  ;;  %v9032_v63 = vadd.f32 %v14365_v8, %v8993_v45  ;;  %v8991_v26 = vadd.f32 %v8878_v15, %v8747_v13  ;;  %v14761_v45 = vld [vmem:[#allocation31_spill] sm:$0xff]  ;;  %v14763_v15 = vld [vmem:[#allocation45_spill] sm:$0xff]  ;;  %v14462_v4 = vpop.f32.mrf.mxu1 }
 0x517   : > { %v11093_v30 = vpop.f32.mrf.mxu0  ;;  %v8420_v20 = vadd.f32 %v14763_v15, %v8176_v61  ;;  %v14776_v61 = vld [vmem:[#allocation21_spill] sm:$0xff] }
 0x518   : > { %9093 = vst [vmem:[%s14374_s12 + $0x20] sm:$0xff] %v9061_v37  ;;  %v9064_v12 = vmax.f32 %v9032_v63, 0.0  ;;  %v9030_v38 = vadd.f32 %v14365_v8, %v8991_v26  ;;  %v8996_v42 = vadd.f32 %v11093_v30, %v8752_v46  ;;  %v8174_v46 = vadd.f32 %v14762_v28, %v14761_v45  ;;  %v14764_v63 = vld [vmem:[#allocation22_spill] sm:$0xff]  ;;  %v14779_v45 = vld [vmem:[#allocation56_spill] sm:$0xff] }
 0x519   : > { %v8891_v53 = vpop.f32.mrf.mxu0  ;;  %v8757_v26 = vadd.f32 %v14764_v63, %v8417_v40  ;;  %v8760_v21 = vadd.f32 %v14360_v41, %v8420_v20  ;;  %v8419_v40 = vadd.f32 %v14773_v47, %v8175_v2  ;;  %v8424_v19 = vadd.f32 %v14776_v61, %v8180_v55  ;;  %v14790_v47 = vld [vmem:[#allocation37_spill] sm:$0xff] }
 0x51a   : > { %9096 = vst [vmem:[%s14374_s12 + $0x38] sm:$0xff] %v9064_v12  ;;  %v9062_v59 = vmax.f32 %v9030_v38, 0.0  ;;  %v9035_v36 = vadd.f32 %v14365_v8, %v8996_v42  ;;  %v8994_v16 = vadd.f32 %v8891_v53, %v8750_v62  ;;  %v14766_v12 = vld [vmem:[#allocation8_spill] sm:$0xff]  ;;  %v14767_v42 = vld [vmem:[#allocation25_spill] sm:$0xff] }
 0x51b   : > { %v11094_v0 = vpop.f32.mrf.mxu0  ;;  %v8177_v38 = vadd.f32 %v14766_v12, %v14765_v52  ;;  %v8418_v1 = vadd.f32 %v14767_v42, %v8174_v46  ;;  %v8759_v20 = vadd.f32 %v14406_v7, %v8419_v40  ;;  %v14782_v12 = vld [vmem:[#allocation58_spill] sm:$0xff] }
 0x51c   : > { %9094 = vst [vmem:[%s14374_s12 + $0x28] sm:$0xff] %v9062_v59  ;;  %v9067_v54 = vmax.f32 %v9035_v36, 0.0  ;;  %v9033_v50 = vadd.f32 %v14365_v8, %v8994_v16  ;;  %v8997_v18 = vadd.f32 %v11094_v0, %v8753_v10  ;;  %v8755_v10 = vadd.f32 %v14348_v9, %v8415_v3 }
 0x51d   : > { %v8894_v49 = vpop.f32.mrf.mxu0  ;;  %v8758_v56 = vadd.f32 %v14379_v6, %v8418_v1 }
 0x51e   : > { %9099 = vst [vmem:[%s14374_s12 + $0x50] sm:$0xff] %v9067_v54  ;;  %v9065_v58 = vmax.f32 %v9033_v50, 0.0  ;;  %v9036_v35 = vadd.f32 %v14365_v8, %v8997_v18  ;;  %v8995_v14 = vadd.f32 %v8894_v49, %v8751_v34  ;;  %v14770_v34 = vld [vmem:[#allocation17_spill] sm:$0xff] }
 0x51f   : > { %v11097_v24 = vpop.f32.mrf.mxu0  ;;  %v8421_v54 = vadd.f32 %v14770_v34, %v8177_v38  ;;  %v14786_v34 = vld [vmem:[#allocation46_spill] sm:$0xff] }
 0x520   : > { %9097 = vst [vmem:[%s14374_s12 + $0x40] sm:$0xff] %v9065_v58  ;;  %v9068_v13 = vmax.f32 %v9036_v35, 0.0  ;;  %v9034_v22 = vadd.f32 %v14365_v8, %v8995_v14  ;;  %v9000_v27 = vadd.f32 %v11097_v24, %v8756_v32  ;;  %v11075_v32 = vpop.f32.mrf.mxu1  ;;  %v14774_v14 = vld [vmem:[#allocation11_spill] sm:$0xff] }
 0x521   : > { %v8907_v37 = vpop.f32.mrf.mxu0  ;;  %v8178_v25 = vadd.f32 %v14775_v23, %v14774_v14  ;;  %v8761_v24 = vadd.f32 %v14392_v43, %v8421_v54  ;;  %v14787_v54 = vld [vmem:[#allocation14_spill] sm:$0xff] }
 0x522   : > { %9100 = vst [vmem:[%s14374_s12 + $0x58] sm:$0xff] %v9068_v13  ;;  %v9066_v51 = vmax.f32 %v9034_v22, 0.0  ;;  %v9039_v62 = vadd.f32 %v14365_v8, %v9000_v27  ;;  %v8998_v30 = vadd.f32 %v8907_v37, %v8754_v11  ;;  %v14777_v13 = vld [vmem:[#allocation42_spill] sm:$0xff]  ;;  %v14778_v22 = vld [vmem:[#allocation40_spill] sm:$0xff]  ;;  %v8711_v46 = vpop.f32.mrf.mxu1 }
 0x523   : > { %v11098_v53 = vpop.f32.mrf.mxu0  ;;  %v8181_v27 = vadd.f32 %v14778_v22, %v14777_v13  ;;  %v8422_v28 = vadd.f32 %v14779_v45, %v8178_v25  ;;  %v14794_v13 = vld [vmem:[#allocation62_spill] sm:$0xff] }
 0x524   : > { %9098 = vst [vmem:[%s14374_s12 + $0x48] sm:$0xff] %v9066_v51  ;;  %v9071_v59 = vmax.f32 %v9039_v62, 0.0  ;;  %v9037_v36 = vadd.f32 %v14365_v8, %v8998_v30  ;;  %v9001_v16 = vadd.f32 %v11098_v53, %v8757_v26  ;;  %v14780_v26 = vld [vmem:[#allocation35_spill] sm:$0xff]  ;;  %v14781_v51 = vld [vmem:[#allocation33_spill] sm:$0xff]  ;;  %v8764_v30 = vadd.f32 %v14420_v5, %v8424_v19  ;;  %v14783_v53 = vld [vmem:[#allocation44_spill] sm:$0xff] }
 0x525   : > { %v8910_v0 = vpop.f32.mrf.mxu0  ;;  %v8179_v62 = vadd.f32 %v14781_v51, %v14780_v26  ;;  %v8425_v38 = vadd.f32 %v14782_v12, %v8181_v27  ;;  %v14792_v19 = vld [vmem:[#allocation9_spill] sm:$0xff] }
 0x526   : > { %9103 = vst [vmem:[%s14374_s12 + $0x70] sm:$0xff] %v9071_v59  ;;  %v9069_v50 = vmax.f32 %v9037_v36, 0.0  ;;  %v9040_v18 = vadd.f32 %v14365_v8, %v9001_v16  ;;  %v8999_v9 = vadd.f32 %v8910_v0, %v8755_v10  ;;  %v14784_v10 = vld [vmem:[#allocation13_spill] sm:$0xff]  ;;  %v8762_v36 = vadd.f32 %v14434_v57, %v8422_v28  ;;  %v11076_v16 = vpop.f32.mrf.mxu1  ;;  %v14795_v28 = vld [vmem:[#allocation39_spill] sm:$0xff] }
 0x527   : > { %v11101_v49 = vpop.f32.mrf.mxu0  ;;  %v8184_v59 = vadd.f32 %v14784_v10, %v14783_v53  ;;  %v8423_v2 = vadd.f32 %v14785_v44, %v8179_v62  ;;  %v8765_v17 = vadd.f32 %v14448_v60, %v8425_v38  ;;  %v14800_v38 = vld [vmem:[#allocation55_spill] sm:$0xff] }
 0x528   : > { %9101 = vst [vmem:[%s14374_s12 + $0x60] sm:$0xff] %v9069_v50  ;;  %v9072_v41 = vmax.f32 %v9040_v18, 0.0  ;;  %v9038_v58 = vadd.f32 %v14365_v8, %v8999_v9  ;;  %v9004_v35 = vadd.f32 %v11101_v49, %v8760_v21  ;;  %v8182_v50 = vadd.f32 %v14787_v54, %v14786_v34  ;;  %v14788_v18 = vld [vmem:[#allocation23_spill] sm:$0xff]  ;;  %v14789_v49 = vld [vmem:[#allocation20_spill] sm:$0xff] }
 0x529   : > { %v8923_v11 = vpop.f32.mrf.mxu0  ;;  %v8428_v9 = vadd.f32 %v14788_v18, %v8184_v59  ;;  %v8185_v40 = vadd.f32 %v14790_v47, %v14789_v49  ;;  %v8763_v23 = vadd.f32 %v14462_v4, %v8423_v2  ;;  %v14803_v2 = vld [vmem:[#allocation26_spill] sm:$0xff]  ;;  %v14805_v18 = vld [vmem:[#allocation43_spill] sm:$0xff] }
 0x52a   : > { %9104 = vst [vmem:[%s14374_s12 + $0x78] sm:$0xff] %v9072_v41  ;;  %v9070_v6 = vmax.f32 %v9038_v58, 0.0  ;;  %v9043_v33 = vadd.f32 %v14365_v8, %v9004_v35  ;;  %v9002_v3 = vadd.f32 %v8923_v11, %v8758_v56  ;;  %v14791_v41 = vld [vmem:[#allocation60_spill] sm:$0xff]  ;;  %v8714_v35 = vpop.f32.mrf.mxu1  ;;  %v14793_v11 = vld [vmem:[#allocation5_spill] sm:$0xff] }
 0x52b   : > { %v11102_v15 = vpop.f32.mrf.mxu0  ;;  %v8426_v58 = vadd.f32 %v14791_v41, %v8182_v50  ;;  %v8429_v22 = vadd.f32 %v14794_v13, %v8185_v40 }
 0x52c   : > { %9102 = vst [vmem:[%s14374_s12 + $0x68] sm:$0xff] %v9070_v6  ;;  %v9075_v37 = vmax.f32 %v9043_v33, 0.0  ;;  %v9041_v43 = vadd.f32 %v14365_v8, %v9002_v3  ;;  %v9005_v63 = vadd.f32 %v11102_v15, %v8761_v24  ;;  %v8183_v24 = vadd.f32 %v14793_v11, %v14792_v19  ;;  %v11079_v33 = vpop.f32.mrf.mxu1  ;;  %v14796_v15 = vld [vmem:[#allocation12_spill] sm:$0xff] }
 0x52d   : > { %v8926_v52 = vpop.f32.mrf.mxu0  ;;  %v8768_v6 = vadd.f32 %v11075_v32, %v8428_v9  ;;  %v8769_v53 = vadd.f32 %v11076_v16, %v8429_v22  ;;  %v14804_v16 = vld [vmem:[#allocation18_spill] sm:$0xff] }
 0x52e   : > { %9107 = vst [vmem:[%s14374_s12 + $0x90] sm:$0xff] %v9075_v37  ;;  %v9073_v42 = vmax.f32 %v9041_v43, 0.0  ;;  %v9044_v1 = vadd.f32 %v14365_v8, %v9005_v63  ;;  %v9003_v7 = vadd.f32 %v8926_v52, %v8759_v20  ;;  %v8188_v20 = vadd.f32 %v14796_v15, %v14795_v28  ;;  %v14797_v63 = vld [vmem:[#allocation53_spill] sm:$0xff]  ;;  %v14799_v52 = vld [vmem:[#allocation16_spill] sm:$0xff] }
 0x52f   : > { %v11105_v31 = vpop.f32.mrf.mxu0  ;;  %v8766_v37 = vadd.f32 %v8711_v46, %v8426_v58  ;;  %v8427_v26 = vadd.f32 %v14797_v63, %v8183_v24  ;;  %v8187_v9 = vadd.f32 %v14805_v18, %v14804_v16 }
 0x530   : > { %9105 = vst [vmem:[%s14374_s12 + $0x80] sm:$0xff] %v9073_v42  ;;  %v9076_v5 = vmax.f32 %v9044_v1, 0.0  ;;  %v9042_v21 = vadd.f32 %v14365_v8, %v9003_v7  ;;  %v9008_v0 = vadd.f32 %v11105_v31, %v8764_v30  ;;  %v14798_v30 = vld [vmem:[#allocation48_spill] sm:$0xff]  ;;  %v8432_v42 = vadd.f32 %v14800_v38, %v8188_v20  ;;  %v8727_v1 = vpop.f32.mrf.mxu1  ;;  %v14802_v31 = vld [vmem:[#allocation50_spill] sm:$0xff] }
 0x531   : > { %v8939_v29 = vpop.f32.mrf.mxu0  ;;  %v8186_v12 = vadd.f32 %v14799_v52, %v14798_v30  ;;  %v8431_v58 = vadd.f32 %v14354_v48, %v8187_v9 }
 0x532   : > { %9108 = vst [vmem:[%s14374_s12 + $0x98] sm:$0xff] %v9076_v5  ;;  %v9074_v57 = vmax.f32 %v9042_v21, 0.0  ;;  %v9047_v55 = vadd.f32 %v14365_v8, %v9008_v0  ;;  %v9006_v56 = vadd.f32 %v8939_v29, %v8762_v36  ;;  %v14801_v36 = vld [vmem:[#allocation41_spill] sm:$0xff]  ;;  %v8767_v0 = vadd.f32 %v8714_v35, %v8427_v26 }
 0x533   : > { %v11106_v14 = vpop.f32.mrf.mxu0  ;;  %v8189_v44 = vadd.f32 %v14802_v31, %v14801_v36  ;;  %v8430_v5 = vadd.f32 %v14803_v2, %v8186_v12  ;;  %v8772_v29 = vadd.f32 %v11079_v33, %v8432_v42 }
 0x534   : > { %9106 = vst [vmem:[%s14374_s12 + $0x88] sm:$0xff] %v9074_v57  ;;  %v9079_v25 = vmax.f32 %v9047_v55, 0.0  ;;  %v9045_v60 = vadd.f32 %v14365_v8, %v9006_v56  ;;  %v9009_v61 = vadd.f32 %v11106_v14, %v8765_v17  ;;  %v11080_v17 = vpop.f32.mrf.mxu1 }
 0x535   : > { %v8942_v3 = vpop.f32.mrf.mxu0  ;;  %v8433_v55 = vadd.f32 %v14350_v39, %v8189_v44  ;;  %v8770_v40 = vadd.f32 %v8727_v1, %v8430_v5 }
 0x536   : > { %9111 = vst [vmem:[%s14374_s12 + $0xb0] sm:$0xff] %v9079_v25  ;;  %v9077_v27 = vmax.f32 %v9045_v60, 0.0  ;;  %v9048_v45 = vadd.f32 %v14365_v8, %v9009_v61  ;;  %v9007_v4 = vadd.f32 %v8942_v3, %v8763_v23  ;;  %v8730_v25 = vpop.f32.mrf.mxu1 }
 0x537   : > { %v11109_v43 = vpop.f32.mrf.mxu0  ;;  %v8773_v61 = vadd.f32 %v11080_v17, %v8433_v55 }
 0x538   : > { %9109 = vst [vmem:[%s14374_s12 + $0xa0] sm:$0xff] %v9077_v27  ;;  %v9080_v51 = vmax.f32 %v9048_v45, 0.0  ;;  %v9046_v32 = vadd.f32 %v14365_v8, %v9007_v4  ;;  %v9012_v62 = vadd.f32 %v11109_v43, %v8768_v6  ;;  %v8771_v6 = vadd.f32 %v8730_v25, %v8431_v58 }
 0x539   : > { %v8955_v7 = vpop.f32.mrf.mxu0 }
 0x53a   : > { %9112 = vst [vmem:[%s14374_s12 + $0xb8] sm:$0xff] %v9080_v51  ;;  %v9078_v10 = vmax.f32 %v9046_v32, 0.0  ;;  %v9051_v46 = vadd.f32 %v14365_v8, %v9012_v62  ;;  %v9010_v59 = vadd.f32 %v8955_v7, %v8766_v37 }
 0x53b   : > { %v11110_v21 = vpop.f32.mrf.mxu0 }
 0x53c   : > { %9110 = vst [vmem:[%s14374_s12 + $0xa8] sm:$0xff] %v9078_v10  ;;  %v9083_v34 = vmax.f32 %v9051_v46, 0.0  ;;  %v9049_v54 = vadd.f32 %v14365_v8, %v9010_v59  ;;  %v9013_v50 = vadd.f32 %v11110_v21, %v8769_v53 }
 0x53d   : > { %v8958_v57 = vpop.f32.mrf.mxu0 }
 0x53e   : > { %9115 = vst [vmem:[%s14374_s12 + $0xd0] sm:$0xff] %v9083_v34  ;;  %v9081_v56 = vmax.f32 %v9049_v54, 0.0  ;;  %v9052_v49 = vadd.f32 %v14365_v8, %v9013_v50  ;;  %v9011_v47 = vadd.f32 %v8958_v57, %v8767_v0 }
 0x53f   : > { %v11113_v41 = vpop.f32.mrf.mxu0 }
 0x540   : > { %9113 = vst [vmem:[%s14374_s12 + $0xc0] sm:$0xff] %v9081_v56  ;;  %v9084_v35 = vmax.f32 %v9052_v49, 0.0  ;;  %v9050_v14 = vadd.f32 %v14365_v8, %v9011_v47  ;;  %v9016_v23 = vadd.f32 %v11113_v41, %v8772_v29 }
 0x541   : > { %v8971_v60 = vpop.f32.mrf.mxu0 }
 0x542   : > { %9116 = vst [vmem:[%s14374_s12 + $0xd8] sm:$0xff] %v9084_v35  ;;  %v9082_v39 = vmax.f32 %v9050_v14, 0.0  ;;  %v9055_v19 = vadd.f32 %v14365_v8, %v9016_v23  ;;  %v9014_v11 = vadd.f32 %v8971_v60, %v8770_v40 }
 0x543   : > { %v11114_v24 = vpop.f32.mrf.mxu0 }
 0x544   : > { %9114 = vst [vmem:[%s14374_s12 + $0xc8] sm:$0xff] %v9082_v39  ;;  %v9087_v48 = vmax.f32 %v9055_v19, 0.0  ;;  %v9053_v33 = vadd.f32 %v14365_v8, %v9014_v11  ;;  %v9017_v3 = vadd.f32 %v11114_v24, %v8773_v61 }
 0x545   : > { %v8974_v13 = vpop.f32.mrf.mxu0 }
 0x546   : > { %9119 = vst [vmem:[%s14374_s12 + $0xf0] sm:$0xff] %v9087_v48  ;;  %v9085_v22 = vmax.f32 %v9053_v33, 0.0  ;;  %v9056_v27 = vadd.f32 %v14365_v8, %v9017_v3  ;;  %v9015_v45 = vadd.f32 %v8974_v13, %v8771_v6 }
 0x548   : > { %9117 = vst [vmem:[%s14374_s12 + $0xe0] sm:$0xff] %v9085_v22  ;;  %v9088_v4 = vmax.f32 %v9056_v27, 0.0  ;;  %v9054_v28 = vadd.f32 %v14365_v8, %v9015_v45 }
 0x54a   : > { %9120 = vst [vmem:[%s14374_s12 + $0xf8] sm:$0xff] %v9088_v4  ;;  %v9086_v15 = vmax.f32 %v9054_v28, 0.0 }
 0x54c   : > { %9118 = vst [vmem:[%s14374_s12 + $0xe8] sm:$0xff] %v9086_v15 }
 0x54d PF: > { %s19_s30 = sadd.s32 1, %s11162_s30  }
 0x54e   : > { %p16_p4 = scmp.ge.s32.totalorder %s19_s30, 4  }
 0x550   :  { %18 = sbr.rel (!%p16_p4) target bundleno = 1 (0x1), region = 95 }

</bundles_post_ra>
